<compile_context>
chip_gen: v7x
topology: tpu7x:2x2x1
jax: 0.10.0
libtpu: 0.0.40
codegen_flags: <defaults>
</compile_context>

<pallas_src>
import functools
import math

import jax
import jax.numpy as jnp
from jax.experimental import pallas as pl
from jax.experimental.pallas import tpu as pltpu  # noqa: F401  (TPU backend)

# ---------------- model hyper-parameters (small, consistent with the module) ----
EMBED = 32
HEADS = 4
HEAD_DIM = EMBED // HEADS
NUM_LAYERS = 2
MAX_LENGTH = 16
SRC_VOCAB = 50
TRG_VOCAB = 50
VPAD = 128                 # fc_out padded to a full 128-lane tile (sliced back to 50)
SRC_PAD = 0
BATCH = 2
SRC_SEQ = 8
TRG_SEQ = 8
FFN = 4 * EMBED
LN_EPS = 1e-5
NEG_INF = -1e30            # additive mask fill; exp underflows to 0 like -inf
CDT = jnp.bfloat16         # MXU operand dtype (accumulation stays f32)


# ---------------- in-kernel helpers (pure functions on jnp values) -------------
def _layernorm(x, gamma, beta):
    # PyTorch nn.LayerNorm: biased variance over the last dim, eps=1e-5.
    mu = jnp.mean(x, axis=-1, keepdims=True)
    var = jnp.mean(jnp.square(x - mu), axis=-1, keepdims=True)
    return (x - mu) * jax.lax.rsqrt(var + LN_EPS) * gamma + beta


def _mha(q, k, v, wo, bo, bias, *, heads, head_dim):
    """Head-batched multi-head attention + output projection.

    q: (N, Lq, E) f32, k/v: (N, Lk, E) f32 (already head-projected, scale folded
    into Q at init), wo: (E, E) bf16 pre-transposed, bo: (1, E) f32,
    bias: additive f32 mask of shape (heads*N, Lq, Lk) (pre-broadcast, hoisted).
    Returns (N*Lq, E) f32.
    """
    n, lq, e = q.shape

    def split(x):
        # (N, L, E) -> (heads*N, L, head_dim); batch index = h*N + n
        return jnp.concatenate(
            [x[:, :, h * head_dim:(h + 1) * head_dim] for h in range(heads)],
            axis=0)

    qh = split(q).astype(CDT)
    kh = split(k).astype(CDT)
    vh = split(v).astype(CDT)

    # one batched score matmul + ONE softmax chain + one batched PV matmul
    en = jnp.einsum("bqd,bkd->bqk", qh, kh,
                    preferred_element_type=jnp.float32) + bias
    en = en - jnp.max(en, axis=-1, keepdims=True)
    p = jnp.exp(en)
    p = p * pl.reciprocal(jnp.sum(p, axis=-1, keepdims=True), approx=True)
    ctx = jnp.einsum("bqk,bkd->bqd", p.astype(CDT), vh,
                     preferred_element_type=jnp.float32)        # (heads*N, Lq, d)

    cat = jnp.concatenate([ctx[h * n:(h + 1) * n] for h in range(heads)],
                          axis=-1).reshape(n * lq, e)
    return jnp.dot(cat.astype(CDT), wo, preferred_element_type=jnp.float32) + bo


def _ffn(x, w1, b1, w2, b2):
    h = jnp.dot(x.astype(CDT), w1, preferred_element_type=jnp.float32) + b1
    h = jnp.maximum(h, 0.0)
    return jnp.dot(h.astype(CDT), w2, preferred_element_type=jnp.float32) + b2


# ---------------- the whole transformer as ONE kernel ---------------------------
def transformer_kernel(src_ref, trg_ref,
                       src_tok_ref, enc_pos_ref, trg_tok_ref, dec_pos_ref,
                       # encoder stacked weights (leading layer axis)
                       e_wqkv_ref, e_wo_ref, e_bo_ref,
                       e_ln1g_ref, e_ln1b_ref, e_ln2g_ref, e_ln2b_ref,
                       e_w1_ref, e_b1_ref, e_w2_ref, e_b2_ref,
                       # decoder stacked weights
                       d_swqkv_ref, d_swo_ref, d_sbo_ref, d_slng_ref, d_slnb_ref,
                       d_cwq_ref, d_cwkv_ref, d_cwo_ref, d_cbo_ref,
                       d_ln1g_ref, d_ln1b_ref, d_ln2g_ref, d_ln2b_ref,
                       d_w1_ref, d_b1_ref, d_w2_ref, d_b2_ref,
                       # final projection (padded to VPAD lanes)
                       wout_ref, bout_ref,
                       o_ref, *, num_layers, heads, head_dim, embed, pad_idx):
    n, s = src_ref.shape
    _, t = trg_ref.shape
    e = embed
    nh = n * heads

    # ---- embeddings via one-hot matmul (in-kernel "gather", stays in VMEM) ----
    src_ids = src_ref[...]                                   # (N, S) int32
    trg_ids = trg_ref[...]                                   # (N, T) int32
    sv = src_tok_ref.shape[0]
    tv = trg_tok_ref.shape[0]
    src_oh = (jax.lax.broadcasted_iota(jnp.int32, (n, s, sv), 2)
              == src_ids[:, :, None]).astype(jnp.float32).reshape(n * s, sv)
    trg_oh = (jax.lax.broadcasted_iota(jnp.int32, (n, t, tv), 2)
              == trg_ids[:, :, None]).astype(jnp.float32).reshape(n * t, tv)
    x_enc = jnp.dot(src_oh, src_tok_ref[...], preferred_element_type=jnp.float32)
    x_enc = (x_enc.reshape(n, s, e) + enc_pos_ref[0:s, :][None, :, :]).reshape(n * s, e)
    x_dec = jnp.dot(trg_oh, trg_tok_ref[...], preferred_element_type=jnp.float32)
    x_dec = (x_dec.reshape(n, t, e) + dec_pos_ref[0:t, :][None, :, :]).reshape(n * t, e)

    # ---- additive attention biases: built + broadcast ONCE, reused per layer --
    kb = jnp.where(src_ids[:, None, :] == pad_idx, NEG_INF, 0.0).astype(jnp.float32)
    kb = jnp.concatenate([kb] * heads, axis=0)               # (heads*N, 1, S)
    kbias_ss = jnp.broadcast_to(kb, (nh, s, s))              # encoder self-attn
    kbias_ts = jnp.broadcast_to(kb, (nh, t, s))              # decoder cross-attn
    row = jax.lax.broadcasted_iota(jnp.int32, (t, t), 0)
    col = jax.lax.broadcasted_iota(jnp.int32, (t, t), 1)
    causal = jnp.where(row >= col, 0.0, NEG_INF).astype(jnp.float32)
    causal = jnp.broadcast_to(causal[None, :, :], (nh, t, t))  # decoder self-attn

    # ---- encoder stack (static layer loop; activations never leave VMEM) ------
    x = x_enc
    for l in range(num_layers):
        qkv = jnp.dot(x.astype(CDT), e_wqkv_ref[l],
                      preferred_element_type=jnp.float32)     # (N*S, 3E)
        q = qkv[:, :e].reshape(n, s, e)
        k = qkv[:, e:2 * e].reshape(n, s, e)
        v = qkv[:, 2 * e:].reshape(n, s, e)
        attn = _mha(q, k, v, e_wo_ref[l], e_bo_ref[l], kbias_ss,
                    heads=heads, head_dim=head_dim)
        x1 = _layernorm(attn + x, e_ln1g_ref[l], e_ln1b_ref[l])
        x = _layernorm(_ffn(x1, e_w1_ref[l], e_b1_ref[l], e_w2_ref[l], e_b2_ref[l]) + x1,
                       e_ln2g_ref[l], e_ln2b_ref[l])
    enc = x                                                   # (N*S, E), stays on-chip

    # ---- decoder stack + final projection --------------------------------------
    x = x_dec
    for l in range(num_layers):
        # masked self-attention + DecoderBlock.norm
        qkv = jnp.dot(x.astype(CDT), d_swqkv_ref[l], preferred_element_type=jnp.float32)
        q = qkv[:, :e].reshape(n, t, e)
        k = qkv[:, e:2 * e].reshape(n, t, e)
        v = qkv[:, 2 * e:].reshape(n, t, e)
        sa = _mha(q, k, v, d_swo_ref[l], d_sbo_ref[l], causal,
                  heads=heads, head_dim=head_dim)
        x = _layernorm(x + sa, d_slng_ref[l], d_slnb_ref[l])
        # cross-attention (k/v from encoder output) + norm1
        q = jnp.dot(x.astype(CDT), d_cwq_ref[l],
                    preferred_element_type=jnp.float32).reshape(n, t, e)
        kv = jnp.dot(enc.astype(CDT), d_cwkv_ref[l], preferred_element_type=jnp.float32)
        k = kv[:, :e].reshape(n, s, e)
        v = kv[:, e:].reshape(n, s, e)
        ca = _mha(q, k, v, d_cwo_ref[l], d_cbo_ref[l], kbias_ts,
                  heads=heads, head_dim=head_dim)
        x1 = _layernorm(ca + x, d_ln1g_ref[l], d_ln1b_ref[l])
        # feed-forward + norm2
        x = _layernorm(_ffn(x1, d_w1_ref[l], d_b1_ref[l], d_w2_ref[l], d_b2_ref[l]) + x1,
                       d_ln2g_ref[l], d_ln2b_ref[l])

    # vocab projection (padded to 128 lanes) + sigmoid; single lane-dense store
    logits = jnp.dot(x.astype(CDT), wout_ref[...],
                     preferred_element_type=jnp.float32) + bout_ref[...]
    sig = pl.reciprocal(1.0 + jnp.exp(-logits), approx=True)  # EUP, not VPU divide
    o_ref[...] = sig.reshape(n, t, -1)


# ---------------- wrapper -------------------------------------------------------
@jax.jit
def transformer_forward(params, src_ids, trg_ids):
    n, s = src_ids.shape
    _, t = trg_ids.shape
    enc, dec = params["enc"], params["dec"]

    kernel = functools.partial(transformer_kernel, num_layers=NUM_LAYERS,
                               heads=HEADS, head_dim=HEAD_DIM, embed=EMBED,
                               pad_idx=SRC_PAD)

    # advisory cost estimate (trace-time Python ints)
    me, md, nhb = n * s, n * t, n * HEADS
    flops = (2 * me * SRC_VOCAB * EMBED + 2 * md * TRG_VOCAB * EMBED
             + NUM_LAYERS * (2 * me * EMBED * (4 * EMBED + 2 * FFN)
                             + 4 * nhb * s * s * HEAD_DIM)
             + NUM_LAYERS * (2 * md * EMBED * (6 * EMBED + 2 * FFN)
                             + 2 * me * EMBED * 2 * EMBED
                             + 4 * nhb * t * t * HEAD_DIM
                             + 4 * nhb * t * s * HEAD_DIM)
             + 2 * md * EMBED * VPAD)
    trans = NUM_LAYERS * nhb * (s * s + t * t + t * s) + md * VPAD
    param_bytes = sum(int(x.size) * jnp.dtype(x.dtype).itemsize
                      for x in jax.tree_util.tree_leaves(params))
    bytes_acc = param_bytes + 4 * (n * s + n * t) + 4 * n * t * VPAD

    out = pl.pallas_call(
        kernel,
        out_shape=jax.ShapeDtypeStruct((n, t, VPAD), jnp.float32),
        cost_estimate=pl.CostEstimate(flops=flops, transcendentals=trans,
                                      bytes_accessed=bytes_acc),
    )(src_ids, trg_ids,
      params["src_tok_emb"], params["enc_pos_emb"],
      params["trg_tok_emb"], params["dec_pos_emb"],
      enc["wqkv"], enc["wo"], enc["bo"],
      enc["ln1g"], enc["ln1b"], enc["ln2g"], enc["ln2b"],
      enc["w1"], enc["b1"], enc["w2"], enc["b2"],
      dec["s_wqkv"], dec["s_wo"], dec["s_bo"], dec["s_lng"], dec["s_lnb"],
      dec["c_wq"], dec["c_wkv"], dec["c_wo"], dec["c_bo"],
      dec["ln1g"], dec["ln1b"], dec["ln2g"], dec["ln2b"],
      dec["w1"], dec["b1"], dec["w2"], dec["b2"],
      params["fc_out_w"], params["fc_out_b"])
    return out[:, :, :TRG_VOCAB]                 # drop the zero-padded vocab lanes


# ---------------- synthetic parameters (shapes match the PyTorch module) --------
def init_params(key):
    scale = 1.0 / math.sqrt(float(EMBED))        # attention scale, folded into Q

    def nrm(k, shape, scl=0.05):
        return (scl * jax.random.normal(k, shape)).astype(jnp.float32)

    keys = jax.random.split(key, 8)
    eye_h = jnp.eye(HEADS, dtype=jnp.float32)

    def blk(w):  # (d,d) torch Linear weight -> per-head block-diag (E,E), pre-transposed
        return jnp.kron(eye_h, w.T)

    def attn_weights(k):
        ks = jax.random.split(k, 5)
        wq = nrm(ks[0], (HEAD_DIM, HEAD_DIM))
        wk = nrm(ks[1], (HEAD_DIM, HEAD_DIM))
        wv = nrm(ks[2], (HEAD_DIM, HEAD_DIM))
        wo = nrm(ks[3], (EMBED, EMBED))
        bo = nrm(ks[4], (1, EMBED))
        # fold 1/sqrt(embed_size) into the Q projection (zero runtime cost)
        return blk(wq) * scale, blk(wk), blk(wv), wo.T, bo

    def ffn_weights(k):
        ks = jax.random.split(k, 4)
        w1 = nrm(ks[0], (FFN, EMBED)); b1 = nrm(ks[1], (1, FFN))
        w2 = nrm(ks[2], (EMBED, FFN)); b2 = nrm(ks[3], (1, EMBED))
        return w1.T, b1, w2.T, b2

    ones = jnp.ones((1, EMBED), jnp.float32)
    zeros = jnp.zeros((1, EMBED), jnp.float32)

    # ---- encoder layers ----
    enc_names = ["wqkv", "wo", "bo", "ln1g", "ln1b", "ln2g", "ln2b",
                 "w1", "b1", "w2", "b2"]
    enc_layers = {name: [] for name in enc_names}
    for lk in jax.random.split(keys[0], NUM_LAYERS):
        ak, fk = jax.random.split(lk, 2)
        wqb, wkb, wvb, wot, bo = attn_weights(ak)
        w1t, b1, w2t, b2 = ffn_weights(fk)
        enc_layers["wqkv"].append(jnp.concatenate([wqb, wkb, wvb], axis=1))
        enc_layers["wo"].append(wot); enc_layers["bo"].append(bo)
        enc_layers["ln1g"].append(ones); enc_layers["ln1b"].append(zeros)
        enc_layers["ln2g"].append(ones); enc_layers["ln2b"].append(zeros)
        enc_layers["w1"].append(w1t); enc_layers["b1"].append(b1)
        enc_layers["w2"].append(w2t); enc_layers["b2"].append(b2)
    enc_mm = {"wqkv", "wo", "w1", "w2"}                      # bf16 MXU operands
    enc = {k: jnp.stack(v).astype(CDT if k in enc_mm else jnp.float32)
           for k, v in enc_layers.items()}

    # ---- decoder layers ----
    dec_names = ["s_wqkv", "s_wo", "s_bo", "s_lng", "s_lnb",
                 "c_wq", "c_wkv", "c_wo", "c_bo",
                 "ln1g", "ln1b", "ln2g", "ln2b", "w1", "b1", "w2", "b2"]
    dec_layers = {name: [] for name in dec_names}
    for lk in jax.random.split(keys[1], NUM_LAYERS):
        sk, ck, fk = jax.random.split(lk, 3)
        swqb, swkb, swvb, swot, sbo = attn_weights(sk)
        cwqb, cwkb, cwvb, cwot, cbo = attn_weights(ck)
        w1t, b1, w2t, b2 = ffn_weights(fk)
        dec_layers["s_wqkv"].append(jnp.concatenate([swqb, swkb, swvb], axis=1))
        dec_layers["s_wo"].append(swot); dec_layers["s_bo"].append(sbo)
        dec_layers["s_lng"].append(ones); dec_layers["s_lnb"].append(zeros)
        dec_layers["c_wq"].append(cwqb)
        dec_layers["c_wkv"].append(jnp.concatenate([cwkb, cwvb], axis=1))
        dec_layers["c_wo"].append(cwot); dec_layers["c_bo"].append(cbo)
        dec_layers["ln1g"].append(ones); dec_layers["ln1b"].append(zeros)
        dec_layers["ln2g"].append(ones); dec_layers["ln2b"].append(zeros)
        dec_layers["w1"].append(w1t); dec_layers["b1"].append(b1)
        dec_layers["w2"].append(w2t); dec_layers["b2"].append(b2)
    dec_mm = {"s_wqkv", "s_wo", "c_wq", "c_wkv", "c_wo", "w1", "w2"}
    dec = {k: jnp.stack(v).astype(CDT if k in dec_mm else jnp.float32)
           for k, v in dec_layers.items()}

    # final projection, zero-padded to a full 128-lane tile (lane-dense store)
    fcw = nrm(keys[6], (TRG_VOCAB, EMBED)).T                          # (E, V)
    fcw = jnp.pad(fcw, ((0, 0), (0, VPAD - TRG_VOCAB))).astype(CDT)   # (E, 128) bf16
    fcb = jnp.pad(nrm(keys[7], (1, TRG_VOCAB)), ((0, 0), (0, VPAD - TRG_VOCAB)))

    return {
        "src_tok_emb": nrm(keys[2], (SRC_VOCAB, EMBED), 0.1),
        "enc_pos_emb": nrm(keys[3], (MAX_LENGTH, EMBED), 0.1),
        "trg_tok_emb": nrm(keys[4], (TRG_VOCAB, EMBED), 0.1),
        "dec_pos_emb": nrm(keys[5], (MAX_LENGTH, EMBED), 0.1),
        "fc_out_w": fcw,
        "fc_out_b": fcb,
        "enc": enc,
        "dec": dec,
    }


if __name__ == "__main__":
    key = jax.random.PRNGKey(0)
    pkey, skey, tkey = jax.random.split(key, 3)
    params = init_params(pkey)

    src = jax.random.randint(skey, (BATCH, SRC_SEQ), 1, SRC_VOCAB, dtype=jnp.int32)
    src = src.at[:, -1].set(SRC_PAD)          # exercise the key-padding mask
    trg = jax.random.randint(tkey, (BATCH, TRG_SEQ), 0, TRG_VOCAB, dtype=jnp.int32)

    out = transformer_forward(params, src, trg)
    out = jax.block_until_ready(out)

    assert out.shape == (BATCH, TRG_SEQ, TRG_VOCAB), out.shape
    assert bool(jnp.all(jnp.isfinite(out)))
    assert bool(jnp.all((out > 0.0) & (out < 1.0)))    # sigmoid output range
    print("KERNEL_OK")
</pallas_src>

<mosaic_0001>
module attributes {stable_mosaic.version = 11 : i64} {
  func.func @transformer_kernel(%arg0: memref<2x8xi32, #tpu.memory_space<vmem>>, %arg1: memref<2x8xi32, #tpu.memory_space<vmem>>, %arg2: memref<50x32xf32, #tpu.memory_space<vmem>>, %arg3: memref<16x32xf32, #tpu.memory_space<vmem>>, %arg4: memref<50x32xf32, #tpu.memory_space<vmem>>, %arg5: memref<16x32xf32, #tpu.memory_space<vmem>>, %arg6: memref<2x32x96xbf16, #tpu.memory_space<vmem>>, %arg7: memref<2x32x32xbf16, #tpu.memory_space<vmem>>, %arg8: memref<2x1x32xf32, #tpu.memory_space<vmem>>, %arg9: memref<2x1x32xf32, #tpu.memory_space<vmem>>, %arg10: memref<2x1x32xf32, #tpu.memory_space<vmem>>, %arg11: memref<2x1x32xf32, #tpu.memory_space<vmem>>, %arg12: memref<2x1x32xf32, #tpu.memory_space<vmem>>, %arg13: memref<2x32x128xbf16, #tpu.memory_space<vmem>>, %arg14: memref<2x1x128xf32, #tpu.memory_space<vmem>>, %arg15: memref<2x128x32xbf16, #tpu.memory_space<vmem>>, %arg16: memref<2x1x32xf32, #tpu.memory_space<vmem>>, %arg17: memref<2x32x96xbf16, #tpu.memory_space<vmem>>, %arg18: memref<2x32x32xbf16, #tpu.memory_space<vmem>>, %arg19: memref<2x1x32xf32, #tpu.memory_space<vmem>>, %arg20: memref<2x1x32xf32, #tpu.memory_space<vmem>>, %arg21: memref<2x1x32xf32, #tpu.memory_space<vmem>>, %arg22: memref<2x32x32xbf16, #tpu.memory_space<vmem>>, %arg23: memref<2x32x64xbf16, #tpu.memory_space<vmem>>, %arg24: memref<2x32x32xbf16, #tpu.memory_space<vmem>>, %arg25: memref<2x1x32xf32, #tpu.memory_space<vmem>>, %arg26: memref<2x1x32xf32, #tpu.memory_space<vmem>>, %arg27: memref<2x1x32xf32, #tpu.memory_space<vmem>>, %arg28: memref<2x1x32xf32, #tpu.memory_space<vmem>>, %arg29: memref<2x1x32xf32, #tpu.memory_space<vmem>>, %arg30: memref<2x32x128xbf16, #tpu.memory_space<vmem>>, %arg31: memref<2x1x128xf32, #tpu.memory_space<vmem>>, %arg32: memref<2x128x32xbf16, #tpu.memory_space<vmem>>, %arg33: memref<2x1x32xf32, #tpu.memory_space<vmem>>, %arg34: memref<32x128xbf16, #tpu.memory_space<vmem>>, %arg35: memref<1x128xf32, #tpu.memory_space<vmem>>, %arg36: memref<2x8x128xf32, #tpu.memory_space<vmem>>) attributes {dimension_semantics = [], scalar_prefetch = 0 : i64, scratch_operands = 0 : i64, tpu.core_type = #tpu.core_type<tc>} {
    %c0 = arith.constant 0 : index
    %c0_0 = arith.constant 0 : index
    %0 = vector.load %arg0[%c0, %c0_0] : memref<2x8xi32, #tpu.memory_space<vmem>>, vector<2x8xi32>
    %c0_1 = arith.constant 0 : index
    %c0_2 = arith.constant 0 : index
    %1 = vector.load %arg1[%c0_1, %c0_2] : memref<2x8xi32, #tpu.memory_space<vmem>>, vector<2x8xi32>
    %2 = tpu.iota {dimensions = array<i32: 2>} : vector<2x8x50xi32>
    %3 = vector.shape_cast %0 : vector<2x8xi32> to vector<2x8x1xi32>
    %4 = vector.broadcast %3 : vector<2x8x1xi32> to vector<2x8x50xi32>
    %5 = arith.cmpi eq, %2, %4 : vector<2x8x50xi32>
    %6 = arith.extui %5 : vector<2x8x50xi1> to vector<2x8x50xi32>
    %7 = arith.sitofp %6 : vector<2x8x50xi32> to vector<2x8x50xf32>
    %8 = vector.shape_cast %7 : vector<2x8x50xf32> to vector<16x50xf32>
    %9 = tpu.iota {dimensions = array<i32: 2>} : vector<2x8x50xi32>
    %10 = vector.shape_cast %1 : vector<2x8xi32> to vector<2x8x1xi32>
    %11 = vector.broadcast %10 : vector<2x8x1xi32> to vector<2x8x50xi32>
    %12 = arith.cmpi eq, %9, %11 : vector<2x8x50xi32>
    %13 = arith.extui %12 : vector<2x8x50xi1> to vector<2x8x50xi32>
    %14 = arith.sitofp %13 : vector<2x8x50xi32> to vector<2x8x50xf32>
    %15 = vector.shape_cast %14 : vector<2x8x50xf32> to vector<16x50xf32>
    %c0_3 = arith.constant 0 : index
    %c0_4 = arith.constant 0 : index
    %16 = vector.load %arg2[%c0_3, %c0_4] : memref<50x32xf32, #tpu.memory_space<vmem>>, vector<50x32xf32>
    %cst = arith.constant dense<0.000000e+00> : vector<16x32xf32>
    %17 = tpu.matmul %8, %16, %cst {dimension_numbers = #tpu.dot_dimension_numbers<[1], [0], [0], [1], [0, 0, 1, 1], [], []>} : vector<16x50xf32>, vector<50x32xf32>, vector<16x32xf32> -> vector<16x32xf32>
    %18 = vector.shape_cast %17 : vector<16x32xf32> to vector<2x8x32xf32>
    %c0_5 = arith.constant 0 : index
    %c0_6 = arith.constant 0 : index
    %19 = vector.load %arg3[%c0_5, %c0_6] : memref<16x32xf32, #tpu.memory_space<vmem>>, vector<8x32xf32>
    %20 = vector.shape_cast %19 : vector<8x32xf32> to vector<1x8x32xf32>
    %21 = vector.broadcast %20 : vector<1x8x32xf32> to vector<2x8x32xf32>
    %22 = arith.addf %18, %21 : vector<2x8x32xf32>
    %23 = vector.shape_cast %22 : vector<2x8x32xf32> to vector<16x32xf32>
    %c0_7 = arith.constant 0 : index
    %c0_8 = arith.constant 0 : index
    %24 = vector.load %arg4[%c0_7, %c0_8] : memref<50x32xf32, #tpu.memory_space<vmem>>, vector<50x32xf32>
    %cst_9 = arith.constant dense<0.000000e+00> : vector<16x32xf32>
    %25 = tpu.matmul %15, %24, %cst_9 {dimension_numbers = #tpu.dot_dimension_numbers<[1], [0], [0], [1], [0, 0, 1, 1], [], []>} : vector<16x50xf32>, vector<50x32xf32>, vector<16x32xf32> -> vector<16x32xf32>
    %26 = vector.shape_cast %25 : vector<16x32xf32> to vector<2x8x32xf32>
    %c0_10 = arith.constant 0 : index
    %c0_11 = arith.constant 0 : index
    %27 = vector.load %arg5[%c0_10, %c0_11] : memref<16x32xf32, #tpu.memory_space<vmem>>, vector<8x32xf32>
    %28 = vector.shape_cast %27 : vector<8x32xf32> to vector<1x8x32xf32>
    %29 = vector.broadcast %28 : vector<1x8x32xf32> to vector<2x8x32xf32>
    %30 = arith.addf %26, %29 : vector<2x8x32xf32>
    %31 = vector.shape_cast %30 : vector<2x8x32xf32> to vector<16x32xf32>
    %32 = vector.shape_cast %0 : vector<2x8xi32> to vector<2x1x8xi32>
    %c0_i32 = arith.constant 0 : i32
    %33 = vector.broadcast %c0_i32 : i32 to vector<2x1x8xi32>
    %34 = arith.cmpi eq, %32, %33 : vector<2x1x8xi32>
    %cst_12 = arith.constant -1.000000e+30 : f32
    %cst_13 = arith.constant 0.000000e+00 : f32
    %35 = vector.broadcast %cst_12 : f32 to vector<2x1x8xf32>
    %36 = vector.broadcast %cst_13 : f32 to vector<2x1x8xf32>
    %37 = arith.select %34, %35, %36 : vector<2x1x8xi1>, vector<2x1x8xf32>
    %38 = tpu.concatenate %37, %37, %37, %37 in 0 : vector<2x1x8xf32>, vector<2x1x8xf32>, vector<2x1x8xf32>, vector<2x1x8xf32> -> vector<8x1x8xf32>
    %39 = vector.shape_cast %38 : vector<8x1x8xf32> to vector<8x1x8xf32>
    %40 = vector.broadcast %39 : vector<8x1x8xf32> to vector<8x8x8xf32>
    %41 = vector.shape_cast %38 : vector<8x1x8xf32> to vector<8x1x8xf32>
    %42 = vector.broadcast %41 : vector<8x1x8xf32> to vector<8x8x8xf32>
    %43 = tpu.iota {dimensions = array<i32: 0>} : vector<8x8xi32>
    %44 = tpu.iota {dimensions = array<i32: 1>} : vector<8x8xi32>
    %45 = arith.cmpi sge, %43, %44 : vector<8x8xi32>
    %cst_14 = arith.constant 0.000000e+00 : f32
    %cst_15 = arith.constant -1.000000e+30 : f32
    %46 = vector.broadcast %cst_14 : f32 to vector<8x8xf32>
    %47 = vector.broadcast %cst_15 : f32 to vector<8x8xf32>
    %48 = arith.select %45, %46, %47 : vector<8x8xi1>, vector<8x8xf32>
    %49 = vector.shape_cast %48 : vector<8x8xf32> to vector<1x8x8xf32>
    %50 = vector.shape_cast %49 : vector<1x8x8xf32> to vector<1x8x8xf32>
    %51 = vector.broadcast %50 : vector<1x8x8xf32> to vector<8x8x8xf32>
    %52 = arith.truncf %23 : vector<16x32xf32> to vector<16x32xbf16>
    %c0_16 = arith.constant 0 : index
    %c0_17 = arith.constant 0 : index
    %c0_18 = arith.constant 0 : index
    %53 = vector.load %arg6[%c0_16, %c0_17, %c0_18] : memref<2x32x96xbf16, #tpu.memory_space<vmem>>, vector<1x32x96xbf16>
    %54 = vector.shape_cast %53 : vector<1x32x96xbf16> to vector<32x96xbf16>
    %cst_19 = arith.constant dense<0.000000e+00> : vector<16x96xf32>
    %55 = tpu.matmul %52, %54, %cst_19 {dimension_numbers = #tpu.dot_dimension_numbers<[1], [0], [0], [1], [0, 0, 1, 1], [], []>} : vector<16x32xbf16>, vector<32x96xbf16>, vector<16x96xf32> -> vector<16x96xf32>
    %56 = vector.extract_strided_slice %55 {offsets = [0, 0], sizes = [16, 32], strides = [1, 1]} : vector<16x96xf32> to vector<16x32xf32>
    %57 = vector.shape_cast %56 : vector<16x32xf32> to vector<2x8x32xf32>
    %58 = vector.extract_strided_slice %55 {offsets = [0, 32], sizes = [16, 32], strides = [1, 1]} : vector<16x96xf32> to vector<16x32xf32>
    %59 = vector.shape_cast %58 : vector<16x32xf32> to vector<2x8x32xf32>
    %60 = vector.extract_strided_slice %55 {offsets = [0, 64], sizes = [16, 32], strides = [1, 1]} : vector<16x96xf32> to vector<16x32xf32>
    %61 = vector.shape_cast %60 : vector<16x32xf32> to vector<2x8x32xf32>
    %c0_20 = arith.constant 0 : index
    %c0_21 = arith.constant 0 : index
    %c0_22 = arith.constant 0 : index
    %62 = vector.load %arg7[%c0_20, %c0_21, %c0_22] : memref<2x32x32xbf16, #tpu.memory_space<vmem>>, vector<1x32x32xbf16>
    %63 = vector.shape_cast %62 : vector<1x32x32xbf16> to vector<32x32xbf16>
    %c0_23 = arith.constant 0 : index
    %c0_24 = arith.constant 0 : index
    %c0_25 = arith.constant 0 : index
    %64 = vector.load %arg8[%c0_23, %c0_24, %c0_25] : memref<2x1x32xf32, #tpu.memory_space<vmem>>, vector<1x1x32xf32>
    %65 = vector.shape_cast %64 : vector<1x1x32xf32> to vector<1x32xf32>
    %66 = vector.extract_strided_slice %57 {offsets = [0, 0, 0], sizes = [2, 8, 8], strides = [1, 1, 1]} : vector<2x8x32xf32> to vector<2x8x8xf32>
    %67 = vector.extract_strided_slice %57 {offsets = [0, 0, 8], sizes = [2, 8, 8], strides = [1, 1, 1]} : vector<2x8x32xf32> to vector<2x8x8xf32>
    %68 = vector.extract_strided_slice %57 {offsets = [0, 0, 16], sizes = [2, 8, 8], strides = [1, 1, 1]} : vector<2x8x32xf32> to vector<2x8x8xf32>
    %69 = vector.extract_strided_slice %57 {offsets = [0, 0, 24], sizes = [2, 8, 8], strides = [1, 1, 1]} : vector<2x8x32xf32> to vector<2x8x8xf32>
    %70 = tpu.concatenate %66, %67, %68, %69 in 0 : vector<2x8x8xf32>, vector<2x8x8xf32>, vector<2x8x8xf32>, vector<2x8x8xf32> -> vector<8x8x8xf32>
    %71 = arith.truncf %70 : vector<8x8x8xf32> to vector<8x8x8xbf16>
    %72 = vector.extract_strided_slice %59 {offsets = [0, 0, 0], sizes = [2, 8, 8], strides = [1, 1, 1]} : vector<2x8x32xf32> to vector<2x8x8xf32>
    %73 = vector.extract_strided_slice %59 {offsets = [0, 0, 8], sizes = [2, 8, 8], strides = [1, 1, 1]} : vector<2x8x32xf32> to vector<2x8x8xf32>
    %74 = vector.extract_strided_slice %59 {offsets = [0, 0, 16], sizes = [2, 8, 8], strides = [1, 1, 1]} : vector<2x8x32xf32> to vector<2x8x8xf32>
    %75 = vector.extract_strided_slice %59 {offsets = [0, 0, 24], sizes = [2, 8, 8], strides = [1, 1, 1]} : vector<2x8x32xf32> to vector<2x8x8xf32>
    %76 = tpu.concatenate %72, %73, %74, %75 in 0 : vector<2x8x8xf32>, vector<2x8x8xf32>, vector<2x8x8xf32>, vector<2x8x8xf32> -> vector<8x8x8xf32>
    %77 = arith.truncf %76 : vector<8x8x8xf32> to vector<8x8x8xbf16>
    %78 = vector.extract_strided_slice %61 {offsets = [0, 0, 0], sizes = [2, 8, 8], strides = [1, 1, 1]} : vector<2x8x32xf32> to vector<2x8x8xf32>
    %79 = vector.extract_strided_slice %61 {offsets = [0, 0, 8], sizes = [2, 8, 8], strides = [1, 1, 1]} : vector<2x8x32xf32> to vector<2x8x8xf32>
    %80 = vector.extract_strided_slice %61 {offsets = [0, 0, 16], sizes = [2, 8, 8], strides = [1, 1, 1]} : vector<2x8x32xf32> to vector<2x8x8xf32>
    %81 = vector.extract_strided_slice %61 {offsets = [0, 0, 24], sizes = [2, 8, 8], strides = [1, 1, 1]} : vector<2x8x32xf32> to vector<2x8x8xf32>
    %82 = tpu.concatenate %78, %79, %80, %81 in 0 : vector<2x8x8xf32>, vector<2x8x8xf32>, vector<2x8x8xf32>, vector<2x8x8xf32> -> vector<8x8x8xf32>
    %83 = arith.truncf %82 : vector<8x8x8xf32> to vector<8x8x8xbf16>
    "tpu.trace_start"() <{level = 10 : i32, message = "bqd,bkd->bqk"}> : () -> ()
    %cst_26 = arith.constant dense<0.000000e+00> : vector<8x8x8xf32>
    %84 = tpu.matmul %71, %77, %cst_26 {dimension_numbers = #tpu.dot_dimension_numbers<[2], [2], [1], [1], [0, 0, 0, 1, 1, 1], [0], [0]>} : vector<8x8x8xbf16>, vector<8x8x8xbf16>, vector<8x8x8xf32> -> vector<8x8x8xf32>
    "tpu.trace_stop"() : () -> ()
    %85 = arith.addf %84, %40 : vector<8x8x8xf32>
    %cst_27 = arith.constant dense<0xFF800000> : vector<8x8xf32>
    %86 = vector.multi_reduction <maximumf>, %85, %cst_27 [2] : vector<8x8x8xf32> to vector<8x8xf32>
    %87 = vector.shape_cast %86 : vector<8x8xf32> to vector<8x8x1xf32>
    %88 = vector.broadcast %87 : vector<8x8x1xf32> to vector<8x8x8xf32>
    %89 = arith.subf %85, %88 : vector<8x8x8xf32>
    %90 = math.exp %89 : vector<8x8x8xf32>
    %cst_28 = arith.constant dense<0.000000e+00> : vector<8x8xf32>
    %91 = vector.multi_reduction <add>, %90, %cst_28 [2] : vector<8x8x8xf32> to vector<8x8xf32>
    %92 = vector.shape_cast %91 : vector<8x8xf32> to vector<8x8x1xf32>
    %93 = tpu.reciprocal %92 {approx = true} : vector<8x8x1xf32> -> vector<8x8x1xf32>
    %94 = vector.broadcast %93 : vector<8x8x1xf32> to vector<8x8x8xf32>
    %95 = arith.mulf %90, %94 : vector<8x8x8xf32>
    %96 = arith.truncf %95 : vector<8x8x8xf32> to vector<8x8x8xbf16>
    "tpu.trace_start"() <{level = 10 : i32, message = "bqk,bkd->bqd"}> : () -> ()
    %cst_29 = arith.constant dense<0.000000e+00> : vector<8x8x8xf32>
    %97 = tpu.matmul %96, %83, %cst_29 {dimension_numbers = #tpu.dot_dimension_numbers<[2], [1], [1], [2], [0, 0, 0, 1, 1, 2], [0], [0]>} : vector<8x8x8xbf16>, vector<8x8x8xbf16>, vector<8x8x8xf32> -> vector<8x8x8xf32>
    "tpu.trace_stop"() : () -> ()
    %98 = vector.extract_strided_slice %97 {offsets = [0, 0, 0], sizes = [2, 8, 8], strides = [1, 1, 1]} : vector<8x8x8xf32> to vector<2x8x8xf32>
    %99 = vector.extract_strided_slice %97 {offsets = [2, 0, 0], sizes = [2, 8, 8], strides = [1, 1, 1]} : vector<8x8x8xf32> to vector<2x8x8xf32>
    %100 = vector.extract_strided_slice %97 {offsets = [4, 0, 0], sizes = [2, 8, 8], strides = [1, 1, 1]} : vector<8x8x8xf32> to vector<2x8x8xf32>
    %101 = vector.extract_strided_slice %97 {offsets = [6, 0, 0], sizes = [2, 8, 8], strides = [1, 1, 1]} : vector<8x8x8xf32> to vector<2x8x8xf32>
    %102 = tpu.concatenate %98, %99, %100, %101 in 2 : vector<2x8x8xf32>, vector<2x8x8xf32>, vector<2x8x8xf32>, vector<2x8x8xf32> -> vector<2x8x32xf32>
    %103 = vector.shape_cast %102 : vector<2x8x32xf32> to vector<16x32xf32>
    %104 = arith.truncf %103 : vector<16x32xf32> to vector<16x32xbf16>
    %cst_30 = arith.constant dense<0.000000e+00> : vector<16x32xf32>
    %105 = tpu.matmul %104, %63, %cst_30 {dimension_numbers = #tpu.dot_dimension_numbers<[1], [0], [0], [1], [0, 0, 1, 1], [], []>} : vector<16x32xbf16>, vector<32x32xbf16>, vector<16x32xf32> -> vector<16x32xf32>
    %106 = vector.broadcast %65 : vector<1x32xf32> to vector<16x32xf32>
    %107 = arith.addf %105, %106 : vector<16x32xf32>
    %108 = arith.addf %107, %23 : vector<16x32xf32>
    %c0_31 = arith.constant 0 : index
    %c0_32 = arith.constant 0 : index
    %c0_33 = arith.constant 0 : index
    %109 = vector.load %arg9[%c0_31, %c0_32, %c0_33] : memref<2x1x32xf32, #tpu.memory_space<vmem>>, vector<1x1x32xf32>
    %110 = vector.shape_cast %109 : vector<1x1x32xf32> to vector<1x32xf32>
    %c0_34 = arith.constant 0 : index
    %c0_35 = arith.constant 0 : index
    %c0_36 = arith.constant 0 : index
    %111 = vector.load %arg10[%c0_34, %c0_35, %c0_36] : memref<2x1x32xf32, #tpu.memory_space<vmem>>, vector<1x1x32xf32>
    %112 = vector.shape_cast %111 : vector<1x1x32xf32> to vector<1x32xf32>
    %cst_37 = arith.constant dense<0.000000e+00> : vector<16xf32>
    %113 = vector.multi_reduction <add>, %108, %cst_37 [1] : vector<16x32xf32> to vector<16xf32>
    %114 = vector.shape_cast %113 : vector<16xf32> to vector<16x1xf32>
    %cst_38 = arith.constant 3.200000e+01 : f32
    %115 = vector.broadcast %cst_38 : f32 to vector<16x1xf32>
    %116 = arith.divf %114, %115 : vector<16x1xf32>
    %117 = vector.broadcast %116 : vector<16x1xf32> to vector<16x32xf32>
    %118 = arith.subf %108, %117 : vector<16x32xf32>
    %119 = arith.mulf %118, %118 : vector<16x32xf32>
    %cst_39 = arith.constant dense<0.000000e+00> : vector<16xf32>
    %120 = vector.multi_reduction <add>, %119, %cst_39 [1] : vector<16x32xf32> to vector<16xf32>
    %121 = vector.shape_cast %120 : vector<16xf32> to vector<16x1xf32>
    %cst_40 = arith.constant 3.200000e+01 : f32
    %122 = vector.broadcast %cst_40 : f32 to vector<16x1xf32>
    %123 = arith.divf %121, %122 : vector<16x1xf32>
    %124 = vector.broadcast %116 : vector<16x1xf32> to vector<16x32xf32>
    %125 = arith.subf %108, %124 : vector<16x32xf32>
    %cst_41 = arith.constant 9.99999974E-6 : f32
    %126 = vector.broadcast %cst_41 : f32 to vector<16x1xf32>
    %127 = arith.addf %123, %126 : vector<16x1xf32>
    %128 = math.rsqrt %127 : vector<16x1xf32>
    %129 = vector.broadcast %128 : vector<16x1xf32> to vector<16x32xf32>
    %130 = arith.mulf %125, %129 : vector<16x32xf32>
    %131 = vector.broadcast %110 : vector<1x32xf32> to vector<16x32xf32>
    %132 = arith.mulf %130, %131 : vector<16x32xf32>
    %133 = vector.broadcast %112 : vector<1x32xf32> to vector<16x32xf32>
    %134 = arith.addf %132, %133 : vector<16x32xf32>
    %c0_42 = arith.constant 0 : index
    %c0_43 = arith.constant 0 : index
    %c0_44 = arith.constant 0 : index
    %135 = vector.load %arg13[%c0_42, %c0_43, %c0_44] : memref<2x32x128xbf16, #tpu.memory_space<vmem>>, vector<1x32x128xbf16>
    %136 = vector.shape_cast %135 : vector<1x32x128xbf16> to vector<32x128xbf16>
    %c0_45 = arith.constant 0 : index
    %c0_46 = arith.constant 0 : index
    %c0_47 = arith.constant 0 : index
    %137 = vector.load %arg14[%c0_45, %c0_46, %c0_47] : memref<2x1x128xf32, #tpu.memory_space<vmem>>, vector<1x1x128xf32>
    %138 = vector.shape_cast %137 : vector<1x1x128xf32> to vector<1x128xf32>
    %c0_48 = arith.constant 0 : index
    %c0_49 = arith.constant 0 : index
    %c0_50 = arith.constant 0 : index
    %139 = vector.load %arg15[%c0_48, %c0_49, %c0_50] : memref<2x128x32xbf16, #tpu.memory_space<vmem>>, vector<1x128x32xbf16>
    %140 = vector.shape_cast %139 : vector<1x128x32xbf16> to vector<128x32xbf16>
    %c0_51 = arith.constant 0 : index
    %c0_52 = arith.constant 0 : index
    %c0_53 = arith.constant 0 : index
    %141 = vector.load %arg16[%c0_51, %c0_52, %c0_53] : memref<2x1x32xf32, #tpu.memory_space<vmem>>, vector<1x1x32xf32>
    %142 = vector.shape_cast %141 : vector<1x1x32xf32> to vector<1x32xf32>
    %143 = arith.truncf %134 : vector<16x32xf32> to vector<16x32xbf16>
    %cst_54 = arith.constant dense<0.000000e+00> : vector<16x128xf32>
    %144 = tpu.matmul %143, %136, %cst_54 {dimension_numbers = #tpu.dot_dimension_numbers<[1], [0], [0], [1], [0, 0, 1, 1], [], []>} : vector<16x32xbf16>, vector<32x128xbf16>, vector<16x128xf32> -> vector<16x128xf32>
    %145 = vector.broadcast %138 : vector<1x128xf32> to vector<16x128xf32>
    %146 = arith.addf %144, %145 : vector<16x128xf32>
    %cst_55 = arith.constant 0.000000e+00 : f32
    %147 = vector.broadcast %cst_55 : f32 to vector<16x128xf32>
    %148 = arith.maximumf %146, %147 : vector<16x128xf32>
    %149 = arith.truncf %148 : vector<16x128xf32> to vector<16x128xbf16>
    %cst_56 = arith.constant dense<0.000000e+00> : vector<16x32xf32>
    %150 = tpu.matmul %149, %140, %cst_56 {dimension_numbers = #tpu.dot_dimension_numbers<[1], [0], [0], [1], [0, 0, 1, 1], [], []>} : vector<16x128xbf16>, vector<128x32xbf16>, vector<16x32xf32> -> vector<16x32xf32>
    %151 = vector.broadcast %142 : vector<1x32xf32> to vector<16x32xf32>
    %152 = arith.addf %150, %151 : vector<16x32xf32>
    %153 = arith.addf %152, %134 : vector<16x32xf32>
    %c0_57 = arith.constant 0 : index
    %c0_58 = arith.constant 0 : index
    %c0_59 = arith.constant 0 : index
    %154 = vector.load %arg11[%c0_57, %c0_58, %c0_59] : memref<2x1x32xf32, #tpu.memory_space<vmem>>, vector<1x1x32xf32>
    %155 = vector.shape_cast %154 : vector<1x1x32xf32> to vector<1x32xf32>
    %c0_60 = arith.constant 0 : index
    %c0_61 = arith.constant 0 : index
    %c0_62 = arith.constant 0 : index
    %156 = vector.load %arg12[%c0_60, %c0_61, %c0_62] : memref<2x1x32xf32, #tpu.memory_space<vmem>>, vector<1x1x32xf32>
    %157 = vector.shape_cast %156 : vector<1x1x32xf32> to vector<1x32xf32>
    %cst_63 = arith.constant dense<0.000000e+00> : vector<16xf32>
    %158 = vector.multi_reduction <add>, %153, %cst_63 [1] : vector<16x32xf32> to vector<16xf32>
    %159 = vector.shape_cast %158 : vector<16xf32> to vector<16x1xf32>
    %cst_64 = arith.constant 3.200000e+01 : f32
    %160 = vector.broadcast %cst_64 : f32 to vector<16x1xf32>
    %161 = arith.divf %159, %160 : vector<16x1xf32>
    %162 = vector.broadcast %161 : vector<16x1xf32> to vector<16x32xf32>
    %163 = arith.subf %153, %162 : vector<16x32xf32>
    %164 = arith.mulf %163, %163 : vector<16x32xf32>
    %cst_65 = arith.constant dense<0.000000e+00> : vector<16xf32>
    %165 = vector.multi_reduction <add>, %164, %cst_65 [1] : vector<16x32xf32> to vector<16xf32>
    %166 = vector.shape_cast %165 : vector<16xf32> to vector<16x1xf32>
    %cst_66 = arith.constant 3.200000e+01 : f32
    %167 = vector.broadcast %cst_66 : f32 to vector<16x1xf32>
    %168 = arith.divf %166, %167 : vector<16x1xf32>
    %169 = vector.broadcast %161 : vector<16x1xf32> to vector<16x32xf32>
    %170 = arith.subf %153, %169 : vector<16x32xf32>
    %cst_67 = arith.constant 9.99999974E-6 : f32
    %171 = vector.broadcast %cst_67 : f32 to vector<16x1xf32>
    %172 = arith.addf %168, %171 : vector<16x1xf32>
    %173 = math.rsqrt %172 : vector<16x1xf32>
    %174 = vector.broadcast %173 : vector<16x1xf32> to vector<16x32xf32>
    %175 = arith.mulf %170, %174 : vector<16x32xf32>
    %176 = vector.broadcast %155 : vector<1x32xf32> to vector<16x32xf32>
    %177 = arith.mulf %175, %176 : vector<16x32xf32>
    %178 = vector.broadcast %157 : vector<1x32xf32> to vector<16x32xf32>
    %179 = arith.addf %177, %178 : vector<16x32xf32>
    %180 = arith.truncf %179 : vector<16x32xf32> to vector<16x32xbf16>
    %c1 = arith.constant 1 : index
    %c0_68 = arith.constant 0 : index
    %c0_69 = arith.constant 0 : index
    %181 = vector.load %arg6[%c1, %c0_68, %c0_69] : memref<2x32x96xbf16, #tpu.memory_space<vmem>>, vector<1x32x96xbf16>
    %182 = vector.shape_cast %181 : vector<1x32x96xbf16> to vector<32x96xbf16>
    %cst_70 = arith.constant dense<0.000000e+00> : vector<16x96xf32>
    %183 = tpu.matmul %180, %182, %cst_70 {dimension_numbers = #tpu.dot_dimension_numbers<[1], [0], [0], [1], [0, 0, 1, 1], [], []>} : vector<16x32xbf16>, vector<32x96xbf16>, vector<16x96xf32> -> vector<16x96xf32>
    %184 = vector.extract_strided_slice %183 {offsets = [0, 0], sizes = [16, 32], strides = [1, 1]} : vector<16x96xf32> to vector<16x32xf32>
    %185 = vector.shape_cast %184 : vector<16x32xf32> to vector<2x8x32xf32>
    %186 = vector.extract_strided_slice %183 {offsets = [0, 32], sizes = [16, 32], strides = [1, 1]} : vector<16x96xf32> to vector<16x32xf32>
    %187 = vector.shape_cast %186 : vector<16x32xf32> to vector<2x8x32xf32>
    %188 = vector.extract_strided_slice %183 {offsets = [0, 64], sizes = [16, 32], strides = [1, 1]} : vector<16x96xf32> to vector<16x32xf32>
    %189 = vector.shape_cast %188 : vector<16x32xf32> to vector<2x8x32xf32>
    %c1_71 = arith.constant 1 : index
    %c0_72 = arith.constant 0 : index
    %c0_73 = arith.constant 0 : index
    %190 = vector.load %arg7[%c1_71, %c0_72, %c0_73] : memref<2x32x32xbf16, #tpu.memory_space<vmem>>, vector<1x32x32xbf16>
    %191 = vector.shape_cast %190 : vector<1x32x32xbf16> to vector<32x32xbf16>
    %c1_74 = arith.constant 1 : index
    %c0_75 = arith.constant 0 : index
    %c0_76 = arith.constant 0 : index
    %192 = vector.load %arg8[%c1_74, %c0_75, %c0_76] : memref<2x1x32xf32, #tpu.memory_space<vmem>>, vector<1x1x32xf32>
    %193 = vector.shape_cast %192 : vector<1x1x32xf32> to vector<1x32xf32>
    %194 = vector.extract_strided_slice %185 {offsets = [0, 0, 0], sizes = [2, 8, 8], strides = [1, 1, 1]} : vector<2x8x32xf32> to vector<2x8x8xf32>
    %195 = vector.extract_strided_slice %185 {offsets = [0, 0, 8], sizes = [2, 8, 8], strides = [1, 1, 1]} : vector<2x8x32xf32> to vector<2x8x8xf32>
    %196 = vector.extract_strided_slice %185 {offsets = [0, 0, 16], sizes = [2, 8, 8], strides = [1, 1, 1]} : vector<2x8x32xf32> to vector<2x8x8xf32>
    %197 = vector.extract_strided_slice %185 {offsets = [0, 0, 24], sizes = [2, 8, 8], strides = [1, 1, 1]} : vector<2x8x32xf32> to vector<2x8x8xf32>
    %198 = tpu.concatenate %194, %195, %196, %197 in 0 : vector<2x8x8xf32>, vector<2x8x8xf32>, vector<2x8x8xf32>, vector<2x8x8xf32> -> vector<8x8x8xf32>
    %199 = arith.truncf %198 : vector<8x8x8xf32> to vector<8x8x8xbf16>
    %200 = vector.extract_strided_slice %187 {offsets = [0, 0, 0], sizes = [2, 8, 8], strides = [1, 1, 1]} : vector<2x8x32xf32> to vector<2x8x8xf32>
    %201 = vector.extract_strided_slice %187 {offsets = [0, 0, 8], sizes = [2, 8, 8], strides = [1, 1, 1]} : vector<2x8x32xf32> to vector<2x8x8xf32>
    %202 = vector.extract_strided_slice %187 {offsets = [0, 0, 16], sizes = [2, 8, 8], strides = [1, 1, 1]} : vector<2x8x32xf32> to vector<2x8x8xf32>
    %203 = vector.extract_strided_slice %187 {offsets = [0, 0, 24], sizes = [2, 8, 8], strides = [1, 1, 1]} : vector<2x8x32xf32> to vector<2x8x8xf32>
    %204 = tpu.concatenate %200, %201, %202, %203 in 0 : vector<2x8x8xf32>, vector<2x8x8xf32>, vector<2x8x8xf32>, vector<2x8x8xf32> -> vector<8x8x8xf32>
    %205 = arith.truncf %204 : vector<8x8x8xf32> to vector<8x8x8xbf16>
    %206 = vector.extract_strided_slice %189 {offsets = [0, 0, 0], sizes = [2, 8, 8], strides = [1, 1, 1]} : vector<2x8x32xf32> to vector<2x8x8xf32>
    %207 = vector.extract_strided_slice %189 {offsets = [0, 0, 8], sizes = [2, 8, 8], strides = [1, 1, 1]} : vector<2x8x32xf32> to vector<2x8x8xf32>
    %208 = vector.extract_strided_slice %189 {offsets = [0, 0, 16], sizes = [2, 8, 8], strides = [1, 1, 1]} : vector<2x8x32xf32> to vector<2x8x8xf32>
    %209 = vector.extract_strided_slice %189 {offsets = [0, 0, 24], sizes = [2, 8, 8], strides = [1, 1, 1]} : vector<2x8x32xf32> to vector<2x8x8xf32>
    %210 = tpu.concatenate %206, %207, %208, %209 in 0 : vector<2x8x8xf32>, vector<2x8x8xf32>, vector<2x8x8xf32>, vector<2x8x8xf32> -> vector<8x8x8xf32>
    %211 = arith.truncf %210 : vector<8x8x8xf32> to vector<8x8x8xbf16>
    "tpu.trace_start"() <{level = 10 : i32, message = "bqd,bkd->bqk"}> : () -> ()
    %cst_77 = arith.constant dense<0.000000e+00> : vector<8x8x8xf32>
    %212 = tpu.matmul %199, %205, %cst_77 {dimension_numbers = #tpu.dot_dimension_numbers<[2], [2], [1], [1], [0, 0, 0, 1, 1, 1], [0], [0]>} : vector<8x8x8xbf16>, vector<8x8x8xbf16>, vector<8x8x8xf32> -> vector<8x8x8xf32>
    "tpu.trace_stop"() : () -> ()
    %213 = arith.addf %212, %40 : vector<8x8x8xf32>
    %cst_78 = arith.constant dense<0xFF800000> : vector<8x8xf32>
    %214 = vector.multi_reduction <maximumf>, %213, %cst_78 [2] : vector<8x8x8xf32> to vector<8x8xf32>
    %215 = vector.shape_cast %214 : vector<8x8xf32> to vector<8x8x1xf32>
    %216 = vector.broadcast %215 : vector<8x8x1xf32> to vector<8x8x8xf32>
    %217 = arith.subf %213, %216 : vector<8x8x8xf32>
    %218 = math.exp %217 : vector<8x8x8xf32>
    %cst_79 = arith.constant dense<0.000000e+00> : vector<8x8xf32>
    %219 = vector.multi_reduction <add>, %218, %cst_79 [2] : vector<8x8x8xf32> to vector<8x8xf32>
    %220 = vector.shape_cast %219 : vector<8x8xf32> to vector<8x8x1xf32>
    %221 = tpu.reciprocal %220 {approx = true} : vector<8x8x1xf32> -> vector<8x8x1xf32>
    %222 = vector.broadcast %221 : vector<8x8x1xf32> to vector<8x8x8xf32>
    %223 = arith.mulf %218, %222 : vector<8x8x8xf32>
    %224 = arith.truncf %223 : vector<8x8x8xf32> to vector<8x8x8xbf16>
    "tpu.trace_start"() <{level = 10 : i32, message = "bqk,bkd->bqd"}> : () -> ()
    %cst_80 = arith.constant dense<0.000000e+00> : vector<8x8x8xf32>
    %225 = tpu.matmul %224, %211, %cst_80 {dimension_numbers = #tpu.dot_dimension_numbers<[2], [1], [1], [2], [0, 0, 0, 1, 1, 2], [0], [0]>} : vector<8x8x8xbf16>, vector<8x8x8xbf16>, vector<8x8x8xf32> -> vector<8x8x8xf32>
    "tpu.trace_stop"() : () -> ()
    %226 = vector.extract_strided_slice %225 {offsets = [0, 0, 0], sizes = [2, 8, 8], strides = [1, 1, 1]} : vector<8x8x8xf32> to vector<2x8x8xf32>
    %227 = vector.extract_strided_slice %225 {offsets = [2, 0, 0], sizes = [2, 8, 8], strides = [1, 1, 1]} : vector<8x8x8xf32> to vector<2x8x8xf32>
    %228 = vector.extract_strided_slice %225 {offsets = [4, 0, 0], sizes = [2, 8, 8], strides = [1, 1, 1]} : vector<8x8x8xf32> to vector<2x8x8xf32>
    %229 = vector.extract_strided_slice %225 {offsets = [6, 0, 0], sizes = [2, 8, 8], strides = [1, 1, 1]} : vector<8x8x8xf32> to vector<2x8x8xf32>
    %230 = tpu.concatenate %226, %227, %228, %229 in 2 : vector<2x8x8xf32>, vector<2x8x8xf32>, vector<2x8x8xf32>, vector<2x8x8xf32> -> vector<2x8x32xf32>
    %231 = vector.shape_cast %230 : vector<2x8x32xf32> to vector<16x32xf32>
    %232 = arith.truncf %231 : vector<16x32xf32> to vector<16x32xbf16>
    %cst_81 = arith.constant dense<0.000000e+00> : vector<16x32xf32>
    %233 = tpu.matmul %232, %191, %cst_81 {dimension_numbers = #tpu.dot_dimension_numbers<[1], [0], [0], [1], [0, 0, 1, 1], [], []>} : vector<16x32xbf16>, vector<32x32xbf16>, vector<16x32xf32> -> vector<16x32xf32>
    %234 = vector.broadcast %193 : vector<1x32xf32> to vector<16x32xf32>
    %235 = arith.addf %233, %234 : vector<16x32xf32>
    %236 = arith.addf %235, %179 : vector<16x32xf32>
    %c1_82 = arith.constant 1 : index
    %c0_83 = arith.constant 0 : index
    %c0_84 = arith.constant 0 : index
    %237 = vector.load %arg9[%c1_82, %c0_83, %c0_84] : memref<2x1x32xf32, #tpu.memory_space<vmem>>, vector<1x1x32xf32>
    %238 = vector.shape_cast %237 : vector<1x1x32xf32> to vector<1x32xf32>
    %c1_85 = arith.constant 1 : index
    %c0_86 = arith.constant 0 : index
    %c0_87 = arith.constant 0 : index
    %239 = vector.load %arg10[%c1_85, %c0_86, %c0_87] : memref<2x1x32xf32, #tpu.memory_space<vmem>>, vector<1x1x32xf32>
    %240 = vector.shape_cast %239 : vector<1x1x32xf32> to vector<1x32xf32>
    %cst_88 = arith.constant dense<0.000000e+00> : vector<16xf32>
    %241 = vector.multi_reduction <add>, %236, %cst_88 [1] : vector<16x32xf32> to vector<16xf32>
    %242 = vector.shape_cast %241 : vector<16xf32> to vector<16x1xf32>
    %cst_89 = arith.constant 3.200000e+01 : f32
    %243 = vector.broadcast %cst_89 : f32 to vector<16x1xf32>
    %244 = arith.divf %242, %243 : vector<16x1xf32>
    %245 = vector.broadcast %244 : vector<16x1xf32> to vector<16x32xf32>
    %246 = arith.subf %236, %245 : vector<16x32xf32>
    %247 = arith.mulf %246, %246 : vector<16x32xf32>
    %cst_90 = arith.constant dense<0.000000e+00> : vector<16xf32>
    %248 = vector.multi_reduction <add>, %247, %cst_90 [1] : vector<16x32xf32> to vector<16xf32>
    %249 = vector.shape_cast %248 : vector<16xf32> to vector<16x1xf32>
    %cst_91 = arith.constant 3.200000e+01 : f32
    %250 = vector.broadcast %cst_91 : f32 to vector<16x1xf32>
    %251 = arith.divf %249, %250 : vector<16x1xf32>
    %252 = vector.broadcast %244 : vector<16x1xf32> to vector<16x32xf32>
    %253 = arith.subf %236, %252 : vector<16x32xf32>
    %cst_92 = arith.constant 9.99999974E-6 : f32
    %254 = vector.broadcast %cst_92 : f32 to vector<16x1xf32>
    %255 = arith.addf %251, %254 : vector<16x1xf32>
    %256 = math.rsqrt %255 : vector<16x1xf32>
    %257 = vector.broadcast %256 : vector<16x1xf32> to vector<16x32xf32>
    %258 = arith.mulf %253, %257 : vector<16x32xf32>
    %259 = vector.broadcast %238 : vector<1x32xf32> to vector<16x32xf32>
    %260 = arith.mulf %258, %259 : vector<16x32xf32>
    %261 = vector.broadcast %240 : vector<1x32xf32> to vector<16x32xf32>
    %262 = arith.addf %260, %261 : vector<16x32xf32>
    %c1_93 = arith.constant 1 : index
    %c0_94 = arith.constant 0 : index
    %c0_95 = arith.constant 0 : index
    %263 = vector.load %arg13[%c1_93, %c0_94, %c0_95] : memref<2x32x128xbf16, #tpu.memory_space<vmem>>, vector<1x32x128xbf16>
    %264 = vector.shape_cast %263 : vector<1x32x128xbf16> to vector<32x128xbf16>
    %c1_96 = arith.constant 1 : index
    %c0_97 = arith.constant 0 : index
    %c0_98 = arith.constant 0 : index
    %265 = vector.load %arg14[%c1_96, %c0_97, %c0_98] : memref<2x1x128xf32, #tpu.memory_space<vmem>>, vector<1x1x128xf32>
    %266 = vector.shape_cast %265 : vector<1x1x128xf32> to vector<1x128xf32>
    %c1_99 = arith.constant 1 : index
    %c0_100 = arith.constant 0 : index
    %c0_101 = arith.constant 0 : index
    %267 = vector.load %arg15[%c1_99, %c0_100, %c0_101] : memref<2x128x32xbf16, #tpu.memory_space<vmem>>, vector<1x128x32xbf16>
    %268 = vector.shape_cast %267 : vector<1x128x32xbf16> to vector<128x32xbf16>
    %c1_102 = arith.constant 1 : index
    %c0_103 = arith.constant 0 : index
    %c0_104 = arith.constant 0 : index
    %269 = vector.load %arg16[%c1_102, %c0_103, %c0_104] : memref<2x1x32xf32, #tpu.memory_space<vmem>>, vector<1x1x32xf32>
    %270 = vector.shape_cast %269 : vector<1x1x32xf32> to vector<1x32xf32>
    %271 = arith.truncf %262 : vector<16x32xf32> to vector<16x32xbf16>
    %cst_105 = arith.constant dense<0.000000e+00> : vector<16x128xf32>
    %272 = tpu.matmul %271, %264, %cst_105 {dimension_numbers = #tpu.dot_dimension_numbers<[1], [0], [0], [1], [0, 0, 1, 1], [], []>} : vector<16x32xbf16>, vector<32x128xbf16>, vector<16x128xf32> -> vector<16x128xf32>
    %273 = vector.broadcast %266 : vector<1x128xf32> to vector<16x128xf32>
    %274 = arith.addf %272, %273 : vector<16x128xf32>
    %cst_106 = arith.constant 0.000000e+00 : f32
    %275 = vector.broadcast %cst_106 : f32 to vector<16x128xf32>
    %276 = arith.maximumf %274, %275 : vector<16x128xf32>
    %277 = arith.truncf %276 : vector<16x128xf32> to vector<16x128xbf16>
    %cst_107 = arith.constant dense<0.000000e+00> : vector<16x32xf32>
    %278 = tpu.matmul %277, %268, %cst_107 {dimension_numbers = #tpu.dot_dimension_numbers<[1], [0], [0], [1], [0, 0, 1, 1], [], []>} : vector<16x128xbf16>, vector<128x32xbf16>, vector<16x32xf32> -> vector<16x32xf32>
    %279 = vector.broadcast %270 : vector<1x32xf32> to vector<16x32xf32>
    %280 = arith.addf %278, %279 : vector<16x32xf32>
    %281 = arith.addf %280, %262 : vector<16x32xf32>
    %c1_108 = arith.constant 1 : index
    %c0_109 = arith.constant 0 : index
    %c0_110 = arith.constant 0 : index
    %282 = vector.load %arg11[%c1_108, %c0_109, %c0_110] : memref<2x1x32xf32, #tpu.memory_space<vmem>>, vector<1x1x32xf32>
    %283 = vector.shape_cast %282 : vector<1x1x32xf32> to vector<1x32xf32>
    %c1_111 = arith.constant 1 : index
    %c0_112 = arith.constant 0 : index
    %c0_113 = arith.constant 0 : index
    %284 = vector.load %arg12[%c1_111, %c0_112, %c0_113] : memref<2x1x32xf32, #tpu.memory_space<vmem>>, vector<1x1x32xf32>
    %285 = vector.shape_cast %284 : vector<1x1x32xf32> to vector<1x32xf32>
    %cst_114 = arith.constant dense<0.000000e+00> : vector<16xf32>
    %286 = vector.multi_reduction <add>, %281, %cst_114 [1] : vector<16x32xf32> to vector<16xf32>
    %287 = vector.shape_cast %286 : vector<16xf32> to vector<16x1xf32>
    %cst_115 = arith.constant 3.200000e+01 : f32
    %288 = vector.broadcast %cst_115 : f32 to vector<16x1xf32>
    %289 = arith.divf %287, %288 : vector<16x1xf32>
    %290 = vector.broadcast %289 : vector<16x1xf32> to vector<16x32xf32>
    %291 = arith.subf %281, %290 : vector<16x32xf32>
    %292 = arith.mulf %291, %291 : vector<16x32xf32>
    %cst_116 = arith.constant dense<0.000000e+00> : vector<16xf32>
    %293 = vector.multi_reduction <add>, %292, %cst_116 [1] : vector<16x32xf32> to vector<16xf32>
    %294 = vector.shape_cast %293 : vector<16xf32> to vector<16x1xf32>
    %cst_117 = arith.constant 3.200000e+01 : f32
    %295 = vector.broadcast %cst_117 : f32 to vector<16x1xf32>
    %296 = arith.divf %294, %295 : vector<16x1xf32>
    %297 = vector.broadcast %289 : vector<16x1xf32> to vector<16x32xf32>
    %298 = arith.subf %281, %297 : vector<16x32xf32>
    %cst_118 = arith.constant 9.99999974E-6 : f32
    %299 = vector.broadcast %cst_118 : f32 to vector<16x1xf32>
    %300 = arith.addf %296, %299 : vector<16x1xf32>
    %301 = math.rsqrt %300 : vector<16x1xf32>
    %302 = vector.broadcast %301 : vector<16x1xf32> to vector<16x32xf32>
    %303 = arith.mulf %298, %302 : vector<16x32xf32>
    %304 = vector.broadcast %283 : vector<1x32xf32> to vector<16x32xf32>
    %305 = arith.mulf %303, %304 : vector<16x32xf32>
    %306 = vector.broadcast %285 : vector<1x32xf32> to vector<16x32xf32>
    %307 = arith.addf %305, %306 : vector<16x32xf32>
    %308 = arith.truncf %31 : vector<16x32xf32> to vector<16x32xbf16>
    %c0_119 = arith.constant 0 : index
    %c0_120 = arith.constant 0 : index
    %c0_121 = arith.constant 0 : index
    %309 = vector.load %arg17[%c0_119, %c0_120, %c0_121] : memref<2x32x96xbf16, #tpu.memory_space<vmem>>, vector<1x32x96xbf16>
    %310 = vector.shape_cast %309 : vector<1x32x96xbf16> to vector<32x96xbf16>
    %cst_122 = arith.constant dense<0.000000e+00> : vector<16x96xf32>
    %311 = tpu.matmul %308, %310, %cst_122 {dimension_numbers = #tpu.dot_dimension_numbers<[1], [0], [0], [1], [0, 0, 1, 1], [], []>} : vector<16x32xbf16>, vector<32x96xbf16>, vector<16x96xf32> -> vector<16x96xf32>
    %312 = vector.extract_strided_slice %311 {offsets = [0, 0], sizes = [16, 32], strides = [1, 1]} : vector<16x96xf32> to vector<16x32xf32>
    %313 = vector.shape_cast %312 : vector<16x32xf32> to vector<2x8x32xf32>
    %314 = vector.extract_strided_slice %311 {offsets = [0, 32], sizes = [16, 32], strides = [1, 1]} : vector<16x96xf32> to vector<16x32xf32>
    %315 = vector.shape_cast %314 : vector<16x32xf32> to vector<2x8x32xf32>
    %316 = vector.extract_strided_slice %311 {offsets = [0, 64], sizes = [16, 32], strides = [1, 1]} : vector<16x96xf32> to vector<16x32xf32>
    %317 = vector.shape_cast %316 : vector<16x32xf32> to vector<2x8x32xf32>
    %c0_123 = arith.constant 0 : index
    %c0_124 = arith.constant 0 : index
    %c0_125 = arith.constant 0 : index
    %318 = vector.load %arg18[%c0_123, %c0_124, %c0_125] : memref<2x32x32xbf16, #tpu.memory_space<vmem>>, vector<1x32x32xbf16>
    %319 = vector.shape_cast %318 : vector<1x32x32xbf16> to vector<32x32xbf16>
    %c0_126 = arith.constant 0 : index
    %c0_127 = arith.constant 0 : index
    %c0_128 = arith.constant 0 : index
    %320 = vector.load %arg19[%c0_126, %c0_127, %c0_128] : memref<2x1x32xf32, #tpu.memory_space<vmem>>, vector<1x1x32xf32>
    %321 = vector.shape_cast %320 : vector<1x1x32xf32> to vector<1x32xf32>
    %322 = vector.extract_strided_slice %313 {offsets = [0, 0, 0], sizes = [2, 8, 8], strides = [1, 1, 1]} : vector<2x8x32xf32> to vector<2x8x8xf32>
    %323 = vector.extract_strided_slice %313 {offsets = [0, 0, 8], sizes = [2, 8, 8], strides = [1, 1, 1]} : vector<2x8x32xf32> to vector<2x8x8xf32>
    %324 = vector.extract_strided_slice %313 {offsets = [0, 0, 16], sizes = [2, 8, 8], strides = [1, 1, 1]} : vector<2x8x32xf32> to vector<2x8x8xf32>
    %325 = vector.extract_strided_slice %313 {offsets = [0, 0, 24], sizes = [2, 8, 8], strides = [1, 1, 1]} : vector<2x8x32xf32> to vector<2x8x8xf32>
    %326 = tpu.concatenate %322, %323, %324, %325 in 0 : vector<2x8x8xf32>, vector<2x8x8xf32>, vector<2x8x8xf32>, vector<2x8x8xf32> -> vector<8x8x8xf32>
    %327 = arith.truncf %326 : vector<8x8x8xf32> to vector<8x8x8xbf16>
    %328 = vector.extract_strided_slice %315 {offsets = [0, 0, 0], sizes = [2, 8, 8], strides = [1, 1, 1]} : vector<2x8x32xf32> to vector<2x8x8xf32>
    %329 = vector.extract_strided_slice %315 {offsets = [0, 0, 8], sizes = [2, 8, 8], strides = [1, 1, 1]} : vector<2x8x32xf32> to vector<2x8x8xf32>
    %330 = vector.extract_strided_slice %315 {offsets = [0, 0, 16], sizes = [2, 8, 8], strides = [1, 1, 1]} : vector<2x8x32xf32> to vector<2x8x8xf32>
    %331 = vector.extract_strided_slice %315 {offsets = [0, 0, 24], sizes = [2, 8, 8], strides = [1, 1, 1]} : vector<2x8x32xf32> to vector<2x8x8xf32>
    %332 = tpu.concatenate %328, %329, %330, %331 in 0 : vector<2x8x8xf32>, vector<2x8x8xf32>, vector<2x8x8xf32>, vector<2x8x8xf32> -> vector<8x8x8xf32>
    %333 = arith.truncf %332 : vector<8x8x8xf32> to vector<8x8x8xbf16>
    %334 = vector.extract_strided_slice %317 {offsets = [0, 0, 0], sizes = [2, 8, 8], strides = [1, 1, 1]} : vector<2x8x32xf32> to vector<2x8x8xf32>
    %335 = vector.extract_strided_slice %317 {offsets = [0, 0, 8], sizes = [2, 8, 8], strides = [1, 1, 1]} : vector<2x8x32xf32> to vector<2x8x8xf32>
    %336 = vector.extract_strided_slice %317 {offsets = [0, 0, 16], sizes = [2, 8, 8], strides = [1, 1, 1]} : vector<2x8x32xf32> to vector<2x8x8xf32>
    %337 = vector.extract_strided_slice %317 {offsets = [0, 0, 24], sizes = [2, 8, 8], strides = [1, 1, 1]} : vector<2x8x32xf32> to vector<2x8x8xf32>
    %338 = tpu.concatenate %334, %335, %336, %337 in 0 : vector<2x8x8xf32>, vector<2x8x8xf32>, vector<2x8x8xf32>, vector<2x8x8xf32> -> vector<8x8x8xf32>
    %339 = arith.truncf %338 : vector<8x8x8xf32> to vector<8x8x8xbf16>
    "tpu.trace_start"() <{level = 10 : i32, message = "bqd,bkd->bqk"}> : () -> ()
    %cst_129 = arith.constant dense<0.000000e+00> : vector<8x8x8xf32>
    %340 = tpu.matmul %327, %333, %cst_129 {dimension_numbers = #tpu.dot_dimension_numbers<[2], [2], [1], [1], [0, 0, 0, 1, 1, 1], [0], [0]>} : vector<8x8x8xbf16>, vector<8x8x8xbf16>, vector<8x8x8xf32> -> vector<8x8x8xf32>
    "tpu.trace_stop"() : () -> ()
    %341 = arith.addf %340, %51 : vector<8x8x8xf32>
    %cst_130 = arith.constant dense<0xFF800000> : vector<8x8xf32>
    %342 = vector.multi_reduction <maximumf>, %341, %cst_130 [2] : vector<8x8x8xf32> to vector<8x8xf32>
    %343 = vector.shape_cast %342 : vector<8x8xf32> to vector<8x8x1xf32>
    %344 = vector.broadcast %343 : vector<8x8x1xf32> to vector<8x8x8xf32>
    %345 = arith.subf %341, %344 : vector<8x8x8xf32>
    %346 = math.exp %345 : vector<8x8x8xf32>
    %cst_131 = arith.constant dense<0.000000e+00> : vector<8x8xf32>
    %347 = vector.multi_reduction <add>, %346, %cst_131 [2] : vector<8x8x8xf32> to vector<8x8xf32>
    %348 = vector.shape_cast %347 : vector<8x8xf32> to vector<8x8x1xf32>
    %349 = tpu.reciprocal %348 {approx = true} : vector<8x8x1xf32> -> vector<8x8x1xf32>
    %350 = vector.broadcast %349 : vector<8x8x1xf32> to vector<8x8x8xf32>
    %351 = arith.mulf %346, %350 : vector<8x8x8xf32>
    %352 = arith.truncf %351 : vector<8x8x8xf32> to vector<8x8x8xbf16>
    "tpu.trace_start"() <{level = 10 : i32, message = "bqk,bkd->bqd"}> : () -> ()
    %cst_132 = arith.constant dense<0.000000e+00> : vector<8x8x8xf32>
    %353 = tpu.matmul %352, %339, %cst_132 {dimension_numbers = #tpu.dot_dimension_numbers<[2], [1], [1], [2], [0, 0, 0, 1, 1, 2], [0], [0]>} : vector<8x8x8xbf16>, vector<8x8x8xbf16>, vector<8x8x8xf32> -> vector<8x8x8xf32>
    "tpu.trace_stop"() : () -> ()
    %354 = vector.extract_strided_slice %353 {offsets = [0, 0, 0], sizes = [2, 8, 8], strides = [1, 1, 1]} : vector<8x8x8xf32> to vector<2x8x8xf32>
    %355 = vector.extract_strided_slice %353 {offsets = [2, 0, 0], sizes = [2, 8, 8], strides = [1, 1, 1]} : vector<8x8x8xf32> to vector<2x8x8xf32>
    %356 = vector.extract_strided_slice %353 {offsets = [4, 0, 0], sizes = [2, 8, 8], strides = [1, 1, 1]} : vector<8x8x8xf32> to vector<2x8x8xf32>
    %357 = vector.extract_strided_slice %353 {offsets = [6, 0, 0], sizes = [2, 8, 8], strides = [1, 1, 1]} : vector<8x8x8xf32> to vector<2x8x8xf32>
    %358 = tpu.concatenate %354, %355, %356, %357 in 2 : vector<2x8x8xf32>, vector<2x8x8xf32>, vector<2x8x8xf32>, vector<2x8x8xf32> -> vector<2x8x32xf32>
    %359 = vector.shape_cast %358 : vector<2x8x32xf32> to vector<16x32xf32>
    %360 = arith.truncf %359 : vector<16x32xf32> to vector<16x32xbf16>
    %cst_133 = arith.constant dense<0.000000e+00> : vector<16x32xf32>
    %361 = tpu.matmul %360, %319, %cst_133 {dimension_numbers = #tpu.dot_dimension_numbers<[1], [0], [0], [1], [0, 0, 1, 1], [], []>} : vector<16x32xbf16>, vector<32x32xbf16>, vector<16x32xf32> -> vector<16x32xf32>
    %362 = vector.broadcast %321 : vector<1x32xf32> to vector<16x32xf32>
    %363 = arith.addf %361, %362 : vector<16x32xf32>
    %364 = arith.addf %31, %363 : vector<16x32xf32>
    %c0_134 = arith.constant 0 : index
    %c0_135 = arith.constant 0 : index
    %c0_136 = arith.constant 0 : index
    %365 = vector.load %arg20[%c0_134, %c0_135, %c0_136] : memref<2x1x32xf32, #tpu.memory_space<vmem>>, vector<1x1x32xf32>
    %366 = vector.shape_cast %365 : vector<1x1x32xf32> to vector<1x32xf32>
    %c0_137 = arith.constant 0 : index
    %c0_138 = arith.constant 0 : index
    %c0_139 = arith.constant 0 : index
    %367 = vector.load %arg21[%c0_137, %c0_138, %c0_139] : memref<2x1x32xf32, #tpu.memory_space<vmem>>, vector<1x1x32xf32>
    %368 = vector.shape_cast %367 : vector<1x1x32xf32> to vector<1x32xf32>
    %cst_140 = arith.constant dense<0.000000e+00> : vector<16xf32>
    %369 = vector.multi_reduction <add>, %364, %cst_140 [1] : vector<16x32xf32> to vector<16xf32>
    %370 = vector.shape_cast %369 : vector<16xf32> to vector<16x1xf32>
    %cst_141 = arith.constant 3.200000e+01 : f32
    %371 = vector.broadcast %cst_141 : f32 to vector<16x1xf32>
    %372 = arith.divf %370, %371 : vector<16x1xf32>
    %373 = vector.broadcast %372 : vector<16x1xf32> to vector<16x32xf32>
    %374 = arith.subf %364, %373 : vector<16x32xf32>
    %375 = arith.mulf %374, %374 : vector<16x32xf32>
    %cst_142 = arith.constant dense<0.000000e+00> : vector<16xf32>
    %376 = vector.multi_reduction <add>, %375, %cst_142 [1] : vector<16x32xf32> to vector<16xf32>
    %377 = vector.shape_cast %376 : vector<16xf32> to vector<16x1xf32>
    %cst_143 = arith.constant 3.200000e+01 : f32
    %378 = vector.broadcast %cst_143 : f32 to vector<16x1xf32>
    %379 = arith.divf %377, %378 : vector<16x1xf32>
    %380 = vector.broadcast %372 : vector<16x1xf32> to vector<16x32xf32>
    %381 = arith.subf %364, %380 : vector<16x32xf32>
    %cst_144 = arith.constant 9.99999974E-6 : f32
    %382 = vector.broadcast %cst_144 : f32 to vector<16x1xf32>
    %383 = arith.addf %379, %382 : vector<16x1xf32>
    %384 = math.rsqrt %383 : vector<16x1xf32>
    %385 = vector.broadcast %384 : vector<16x1xf32> to vector<16x32xf32>
    %386 = arith.mulf %381, %385 : vector<16x32xf32>
    %387 = vector.broadcast %366 : vector<1x32xf32> to vector<16x32xf32>
    %388 = arith.mulf %386, %387 : vector<16x32xf32>
    %389 = vector.broadcast %368 : vector<1x32xf32> to vector<16x32xf32>
    %390 = arith.addf %388, %389 : vector<16x32xf32>
    %391 = arith.truncf %390 : vector<16x32xf32> to vector<16x32xbf16>
    %c0_145 = arith.constant 0 : index
    %c0_146 = arith.constant 0 : index
    %c0_147 = arith.constant 0 : index
    %392 = vector.load %arg22[%c0_145, %c0_146, %c0_147] : memref<2x32x32xbf16, #tpu.memory_space<vmem>>, vector<1x32x32xbf16>
    %393 = vector.shape_cast %392 : vector<1x32x32xbf16> to vector<32x32xbf16>
    %cst_148 = arith.constant dense<0.000000e+00> : vector<16x32xf32>
    %394 = tpu.matmul %391, %393, %cst_148 {dimension_numbers = #tpu.dot_dimension_numbers<[1], [0], [0], [1], [0, 0, 1, 1], [], []>} : vector<16x32xbf16>, vector<32x32xbf16>, vector<16x32xf32> -> vector<16x32xf32>
    %395 = vector.shape_cast %394 : vector<16x32xf32> to vector<2x8x32xf32>
    %396 = arith.truncf %307 : vector<16x32xf32> to vector<16x32xbf16>
    %c0_149 = arith.constant 0 : index
    %c0_150 = arith.constant 0 : index
    %c0_151 = arith.constant 0 : index
    %397 = vector.load %arg23[%c0_149, %c0_150, %c0_151] : memref<2x32x64xbf16, #tpu.memory_space<vmem>>, vector<1x32x64xbf16>
    %398 = vector.shape_cast %397 : vector<1x32x64xbf16> to vector<32x64xbf16>
    %cst_152 = arith.constant dense<0.000000e+00> : vector<16x64xf32>
    %399 = tpu.matmul %396, %398, %cst_152 {dimension_numbers = #tpu.dot_dimension_numbers<[1], [0], [0], [1], [0, 0, 1, 1], [], []>} : vector<16x32xbf16>, vector<32x64xbf16>, vector<16x64xf32> -> vector<16x64xf32>
    %400 = vector.extract_strided_slice %399 {offsets = [0, 0], sizes = [16, 32], strides = [1, 1]} : vector<16x64xf32> to vector<16x32xf32>
    %401 = vector.shape_cast %400 : vector<16x32xf32> to vector<2x8x32xf32>
    %402 = vector.extract_strided_slice %399 {offsets = [0, 32], sizes = [16, 32], strides = [1, 1]} : vector<16x64xf32> to vector<16x32xf32>
    %403 = vector.shape_cast %402 : vector<16x32xf32> to vector<2x8x32xf32>
    %c0_153 = arith.constant 0 : index
    %c0_154 = arith.constant 0 : index
    %c0_155 = arith.constant 0 : index
    %404 = vector.load %arg24[%c0_153, %c0_154, %c0_155] : memref<2x32x32xbf16, #tpu.memory_space<vmem>>, vector<1x32x32xbf16>
    %405 = vector.shape_cast %404 : vector<1x32x32xbf16> to vector<32x32xbf16>
    %c0_156 = arith.constant 0 : index
    %c0_157 = arith.constant 0 : index
    %c0_158 = arith.constant 0 : index
    %406 = vector.load %arg25[%c0_156, %c0_157, %c0_158] : memref<2x1x32xf32, #tpu.memory_space<vmem>>, vector<1x1x32xf32>
    %407 = vector.shape_cast %406 : vector<1x1x32xf32> to vector<1x32xf32>
    %408 = vector.extract_strided_slice %395 {offsets = [0, 0, 0], sizes = [2, 8, 8], strides = [1, 1, 1]} : vector<2x8x32xf32> to vector<2x8x8xf32>
    %409 = vector.extract_strided_slice %395 {offsets = [0, 0, 8], sizes = [2, 8, 8], strides = [1, 1, 1]} : vector<2x8x32xf32> to vector<2x8x8xf32>
    %410 = vector.extract_strided_slice %395 {offsets = [0, 0, 16], sizes = [2, 8, 8], strides = [1, 1, 1]} : vector<2x8x32xf32> to vector<2x8x8xf32>
    %411 = vector.extract_strided_slice %395 {offsets = [0, 0, 24], sizes = [2, 8, 8], strides = [1, 1, 1]} : vector<2x8x32xf32> to vector<2x8x8xf32>
    %412 = tpu.concatenate %408, %409, %410, %411 in 0 : vector<2x8x8xf32>, vector<2x8x8xf32>, vector<2x8x8xf32>, vector<2x8x8xf32> -> vector<8x8x8xf32>
    %413 = arith.truncf %412 : vector<8x8x8xf32> to vector<8x8x8xbf16>
    %414 = vector.extract_strided_slice %401 {offsets = [0, 0, 0], sizes = [2, 8, 8], strides = [1, 1, 1]} : vector<2x8x32xf32> to vector<2x8x8xf32>
    %415 = vector.extract_strided_slice %401 {offsets = [0, 0, 8], sizes = [2, 8, 8], strides = [1, 1, 1]} : vector<2x8x32xf32> to vector<2x8x8xf32>
    %416 = vector.extract_strided_slice %401 {offsets = [0, 0, 16], sizes = [2, 8, 8], strides = [1, 1, 1]} : vector<2x8x32xf32> to vector<2x8x8xf32>
    %417 = vector.extract_strided_slice %401 {offsets = [0, 0, 24], sizes = [2, 8, 8], strides = [1, 1, 1]} : vector<2x8x32xf32> to vector<2x8x8xf32>
    %418 = tpu.concatenate %414, %415, %416, %417 in 0 : vector<2x8x8xf32>, vector<2x8x8xf32>, vector<2x8x8xf32>, vector<2x8x8xf32> -> vector<8x8x8xf32>
    %419 = arith.truncf %418 : vector<8x8x8xf32> to vector<8x8x8xbf16>
    %420 = vector.extract_strided_slice %403 {offsets = [0, 0, 0], sizes = [2, 8, 8], strides = [1, 1, 1]} : vector<2x8x32xf32> to vector<2x8x8xf32>
    %421 = vector.extract_strided_slice %403 {offsets = [0, 0, 8], sizes = [2, 8, 8], strides = [1, 1, 1]} : vector<2x8x32xf32> to vector<2x8x8xf32>
    %422 = vector.extract_strided_slice %403 {offsets = [0, 0, 16], sizes = [2, 8, 8], strides = [1, 1, 1]} : vector<2x8x32xf32> to vector<2x8x8xf32>
    %423 = vector.extract_strided_slice %403 {offsets = [0, 0, 24], sizes = [2, 8, 8], strides = [1, 1, 1]} : vector<2x8x32xf32> to vector<2x8x8xf32>
    %424 = tpu.concatenate %420, %421, %422, %423 in 0 : vector<2x8x8xf32>, vector<2x8x8xf32>, vector<2x8x8xf32>, vector<2x8x8xf32> -> vector<8x8x8xf32>
    %425 = arith.truncf %424 : vector<8x8x8xf32> to vector<8x8x8xbf16>
    "tpu.trace_start"() <{level = 10 : i32, message = "bqd,bkd->bqk"}> : () -> ()
    %cst_159 = arith.constant dense<0.000000e+00> : vector<8x8x8xf32>
    %426 = tpu.matmul %413, %419, %cst_159 {dimension_numbers = #tpu.dot_dimension_numbers<[2], [2], [1], [1], [0, 0, 0, 1, 1, 1], [0], [0]>} : vector<8x8x8xbf16>, vector<8x8x8xbf16>, vector<8x8x8xf32> -> vector<8x8x8xf32>
    "tpu.trace_stop"() : () -> ()
    %427 = arith.addf %426, %42 : vector<8x8x8xf32>
    %cst_160 = arith.constant dense<0xFF800000> : vector<8x8xf32>
    %428 = vector.multi_reduction <maximumf>, %427, %cst_160 [2] : vector<8x8x8xf32> to vector<8x8xf32>
    %429 = vector.shape_cast %428 : vector<8x8xf32> to vector<8x8x1xf32>
    %430 = vector.broadcast %429 : vector<8x8x1xf32> to vector<8x8x8xf32>
    %431 = arith.subf %427, %430 : vector<8x8x8xf32>
    %432 = math.exp %431 : vector<8x8x8xf32>
    %cst_161 = arith.constant dense<0.000000e+00> : vector<8x8xf32>
    %433 = vector.multi_reduction <add>, %432, %cst_161 [2] : vector<8x8x8xf32> to vector<8x8xf32>
    %434 = vector.shape_cast %433 : vector<8x8xf32> to vector<8x8x1xf32>
    %435 = tpu.reciprocal %434 {approx = true} : vector<8x8x1xf32> -> vector<8x8x1xf32>
    %436 = vector.broadcast %435 : vector<8x8x1xf32> to vector<8x8x8xf32>
    %437 = arith.mulf %432, %436 : vector<8x8x8xf32>
    %438 = arith.truncf %437 : vector<8x8x8xf32> to vector<8x8x8xbf16>
    "tpu.trace_start"() <{level = 10 : i32, message = "bqk,bkd->bqd"}> : () -> ()
    %cst_162 = arith.constant dense<0.000000e+00> : vector<8x8x8xf32>
    %439 = tpu.matmul %438, %425, %cst_162 {dimension_numbers = #tpu.dot_dimension_numbers<[2], [1], [1], [2], [0, 0, 0, 1, 1, 2], [0], [0]>} : vector<8x8x8xbf16>, vector<8x8x8xbf16>, vector<8x8x8xf32> -> vector<8x8x8xf32>
    "tpu.trace_stop"() : () -> ()
    %440 = vector.extract_strided_slice %439 {offsets = [0, 0, 0], sizes = [2, 8, 8], strides = [1, 1, 1]} : vector<8x8x8xf32> to vector<2x8x8xf32>
    %441 = vector.extract_strided_slice %439 {offsets = [2, 0, 0], sizes = [2, 8, 8], strides = [1, 1, 1]} : vector<8x8x8xf32> to vector<2x8x8xf32>
    %442 = vector.extract_strided_slice %439 {offsets = [4, 0, 0], sizes = [2, 8, 8], strides = [1, 1, 1]} : vector<8x8x8xf32> to vector<2x8x8xf32>
    %443 = vector.extract_strided_slice %439 {offsets = [6, 0, 0], sizes = [2, 8, 8], strides = [1, 1, 1]} : vector<8x8x8xf32> to vector<2x8x8xf32>
    %444 = tpu.concatenate %440, %441, %442, %443 in 2 : vector<2x8x8xf32>, vector<2x8x8xf32>, vector<2x8x8xf32>, vector<2x8x8xf32> -> vector<2x8x32xf32>
    %445 = vector.shape_cast %444 : vector<2x8x32xf32> to vector<16x32xf32>
    %446 = arith.truncf %445 : vector<16x32xf32> to vector<16x32xbf16>
    %cst_163 = arith.constant dense<0.000000e+00> : vector<16x32xf32>
    %447 = tpu.matmul %446, %405, %cst_163 {dimension_numbers = #tpu.dot_dimension_numbers<[1], [0], [0], [1], [0, 0, 1, 1], [], []>} : vector<16x32xbf16>, vector<32x32xbf16>, vector<16x32xf32> -> vector<16x32xf32>
    %448 = vector.broadcast %407 : vector<1x32xf32> to vector<16x32xf32>
    %449 = arith.addf %447, %448 : vector<16x32xf32>
    %450 = arith.addf %449, %390 : vector<16x32xf32>
    %c0_164 = arith.constant 0 : index
    %c0_165 = arith.constant 0 : index
    %c0_166 = arith.constant 0 : index
    %451 = vector.load %arg26[%c0_164, %c0_165, %c0_166] : memref<2x1x32xf32, #tpu.memory_space<vmem>>, vector<1x1x32xf32>
    %452 = vector.shape_cast %451 : vector<1x1x32xf32> to vector<1x32xf32>
    %c0_167 = arith.constant 0 : index
    %c0_168 = arith.constant 0 : index
    %c0_169 = arith.constant 0 : index
    %453 = vector.load %arg27[%c0_167, %c0_168, %c0_169] : memref<2x1x32xf32, #tpu.memory_space<vmem>>, vector<1x1x32xf32>
    %454 = vector.shape_cast %453 : vector<1x1x32xf32> to vector<1x32xf32>
    %cst_170 = arith.constant dense<0.000000e+00> : vector<16xf32>
    %455 = vector.multi_reduction <add>, %450, %cst_170 [1] : vector<16x32xf32> to vector<16xf32>
    %456 = vector.shape_cast %455 : vector<16xf32> to vector<16x1xf32>
    %cst_171 = arith.constant 3.200000e+01 : f32
    %457 = vector.broadcast %cst_171 : f32 to vector<16x1xf32>
    %458 = arith.divf %456, %457 : vector<16x1xf32>
    %459 = vector.broadcast %458 : vector<16x1xf32> to vector<16x32xf32>
    %460 = arith.subf %450, %459 : vector<16x32xf32>
    %461 = arith.mulf %460, %460 : vector<16x32xf32>
    %cst_172 = arith.constant dense<0.000000e+00> : vector<16xf32>
    %462 = vector.multi_reduction <add>, %461, %cst_172 [1] : vector<16x32xf32> to vector<16xf32>
    %463 = vector.shape_cast %462 : vector<16xf32> to vector<16x1xf32>
    %cst_173 = arith.constant 3.200000e+01 : f32
    %464 = vector.broadcast %cst_173 : f32 to vector<16x1xf32>
    %465 = arith.divf %463, %464 : vector<16x1xf32>
    %466 = vector.broadcast %458 : vector<16x1xf32> to vector<16x32xf32>
    %467 = arith.subf %450, %466 : vector<16x32xf32>
    %cst_174 = arith.constant 9.99999974E-6 : f32
    %468 = vector.broadcast %cst_174 : f32 to vector<16x1xf32>
    %469 = arith.addf %465, %468 : vector<16x1xf32>
    %470 = math.rsqrt %469 : vector<16x1xf32>
    %471 = vector.broadcast %470 : vector<16x1xf32> to vector<16x32xf32>
    %472 = arith.mulf %467, %471 : vector<16x32xf32>
    %473 = vector.broadcast %452 : vector<1x32xf32> to vector<16x32xf32>
    %474 = arith.mulf %472, %473 : vector<16x32xf32>
    %475 = vector.broadcast %454 : vector<1x32xf32> to vector<16x32xf32>
    %476 = arith.addf %474, %475 : vector<16x32xf32>
    %c0_175 = arith.constant 0 : index
    %c0_176 = arith.constant 0 : index
    %c0_177 = arith.constant 0 : index
    %477 = vector.load %arg30[%c0_175, %c0_176, %c0_177] : memref<2x32x128xbf16, #tpu.memory_space<vmem>>, vector<1x32x128xbf16>
    %478 = vector.shape_cast %477 : vector<1x32x128xbf16> to vector<32x128xbf16>
    %c0_178 = arith.constant 0 : index
    %c0_179 = arith.constant 0 : index
    %c0_180 = arith.constant 0 : index
    %479 = vector.load %arg31[%c0_178, %c0_179, %c0_180] : memref<2x1x128xf32, #tpu.memory_space<vmem>>, vector<1x1x128xf32>
    %480 = vector.shape_cast %479 : vector<1x1x128xf32> to vector<1x128xf32>
    %c0_181 = arith.constant 0 : index
    %c0_182 = arith.constant 0 : index
    %c0_183 = arith.constant 0 : index
    %481 = vector.load %arg32[%c0_181, %c0_182, %c0_183] : memref<2x128x32xbf16, #tpu.memory_space<vmem>>, vector<1x128x32xbf16>
    %482 = vector.shape_cast %481 : vector<1x128x32xbf16> to vector<128x32xbf16>
    %c0_184 = arith.constant 0 : index
    %c0_185 = arith.constant 0 : index
    %c0_186 = arith.constant 0 : index
    %483 = vector.load %arg33[%c0_184, %c0_185, %c0_186] : memref<2x1x32xf32, #tpu.memory_space<vmem>>, vector<1x1x32xf32>
    %484 = vector.shape_cast %483 : vector<1x1x32xf32> to vector<1x32xf32>
    %485 = arith.truncf %476 : vector<16x32xf32> to vector<16x32xbf16>
    %cst_187 = arith.constant dense<0.000000e+00> : vector<16x128xf32>
    %486 = tpu.matmul %485, %478, %cst_187 {dimension_numbers = #tpu.dot_dimension_numbers<[1], [0], [0], [1], [0, 0, 1, 1], [], []>} : vector<16x32xbf16>, vector<32x128xbf16>, vector<16x128xf32> -> vector<16x128xf32>
    %487 = vector.broadcast %480 : vector<1x128xf32> to vector<16x128xf32>
    %488 = arith.addf %486, %487 : vector<16x128xf32>
    %cst_188 = arith.constant 0.000000e+00 : f32
    %489 = vector.broadcast %cst_188 : f32 to vector<16x128xf32>
    %490 = arith.maximumf %488, %489 : vector<16x128xf32>
    %491 = arith.truncf %490 : vector<16x128xf32> to vector<16x128xbf16>
    %cst_189 = arith.constant dense<0.000000e+00> : vector<16x32xf32>
    %492 = tpu.matmul %491, %482, %cst_189 {dimension_numbers = #tpu.dot_dimension_numbers<[1], [0], [0], [1], [0, 0, 1, 1], [], []>} : vector<16x128xbf16>, vector<128x32xbf16>, vector<16x32xf32> -> vector<16x32xf32>
    %493 = vector.broadcast %484 : vector<1x32xf32> to vector<16x32xf32>
    %494 = arith.addf %492, %493 : vector<16x32xf32>
    %495 = arith.addf %494, %476 : vector<16x32xf32>
    %c0_190 = arith.constant 0 : index
    %c0_191 = arith.constant 0 : index
    %c0_192 = arith.constant 0 : index
    %496 = vector.load %arg28[%c0_190, %c0_191, %c0_192] : memref<2x1x32xf32, #tpu.memory_space<vmem>>, vector<1x1x32xf32>
    %497 = vector.shape_cast %496 : vector<1x1x32xf32> to vector<1x32xf32>
    %c0_193 = arith.constant 0 : index
    %c0_194 = arith.constant 0 : index
    %c0_195 = arith.constant 0 : index
    %498 = vector.load %arg29[%c0_193, %c0_194, %c0_195] : memref<2x1x32xf32, #tpu.memory_space<vmem>>, vector<1x1x32xf32>
    %499 = vector.shape_cast %498 : vector<1x1x32xf32> to vector<1x32xf32>
    %cst_196 = arith.constant dense<0.000000e+00> : vector<16xf32>
    %500 = vector.multi_reduction <add>, %495, %cst_196 [1] : vector<16x32xf32> to vector<16xf32>
    %501 = vector.shape_cast %500 : vector<16xf32> to vector<16x1xf32>
    %cst_197 = arith.constant 3.200000e+01 : f32
    %502 = vector.broadcast %cst_197 : f32 to vector<16x1xf32>
    %503 = arith.divf %501, %502 : vector<16x1xf32>
    %504 = vector.broadcast %503 : vector<16x1xf32> to vector<16x32xf32>
    %505 = arith.subf %495, %504 : vector<16x32xf32>
    %506 = arith.mulf %505, %505 : vector<16x32xf32>
    %cst_198 = arith.constant dense<0.000000e+00> : vector<16xf32>
    %507 = vector.multi_reduction <add>, %506, %cst_198 [1] : vector<16x32xf32> to vector<16xf32>
    %508 = vector.shape_cast %507 : vector<16xf32> to vector<16x1xf32>
    %cst_199 = arith.constant 3.200000e+01 : f32
    %509 = vector.broadcast %cst_199 : f32 to vector<16x1xf32>
    %510 = arith.divf %508, %509 : vector<16x1xf32>
    %511 = vector.broadcast %503 : vector<16x1xf32> to vector<16x32xf32>
    %512 = arith.subf %495, %511 : vector<16x32xf32>
    %cst_200 = arith.constant 9.99999974E-6 : f32
    %513 = vector.broadcast %cst_200 : f32 to vector<16x1xf32>
    %514 = arith.addf %510, %513 : vector<16x1xf32>
    %515 = math.rsqrt %514 : vector<16x1xf32>
    %516 = vector.broadcast %515 : vector<16x1xf32> to vector<16x32xf32>
    %517 = arith.mulf %512, %516 : vector<16x32xf32>
    %518 = vector.broadcast %497 : vector<1x32xf32> to vector<16x32xf32>
    %519 = arith.mulf %517, %518 : vector<16x32xf32>
    %520 = vector.broadcast %499 : vector<1x32xf32> to vector<16x32xf32>
    %521 = arith.addf %519, %520 : vector<16x32xf32>
    %522 = arith.truncf %521 : vector<16x32xf32> to vector<16x32xbf16>
    %c1_201 = arith.constant 1 : index
    %c0_202 = arith.constant 0 : index
    %c0_203 = arith.constant 0 : index
    %523 = vector.load %arg17[%c1_201, %c0_202, %c0_203] : memref<2x32x96xbf16, #tpu.memory_space<vmem>>, vector<1x32x96xbf16>
    %524 = vector.shape_cast %523 : vector<1x32x96xbf16> to vector<32x96xbf16>
    %cst_204 = arith.constant dense<0.000000e+00> : vector<16x96xf32>
    %525 = tpu.matmul %522, %524, %cst_204 {dimension_numbers = #tpu.dot_dimension_numbers<[1], [0], [0], [1], [0, 0, 1, 1], [], []>} : vector<16x32xbf16>, vector<32x96xbf16>, vector<16x96xf32> -> vector<16x96xf32>
    %526 = vector.extract_strided_slice %525 {offsets = [0, 0], sizes = [16, 32], strides = [1, 1]} : vector<16x96xf32> to vector<16x32xf32>
    %527 = vector.shape_cast %526 : vector<16x32xf32> to vector<2x8x32xf32>
    %528 = vector.extract_strided_slice %525 {offsets = [0, 32], sizes = [16, 32], strides = [1, 1]} : vector<16x96xf32> to vector<16x32xf32>
    %529 = vector.shape_cast %528 : vector<16x32xf32> to vector<2x8x32xf32>
    %530 = vector.extract_strided_slice %525 {offsets = [0, 64], sizes = [16, 32], strides = [1, 1]} : vector<16x96xf32> to vector<16x32xf32>
    %531 = vector.shape_cast %530 : vector<16x32xf32> to vector<2x8x32xf32>
    %c1_205 = arith.constant 1 : index
    %c0_206 = arith.constant 0 : index
    %c0_207 = arith.constant 0 : index
    %532 = vector.load %arg18[%c1_205, %c0_206, %c0_207] : memref<2x32x32xbf16, #tpu.memory_space<vmem>>, vector<1x32x32xbf16>
    %533 = vector.shape_cast %532 : vector<1x32x32xbf16> to vector<32x32xbf16>
    %c1_208 = arith.constant 1 : index
    %c0_209 = arith.constant 0 : index
    %c0_210 = arith.constant 0 : index
    %534 = vector.load %arg19[%c1_208, %c0_209, %c0_210] : memref<2x1x32xf32, #tpu.memory_space<vmem>>, vector<1x1x32xf32>
    %535 = vector.shape_cast %534 : vector<1x1x32xf32> to vector<1x32xf32>
    %536 = vector.extract_strided_slice %527 {offsets = [0, 0, 0], sizes = [2, 8, 8], strides = [1, 1, 1]} : vector<2x8x32xf32> to vector<2x8x8xf32>
    %537 = vector.extract_strided_slice %527 {offsets = [0, 0, 8], sizes = [2, 8, 8], strides = [1, 1, 1]} : vector<2x8x32xf32> to vector<2x8x8xf32>
    %538 = vector.extract_strided_slice %527 {offsets = [0, 0, 16], sizes = [2, 8, 8], strides = [1, 1, 1]} : vector<2x8x32xf32> to vector<2x8x8xf32>
    %539 = vector.extract_strided_slice %527 {offsets = [0, 0, 24], sizes = [2, 8, 8], strides = [1, 1, 1]} : vector<2x8x32xf32> to vector<2x8x8xf32>
    %540 = tpu.concatenate %536, %537, %538, %539 in 0 : vector<2x8x8xf32>, vector<2x8x8xf32>, vector<2x8x8xf32>, vector<2x8x8xf32> -> vector<8x8x8xf32>
    %541 = arith.truncf %540 : vector<8x8x8xf32> to vector<8x8x8xbf16>
    %542 = vector.extract_strided_slice %529 {offsets = [0, 0, 0], sizes = [2, 8, 8], strides = [1, 1, 1]} : vector<2x8x32xf32> to vector<2x8x8xf32>
    %543 = vector.extract_strided_slice %529 {offsets = [0, 0, 8], sizes = [2, 8, 8], strides = [1, 1, 1]} : vector<2x8x32xf32> to vector<2x8x8xf32>
    %544 = vector.extract_strided_slice %529 {offsets = [0, 0, 16], sizes = [2, 8, 8], strides = [1, 1, 1]} : vector<2x8x32xf32> to vector<2x8x8xf32>
    %545 = vector.extract_strided_slice %529 {offsets = [0, 0, 24], sizes = [2, 8, 8], strides = [1, 1, 1]} : vector<2x8x32xf32> to vector<2x8x8xf32>
    %546 = tpu.concatenate %542, %543, %544, %545 in 0 : vector<2x8x8xf32>, vector<2x8x8xf32>, vector<2x8x8xf32>, vector<2x8x8xf32> -> vector<8x8x8xf32>
    %547 = arith.truncf %546 : vector<8x8x8xf32> to vector<8x8x8xbf16>
    %548 = vector.extract_strided_slice %531 {offsets = [0, 0, 0], sizes = [2, 8, 8], strides = [1, 1, 1]} : vector<2x8x32xf32> to vector<2x8x8xf32>
    %549 = vector.extract_strided_slice %531 {offsets = [0, 0, 8], sizes = [2, 8, 8], strides = [1, 1, 1]} : vector<2x8x32xf32> to vector<2x8x8xf32>
    %550 = vector.extract_strided_slice %531 {offsets = [0, 0, 16], sizes = [2, 8, 8], strides = [1, 1, 1]} : vector<2x8x32xf32> to vector<2x8x8xf32>
    %551 = vector.extract_strided_slice %531 {offsets = [0, 0, 24], sizes = [2, 8, 8], strides = [1, 1, 1]} : vector<2x8x32xf32> to vector<2x8x8xf32>
    %552 = tpu.concatenate %548, %549, %550, %551 in 0 : vector<2x8x8xf32>, vector<2x8x8xf32>, vector<2x8x8xf32>, vector<2x8x8xf32> -> vector<8x8x8xf32>
    %553 = arith.truncf %552 : vector<8x8x8xf32> to vector<8x8x8xbf16>
    "tpu.trace_start"() <{level = 10 : i32, message = "bqd,bkd->bqk"}> : () -> ()
    %cst_211 = arith.constant dense<0.000000e+00> : vector<8x8x8xf32>
    %554 = tpu.matmul %541, %547, %cst_211 {dimension_numbers = #tpu.dot_dimension_numbers<[2], [2], [1], [1], [0, 0, 0, 1, 1, 1], [0], [0]>} : vector<8x8x8xbf16>, vector<8x8x8xbf16>, vector<8x8x8xf32> -> vector<8x8x8xf32>
    "tpu.trace_stop"() : () -> ()
    %555 = arith.addf %554, %51 : vector<8x8x8xf32>
    %cst_212 = arith.constant dense<0xFF800000> : vector<8x8xf32>
    %556 = vector.multi_reduction <maximumf>, %555, %cst_212 [2] : vector<8x8x8xf32> to vector<8x8xf32>
    %557 = vector.shape_cast %556 : vector<8x8xf32> to vector<8x8x1xf32>
    %558 = vector.broadcast %557 : vector<8x8x1xf32> to vector<8x8x8xf32>
    %559 = arith.subf %555, %558 : vector<8x8x8xf32>
    %560 = math.exp %559 : vector<8x8x8xf32>
    %cst_213 = arith.constant dense<0.000000e+00> : vector<8x8xf32>
    %561 = vector.multi_reduction <add>, %560, %cst_213 [2] : vector<8x8x8xf32> to vector<8x8xf32>
    %562 = vector.shape_cast %561 : vector<8x8xf32> to vector<8x8x1xf32>
    %563 = tpu.reciprocal %562 {approx = true} : vector<8x8x1xf32> -> vector<8x8x1xf32>
    %564 = vector.broadcast %563 : vector<8x8x1xf32> to vector<8x8x8xf32>
    %565 = arith.mulf %560, %564 : vector<8x8x8xf32>
    %566 = arith.truncf %565 : vector<8x8x8xf32> to vector<8x8x8xbf16>
    "tpu.trace_start"() <{level = 10 : i32, message = "bqk,bkd->bqd"}> : () -> ()
    %cst_214 = arith.constant dense<0.000000e+00> : vector<8x8x8xf32>
    %567 = tpu.matmul %566, %553, %cst_214 {dimension_numbers = #tpu.dot_dimension_numbers<[2], [1], [1], [2], [0, 0, 0, 1, 1, 2], [0], [0]>} : vector<8x8x8xbf16>, vector<8x8x8xbf16>, vector<8x8x8xf32> -> vector<8x8x8xf32>
    "tpu.trace_stop"() : () -> ()
    %568 = vector.extract_strided_slice %567 {offsets = [0, 0, 0], sizes = [2, 8, 8], strides = [1, 1, 1]} : vector<8x8x8xf32> to vector<2x8x8xf32>
    %569 = vector.extract_strided_slice %567 {offsets = [2, 0, 0], sizes = [2, 8, 8], strides = [1, 1, 1]} : vector<8x8x8xf32> to vector<2x8x8xf32>
    %570 = vector.extract_strided_slice %567 {offsets = [4, 0, 0], sizes = [2, 8, 8], strides = [1, 1, 1]} : vector<8x8x8xf32> to vector<2x8x8xf32>
    %571 = vector.extract_strided_slice %567 {offsets = [6, 0, 0], sizes = [2, 8, 8], strides = [1, 1, 1]} : vector<8x8x8xf32> to vector<2x8x8xf32>
    %572 = tpu.concatenate %568, %569, %570, %571 in 2 : vector<2x8x8xf32>, vector<2x8x8xf32>, vector<2x8x8xf32>, vector<2x8x8xf32> -> vector<2x8x32xf32>
    %573 = vector.shape_cast %572 : vector<2x8x32xf32> to vector<16x32xf32>
    %574 = arith.truncf %573 : vector<16x32xf32> to vector<16x32xbf16>
    %cst_215 = arith.constant dense<0.000000e+00> : vector<16x32xf32>
    %575 = tpu.matmul %574, %533, %cst_215 {dimension_numbers = #tpu.dot_dimension_numbers<[1], [0], [0], [1], [0, 0, 1, 1], [], []>} : vector<16x32xbf16>, vector<32x32xbf16>, vector<16x32xf32> -> vector<16x32xf32>
    %576 = vector.broadcast %535 : vector<1x32xf32> to vector<16x32xf32>
    %577 = arith.addf %575, %576 : vector<16x32xf32>
    %578 = arith.addf %521, %577 : vector<16x32xf32>
    %c1_216 = arith.constant 1 : index
    %c0_217 = arith.constant 0 : index
    %c0_218 = arith.constant 0 : index
    %579 = vector.load %arg20[%c1_216, %c0_217, %c0_218] : memref<2x1x32xf32, #tpu.memory_space<vmem>>, vector<1x1x32xf32>
    %580 = vector.shape_cast %579 : vector<1x1x32xf32> to vector<1x32xf32>
    %c1_219 = arith.constant 1 : index
    %c0_220 = arith.constant 0 : index
    %c0_221 = arith.constant 0 : index
    %581 = vector.load %arg21[%c1_219, %c0_220, %c0_221] : memref<2x1x32xf32, #tpu.memory_space<vmem>>, vector<1x1x32xf32>
    %582 = vector.shape_cast %581 : vector<1x1x32xf32> to vector<1x32xf32>
    %cst_222 = arith.constant dense<0.000000e+00> : vector<16xf32>
    %583 = vector.multi_reduction <add>, %578, %cst_222 [1] : vector<16x32xf32> to vector<16xf32>
    %584 = vector.shape_cast %583 : vector<16xf32> to vector<16x1xf32>
    %cst_223 = arith.constant 3.200000e+01 : f32
    %585 = vector.broadcast %cst_223 : f32 to vector<16x1xf32>
    %586 = arith.divf %584, %585 : vector<16x1xf32>
    %587 = vector.broadcast %586 : vector<16x1xf32> to vector<16x32xf32>
    %588 = arith.subf %578, %587 : vector<16x32xf32>
    %589 = arith.mulf %588, %588 : vector<16x32xf32>
    %cst_224 = arith.constant dense<0.000000e+00> : vector<16xf32>
    %590 = vector.multi_reduction <add>, %589, %cst_224 [1] : vector<16x32xf32> to vector<16xf32>
    %591 = vector.shape_cast %590 : vector<16xf32> to vector<16x1xf32>
    %cst_225 = arith.constant 3.200000e+01 : f32
    %592 = vector.broadcast %cst_225 : f32 to vector<16x1xf32>
    %593 = arith.divf %591, %592 : vector<16x1xf32>
    %594 = vector.broadcast %586 : vector<16x1xf32> to vector<16x32xf32>
    %595 = arith.subf %578, %594 : vector<16x32xf32>
    %cst_226 = arith.constant 9.99999974E-6 : f32
    %596 = vector.broadcast %cst_226 : f32 to vector<16x1xf32>
    %597 = arith.addf %593, %596 : vector<16x1xf32>
    %598 = math.rsqrt %597 : vector<16x1xf32>
    %599 = vector.broadcast %598 : vector<16x1xf32> to vector<16x32xf32>
    %600 = arith.mulf %595, %599 : vector<16x32xf32>
    %601 = vector.broadcast %580 : vector<1x32xf32> to vector<16x32xf32>
    %602 = arith.mulf %600, %601 : vector<16x32xf32>
    %603 = vector.broadcast %582 : vector<1x32xf32> to vector<16x32xf32>
    %604 = arith.addf %602, %603 : vector<16x32xf32>
    %605 = arith.truncf %604 : vector<16x32xf32> to vector<16x32xbf16>
    %c1_227 = arith.constant 1 : index
    %c0_228 = arith.constant 0 : index
    %c0_229 = arith.constant 0 : index
    %606 = vector.load %arg22[%c1_227, %c0_228, %c0_229] : memref<2x32x32xbf16, #tpu.memory_space<vmem>>, vector<1x32x32xbf16>
    %607 = vector.shape_cast %606 : vector<1x32x32xbf16> to vector<32x32xbf16>
    %cst_230 = arith.constant dense<0.000000e+00> : vector<16x32xf32>
    %608 = tpu.matmul %605, %607, %cst_230 {dimension_numbers = #tpu.dot_dimension_numbers<[1], [0], [0], [1], [0, 0, 1, 1], [], []>} : vector<16x32xbf16>, vector<32x32xbf16>, vector<16x32xf32> -> vector<16x32xf32>
    %609 = vector.shape_cast %608 : vector<16x32xf32> to vector<2x8x32xf32>
    %610 = arith.truncf %307 : vector<16x32xf32> to vector<16x32xbf16>
    %c1_231 = arith.constant 1 : index
    %c0_232 = arith.constant 0 : index
    %c0_233 = arith.constant 0 : index
    %611 = vector.load %arg23[%c1_231, %c0_232, %c0_233] : memref<2x32x64xbf16, #tpu.memory_space<vmem>>, vector<1x32x64xbf16>
    %612 = vector.shape_cast %611 : vector<1x32x64xbf16> to vector<32x64xbf16>
    %cst_234 = arith.constant dense<0.000000e+00> : vector<16x64xf32>
    %613 = tpu.matmul %610, %612, %cst_234 {dimension_numbers = #tpu.dot_dimension_numbers<[1], [0], [0], [1], [0, 0, 1, 1], [], []>} : vector<16x32xbf16>, vector<32x64xbf16>, vector<16x64xf32> -> vector<16x64xf32>
    %614 = vector.extract_strided_slice %613 {offsets = [0, 0], sizes = [16, 32], strides = [1, 1]} : vector<16x64xf32> to vector<16x32xf32>
    %615 = vector.shape_cast %614 : vector<16x32xf32> to vector<2x8x32xf32>
    %616 = vector.extract_strided_slice %613 {offsets = [0, 32], sizes = [16, 32], strides = [1, 1]} : vector<16x64xf32> to vector<16x32xf32>
    %617 = vector.shape_cast %616 : vector<16x32xf32> to vector<2x8x32xf32>
    %c1_235 = arith.constant 1 : index
    %c0_236 = arith.constant 0 : index
    %c0_237 = arith.constant 0 : index
    %618 = vector.load %arg24[%c1_235, %c0_236, %c0_237] : memref<2x32x32xbf16, #tpu.memory_space<vmem>>, vector<1x32x32xbf16>
    %619 = vector.shape_cast %618 : vector<1x32x32xbf16> to vector<32x32xbf16>
    %c1_238 = arith.constant 1 : index
    %c0_239 = arith.constant 0 : index
    %c0_240 = arith.constant 0 : index
    %620 = vector.load %arg25[%c1_238, %c0_239, %c0_240] : memref<2x1x32xf32, #tpu.memory_space<vmem>>, vector<1x1x32xf32>
    %621 = vector.shape_cast %620 : vector<1x1x32xf32> to vector<1x32xf32>
    %622 = vector.extract_strided_slice %609 {offsets = [0, 0, 0], sizes = [2, 8, 8], strides = [1, 1, 1]} : vector<2x8x32xf32> to vector<2x8x8xf32>
    %623 = vector.extract_strided_slice %609 {offsets = [0, 0, 8], sizes = [2, 8, 8], strides = [1, 1, 1]} : vector<2x8x32xf32> to vector<2x8x8xf32>
    %624 = vector.extract_strided_slice %609 {offsets = [0, 0, 16], sizes = [2, 8, 8], strides = [1, 1, 1]} : vector<2x8x32xf32> to vector<2x8x8xf32>
    %625 = vector.extract_strided_slice %609 {offsets = [0, 0, 24], sizes = [2, 8, 8], strides = [1, 1, 1]} : vector<2x8x32xf32> to vector<2x8x8xf32>
    %626 = tpu.concatenate %622, %623, %624, %625 in 0 : vector<2x8x8xf32>, vector<2x8x8xf32>, vector<2x8x8xf32>, vector<2x8x8xf32> -> vector<8x8x8xf32>
    %627 = arith.truncf %626 : vector<8x8x8xf32> to vector<8x8x8xbf16>
    %628 = vector.extract_strided_slice %615 {offsets = [0, 0, 0], sizes = [2, 8, 8], strides = [1, 1, 1]} : vector<2x8x32xf32> to vector<2x8x8xf32>
    %629 = vector.extract_strided_slice %615 {offsets = [0, 0, 8], sizes = [2, 8, 8], strides = [1, 1, 1]} : vector<2x8x32xf32> to vector<2x8x8xf32>
    %630 = vector.extract_strided_slice %615 {offsets = [0, 0, 16], sizes = [2, 8, 8], strides = [1, 1, 1]} : vector<2x8x32xf32> to vector<2x8x8xf32>
    %631 = vector.extract_strided_slice %615 {offsets = [0, 0, 24], sizes = [2, 8, 8], strides = [1, 1, 1]} : vector<2x8x32xf32> to vector<2x8x8xf32>
    %632 = tpu.concatenate %628, %629, %630, %631 in 0 : vector<2x8x8xf32>, vector<2x8x8xf32>, vector<2x8x8xf32>, vector<2x8x8xf32> -> vector<8x8x8xf32>
    %633 = arith.truncf %632 : vector<8x8x8xf32> to vector<8x8x8xbf16>
    %634 = vector.extract_strided_slice %617 {offsets = [0, 0, 0], sizes = [2, 8, 8], strides = [1, 1, 1]} : vector<2x8x32xf32> to vector<2x8x8xf32>
    %635 = vector.extract_strided_slice %617 {offsets = [0, 0, 8], sizes = [2, 8, 8], strides = [1, 1, 1]} : vector<2x8x32xf32> to vector<2x8x8xf32>
    %636 = vector.extract_strided_slice %617 {offsets = [0, 0, 16], sizes = [2, 8, 8], strides = [1, 1, 1]} : vector<2x8x32xf32> to vector<2x8x8xf32>
    %637 = vector.extract_strided_slice %617 {offsets = [0, 0, 24], sizes = [2, 8, 8], strides = [1, 1, 1]} : vector<2x8x32xf32> to vector<2x8x8xf32>
    %638 = tpu.concatenate %634, %635, %636, %637 in 0 : vector<2x8x8xf32>, vector<2x8x8xf32>, vector<2x8x8xf32>, vector<2x8x8xf32> -> vector<8x8x8xf32>
    %639 = arith.truncf %638 : vector<8x8x8xf32> to vector<8x8x8xbf16>
    "tpu.trace_start"() <{level = 10 : i32, message = "bqd,bkd->bqk"}> : () -> ()
    %cst_241 = arith.constant dense<0.000000e+00> : vector<8x8x8xf32>
    %640 = tpu.matmul %627, %633, %cst_241 {dimension_numbers = #tpu.dot_dimension_numbers<[2], [2], [1], [1], [0, 0, 0, 1, 1, 1], [0], [0]>} : vector<8x8x8xbf16>, vector<8x8x8xbf16>, vector<8x8x8xf32> -> vector<8x8x8xf32>
    "tpu.trace_stop"() : () -> ()
    %641 = arith.addf %640, %42 : vector<8x8x8xf32>
    %cst_242 = arith.constant dense<0xFF800000> : vector<8x8xf32>
    %642 = vector.multi_reduction <maximumf>, %641, %cst_242 [2] : vector<8x8x8xf32> to vector<8x8xf32>
    %643 = vector.shape_cast %642 : vector<8x8xf32> to vector<8x8x1xf32>
    %644 = vector.broadcast %643 : vector<8x8x1xf32> to vector<8x8x8xf32>
    %645 = arith.subf %641, %644 : vector<8x8x8xf32>
    %646 = math.exp %645 : vector<8x8x8xf32>
    %cst_243 = arith.constant dense<0.000000e+00> : vector<8x8xf32>
    %647 = vector.multi_reduction <add>, %646, %cst_243 [2] : vector<8x8x8xf32> to vector<8x8xf32>
    %648 = vector.shape_cast %647 : vector<8x8xf32> to vector<8x8x1xf32>
    %649 = tpu.reciprocal %648 {approx = true} : vector<8x8x1xf32> -> vector<8x8x1xf32>
    %650 = vector.broadcast %649 : vector<8x8x1xf32> to vector<8x8x8xf32>
    %651 = arith.mulf %646, %650 : vector<8x8x8xf32>
    %652 = arith.truncf %651 : vector<8x8x8xf32> to vector<8x8x8xbf16>
    "tpu.trace_start"() <{level = 10 : i32, message = "bqk,bkd->bqd"}> : () -> ()
    %cst_244 = arith.constant dense<0.000000e+00> : vector<8x8x8xf32>
    %653 = tpu.matmul %652, %639, %cst_244 {dimension_numbers = #tpu.dot_dimension_numbers<[2], [1], [1], [2], [0, 0, 0, 1, 1, 2], [0], [0]>} : vector<8x8x8xbf16>, vector<8x8x8xbf16>, vector<8x8x8xf32> -> vector<8x8x8xf32>
    "tpu.trace_stop"() : () -> ()
    %654 = vector.extract_strided_slice %653 {offsets = [0, 0, 0], sizes = [2, 8, 8], strides = [1, 1, 1]} : vector<8x8x8xf32> to vector<2x8x8xf32>
    %655 = vector.extract_strided_slice %653 {offsets = [2, 0, 0], sizes = [2, 8, 8], strides = [1, 1, 1]} : vector<8x8x8xf32> to vector<2x8x8xf32>
    %656 = vector.extract_strided_slice %653 {offsets = [4, 0, 0], sizes = [2, 8, 8], strides = [1, 1, 1]} : vector<8x8x8xf32> to vector<2x8x8xf32>
    %657 = vector.extract_strided_slice %653 {offsets = [6, 0, 0], sizes = [2, 8, 8], strides = [1, 1, 1]} : vector<8x8x8xf32> to vector<2x8x8xf32>
    %658 = tpu.concatenate %654, %655, %656, %657 in 2 : vector<2x8x8xf32>, vector<2x8x8xf32>, vector<2x8x8xf32>, vector<2x8x8xf32> -> vector<2x8x32xf32>
    %659 = vector.shape_cast %658 : vector<2x8x32xf32> to vector<16x32xf32>
    %660 = arith.truncf %659 : vector<16x32xf32> to vector<16x32xbf16>
    %cst_245 = arith.constant dense<0.000000e+00> : vector<16x32xf32>
    %661 = tpu.matmul %660, %619, %cst_245 {dimension_numbers = #tpu.dot_dimension_numbers<[1], [0], [0], [1], [0, 0, 1, 1], [], []>} : vector<16x32xbf16>, vector<32x32xbf16>, vector<16x32xf32> -> vector<16x32xf32>
    %662 = vector.broadcast %621 : vector<1x32xf32> to vector<16x32xf32>
    %663 = arith.addf %661, %662 : vector<16x32xf32>
    %664 = arith.addf %663, %604 : vector<16x32xf32>
    %c1_246 = arith.constant 1 : index
    %c0_247 = arith.constant 0 : index
    %c0_248 = arith.constant 0 : index
    %665 = vector.load %arg26[%c1_246, %c0_247, %c0_248] : memref<2x1x32xf32, #tpu.memory_space<vmem>>, vector<1x1x32xf32>
    %666 = vector.shape_cast %665 : vector<1x1x32xf32> to vector<1x32xf32>
    %c1_249 = arith.constant 1 : index
    %c0_250 = arith.constant 0 : index
    %c0_251 = arith.constant 0 : index
    %667 = vector.load %arg27[%c1_249, %c0_250, %c0_251] : memref<2x1x32xf32, #tpu.memory_space<vmem>>, vector<1x1x32xf32>
    %668 = vector.shape_cast %667 : vector<1x1x32xf32> to vector<1x32xf32>
    %cst_252 = arith.constant dense<0.000000e+00> : vector<16xf32>
    %669 = vector.multi_reduction <add>, %664, %cst_252 [1] : vector<16x32xf32> to vector<16xf32>
    %670 = vector.shape_cast %669 : vector<16xf32> to vector<16x1xf32>
    %cst_253 = arith.constant 3.200000e+01 : f32
    %671 = vector.broadcast %cst_253 : f32 to vector<16x1xf32>
    %672 = arith.divf %670, %671 : vector<16x1xf32>
    %673 = vector.broadcast %672 : vector<16x1xf32> to vector<16x32xf32>
    %674 = arith.subf %664, %673 : vector<16x32xf32>
    %675 = arith.mulf %674, %674 : vector<16x32xf32>
    %cst_254 = arith.constant dense<0.000000e+00> : vector<16xf32>
    %676 = vector.multi_reduction <add>, %675, %cst_254 [1] : vector<16x32xf32> to vector<16xf32>
    %677 = vector.shape_cast %676 : vector<16xf32> to vector<16x1xf32>
    %cst_255 = arith.constant 3.200000e+01 : f32
    %678 = vector.broadcast %cst_255 : f32 to vector<16x1xf32>
    %679 = arith.divf %677, %678 : vector<16x1xf32>
    %680 = vector.broadcast %672 : vector<16x1xf32> to vector<16x32xf32>
    %681 = arith.subf %664, %680 : vector<16x32xf32>
    %cst_256 = arith.constant 9.99999974E-6 : f32
    %682 = vector.broadcast %cst_256 : f32 to vector<16x1xf32>
    %683 = arith.addf %679, %682 : vector<16x1xf32>
    %684 = math.rsqrt %683 : vector<16x1xf32>
    %685 = vector.broadcast %684 : vector<16x1xf32> to vector<16x32xf32>
    %686 = arith.mulf %681, %685 : vector<16x32xf32>
    %687 = vector.broadcast %666 : vector<1x32xf32> to vector<16x32xf32>
    %688 = arith.mulf %686, %687 : vector<16x32xf32>
    %689 = vector.broadcast %668 : vector<1x32xf32> to vector<16x32xf32>
    %690 = arith.addf %688, %689 : vector<16x32xf32>
    %c1_257 = arith.constant 1 : index
    %c0_258 = arith.constant 0 : index
    %c0_259 = arith.constant 0 : index
    %691 = vector.load %arg30[%c1_257, %c0_258, %c0_259] : memref<2x32x128xbf16, #tpu.memory_space<vmem>>, vector<1x32x128xbf16>
    %692 = vector.shape_cast %691 : vector<1x32x128xbf16> to vector<32x128xbf16>
    %c1_260 = arith.constant 1 : index
    %c0_261 = arith.constant 0 : index
    %c0_262 = arith.constant 0 : index
    %693 = vector.load %arg31[%c1_260, %c0_261, %c0_262] : memref<2x1x128xf32, #tpu.memory_space<vmem>>, vector<1x1x128xf32>
    %694 = vector.shape_cast %693 : vector<1x1x128xf32> to vector<1x128xf32>
    %c1_263 = arith.constant 1 : index
    %c0_264 = arith.constant 0 : index
    %c0_265 = arith.constant 0 : index
    %695 = vector.load %arg32[%c1_263, %c0_264, %c0_265] : memref<2x128x32xbf16, #tpu.memory_space<vmem>>, vector<1x128x32xbf16>
    %696 = vector.shape_cast %695 : vector<1x128x32xbf16> to vector<128x32xbf16>
    %c1_266 = arith.constant 1 : index
    %c0_267 = arith.constant 0 : index
    %c0_268 = arith.constant 0 : index
    %697 = vector.load %arg33[%c1_266, %c0_267, %c0_268] : memref<2x1x32xf32, #tpu.memory_space<vmem>>, vector<1x1x32xf32>
    %698 = vector.shape_cast %697 : vector<1x1x32xf32> to vector<1x32xf32>
    %699 = arith.truncf %690 : vector<16x32xf32> to vector<16x32xbf16>
    %cst_269 = arith.constant dense<0.000000e+00> : vector<16x128xf32>
    %700 = tpu.matmul %699, %692, %cst_269 {dimension_numbers = #tpu.dot_dimension_numbers<[1], [0], [0], [1], [0, 0, 1, 1], [], []>} : vector<16x32xbf16>, vector<32x128xbf16>, vector<16x128xf32> -> vector<16x128xf32>
    %701 = vector.broadcast %694 : vector<1x128xf32> to vector<16x128xf32>
    %702 = arith.addf %700, %701 : vector<16x128xf32>
    %cst_270 = arith.constant 0.000000e+00 : f32
    %703 = vector.broadcast %cst_270 : f32 to vector<16x128xf32>
    %704 = arith.maximumf %702, %703 : vector<16x128xf32>
    %705 = arith.truncf %704 : vector<16x128xf32> to vector<16x128xbf16>
    %cst_271 = arith.constant dense<0.000000e+00> : vector<16x32xf32>
    %706 = tpu.matmul %705, %696, %cst_271 {dimension_numbers = #tpu.dot_dimension_numbers<[1], [0], [0], [1], [0, 0, 1, 1], [], []>} : vector<16x128xbf16>, vector<128x32xbf16>, vector<16x32xf32> -> vector<16x32xf32>
    %707 = vector.broadcast %698 : vector<1x32xf32> to vector<16x32xf32>
    %708 = arith.addf %706, %707 : vector<16x32xf32>
    %709 = arith.addf %708, %690 : vector<16x32xf32>
    %c1_272 = arith.constant 1 : index
    %c0_273 = arith.constant 0 : index
    %c0_274 = arith.constant 0 : index
    %710 = vector.load %arg28[%c1_272, %c0_273, %c0_274] : memref<2x1x32xf32, #tpu.memory_space<vmem>>, vector<1x1x32xf32>
    %711 = vector.shape_cast %710 : vector<1x1x32xf32> to vector<1x32xf32>
    %c1_275 = arith.constant 1 : index
    %c0_276 = arith.constant 0 : index
    %c0_277 = arith.constant 0 : index
    %712 = vector.load %arg29[%c1_275, %c0_276, %c0_277] : memref<2x1x32xf32, #tpu.memory_space<vmem>>, vector<1x1x32xf32>
    %713 = vector.shape_cast %712 : vector<1x1x32xf32> to vector<1x32xf32>
    %cst_278 = arith.constant dense<0.000000e+00> : vector<16xf32>
    %714 = vector.multi_reduction <add>, %709, %cst_278 [1] : vector<16x32xf32> to vector<16xf32>
    %715 = vector.shape_cast %714 : vector<16xf32> to vector<16x1xf32>
    %cst_279 = arith.constant 3.200000e+01 : f32
    %716 = vector.broadcast %cst_279 : f32 to vector<16x1xf32>
    %717 = arith.divf %715, %716 : vector<16x1xf32>
    %718 = vector.broadcast %717 : vector<16x1xf32> to vector<16x32xf32>
    %719 = arith.subf %709, %718 : vector<16x32xf32>
    %720 = arith.mulf %719, %719 : vector<16x32xf32>
    %cst_280 = arith.constant dense<0.000000e+00> : vector<16xf32>
    %721 = vector.multi_reduction <add>, %720, %cst_280 [1] : vector<16x32xf32> to vector<16xf32>
    %722 = vector.shape_cast %721 : vector<16xf32> to vector<16x1xf32>
    %cst_281 = arith.constant 3.200000e+01 : f32
    %723 = vector.broadcast %cst_281 : f32 to vector<16x1xf32>
    %724 = arith.divf %722, %723 : vector<16x1xf32>
    %725 = vector.broadcast %717 : vector<16x1xf32> to vector<16x32xf32>
    %726 = arith.subf %709, %725 : vector<16x32xf32>
    %cst_282 = arith.constant 9.99999974E-6 : f32
    %727 = vector.broadcast %cst_282 : f32 to vector<16x1xf32>
    %728 = arith.addf %724, %727 : vector<16x1xf32>
    %729 = math.rsqrt %728 : vector<16x1xf32>
    %730 = vector.broadcast %729 : vector<16x1xf32> to vector<16x32xf32>
    %731 = arith.mulf %726, %730 : vector<16x32xf32>
    %732 = vector.broadcast %711 : vector<1x32xf32> to vector<16x32xf32>
    %733 = arith.mulf %731, %732 : vector<16x32xf32>
    %734 = vector.broadcast %713 : vector<1x32xf32> to vector<16x32xf32>
    %735 = arith.addf %733, %734 : vector<16x32xf32>
    %736 = arith.truncf %735 : vector<16x32xf32> to vector<16x32xbf16>
    %c0_283 = arith.constant 0 : index
    %c0_284 = arith.constant 0 : index
    %737 = vector.load %arg34[%c0_283, %c0_284] : memref<32x128xbf16, #tpu.memory_space<vmem>>, vector<32x128xbf16>
    %cst_285 = arith.constant dense<0.000000e+00> : vector<16x128xf32>
    %738 = tpu.matmul %736, %737, %cst_285 {dimension_numbers = #tpu.dot_dimension_numbers<[1], [0], [0], [1], [0, 0, 1, 1], [], []>} : vector<16x32xbf16>, vector<32x128xbf16>, vector<16x128xf32> -> vector<16x128xf32>
    %c0_286 = arith.constant 0 : index
    %c0_287 = arith.constant 0 : index
    %739 = vector.load %arg35[%c0_286, %c0_287] : memref<1x128xf32, #tpu.memory_space<vmem>>, vector<1x128xf32>
    %740 = vector.broadcast %739 : vector<1x128xf32> to vector<16x128xf32>
    %741 = arith.addf %738, %740 : vector<16x128xf32>
    %cst_288 = arith.constant 0.000000e+00 : f32
    %742 = vector.broadcast %cst_288 : f32 to vector<16x128xf32>
    %743 = arith.subf %742, %741 : vector<16x128xf32>
    %744 = math.exp %743 : vector<16x128xf32>
    %cst_289 = arith.constant 1.000000e+00 : f32
    %745 = vector.broadcast %cst_289 : f32 to vector<16x128xf32>
    %746 = arith.addf %745, %744 : vector<16x128xf32>
    %747 = tpu.reciprocal %746 {approx = true} : vector<16x128xf32> -> vector<16x128xf32>
    %748 = vector.shape_cast %747 : vector<16x128xf32> to vector<2x8x128xf32>
    %c0_290 = arith.constant 0 : index
    %c0_291 = arith.constant 0 : index
    %c0_292 = arith.constant 0 : index
    %749 = vector.load %arg36[%c0_290, %c0_291, %c0_292] : memref<2x8x128xf32, #tpu.memory_space<vmem>>, vector<2x8x128xf32>
    tpu.vector_store %arg36[%c0_290, %c0_291, %c0_292], %748 {strides = array<i32>} : memref<2x8x128xf32, #tpu.memory_space<vmem>>, vector<2x8x128xf32>,
    return
  }
}

</mosaic_0001>

<bundles_post_ra>
// kernel: transformer_forward.1
= control target key start
LH: loop header
LB: loop body
LE: loop exit
PB: predicated region body
PF: predicated region fallthrough
CT: control target
= control target key end

     0   :  { %s10360_s6 = smov 1   ;;  %s10361_s10 = smov 2   ;;  %s12210_s0 = inlined_call_operand.smem [shape: u32[37], index: -1, kind: input, shape index: {}] }
   0x1   :  { %s10418_s5 = sld [smem:[%s12210_s0]]   ;;  %s10362_s14 = smov 3  }
   0x2   :  { %s10423_s9 = sld [smem:[%s12210_s0 + %s10360_s6]]   ;;  %s10363_s18 = smov 4  }
   0x3   :  { %s10428_s13 = sld [smem:[%s12210_s0 + %s10361_s10]]   ;;  %s10364_s22 = smov 5  }
   0x4   :  { %s10433_s17 = sld [smem:[%s12210_s0 + %s10362_s14]]   ;;  %s10365_s26 = smov 6  }
   0x5   :  { %s10438_s21 = sld [smem:[%s12210_s0 + %s10363_s18]]   ;;  %s10366_s30 = smov 7  }
   0x6   :  { %s10443_s25 = sld [smem:[%s12210_s0 + %s10364_s22]]   ;;  %s10367_s4 = smov 8  }
   0x7   :  { %s10448_s29 = sld [smem:[%s12210_s0 + %s10365_s26]]   ;;  %s10368_s10 = smov 9  }
   0x8   :  { %s10453_s3 = sld [smem:[%s12210_s0 + %s10366_s30]]   ;;  %s10369_s15 = smov 10  }
   0x9   :  { %s10458_s8 = sld [smem:[%s12210_s0 + %s10367_s4]]   ;;  %s10370_s20 = smov 11  }
   0xa   :  { %s10463_s14 = sld [smem:[%s12210_s0 + %s10368_s10]]   ;;  %s10371_s26 = smov 12  }
   0xb   :  { %s10468_s19 = sld [smem:[%s12210_s0 + %s10369_s15]]   ;;  %s10372_s1 = smov 13  }
   0xc   :  { %12229 = sst [smem:[#allocation5_spill]] %s10443_s25  ;;  %s10373_s7 = smov 14  }
   0xd   :  { %s10473_s24 = sld [smem:[%s12210_s0 + %s10370_s20]]   ;;  %s10374_s15 = smov 15  }
   0xe   :  { %s10478_s30 = sld [smem:[%s12210_s0 + %s10371_s26]]   ;;  %s10375_s22 = smov 16  }
   0xf   :  { %s10483_s6 = sld [smem:[%s12210_s0 + %s10372_s1]]   ;;  %s10376_s28 = smov 17  }
  0x10   :  { %s10488_s12 = sld [smem:[%s12210_s0 + %s10373_s7]]   ;;  %s10377_s7 = smov 18  }
  0x11   :  { %s10493_s20 = sld [smem:[%s12210_s0 + %s10374_s15]]   ;;  %s10378_s15 = smov 19  }
  0x12   :  { %s10498_s27 = sld [smem:[%s12210_s0 + %s10375_s22]]   ;;  %s10379_s22 = smov 20  }
  0x13   :  { %12230 = sst [smem:[#allocation6_spill]] %s10473_s24 }
  0x14   :  { %12231 = sst [smem:[#allocation7_spill]] %s10478_s30 }
  0x15   :  { %s10503_s4 = sld [smem:[%s12210_s0 + %s10376_s28]]   ;;  %s10380_s28 = smov 21  }
  0x16   :  { %s10508_s25 = sld [smem:[%s12210_s0 + %s10377_s7]]   ;;  %s10381_s7 = smov 22  }
  0x17   :  { %s10513_s30 = sld [smem:[%s12210_s0 + %s10378_s15]]   ;;  %s10382_s15 = smov 23  }
  0x18   :  { %s10518_s24 = sld [smem:[%s12210_s0 + %s10379_s22]]   ;;  %s10383_s22 = smov 24  }
  0x1b   :  { %12232 = sst [smem:[#allocation8_spill]] %s10503_s4 }
  0x1c   :  { %12233 = sst [smem:[#allocation9_spill]] %s10508_s25 }
  0x1d   :  { %12234 = sst [smem:[#allocation10_spill]] %s10513_s30 }
  0x1e   :  { %12235 = sst [smem:[#allocation11_spill]] %s10518_s24 }
  0x1f   :  { %s10523_s4 = sld [smem:[%s12210_s0 + %s10380_s28]]   ;;  %s10384_s28 = smov 25  }
  0x20   :  { %s10528_s25 = sld [smem:[%s12210_s0 + %s10381_s7]]   ;;  %s10385_s7 = smov 26  }
  0x21   :  { %s10533_s30 = sld [smem:[%s12210_s0 + %s10382_s15]]   ;;  %s10386_s15 = smov 27  }
  0x22   :  { %s10538_s24 = sld [smem:[%s12210_s0 + %s10383_s22]]   ;;  %s10387_s22 = smov 28  }
  0x25   :  { %12236 = sst [smem:[#allocation12_spill]] %s10523_s4 }
  0x26   :  { %12237 = sst [smem:[#allocation13_spill]] %s10528_s25 }
  0x27   :  { %12238 = sst [smem:[#allocation14_spill]] %s10533_s30 }
  0x28   :  { %12239 = sst [smem:[#allocation15_spill]] %s10538_s24 }
  0x29   :  { %s10543_s4 = sld [smem:[%s12210_s0 + %s10384_s28]]   ;;  %s10388_s28 = smov 29  }
  0x2a   :  { %s10548_s25 = sld [smem:[%s12210_s0 + %s10385_s7]]   ;;  %s10389_s7 = smov 30  }
  0x2b   :  { %s10553_s30 = sld [smem:[%s12210_s0 + %s10386_s15]]   ;;  %s10390_s15 = smov 31  }
  0x2c   :  { %s10558_s24 = sld [smem:[%s12210_s0 + %s10387_s22]]   ;;  %s10391_s22 = smov 32  }
  0x2f   :  { %12240 = sst [smem:[#allocation16_spill]] %s10543_s4 }
  0x30   :  { %12241 = sst [smem:[#allocation17_spill]] %s10548_s25 }
  0x31   :  { %12242 = sst [smem:[#allocation18_spill]] %s10553_s30 }
  0x32   :  { %12243 = sst [smem:[#allocation19_spill]] %s10558_s24 }
  0x33   :  { %s10563_s4 = sld [smem:[%s12210_s0 + %s10388_s28]]   ;;  %s10392_s28 = smov 33  }
  0x34   :  { %s10568_s25 = sld [smem:[%s12210_s0 + %s10389_s7]]   ;;  %s10393_s7 = smov 34  }
  0x35   :  { %s10573_s30 = sld [smem:[%s12210_s0 + %s10390_s15]]   ;;  %s10394_s15 = smov 35  }
  0x36   :  { %s10578_s24 = sld [smem:[%s12210_s0 + %s10391_s22]]   ;;  %s10395_s22 = smov 36  }
  0x39   :  { %12244 = sst [smem:[#allocation20_spill]] %s10563_s4 }
  0x3a   :  { %12245 = sst [smem:[#allocation21_spill]] %s10568_s25 }
  0x3b   :  { %12246 = sst [smem:[#allocation22_spill]] %s10573_s30 }
  0x3c   :  { %12247 = sst [smem:[#allocation23_spill]] %s10578_s24 }
  0x3d   :  { %s10583_s4 = sld [smem:[%s12210_s0 + %s10392_s28]]  }
  0x3e   :  { %s10588_s25 = sld [smem:[%s12210_s0 + %s10393_s7]]  }
  0x3f   :  { %s10593_s30 = sld [smem:[%s12210_s0 + %s10394_s15]]  }
  0x40   :  { %s10598_s24 = sld [smem:[%s12210_s0 + %s10395_s22]]  }
  0x41   :  { %v154_v0 = vlaneseq  ;;  %v196_v1 = vld [vmem:[%s10428_s13] sm:$0xff]  ;;  %v10396_v2 = vmov 1966171168   ;;  %v197_v4 = vld [vmem:[%s10428_s13 + $0x8] sm:$0xff]  ;;  %v198_v5 = vld [vmem:[%s10428_s13 + $0x10] sm:$0xff]  ;;  %v10397_v7 = vmov 0.0  }
  0x42   :  { %v387_v3 = vunpack.c.l.s4 %v10396_v2  ;;  %v199_v6 = vld [vmem:[%s10428_s13 + $0x18] sm:$0xff]  ;;  %8934 = vmatprep.subr.bf16.mxu0 %v10397_v7  ;;  %v152_v8 = vld [vmem:[%s10418_s5] sm:$0x3]  ;;  %v9742_v10 = vpack.c.bf16 %v197_v4, %v196_v1  ;;  %v201_v13 = vld [vmem:[%s10428_s13 + $0x28] sm:$0xff]  ;;  %vm210_vm0 = vcmask 1041408  }
  0x43   :  { %v10606_v9 = vshrl.u32 %v154_v0, 7  ;;  %v9746_v11 = vpack.c.bf16 %v199_v6, %v198_v5  ;;  %v200_v12 = vld [vmem:[%s10428_s13 + $0x20] sm:$0xff]  ;;  %v202_v25 = vld [vmem:[%s10428_s13 + $0x30] sm:$0x3] }
  0x44   :  { %v388_v14 = vunpack.c.0.s8 %v387_v3  ;;  %v10026_v15 = vld [vmem:[%s10448_s29] sm:$0xff]   ;;  %9743 = vmatprep.subr.bf16.mxu1 %v9742_v10  ;;  %v9750_v20 = vpack.c.bf16 %v201_v13, %v200_v12 }
  0x45   :  { %v10612_v16 = vsub.s32 0, %v10606_v9  ;;  %v165_v17 = vsub.s32 1, %v10606_v9  ;;  %9745 = vmatpush3.bf16.msra.mxu1 %v9742_v10  ;;  %8935 = vmatpush3.bf16.msra.mxu0 %v10026_v15 }
  0x46   :  { %v10616_v18 = vsub.s32 %v388_v14, %v10606_v9  ;;  %9747 = vmatprep.subr.bf16.mxu1 %v9746_v11  ;;  %8936 = vmatprep.subr.bf16.mxu0 %v10397_v7 }
  0x47   :  { %v159_v19 = vrot.slane %v152_v8, %v10612_v16  ;;  %v166_v22 = vrot.slane %v152_v8, %v165_v17 }
  0x48   :  { %v10621_v21 = vrot.slane %v152_v8, %v10616_v18 }
  0x49   :  { %161 = vbcast.lane.b32.xlu0 %v159_v19, 256  ;;  %9749 = vmatpush3.bf16.msra.mxu1 %v9746_v11 }
  0x4a   :  { %v393_v23 = vcombine.high %v10621_v21, %v10621_v21  ;;  %v400_v24 = vrot.slane %v10621_v21, %v10616_v18  ;;  %9751 = vmatprep.subr.bf16.mxu1 %v9750_v20 }
  0x4c   :  { %v10631_v26 = vrot.slane %v393_v23, %v10616_v18 }
  0x4d   :  { %168 = vbcast.lane.b32.xlu0 %v166_v22, 256  ;;  %9753 = vmatpush3.bf16.msra.mxu1 %v9750_v20 }
  0x4e   :  { %8912 = vmatprep.subr.msk.mxu1 %vm210_vm0, %v202_v25 }
  0x51   :  { %8913 = vmatpush3.msk.msra.mxu1 %vm210_vm0, %v202_v25 }
  0x52   :  { %78 = vsyncpa [#allocation3], 0  ;;  %v10635_v27 = vand.u32 127, %v154_v0  ;;  %vm203_vm1 = vcmask 408576   ;;  %v10027_v32 = vld [vmem:[%s10448_s29 + $0x8] sm:$0xff]   ;;  %vm10398_vm4 = vmmov 0  }
  0x53   :  { %8937 = vmatpush3.bf16.msra.mxu0 %v10027_v32  ;;  %8938 = vmatprep.mubr.msk.bf16.mxu0 %vm10398_vm4, %v10397_v7  ;;  %v289_v33 = vld [vmem:[%s10433_s17] sm:$0xff]  ;;  %vm445_vm5 = vcmask 261120   ;;  %v293_v40 = vld [vmem:[%s10438_s21 + $0x8] sm:$0xff]  ;;  %v294_v41 = vld [vmem:[%s10438_s21 + $0x10] sm:$0xff]  ;;  %s10399_s0 = smov 104   ;;  %s10400_s5 = smov 120  }
  0x54   :  { %8948 = vmatprep.subr.bf16.mxu0 %v10397_v7  ;;  %v292_v39 = vld [vmem:[%s10438_s21] sm:$0xff]  ;;  %v295_v43 = vld [vmem:[%s10438_s21 + $0x18] sm:$0xff]  ;;  %v297_v46 = vld [vmem:[%s10438_s21 + $0x28] sm:$0xff]  ;;  %s10401_s13 = smov 112   ;;  %vm526_vm7 = vcmask 64512   ;;  %s10403_s17 = smov 64   ;;  %vm426_vm14 = vcmp.ge.s32.totalorder %v10606_v9, %v10635_v27 }
  0x55   :  { %v9754_v42 = vpack.c.bf16 %v293_v40, %v292_v39  ;;  %v9758_v44 = vpack.c.bf16 %v295_v43, %v294_v41  ;;  %v296_v45 = vld [vmem:[%s10438_s21 + $0x20] sm:$0xff]  ;;  %v298_v48 = vld [vmem:[%s10438_s21 + $0x30] sm:$0x3]  ;;  %vm1017_vm9 = vcmask 1043456   ;;  %vm409_vm10 = vcmp.eq.s32.totalorder %v10631_v26, 0  ;;  %s10404_s21 = smov 8  }
  0x56   :  { %v9762_v47 = vpack.c.bf16 %v297_v46, %v296_v45  ;;  %v153_v52 = vld [vmem:[%s10423_s9] sm:$0x3]  ;;  %s10402_s9 = smov 96   ;;  %vm408_vm11 = vcmp.eq.s32.totalorder %v400_v24, 0  ;;  %s10405_s28 = smov 16   ;;  %vm1423_vm12 = vcmask 130048  }
  0x57   :  { %9755 = vmatprep.subr.bf16.mxu1 %v9754_v42  ;;  %v186_v55 = vrot.slane %v153_v52, %v165_v17  ;;  %v179_v56 = vrot.slane %v153_v52, %v10612_v16  ;;  %s10406_s1 = smov 24   ;;  %vm1426_vm13 = vcmask 195584   ;;  %s12248_s2 = sld [smem:[#allocation6_spill]] }
  0x58   :  { %s12249_s7 = sld [smem:[#allocation7_spill]]  ;;  %s12259_s10 = sld [smem:[#allocation16_spill]] }
  0x59   :  { %s12260_s11 = sld [smem:[#allocation21_spill]]  ;;  %s12261_s15 = sld [smem:[#allocation23_spill]] }
  0x5a   :  { %s12262_s16 = sld [smem:[#allocation17_spill]]  ;;  %s12263_s18 = sld [smem:[#allocation18_spill]] }
  0x5b   :  { %s12264_s22 = sld [smem:[#allocation22_spill]]  ;;  %s12265_s23 = sld [smem:[#allocation19_spill]] }
  0x5c   :  { %s12266_s26 = sld [smem:[#allocation20_spill]] }
  0xbb   :  { %v162_v28 = vpop.permute.xlu0 %161 }
  0xbc   :  { %vm170_vm2 = vcmp.eq.s32.totalorder %v10635_v27, %v162_v28 }
  0xbd   :  { %v8282_v29 = vsel %vm170_vm2, 1.0, %v10397_v7 }
  0xbe   :  { %8914 = vmatprep.mubr.msk.f32.mxu1 %vm203_vm1, %v8282_v29 }
  0xbf   :  { %v169_v30 = vpop.permute.xlu0 %168 }
  0xc0   :  { %vm171_vm3 = vcmp.eq.s32.totalorder %v10635_v27, %v169_v30 }
  0xc1   :  { %v8283_v31 = vsel %vm171_vm3, 1.0, %v10397_v7 }
  0xc2   :  { %8915 = vmatmul.mubr.msk.f32.vlgmr.msra.gmra.mrb[0].mxu1 %vm203_vm1, %v8283_v31 }
  0xc3   :  { %9757 = vmatpush3.bf16.msra.mxu1 %v9754_v42 }
  0xc4   :  { %9759 = vmatprep.subr.bf16.mxu1 %v9758_v44 }
  0xc7   :  { %9761 = vmatpush3.bf16.msra.mxu1 %v9758_v44  ;;  %v411_v44 = vsel %vm409_vm10, -1e+30, %v10397_v7 }
  0xc8   :  { %9763 = vmatprep.subr.bf16.mxu1 %v9762_v47 }
  0xcb   :  { %9765 = vmatpush3.bf16.msra.mxu1 %v9762_v47  ;;  %v410_v47 = vsel %vm408_vm11, -1e+30, %v10397_v7 }
  0xcc   :  { %8929 = vmatprep.subr.msk.mxu1 %vm210_vm0, %v298_v48 }
  0xcf   :  { %8930 = vmatpush3.msk.msra.mxu1 %vm210_vm0, %v298_v48  ;;  %v10771_v48 = vrot.slane %v411_v44, %v10612_v16 }
  0xd0   :  { %8942 = vmatprep.subr.bf16.mxu1 %v10397_v7 }
 0x195   :  { %v8916_v34 = vpop.f32.mrb[0].mxu1 }
 0x196   :  { %v10648_v35 = vadd.f32 %v8916_v34, %v289_v33  ;;  %v280_v36 = vpop.f32.mrb[1].mxu1 }
 0x197   :  { %v10650_v37 = vadd.f32 %v289_v33, %v280_v36 }
 0x199   :  { %v428_v38 = vpack.c.bf16 %v10648_v35, %v10650_v37 }
 0x19b   :  { %8939 = vmatmul.mubr.msk.bf16.vlgmr.msra.gmra.mrb[0].mxu0 %vm445_vm5, %v428_v38 }
 0x19c   :  { %8950 = vmatprep.mubr.msk.bf16.mxu0 %vm10398_vm4, %v10397_v7 }
 0x26e   :  { %v483_v49 = vpop.f32.mrb[0].mxu0 }
 0x26f   :  { %v8940_v50 = vpop.f32.mrb[1].mxu0  ;;  %v515_v58 = vpack.c.bf16 %v483_v49, %v483_v49 }
 0x270   :  { %v486_v51 = vpop.f32.mrb[2].mxu0 }
 0x271   :  { %v8941_v53 = vpop.f32.mrb[3].mxu0  ;;  %v9826_v54 = vpack.i.bf16 %v486_v51, %v483_v49  ;;  %v516_v57 = vpack.c.bf16 %v486_v51, %v486_v51  ;;  %v10774_v49 = vrot.slane %v410_v47, %v10612_v16 }
 0x273   :  { %9827 = vrot.lane.b32.xlu0 %v9826_v54, %s10399_s0  ;;  %9817 = vrot.lane.b32.xlu1 %v9826_v54, %s10400_s5 }
 0x277   :  { %188 = vbcast.lane.b32.xlu0 %v186_v55, 256  ;;  %9822 = vrot.lane.b32.xlu1 %v9826_v54, %s10401_s13 }
 0x27b   :  { %181 = vbcast.lane.b32.xlu1 %v179_v56, 256  ;;  %574 = vrot.lane.b32.xlu0 %v516_v57, %s10402_s9 }
 0x27f   :  { %524 = vrot.lane.b32.xlu1 %v515_v58, %s10402_s9 }
 0x2e5   :  { %v9828_v59 = vpop.permute.xlu0 %9827  ;;  %v9818_v60 = vpop.permute.xlu1 %9817 }
 0x2e6   :  { %v9820_v61 = vunpack.i.h.bf16 %v9818_v60  ;;  %v9819_v62 = vunpack.i.l.bf16 %v9818_v60  ;;  %v9830_v5 = vunpack.i.h.bf16 %v9828_v59  ;;  %v9829_v6 = vunpack.i.l.bf16 %v9828_v59 }
 0x2e8   :  { %v10676_v63 = vpack.c.bf16 %v9819_v62, %v9819_v62  ;;  %v10678_v0 = vpack.c.bf16 %v9820_v61, %v9820_v61  ;;  %v10698_v17 = vpack.c.bf16 %v9829_v6, %v9829_v6  ;;  %v10700_v19 = vpack.c.bf16 %v9830_v5, %v9830_v5 }
 0x2e9   :  { %v189_v1 = vpop.permute.xlu0 %188  ;;  %v9823_v2 = vpop.permute.xlu1 %9822 }
 0x2ea   :  { %v9825_v3 = vunpack.i.h.bf16 %v9823_v2  ;;  %v9824_v4 = vunpack.i.l.bf16 %v9823_v2  ;;  %623 = vrot.lane.b32.xlu1 %v10676_v63, %s10402_s9  ;;  %672 = vrot.lane.b32.xlu0 %v10678_v0, %s10402_s9  ;;  %vm191_vm6 = vcmp.eq.s32.totalorder %v10635_v27, %v189_v1 }
 0x2eb   :  { %v8285_v13 = vsel %vm191_vm6, 1.0, %v10397_v7 }
 0x2ec   :  { %v10685_v8 = vpack.c.bf16 %v9824_v4, %v9824_v4  ;;  %v10687_v10 = vpack.c.bf16 %v9825_v3, %v9825_v3 }
 0x2ed   :  { %v182_v11 = vpop.permute.xlu1 %181  ;;  %v575_v12 = vpop.permute.xlu0 %574 }
 0x2ee   :  { %vm190_vm8 = vcmp.eq.s32.totalorder %v10635_v27, %v182_v11  ;;  %v580_v14 = vsel %vm526_vm7, %v575_v12, 0  ;;  %721 = vrot.lane.b32.xlu1 %v10685_v8, %s10402_s9  ;;  %770 = vrot.lane.b32.xlu0 %v10687_v10, %s10402_s9 }
 0x2ef   :  { %v8284_v15 = vsel %vm190_vm8, 1.0, %v10397_v7  ;;  %8949 = vmatpush3.bf16.xpose.msra.mxu0 %v580_v14 }
 0x2f0   :  { %8931 = vmatprep.mubr.msk.f32.mxu1 %vm203_vm1, %v8284_v15  ;;  %8960 = vmatprep.subr.bf16.mxu0 %v10397_v7 }
 0x2f1   :  { %v525_v20 = vpop.permute.xlu1 %524  ;;  %8932 = vmatmul.mubr.msk.f32.vlgmr.msra.gmra.mrb[2].mxu1 %vm203_vm1, %v8285_v13 }
 0x2f2   :  { %v531_v22 = vsel %vm526_vm7, %v525_v20, 0  ;;  %819 = vrot.lane.b32.xlu1 %v10698_v17, %s10402_s9  ;;  %868 = vrot.lane.b32.xlu0 %v10700_v19, %s10402_s9 }
 0x2f3   :  { %8943 = vmatpush3.bf16.xpose.msra.mxu1 %v531_v22  ;;  %8944 = vmatprep.mubr.msk.bf16.mxu1 %vm10398_vm4, %v10397_v7 }
 0x2f4   :  { %8954 = vmatprep.subr.bf16.mxu1 %v10397_v7 }
 0x2f6   :  { %1061 = vrot.lane.b32.xlu1 %v516_v57, %s10403_s17  ;;  %1012 = vrot.lane.b32.xlu0 %v515_v58, %s10403_s17 }
 0x2f7   :  { %8951 = vmatmul.mubr.msk.bf16.vlgmr.msra.gmra.mrb[4].mxu0 %vm526_vm7, %v516_v57 }
 0x2f8   :  { %8962 = vmatprep.mubr.msk.bf16.mxu0 %vm10398_vm4, %v10397_v7 }
 0x2fa   :  { %8945 = vmatmul.mubr.msk.bf16.vlgmr.msra.gmra.mrb[4].mxu1 %vm526_vm7, %v515_v58 }
 0x2fb   :  { %8956 = vmatprep.mubr.msk.bf16.mxu1 %vm10398_vm4, %v10397_v7 }
 0x35c   :  { %v624_v23 = vpop.permute.xlu1 %623  ;;  %v673_v25 = vpop.permute.xlu0 %672 }
 0x35d   :  { %v629_v28 = vsel %vm526_vm7, %v624_v23, 0  ;;  %v678_v29 = vsel %vm526_vm7, %v673_v25, 0 }
 0x35e   :  { %8955 = vmatpush3.bf16.xpose.msra.mxu1 %v629_v28  ;;  %8961 = vmatpush3.bf16.xpose.msra.mxu0 %v678_v29 }
 0x35f   :  { %8966 = vmatprep.subr.bf16.mxu1 %v10397_v7  ;;  %8972 = vmatprep.subr.bf16.mxu0 %v10397_v7 }
 0x360   :  { %v722_v30 = vpop.permute.xlu1 %721  ;;  %v771_v31 = vpop.permute.xlu0 %770 }
 0x361   :  { %v727_v32 = vsel %vm526_vm7, %v722_v30, 0  ;;  %v776_v33 = vsel %vm526_vm7, %v771_v31, 0 }
 0x364   :  { %v820_v34 = vpop.permute.xlu1 %819  ;;  %v869_v36 = vpop.permute.xlu0 %868 }
 0x365   :  { %8957 = vmatmul.mubr.msk.bf16.vlgmr.msra.gmra.mrb[8].mxu1 %vm526_vm7, %v10676_v63  ;;  %8963 = vmatmul.mubr.msk.bf16.vlgmr.msra.gmra.mrb[8].mxu0 %vm526_vm7, %v10678_v0  ;;  %v825_v38 = vsel %vm526_vm7, %v820_v34, 0  ;;  %v874_v39 = vsel %vm526_vm7, %v869_v36, 0 }
 0x366   :  { %8967 = vmatpush3.bf16.xpose.msra.mxu1 %v727_v32  ;;  %8973 = vmatpush3.bf16.xpose.msra.mxu0 %v776_v33 }
 0x367   :  { %8968 = vmatprep.mubr.msk.bf16.mxu1 %vm10398_vm4, %v10397_v7  ;;  %8974 = vmatprep.mubr.msk.bf16.mxu0 %vm10398_vm4, %v10397_v7 }
 0x368   :  { %8978 = vmatprep.subr.bf16.mxu1 %v10397_v7  ;;  %8984 = vmatprep.subr.bf16.mxu0 %v10397_v7  ;;  %v1062_v40 = vpop.permute.xlu1 %1061  ;;  %v1013_v41 = vpop.permute.xlu0 %1012 }
 0x369   :  { %v1067_v42 = vsel %vm1017_vm9, %v1062_v40, 0  ;;  %v1019_v43 = vsel %vm1017_vm9, %v1013_v41, 0 }
 0x36d   :  { %8969 = vmatmul.mubr.msk.bf16.vlgmr.msra.gmra.mrb[12].mxu1 %vm526_vm7, %v10685_v8  ;;  %8975 = vmatmul.mubr.msk.bf16.vlgmr.msra.gmra.mrb[12].mxu0 %vm526_vm7, %v10687_v10 }
 0x36e   :  { %8979 = vmatpush3.bf16.xpose.msra.mxu1 %v825_v38  ;;  %8985 = vmatpush3.bf16.xpose.msra.mxu0 %v874_v39 }
 0x36f   :  { %8980 = vmatprep.mubr.msk.bf16.mxu1 %vm10398_vm4, %v10397_v7  ;;  %8986 = vmatprep.mubr.msk.bf16.mxu0 %vm10398_vm4, %v10397_v7 }
 0x370   :  { %8990 = vmatprep.subr.bf16.mxu1 %v10397_v7  ;;  %8996 = vmatprep.subr.bf16.mxu0 %v10397_v7 }
 0x375   :  { %8981 = vmatmul.mubr.msk.bf16.vlgmr.msra.gmra.mrb[16].mxu1 %vm526_vm7, %v10698_v17  ;;  %8987 = vmatmul.mubr.msk.bf16.vlgmr.msra.gmra.mrb[16].mxu0 %vm526_vm7, %v10700_v19 }
 0x376   :  { %8991 = vmatpush3.bf16.msra.mxu1 %v1019_v43  ;;  %8997 = vmatpush3.bf16.msra.mxu0 %v1067_v42 }
 0x377   :  { %8992 = vmatprep.mubr.msk.bf16.mxu1 %vm10398_vm4, %v10397_v7  ;;  %8998 = vmatprep.mubr.msk.bf16.mxu0 %vm10398_vm4, %v10397_v7 }
 0x378   :  { %9002 = vmatprep.subr.bf16.mxu1 %v10397_v7  ;;  %9008 = vmatprep.subr.bf16.mxu0 %v10397_v7 }
 0x3c4   :  { %v10765_v45 = vpop.f32.mrb[2].mxu1 }
 0x3c5   :  { %v10767_v46 = vpop.f32.mrb[3].mxu1 }
 0x3ca   :  { %v616_v50 = vpop.f32.mrb[4].mxu0 }
 0x3cb   :  { %v617_v26 = vadd.f32 %v616_v50, %v10771_v48  ;;  %v8952_v51 = vpop.f32.mrb[5].mxu0 }
 0x3cc   :  { %v619_v18 = vpop.f32.mrb[6].mxu0 }
 0x3cd   :  { %v8953_v21 = vpop.f32.mrb[7].mxu0  ;;  %v567_v24 = vpop.f32.mrb[4].mxu1  ;;  %v919_v52 = vsel %vm526_vm7, %v617_v26, -inf }
 0x3ce   :  { %v568_v53 = vadd.f32 %v567_v24, %v10774_v49  ;;  %920 = vmax.xlane.f32.xlu0 %v919_v52  ;;  %v8946_v54 = vpop.f32.mrb[5].mxu1 }
 0x3cf   :  { %v570_v55 = vpop.f32.mrb[6].mxu1 }
 0x3d0   :  { %v8947_v56 = vpop.f32.mrb[7].mxu1  ;;  %v916_v57 = vsel %vm526_vm7, %v568_v53, -inf }
 0x3d1   :  { %917 = vmax.xlane.f32.xlu1 %v916_v57 }
 0x438   :  { %v665_v16 = vpop.f32.mrb[8].mxu1  ;;  %v714_v58 = vpop.f32.mrb[8].mxu0 }
 0x439   :  { %v666_v59 = vadd.f32 %v665_v16, %v10774_v49  ;;  %v715_v60 = vadd.f32 %v714_v58, %v10771_v48  ;;  %v8958_v61 = vpop.f32.mrb[9].mxu1  ;;  %v8964_v62 = vpop.f32.mrb[9].mxu0 }
 0x43a   :  { %v668_v1 = vpop.f32.mrb[10].mxu1  ;;  %v717_v2 = vpop.f32.mrb[10].mxu0 }
 0x43b   :  { %v8959_v3 = vpop.f32.mrb[11].mxu1  ;;  %v8965_v4 = vpop.f32.mrb[11].mxu0  ;;  %v922_v5 = vsel %vm526_vm7, %v666_v59, -inf  ;;  %v925_v6 = vsel %vm526_vm7, %v715_v60, -inf }
 0x43c   :  { %923 = vmax.xlane.f32.xlu0 %v922_v5  ;;  %926 = vmax.xlane.f32.xlu1 %v925_v6 }
 0x440   :  { %v763_v11 = vpop.f32.mrb[12].mxu1  ;;  %v812_v12 = vpop.f32.mrb[12].mxu0 }
 0x441   :  { %v10785_v13 = vadd.f32 %v763_v11, %v10774_v49  ;;  %v813_v14 = vadd.f32 %v812_v12, %v10771_v48  ;;  %v8970_v15 = vpop.f32.mrb[13].mxu1  ;;  %v8976_v20 = vpop.f32.mrb[13].mxu0 }
 0x442   :  { %v766_v22 = vpop.f32.mrb[14].mxu1  ;;  %v815_v23 = vpop.f32.mrb[14].mxu0 }
 0x443   :  { %v8971_v25 = vpop.f32.mrb[15].mxu1  ;;  %v8977_v28 = vpop.f32.mrb[15].mxu0  ;;  %v928_v29 = vsel %vm526_vm7, %v10785_v13, -inf  ;;  %v931_v30 = vsel %vm526_vm7, %v813_v14, -inf }
 0x444   :  { %929 = vmax.xlane.f32.xlu0 %v928_v29  ;;  %932 = vmax.xlane.f32.xlu1 %v931_v30 }
 0x448   :  { %v861_v31 = vpop.f32.mrb[16].mxu1  ;;  %v910_v32 = vpop.f32.mrb[16].mxu0 }
 0x449   :  { %v10792_v33 = vadd.f32 %v861_v31, %v10774_v49  ;;  %v911_v34 = vadd.f32 %v910_v32, %v10771_v48  ;;  %v8982_v36 = vpop.f32.mrb[17].mxu1  ;;  %v8988_v38 = vpop.f32.mrb[17].mxu0 }
 0x44a   :  { %v864_v39 = vpop.f32.mrb[18].mxu1  ;;  %v913_v40 = vpop.f32.mrb[18].mxu0 }
 0x44b   :  { %v8983_v41 = vpop.f32.mrb[19].mxu1  ;;  %v8989_v42 = vpop.f32.mrb[19].mxu0  ;;  %v934_v43 = vsel %vm526_vm7, %v10792_v33, -inf  ;;  %v937_v44 = vsel %vm526_vm7, %v911_v34, -inf }
 0x44c   :  { %935 = vmax.xlane.f32.xlu0 %v934_v43  ;;  %938 = vmax.xlane.f32.xlu1 %v937_v44 }
 0x45b   :  { %v921_v47 = vpop.xlane.xlu0 %920 }
 0x45c   :  { %v941_v51 = vsub.f32 %v617_v26, %v921_v47 }
 0x45d   :  { %1109 = vrot.lane.b32.xlu1 %v10676_v63, %s10403_s17 }
 0x45e   :  { %v918_v50 = vpop.xlane.xlu1 %917  ;;  %v950_v21 = vmul.f32 1.442695, %v941_v51 }
 0x45f   :  { %v940_v18 = vsub.f32 %v568_v53, %v918_v50 }
 0x460   :  { %10096 = vpow2.f32 %v950_v21 }
 0x461   :  { %v948_v24 = vmul.f32 1.442695, %v940_v18 }
 0x462   :  { %1157 = vrot.lane.b32.xlu0 %v10678_v0, %s10403_s17 }
 0x463   :  { %10098 = vpow2.f32 %v948_v24 }
 0x46a   :  { %v10097_v52 = vpop.eup %10096 }
 0x46b   :  { %v967_v56 = vsel %vm526_vm7, %v10097_v52, 0.0 }
 0x46d   :  { %v10099_v54 = vpop.eup %10098 }
 0x46e   :  { %v964_v55 = vsel %vm526_vm7, %v10099_v54, 0.0 }
 0x481   :  { %965 = vadd.xlane.f32.xlu0 %v964_v55  ;;  %968 = vadd.xlane.f32.xlu1 %v967_v56 }
 0x492   :  { %1205 = vrot.lane.b32.xlu1 %v10685_v8, %s10403_s17 }
 0x4c9   :  { %v924_v63 = vpop.xlane.xlu0 %923  ;;  %v927_v0 = vpop.xlane.xlu1 %926 }
 0x4ca   :  { %v942_v57 = vsub.f32 %v666_v59, %v924_v63  ;;  %v943_v26 = vsub.f32 %v715_v60, %v927_v0 }
 0x4cc   :  { %v952_v53 = vmul.f32 1.442695, %v942_v57  ;;  %v954_v16 = vmul.f32 1.442695, %v943_v26 }
 0x4ce   :  { %10100 = vpow2.f32 %v952_v53 }
 0x4cf   :  { %10102 = vpow2.f32 %v954_v16 }
 0x4d1   :  { %v933_v58 = vpop.xlane.xlu1 %932 }
 0x4d2   :  { %v945_v61 = vsub.f32 %v813_v14, %v933_v58  ;;  %v930_v14 = vpop.xlane.xlu0 %929 }
 0x4d3   :  { %v944_v15 = vsub.f32 %v10785_v13, %v930_v14 }
 0x4d4   :  { %v958_v62 = vmul.f32 1.442695, %v945_v61 }
 0x4d5   :  { %v956_v22 = vmul.f32 1.442695, %v944_v15 }
 0x4d6   :  { %10104 = vpow2.f32 %v958_v62 }
 0x4d8   :  { %v10806_v1 = vpop.eup %10100 }
 0x4d9   :  { %v10808_v2 = vpop.eup %10102  ;;  %v939_v3 = vpop.xlane.xlu1 %938  ;;  %v970_v8 = vsel %vm526_vm7, %v10806_v1, 0.0 }
 0x4da   :  { %v947_v4 = vsub.f32 %v911_v34, %v939_v3  ;;  %971 = vadd.xlane.f32.xlu0 %v970_v8  ;;  %v973_v59 = vsel %vm526_vm7, %v10808_v2, 0.0  ;;  %v936_v20 = vpop.xlane.xlu0 %935 }
 0x4db   :  { %974 = vadd.xlane.f32.xlu1 %v973_v59  ;;  %v946_v23 = vsub.f32 %v10792_v33, %v936_v20 }
 0x4dc   :  { %v962_v60 = vmul.f32 1.442695, %v947_v4 }
 0x4dd   :  { %v960_v25 = vmul.f32 1.442695, %v946_v23  ;;  %v1110_v29 = vpop.permute.xlu1 %1109 }
 0x4de   :  { %10106 = vpow2.f32 %v962_v60  ;;  %v1158_v28 = vpop.permute.xlu0 %1157  ;;  %v1115_v41 = vsel %vm1017_vm9, %v1110_v29, 0 }
 0x4df   :  { %10108 = vpow2.f32 %v956_v22  ;;  %v1163_v42 = vsel %vm1017_vm9, %v1158_v28, 0 }
 0x4e0   :  { %v10814_v5 = vpop.eup %10104  ;;  %10110 = vpow2.f32 %v960_v25 }
 0x4e1   :  { %v979_v6 = vsel %vm526_vm7, %v10814_v5, 0.0 }
 0x4e2   :  { %980 = vadd.xlane.f32.xlu1 %v979_v6 }
 0x4e8   :  { %v10818_v11 = vpop.eup %10106 }
 0x4e9   :  { %v985_v12 = vsel %vm526_vm7, %v10818_v11, 0.0  ;;  %v10828_v30 = vpop.eup %10108 }
 0x4ea   :  { %986 = vadd.xlane.f32.xlu1 %v985_v12  ;;  %v10832_v13 = vpop.eup %10110 }
 0x4f0   :  { %1253 = vrot.lane.b32.xlu0 %v10687_v10, %s10403_s17  ;;  %v976_v10 = vsel %vm526_vm7, %v10828_v30, 0.0 }
 0x4fb   :  { %1301 = vrot.lane.b32.xlu1 %v10698_v17, %s10403_s17  ;;  %v982_v17 = vsel %vm526_vm7, %v10832_v13, 0.0 }
 0x50e   :  { %v966_v31 = vpop.xlane.xlu0 %965  ;;  %v969_v32 = vpop.xlane.xlu1 %968 }
 0x50f   :  { %10112 = vrcp.f32 %v966_v31  ;;  %977 = vadd.xlane.f32.xlu0 %v976_v10 }
 0x510   :  { %10114 = vrcp.f32 %v969_v32 }
 0x512   :  { %v1206_v43 = vpop.permute.xlu1 %1205 }
 0x513   :  { %983 = vadd.xlane.f32.xlu0 %v982_v17  ;;  %v1211_v56 = vsel %vm1017_vm9, %v1206_v43, 0 }
 0x519   :  { %v10113_v33 = vpop.eup %10112 }
 0x51a   :  { %v10115_v34 = vpop.eup %10114  ;;  %v996_v36 = vmul.f32 %v10113_v33, %v10099_v54 }
 0x51b   :  { %v997_v38 = vmul.f32 %v10115_v34, %v10097_v52 }
 0x51c   :  { %v1004_v39 = vpack.c.bf16 %v996_v36, %v996_v36 }
 0x51d   :  { %v1005_v40 = vpack.c.bf16 %v997_v38, %v997_v38 }
 0x51e   :  { %8993 = vmatmul.mubr.msk.bf16.vlgmr.msra.gmra.mrb[20].mxu1 %vm526_vm7, %v1004_v39 }
 0x51f   :  { %8999 = vmatmul.mubr.msk.bf16.vlgmr.msra.gmra.mrb[20].mxu0 %vm526_vm7, %v1005_v40  ;;  %9003 = vmatpush3.bf16.msra.mxu1 %v1115_v41  ;;  %v10028_v41 = vld [vmem:[%s10453_s3] sm:$0xff]  }
 0x520   :  { %9009 = vmatpush3.bf16.msra.mxu0 %v1163_v42  ;;  %9004 = vmatprep.mubr.msk.bf16.mxu1 %vm10398_vm4, %v10397_v7 }
 0x521   :  { %9010 = vmatprep.mubr.msk.bf16.mxu0 %vm10398_vm4, %v10397_v7  ;;  %9014 = vmatprep.subr.bf16.mxu1 %v10397_v7 }
 0x522   :  { %9020 = vmatprep.subr.bf16.mxu0 %v10397_v7 }
 0x529   :  { %1349 = vrot.lane.b32.xlu0 %v10700_v19, %s10403_s17 }
 0x567   :  { %v972_v44 = vpop.xlane.xlu0 %971 }
 0x568   :  { %10116 = vrcp.f32 %v972_v44  ;;  %v975_v47 = vpop.xlane.xlu1 %974 }
 0x569   :  { %10118 = vrcp.f32 %v975_v47 }
 0x56b   :  { %v1254_v52 = vpop.permute.xlu0 %1253 }
 0x56c   :  { %v1259_v19 = vsel %vm1017_vm9, %v1254_v52, 0 }
 0x56f   :  { %v981_v50 = vpop.xlane.xlu1 %980 }
 0x570   :  { %10120 = vrcp.f32 %v981_v50 }
 0x572   :  { %v10117_v51 = vpop.eup %10116 }
 0x573   :  { %v10119_v18 = vpop.eup %10118  ;;  %v998_v21 = vmul.f32 %v10117_v51, %v10806_v1  ;;  %v10029_v51 = vld [vmem:[%s10453_s3 + $0x8] sm:$0xff]  }
 0x574   :  { %v999_v24 = vmul.f32 %v10119_v18, %v10808_v2 }
 0x575   :  { %v1006_v54 = vpack.c.bf16 %v998_v21, %v998_v21 }
 0x576   :  { %v1007_v55 = vpack.c.bf16 %v999_v24, %v999_v24 }
 0x577   :  { %9005 = vmatmul.mubr.msk.bf16.vlgmr.msra.gmra.mrb[24].mxu1 %vm526_vm7, %v1006_v54  ;;  %v987_v26 = vpop.xlane.xlu1 %986 }
 0x578   :  { %9011 = vmatmul.mubr.msk.bf16.vlgmr.msra.gmra.mrb[24].mxu0 %vm526_vm7, %v1007_v55  ;;  %9015 = vmatpush3.bf16.msra.mxu1 %v1211_v56  ;;  %10122 = vrcp.f32 %v987_v26 }
 0x579   :  { %9021 = vmatpush3.bf16.msra.mxu0 %v1259_v19  ;;  %9022 = vmatprep.mubr.msk.bf16.mxu0 %vm10398_vm4, %v10397_v7 }
 0x57a   :  { %9032 = vmatprep.subr.bf16.mxu0 %v10397_v7  ;;  %9016 = vmatprep.mubr.msk.bf16.mxu1 %vm10398_vm4, %v10397_v7  ;;  %v10121_v63 = vpop.eup %10120 }
 0x57b   :  { %9026 = vmatprep.subr.bf16.mxu1 %v10397_v7  ;;  %v1001_v0 = vmul.f32 %v10121_v63, %v10814_v5  ;;  %v1302_v4 = vpop.permute.xlu1 %1301 }
 0x57c   :  { %v1307_v5 = vsel %vm1017_vm9, %v1302_v4, 0 }
 0x57d   :  { %v1009_v57 = vpack.c.bf16 %v1001_v0, %v1001_v0 }
 0x580   :  { %9023 = vmatmul.mubr.msk.bf16.vlgmr.msra.gmra.mrb[28].mxu0 %vm526_vm7, %v1009_v57 }
 0x581   :  { %9034 = vmatprep.mubr.msk.bf16.mxu0 %vm10398_vm4, %v10397_v7 }
 0x582   :  { %v10123_v16 = vpop.eup %10122 }
 0x583   :  { %v1003_v61 = vmul.f32 %v10123_v16, %v10818_v11 }
 0x585   :  { %v1011_v3 = vpack.c.bf16 %v1003_v61, %v1003_v61 }
 0x59c   :  { %v978_v53 = vpop.xlane.xlu0 %977 }
 0x59d   :  { %10124 = vrcp.f32 %v978_v53 }
 0x5a0   :  { %v984_v58 = vpop.xlane.xlu0 %983 }
 0x5a1   :  { %10126 = vrcp.f32 %v984_v58 }
 0x5a4   :  { %v1350_v62 = vpop.permute.xlu0 %1349 }
 0x5a5   :  { %v1355_v1 = vsel %vm1017_vm9, %v1350_v62, 0 }
 0x5a6   :  { %9033 = vmatpush3.bf16.msra.mxu0 %v1355_v1 }
 0x5a7   :  { %v10125_v2 = vpop.eup %10124  ;;  %9046 = vmatprep.subr.bf16.mxu0 %v10397_v7 }
 0x5a8   :  { %v1000_v8 = vmul.f32 %v10125_v2, %v10828_v30 }
 0x5a9   :  { %9035 = vmatmul.mubr.msk.bf16.vlgmr.msra.gmra.mrb[32].mxu0 %vm526_vm7, %v1011_v3 }
 0x5aa   :  { %v1008_v59 = vpack.c.bf16 %v1000_v8, %v1000_v8  ;;  %9050 = vmatprep.mubr.msk.bf16.mxu0 %vm10398_vm4, %v10397_v7 }
 0x5ab   :  { %v10127_v60 = vpop.eup %10126 }
 0x5ac   :  { %9017 = vmatmul.mubr.msk.bf16.vlgmr.msra.gmra.mrb[28].mxu1 %vm526_vm7, %v1008_v59  ;;  %v1002_v6 = vmul.f32 %v10127_v60, %v10832_v13 }
 0x5ad   :  { %9027 = vmatpush3.bf16.msra.mxu1 %v1307_v5  ;;  %9028 = vmatprep.mubr.msk.bf16.mxu1 %vm10398_vm4, %v10397_v7 }
 0x5ae   :  { %9038 = vmatprep.subr.bf16.mxu1 %v10397_v7  ;;  %v1010_v11 = vpack.c.bf16 %v1002_v6, %v1002_v6  ;;  %v8311_v6 = vld [vmem:[%s10458_s8] ss:$0 sm:$0xff] }
 0x5b4   :  { %9029 = vmatmul.mubr.msk.bf16.vlgmr.msra.gmra.mrb[32].mxu1 %vm526_vm7, %v1010_v11 }
 0x5b5   :  { %9042 = vmatprep.mubr.msk.bf16.mxu1 %vm10398_vm4, %v10397_v7  ;;  %9039 = vmatpush3.bf16.msra.mxu1 %v10028_v41  ;;  %v10034_v41 = vld [vmem:[%s10493_s20 + $0x10] sm:$0xff]  }
 0x5b6   :  { %9040 = vmatprep.subr.bf16.mxu1 %v10397_v7 }
 0x5b9   :  { %9041 = vmatpush3.bf16.msra.mxu1 %v10029_v51 }
 0x5ba   :  { %9054 = vmatprep.subr.bf16.mxu1 %v10397_v7 }
 0x5f1   :  { %v1055_v12 = vpop.f32.mrb[20].mxu1 }
 0x5f2   :  { %v1103_v14 = vpop.f32.mrb[20].mxu0  ;;  %v8994_v15 = vpop.f32.mrb[21].mxu1 }
 0x5f3   :  { %v9000_v20 = vpop.f32.mrb[21].mxu0  ;;  %v1058_v22 = vpop.f32.mrb[22].mxu1 }
 0x5f4   :  { %v1106_v23 = vpop.f32.mrb[22].mxu0  ;;  %v8995_v25 = vpop.f32.mrb[23].mxu1 }
 0x5f5   :  { %v9001_v28 = vpop.f32.mrb[23].mxu0 }
 0x64a   :  { %v1151_v29 = vpop.f32.mrb[24].mxu1 }
 0x64b   :  { %v1199_v30 = vpop.f32.mrb[24].mxu0  ;;  %v9006_v31 = vpop.f32.mrb[25].mxu1 }
 0x64c   :  { %v9831_v32 = vpack.i.bf16 %v1199_v30, %v1151_v29  ;;  %v9012_v10 = vpop.f32.mrb[25].mxu0  ;;  %v1154_v13 = vpop.f32.mrb[26].mxu1 }
 0x64d   :  { %v1202_v17 = vpop.f32.mrb[26].mxu0  ;;  %v9007_v33 = vpop.f32.mrb[27].mxu1 }
 0x64e   :  { %9832 = vrot.lane.b32.xlu1 %v9831_v32, %s10404_s21  ;;  %v9013_v34 = vpop.f32.mrb[27].mxu0 }
 0x653   :  { %v1295_v36 = vpop.f32.mrb[28].mxu0 }
 0x654   :  { %v9024_v38 = vpop.f32.mrb[29].mxu0 }
 0x655   :  { %v1298_v39 = vpop.f32.mrb[30].mxu0  ;;  %v10031_v38 = vld [vmem:[%s10483_s6 + $0x8] sm:$0xff]  }
 0x656   :  { %v9025_v40 = vpop.f32.mrb[31].mxu0  ;;  %v10032_v39 = vld [vmem:[%s10493_s20] sm:$0xff]  }
 0x657   :  { %v10033_v40 = vld [vmem:[%s10493_s20 + $0x8] sm:$0xff]  }
 0x67c   :  { %v1391_v42 = vpop.f32.mrb[32].mxu0 }
 0x67d   :  { %v9036_v43 = vpop.f32.mrb[33].mxu0 }
 0x67e   :  { %v1394_v44 = vpop.f32.mrb[34].mxu0  ;;  %v10036_v43 = vld [vmem:[%s10493_s20 + $0x20] sm:$0xff]  }
 0x67f   :  { %v1247_v47 = vpop.f32.mrb[28].mxu1  ;;  %v9037_v50 = vpop.f32.mrb[35].mxu0  ;;  %v10037_v44 = vld [vmem:[%s10493_s20 + $0x28] sm:$0xff]  }
 0x680   :  { %v9836_v18 = vpack.i.bf16 %v1295_v36, %v1247_v47  ;;  %v9018_v21 = vpop.f32.mrb[29].mxu1  ;;  %v10030_v36 = vld [vmem:[%s10483_s6] sm:$0xff]  }
 0x681   :  { %v1250_v24 = vpop.f32.mrb[30].mxu1  ;;  %9047 = vmatpush3.bf16.msra.mxu0 %v10030_v36 }
 0x682   :  { %v9019_v52 = vpop.f32.mrb[31].mxu1  ;;  %9837 = vrot.lane.b32.xlu0 %v9836_v18, %s10405_s28  ;;  %9048 = vmatprep.subr.bf16.mxu0 %v10397_v7 }
 0x685   :  { %9049 = vmatpush3.bf16.msra.mxu0 %v10031_v38  ;;  %v10040_v38 = vld [vmem:[%s10448_s29 + $0x10] sm:$0xff]  }
 0x686   :  { %9074 = vmatprep.subr.bf16.mxu0 %v10397_v7 }
 0x687   :  { %v1343_v54 = vpop.f32.mrb[32].mxu1 }
 0x688   :  { %v9841_v55 = vpack.i.bf16 %v1391_v42, %v1343_v54  ;;  %v9030_v56 = vpop.f32.mrb[33].mxu1  ;;  %v10035_v42 = vld [vmem:[%s10493_s20 + $0x18] sm:$0xff]  }
 0x689   :  { %v1346_v19 = vpop.f32.mrb[34].mxu1 }
 0x68a   :  { %v9031_v63 = vpop.f32.mrb[35].mxu1  ;;  %9842 = vrot.lane.b32.xlu1 %v9841_v55, %s10406_s1  ;;  %v8315_v55 = vld [vmem:[%s10463_s14] ss:$0 sm:$0xff] }
 0x6c0   :  { %v9833_v0 = vpop.permute.xlu1 %9832 }
 0x6c1   :  { %v9835_v26 = vunpack.i.h.bf16 %v9833_v0  ;;  %v9834_v53 = vunpack.i.l.bf16 %v9833_v0  ;;  %v8316_v0 = vld [vmem:[%s10468_s19] ss:$0 sm:$0xff] }
 0x6c3   :  { %v1422_v62 = vsel %vm526_vm7, %v1103_v14, %v9835_v26  ;;  %v1421_v1 = vsel %vm526_vm7, %v1055_v12, %v9834_v53 }
 0x6f4   :  { %v9838_v57 = vpop.permute.xlu0 %9837 }
 0x6f5   :  { %v9840_v16 = vunpack.i.h.bf16 %v9838_v57  ;;  %v9839_v58 = vunpack.i.l.bf16 %v9838_v57 }
 0x6f7   :  { %v1425_v8 = vsel %vm1423_vm12, %v1422_v62, %v9840_v16  ;;  %v1424_v4 = vsel %vm1423_vm12, %v1421_v1, %v9839_v58  ;;  %v10038_v58 = vld [vmem:[%s10493_s20 + $0x30] sm:$0xff]   ;;  %v8317_v62 = vld [vmem:[%s10488_s12] ss:$0 sm:$0xff] }
 0x6fc   :  { %v9843_v61 = vpop.permute.xlu1 %9842 }
 0x6fd   :  { %v9845_v2 = vunpack.i.h.bf16 %v9843_v61  ;;  %v9844_v3 = vunpack.i.l.bf16 %v9843_v61  ;;  %v10039_v61 = vld [vmem:[%s10493_s20 + $0x38] sm:$0xff]  }
 0x6ff   :  { %v1428_v59 = vsel %vm1426_vm13, %v1425_v8, %v9845_v2  ;;  %v1427_v60 = vsel %vm1426_vm13, %v1424_v4, %v9844_v3 }
 0x700   :  { %v1429_v5 = vpack.c.bf16 %v1428_v59, %v1427_v60 }
 0x702   :  { %9043 = vmatmul.mubr.msk.bf16.vlgmr.msra.gmra.mrb[36].mxu1 %vm445_vm5, %v1429_v5 }
 0x703   :  { %9070 = vmatprep.mubr.msk.bf16.mxu1 %vm10398_vm4, %v10397_v7  ;;  %9055 = vmatpush3.bf16.msra.mxu1 %v10032_v39  ;;  %v10041_v39 = vld [vmem:[%s10448_s29 + $0x18] sm:$0xff]   ;;  %s12250_s29 = sld [smem:[#allocation8_spill]] }
 0x704   :  { %9056 = vmatprep.subr.bf16.mxu1 %v10397_v7 }
 0x707   :  { %9057 = vmatpush3.bf16.msra.mxu1 %v10033_v40 }
 0x708   :  { %9058 = vmatprep.subr.bf16.mxu1 %v10397_v7 }
 0x70b   :  { %9059 = vmatpush3.bf16.msra.mxu1 %v10034_v41 }
 0x70c   :  { %9060 = vmatprep.subr.bf16.mxu1 %v10397_v7 }
 0x70f   :  { %9061 = vmatpush3.bf16.msra.mxu1 %v10035_v42 }
 0x710   :  { %9062 = vmatprep.subr.bf16.mxu1 %v10397_v7 }
 0x713   :  { %9063 = vmatpush3.bf16.msra.mxu1 %v10036_v43 }
 0x714   :  { %9064 = vmatprep.subr.bf16.mxu1 %v10397_v7 }
 0x717   :  { %9065 = vmatpush3.bf16.msra.mxu1 %v10037_v44 }
 0x718   :  { %9066 = vmatprep.subr.bf16.mxu1 %v10397_v7 }
 0x71b   :  { %9067 = vmatpush3.bf16.msra.mxu1 %v10038_v58 }
 0x71c   :  { %9068 = vmatprep.subr.bf16.mxu1 %v10397_v7 }
 0x71f   :  { %9069 = vmatpush3.bf16.msra.mxu1 %v10039_v61 }
 0x720   :  { %9100 = vmatprep.subr.bf16.mxu1 %v10397_v7 }
 0x7d5   :  { %v1485_v11 = vpop.f32.mrb[36].mxu1 }
 0x7d6   :  { %v1486_v14 = vadd.f32 %v8311_v6, %v1485_v11  ;;  %v9044_v12 = vpop.f32.mrb[37].mxu1  ;;  %v8321_v11 = vld [vmem:[%s10498_s27] ss:$0 sm:$0xff] }
 0x7d7   :  { %v1488_v15 = vpop.f32.mrb[38].mxu1 }
 0x7d8   :  { %v1489_v20 = vadd.f32 %v8311_v6, %v1488_v15  ;;  %v9045_v22 = vpop.f32.mrb[39].mxu1  ;;  %v1492_v23 = vadd.f32 %v1486_v14, %v10650_v37 }
 0x7da   :  { %v1496_v25 = vsel %vm445_vm5, %v1492_v23, 0.0  ;;  %v1493_v28 = vadd.f32 %v1489_v20, %v10648_v35 }
 0x7db   :  { %1497 = vadd.xlane.f32.xlu0 %v1496_v25 }
 0x7dc   :  { %v1499_v29 = vsel %vm445_vm5, %v1493_v28, 0.0 }
 0x7dd   :  { %1500 = vadd.xlane.f32.xlu1 %v1499_v29 }
 0x868   :  { %v1498_v30 = vpop.xlane.xlu0 %1497 }
 0x869   :  { %v1503_v31 = vmul.f32 0.03125, %v1498_v30 }
 0x86a   :  { %v1501_v32 = vpop.xlane.xlu1 %1500 }
 0x86b   :  { %v1505_v10 = vsub.f32 %v1492_v23, %v1503_v31  ;;  %v1504_v13 = vmul.f32 0.03125, %v1501_v32 }
 0x86d   :  { %v1506_v17 = vsub.f32 %v1493_v28, %v1504_v13  ;;  %v1507_v33 = vmul.f32 %v1505_v10, %v1505_v10 }
 0x86f   :  { %v1509_v37 = vsel %vm445_vm5, %v1507_v33, 0.0  ;;  %v1508_v34 = vmul.f32 %v1506_v17, %v1506_v17 }
 0x870   :  { %1510 = vadd.xlane.f32.xlu0 %v1509_v37 }
 0x871   :  { %v1512_v35 = vsel %vm445_vm5, %v1508_v34, 0.0 }
 0x874   :  { %1513 = vadd.xlane.f32.xlu0 %v1512_v35 }
 0x8fd   :  { %v1511_v47 = vpop.xlane.xlu0 %1510 }
 0x8fe   :  { %v1515_v50 = vmul.f32 0.03125, %v1511_v47 }
 0x900   :  { %v1517_v51 = vadd.f32 1e-05, %v1515_v50 }
 0x901   :  { %v1514_v18 = vpop.xlane.xlu0 %1513 }
 0x902   :  { %10128 = vrsqrt.f32 %v1517_v51  ;;  %v1516_v21 = vmul.f32 0.03125, %v1514_v18  ;;  %v8330_v51 = vld [vmem:[%s12248_s2] ss:$0 sm:$0xff] }
 0x904   :  { %v1518_v24 = vadd.f32 1e-05, %v1516_v21 }
 0x906   :  { %10130 = vrsqrt.f32 %v1518_v24 }
 0x90c   :  { %v10129_v52 = vpop.eup %10128 }
 0x90d   :  { %v1521_v54 = vmul.f32 %v10129_v52, %v1505_v10 }
 0x90f   :  { %v1529_v19 = vmul.f32 %v8315_v55, %v1521_v54  ;;  %v8331_v54 = vld [vmem:[%s12249_s7] ss:$0 sm:$0xff] }
 0x910   :  { %v10131_v56 = vpop.eup %10130 }
 0x911   :  { %v1522_v63 = vmul.f32 %v10131_v56, %v1506_v17  ;;  %v1537_v26 = vadd.f32 %v8316_v0, %v1529_v19 }
 0x913   :  { %v1530_v57 = vmul.f32 %v8315_v55, %v1522_v63 }
 0x915   :  { %v1538_v53 = vadd.f32 %v8316_v0, %v1530_v57 }
 0x917   :  { %v1561_v16 = vpack.c.bf16 %v1538_v53, %v1537_v26 }
 0x919   :  { %9051 = vmatmul.mubr.msk.bf16.vlgmr.msra.gmra.mrb[36].mxu0 %vm445_vm5, %v1561_v16 }
 0x91a   :  { %9078 = vmatprep.mubr.msk.bf16.mxu0 %vm10398_vm4, %v10397_v7  ;;  %9075 = vmatpush3.bf16.msra.mxu0 %v10040_v38 }
 0x91b   :  { %9076 = vmatprep.subr.bf16.mxu0 %v10397_v7 }
 0x91e   :  { %9077 = vmatpush3.bf16.msra.mxu0 %v10041_v39 }
 0x91f   :  { %9082 = vmatprep.subr.bf16.mxu0 %v10397_v7 }
 0x9ec   :  { %v1617_v1 = vpop.f32.mrb[36].mxu0 }
 0x9ed   :  { %v1618_v2 = vadd.f32 %v8317_v62, %v1617_v1  ;;  %v9052_v3 = vpop.f32.mrb[37].mxu0 }
 0x9ee   :  { %v1620_v8 = vpop.f32.mrb[38].mxu0 }
 0x9ef   :  { %v1621_v4 = vadd.f32 %v8317_v62, %v1620_v8  ;;  %v9053_v59 = vpop.f32.mrb[39].mxu0  ;;  %v1624_v60 = vmax.f32 %v1618_v2, 0.0 }
 0x9f1   :  { %v1625_v5 = vmax.f32 %v1621_v4, 0.0 }
 0x9f3   :  { %v1626_v6 = vpack.c.bf16 %v1625_v5, %v1624_v60 }
 0x9f5   :  { %9071 = vmatmul.mubr.bf16.vlgmr.msra.gmra.mrb[40].mxu1 %v1626_v6 }
 0x9f6   :  { %9102 = vmatprep.mubr.msk.bf16.mxu1 %vm10398_vm4, %v10397_v7 }
 0xac8   :  { %v1715_v14 = vpop.f32.mrb[40].mxu1 }
 0xac9   :  { %v1716_v12 = vadd.f32 %v8321_v11, %v1715_v14  ;;  %v9072_v15 = vpop.f32.mrb[41].mxu1 }
 0xaca   :  { %v1718_v20 = vpop.f32.mrb[42].mxu1 }
 0xacb   :  { %v1719_v22 = vadd.f32 %v8321_v11, %v1718_v20  ;;  %v9073_v23 = vpop.f32.mrb[43].mxu1  ;;  %v1722_v25 = vadd.f32 %v1716_v12, %v1537_v26 }
 0xacd   :  { %v1726_v28 = vsel %vm445_vm5, %v1722_v25, 0.0  ;;  %v1723_v29 = vadd.f32 %v1719_v22, %v1538_v53 }
 0xace   :  { %1727 = vadd.xlane.f32.xlu1 %v1726_v28 }
 0xacf   :  { %v1729_v30 = vsel %vm445_vm5, %v1723_v29, 0.0 }
 0xad0   :  { %1730 = vadd.xlane.f32.xlu0 %v1729_v30 }
 0xb5b   :  { %v1728_v31 = vpop.xlane.xlu1 %1727 }
 0xb5c   :  { %v1732_v32 = vmul.f32 0.03125, %v1728_v31 }
 0xb5d   :  { %v1731_v10 = vpop.xlane.xlu0 %1730 }
 0xb5e   :  { %v1734_v13 = vsub.f32 %v1722_v25, %v1732_v32  ;;  %v1733_v17 = vmul.f32 0.03125, %v1731_v10 }
 0xb60   :  { %v1735_v33 = vsub.f32 %v1723_v29, %v1733_v17  ;;  %v1736_v37 = vmul.f32 %v1734_v13, %v1734_v13 }
 0xb62   :  { %v1738_v34 = vsel %vm445_vm5, %v1736_v37, 0.0  ;;  %v1737_v35 = vmul.f32 %v1735_v33, %v1735_v33 }
 0xb63   :  { %1739 = vadd.xlane.f32.xlu1 %v1738_v34 }
 0xb64   :  { %v1741_v36 = vsel %vm445_vm5, %v1737_v35, 0.0 }
 0xb65   :  { %1742 = vadd.xlane.f32.xlu0 %v1741_v36 }
 0xbf0   :  { %v1740_v40 = vpop.xlane.xlu1 %1739 }
 0xbf1   :  { %v1744_v41 = vmul.f32 0.03125, %v1740_v40 }
 0xbf2   :  { %v1743_v42 = vpop.xlane.xlu0 %1742 }
 0xbf3   :  { %v1746_v43 = vadd.f32 1e-05, %v1744_v41  ;;  %v1745_v44 = vmul.f32 0.03125, %v1743_v42 }
 0xbf5   :  { %10132 = vrsqrt.f32 %v1746_v43  ;;  %v1747_v47 = vadd.f32 1e-05, %v1745_v44 }
 0xbf7   :  { %10134 = vrsqrt.f32 %v1747_v47 }
 0xbff   :  { %v10133_v50 = vpop.eup %10132 }
 0xc00   :  { %v1750_v18 = vmul.f32 %v10133_v50, %v1734_v13 }
 0xc01   :  { %v10135_v21 = vpop.eup %10134 }
 0xc02   :  { %v1758_v24 = vmul.f32 %v8330_v51, %v1750_v18  ;;  %v1751_v52 = vmul.f32 %v10135_v21, %v1735_v33 }
 0xc04   :  { %v1759_v55 = vmul.f32 %v8330_v51, %v1751_v52  ;;  %v10942_v56 = vadd.f32 %v8331_v54, %v1758_v24 }
 0xc06   :  { %v10944_v19 = vadd.f32 %v8331_v54, %v1759_v55 }
 0xc08   :  { %v1768_v63 = vpack.c.bf16 %v10944_v19, %v10942_v56 }
 0xc0a   :  { %9079 = vmatmul.mubr.msk.bf16.vlgmr.msra.gmra.mrb[40].mxu0 %vm445_vm5, %v1768_v63 }
 0xc0b   :  { %9084 = vmatprep.mubr.msk.bf16.mxu0 %vm10398_vm4, %v10397_v7 }
 0xcdd   :  { %v1823_v0 = vpop.f32.mrb[40].mxu0 }
 0xcde   :  { %v9080_v57 = vpop.f32.mrb[41].mxu0  ;;  %v1857_v61 = vpack.c.bf16 %v1823_v0, %v1823_v0 }
 0xcdf   :  { %v1826_v26 = vpop.f32.mrb[42].mxu0 }
 0xce0   :  { %v9081_v53 = vpop.f32.mrb[43].mxu0  ;;  %v9851_v16 = vpack.i.bf16 %v1826_v26, %v1823_v0  ;;  %v1858_v58 = vpack.c.bf16 %v1826_v26, %v1826_v26 }
 0xce2   :  { %9852 = vrot.lane.b32.xlu0 %v9851_v16, %s10401_s13  ;;  %9847 = vrot.lane.b32.xlu1 %v9851_v16, %s10400_s5 }
 0xce6   :  { %9857 = vrot.lane.b32.xlu1 %v9851_v16, %s10399_s0  ;;  %1915 = vrot.lane.b32.xlu0 %v1858_v58, %s10402_s9 }
 0xcea   :  { %1866 = vrot.lane.b32.xlu1 %v1857_v61, %s10402_s9 }
 0xd54   :  { %v9853_v62 = vpop.permute.xlu0 %9852  ;;  %v9848_v1 = vpop.permute.xlu1 %9847 }
 0xd55   :  { %v9850_v2 = vunpack.i.h.bf16 %v9848_v1  ;;  %v9849_v3 = vunpack.i.l.bf16 %v9848_v1  ;;  %v9855_v8 = vunpack.i.h.bf16 %v9853_v62  ;;  %v9854_v4 = vunpack.i.l.bf16 %v9853_v62 }
 0xd57   :  { %v10956_v59 = vpack.c.bf16 %v9849_v3, %v9849_v3  ;;  %v10958_v60 = vpack.c.bf16 %v9850_v2, %v9850_v2  ;;  %v10964_v14 = vpack.c.bf16 %v9854_v4, %v9854_v4  ;;  %v10966_v12 = vpack.c.bf16 %v9855_v8, %v9855_v8 }
 0xd58   :  { %v9858_v5 = vpop.permute.xlu1 %9857  ;;  %v1916_v25 = vpop.permute.xlu0 %1915 }
 0xd59   :  { %1964 = vrot.lane.b32.xlu1 %v10956_v59, %s10402_s9  ;;  %2013 = vrot.lane.b32.xlu0 %v10958_v60, %s10402_s9  ;;  %v9860_v6 = vunpack.i.h.bf16 %v9858_v5  ;;  %v9859_v11 = vunpack.i.l.bf16 %v9858_v5  ;;  %v1921_v28 = vsel %vm526_vm7, %v1916_v25, 0 }
 0xd5b   :  { %v10973_v22 = vpack.c.bf16 %v9859_v11, %v9859_v11  ;;  %v10975_v23 = vpack.c.bf16 %v9860_v6, %v9860_v6 }
 0xd5c   :  { %v1867_v15 = vpop.permute.xlu1 %1866 }
 0xd5d   :  { %v1872_v20 = vsel %vm526_vm7, %v1867_v15, 0  ;;  %2062 = vrot.lane.b32.xlu1 %v10964_v14, %s10402_s9  ;;  %2111 = vrot.lane.b32.xlu0 %v10966_v12, %s10402_s9 }
 0xd5e   :  { %9083 = vmatpush3.bf16.xpose.msra.mxu0 %v1872_v20 }
 0xd5f   :  { %9088 = vmatprep.subr.bf16.mxu0 %v10397_v7 }
 0xd61   :  { %2160 = vrot.lane.b32.xlu1 %v10973_v22, %s10402_s9  ;;  %2209 = vrot.lane.b32.xlu0 %v10975_v23, %s10402_s9 }
 0xd65   :  { %9085 = vmatmul.mubr.msk.bf16.vlgmr.msra.gmra.mrb[44].mxu0 %vm526_vm7, %v1857_v61  ;;  %2401 = vrot.lane.b32.xlu1 %v1858_v58, %s10403_s17 }
 0xd66   :  { %2353 = vrot.lane.b32.xlu0 %v1857_v61, %s10403_s17  ;;  %9089 = vmatpush3.bf16.xpose.msra.mxu0 %v1921_v28 }
 0xd67   :  { %9090 = vmatprep.mubr.msk.bf16.mxu0 %vm10398_vm4, %v10397_v7  ;;  %9094 = vmatprep.subr.bf16.mxu0 %v10397_v7 }
 0xd6d   :  { %9091 = vmatmul.mubr.msk.bf16.vlgmr.msra.gmra.mrb[48].mxu0 %vm526_vm7, %v1858_v58 }
 0xd6e   :  { %9096 = vmatprep.mubr.msk.bf16.mxu0 %vm10398_vm4, %v10397_v7 }
 0xdcb   :  { %v1965_v29 = vpop.permute.xlu1 %1964  ;;  %v2014_v30 = vpop.permute.xlu0 %2013 }
 0xdcc   :  { %v1970_v31 = vsel %vm526_vm7, %v1965_v29, 0  ;;  %v2019_v32 = vsel %vm526_vm7, %v2014_v30, 0 }
 0xdcd   :  { %9095 = vmatpush3.bf16.xpose.msra.mxu0 %v1970_v31  ;;  %9101 = vmatpush3.bf16.xpose.msra.mxu1 %v2019_v32 }
 0xdce   :  { %9106 = vmatprep.subr.bf16.mxu0 %v10397_v7  ;;  %9112 = vmatprep.subr.bf16.mxu1 %v10397_v7 }
 0xdcf   :  { %v2063_v10 = vpop.permute.xlu1 %2062  ;;  %v2112_v13 = vpop.permute.xlu0 %2111 }
 0xdd0   :  { %v2068_v17 = vsel %vm526_vm7, %v2063_v10, 0  ;;  %v2117_v33 = vsel %vm526_vm7, %v2112_v13, 0 }
 0xdd3   :  { %v2161_v37 = vpop.permute.xlu1 %2160  ;;  %v2210_v34 = vpop.permute.xlu0 %2209 }
 0xdd4   :  { %9097 = vmatmul.mubr.msk.bf16.vlgmr.msra.gmra.mrb[52].mxu0 %vm526_vm7, %v10956_v59  ;;  %9103 = vmatmul.mubr.msk.bf16.vlgmr.msra.gmra.mrb[44].mxu1 %vm526_vm7, %v10958_v60  ;;  %v2166_v35 = vsel %vm526_vm7, %v2161_v37, 0  ;;  %v2215_v36 = vsel %vm526_vm7, %v2210_v34, 0 }
 0xdd5   :  { %9107 = vmatpush3.bf16.xpose.msra.mxu0 %v2068_v17  ;;  %9113 = vmatpush3.bf16.xpose.msra.mxu1 %v2117_v33 }
 0xdd6   :  { %9108 = vmatprep.mubr.msk.bf16.mxu0 %vm10398_vm4, %v10397_v7  ;;  %9114 = vmatprep.mubr.msk.bf16.mxu1 %vm10398_vm4, %v10397_v7 }
 0xdd7   :  { %9118 = vmatprep.subr.bf16.mxu0 %v10397_v7  ;;  %9124 = vmatprep.subr.bf16.mxu1 %v10397_v7  ;;  %v2402_v38 = vpop.permute.xlu1 %2401 }
 0xdd8   :  { %v2354_v39 = vpop.permute.xlu0 %2353  ;;  %v2407_v40 = vsel %vm1017_vm9, %v2402_v38, 0 }
 0xdd9   :  { %v2359_v41 = vsel %vm1017_vm9, %v2354_v39, 0 }
 0xddc   :  { %9109 = vmatmul.mubr.msk.bf16.vlgmr.msra.gmra.mrb[56].mxu0 %vm526_vm7, %v10964_v14  ;;  %9115 = vmatmul.mubr.msk.bf16.vlgmr.msra.gmra.mrb[48].mxu1 %vm526_vm7, %v10966_v12 }
 0xddd   :  { %9119 = vmatpush3.bf16.xpose.msra.mxu0 %v2166_v35  ;;  %9125 = vmatpush3.bf16.xpose.msra.mxu1 %v2215_v36 }
 0xdde   :  { %9120 = vmatprep.mubr.msk.bf16.mxu0 %vm10398_vm4, %v10397_v7  ;;  %9126 = vmatprep.mubr.msk.bf16.mxu1 %vm10398_vm4, %v10397_v7 }
 0xddf   :  { %9130 = vmatprep.subr.bf16.mxu0 %v10397_v7  ;;  %9136 = vmatprep.subr.bf16.mxu1 %v10397_v7 }
 0xde4   :  { %9121 = vmatmul.mubr.msk.bf16.vlgmr.msra.gmra.mrb[60].mxu0 %vm526_vm7, %v10973_v22  ;;  %9127 = vmatmul.mubr.msk.bf16.vlgmr.msra.gmra.mrb[52].mxu1 %vm526_vm7, %v10975_v23 }
 0xde5   :  { %9131 = vmatpush3.bf16.msra.mxu0 %v2359_v41  ;;  %9137 = vmatpush3.bf16.msra.mxu1 %v2407_v40 }
 0xde6   :  { %9132 = vmatprep.mubr.msk.bf16.mxu0 %vm10398_vm4, %v10397_v7  ;;  %9138 = vmatprep.mubr.msk.bf16.mxu1 %vm10398_vm4, %v10397_v7 }
 0xde7   :  { %9142 = vmatprep.subr.bf16.mxu0 %v10397_v7  ;;  %9148 = vmatprep.subr.bf16.mxu1 %v10397_v7 }
 0xe38   :  { %v1908_v42 = vpop.f32.mrb[44].mxu0 }
 0xe39   :  { %v1909_v43 = vadd.f32 %v1908_v42, %v10774_v49  ;;  %v9086_v44 = vpop.f32.mrb[45].mxu0 }
 0xe3a   :  { %v1911_v47 = vpop.f32.mrb[46].mxu0 }
 0xe3b   :  { %v9087_v50 = vpop.f32.mrb[47].mxu0  ;;  %v2257_v51 = vsel %vm526_vm7, %v1909_v43, -inf }
 0xe3c   :  { %2258 = vmax.xlane.f32.xlu1 %v2257_v51 }
 0xe40   :  { %v1957_v18 = vpop.f32.mrb[48].mxu0 }
 0xe41   :  { %v1958_v21 = vadd.f32 %v1957_v18, %v10771_v48  ;;  %v9092_v24 = vpop.f32.mrb[49].mxu0 }
 0xe42   :  { %v1960_v52 = vpop.f32.mrb[50].mxu0 }
 0xe43   :  { %v9093_v54 = vpop.f32.mrb[51].mxu0  ;;  %v2260_v55 = vsel %vm526_vm7, %v1958_v21, -inf }
 0xe44   :  { %2261 = vmax.xlane.f32.xlu0 %v2260_v55 }
 0xea7   :  { %v2006_v63 = vpop.f32.mrb[52].mxu0  ;;  %v2055_v0 = vpop.f32.mrb[44].mxu1 }
 0xea8   :  { %v2007_v57 = vadd.f32 %v2006_v63, %v10774_v49  ;;  %v2056_v26 = vadd.f32 %v2055_v0, %v10771_v48  ;;  %v9098_v53 = vpop.f32.mrb[53].mxu0  ;;  %v9104_v16 = vpop.f32.mrb[45].mxu1 }
 0xea9   :  { %v2009_v58 = vpop.f32.mrb[54].mxu0  ;;  %v2058_v61 = vpop.f32.mrb[46].mxu1 }
 0xeaa   :  { %v9099_v62 = vpop.f32.mrb[55].mxu0  ;;  %v9105_v1 = vpop.f32.mrb[47].mxu1  ;;  %v2266_v2 = vsel %vm526_vm7, %v2056_v26, -inf  ;;  %v2263_v3 = vsel %vm526_vm7, %v2007_v57, -inf }
 0xeab   :  { %2267 = vmax.xlane.f32.xlu1 %v2266_v2  ;;  %2264 = vmax.xlane.f32.xlu0 %v2263_v3 }
 0xeaf   :  { %v2104_v8 = vpop.f32.mrb[56].mxu0  ;;  %v2153_v4 = vpop.f32.mrb[48].mxu1 }
 0xeb0   :  { %v11041_v5 = vadd.f32 %v2104_v8, %v10774_v49  ;;  %v2154_v6 = vadd.f32 %v2153_v4, %v10771_v48  ;;  %v9110_v11 = vpop.f32.mrb[57].mxu0  ;;  %v9116_v15 = vpop.f32.mrb[49].mxu1 }
 0xeb1   :  { %v2107_v20 = vpop.f32.mrb[58].mxu0  ;;  %v2156_v25 = vpop.f32.mrb[50].mxu1 }
 0xeb2   :  { %v9111_v28 = vpop.f32.mrb[59].mxu0  ;;  %v9117_v29 = vpop.f32.mrb[51].mxu1  ;;  %v2272_v30 = vsel %vm526_vm7, %v2154_v6, -inf  ;;  %v2269_v31 = vsel %vm526_vm7, %v11041_v5, -inf }
 0xeb3   :  { %2273 = vmax.xlane.f32.xlu1 %v2272_v30  ;;  %2270 = vmax.xlane.f32.xlu0 %v2269_v31 }
 0xeb7   :  { %v2202_v32 = vpop.f32.mrb[60].mxu0  ;;  %v2251_v10 = vpop.f32.mrb[52].mxu1 }
 0xeb8   :  { %v11048_v13 = vadd.f32 %v2202_v32, %v10774_v49  ;;  %v2252_v17 = vadd.f32 %v2251_v10, %v10771_v48  ;;  %v9122_v33 = vpop.f32.mrb[61].mxu0  ;;  %v9128_v37 = vpop.f32.mrb[53].mxu1 }
 0xeb9   :  { %v2205_v34 = vpop.f32.mrb[62].mxu0  ;;  %v2254_v35 = vpop.f32.mrb[54].mxu1 }
 0xeba   :  { %v9123_v36 = vpop.f32.mrb[63].mxu0  ;;  %v9129_v38 = vpop.f32.mrb[55].mxu1  ;;  %v2278_v39 = vsel %vm526_vm7, %v2252_v17, -inf  ;;  %v2275_v40 = vsel %vm526_vm7, %v11048_v13, -inf }
 0xebb   :  { %2279 = vmax.xlane.f32.xlu1 %v2278_v39  ;;  %2276 = vmax.xlane.f32.xlu0 %v2275_v40 }
 0xec9   :  { %v2259_v41 = vpop.xlane.xlu1 %2258 }
 0xeca   :  { %v2281_v44 = vsub.f32 %v1909_v43, %v2259_v41 }
 0xecc   :  { %2449 = vrot.lane.b32.xlu1 %v10956_v59, %s10403_s17  ;;  %v2289_v50 = vmul.f32 1.442695, %v2281_v44 }
 0xece   :  { %10136 = vpow2.f32 %v2289_v50 }
 0xed1   :  { %2497 = vrot.lane.b32.xlu0 %v10958_v60, %s10403_s17  ;;  %v2262_v42 = vpop.xlane.xlu0 %2261 }
 0xed2   :  { %v2282_v47 = vsub.f32 %v1958_v21, %v2262_v42 }
 0xed4   :  { %v2291_v51 = vmul.f32 1.442695, %v2282_v47 }
 0xed6   :  { %10138 = vpow2.f32 %v2291_v51 }
 0xed8   :  { %v10137_v18 = vpop.eup %10136 }
 0xed9   :  { %v2305_v54 = vsel %vm526_vm7, %v10137_v18, 0.0 }
 0xee0   :  { %v10139_v24 = vpop.eup %10138 }
 0xee1   :  { %v2308_v52 = vsel %vm526_vm7, %v10139_v24, 0.0 }
 0xef0   :  { %2309 = vadd.xlane.f32.xlu1 %v2308_v52  ;;  %2306 = vadd.xlane.f32.xlu0 %v2305_v54 }
 0xf01   :  { %2545 = vrot.lane.b32.xlu1 %v10964_v14, %s10403_s17 }
 0xf38   :  { %v2268_v59 = vpop.xlane.xlu1 %2267  ;;  %v2265_v60 = vpop.xlane.xlu0 %2264 }
 0xf39   :  { %v2284_v55 = vsub.f32 %v2056_v26, %v2268_v59  ;;  %v2283_v43 = vsub.f32 %v2007_v57, %v2265_v60 }
 0xf3b   :  { %v2295_v21 = vmul.f32 1.442695, %v2284_v55  ;;  %v2293_v63 = vmul.f32 1.442695, %v2283_v43 }
 0xf3d   :  { %10140 = vpow2.f32 %v2295_v21 }
 0xf3e   :  { %10142 = vpow2.f32 %v2293_v63 }
 0xf40   :  { %v2274_v0 = vpop.xlane.xlu1 %2273 }
 0xf41   :  { %v2286_v53 = vsub.f32 %v2154_v6, %v2274_v0  ;;  %v2271_v6 = vpop.xlane.xlu0 %2270 }
 0xf42   :  { %v2285_v11 = vsub.f32 %v11041_v5, %v2271_v6 }
 0xf43   :  { %v2299_v16 = vmul.f32 1.442695, %v2286_v53 }
 0xf44   :  { %v2297_v20 = vmul.f32 1.442695, %v2285_v11 }
 0xf45   :  { %10144 = vpow2.f32 %v2299_v16 }
 0xf47   :  { %v11062_v58 = vpop.eup %10140 }
 0xf48   :  { %v11064_v61 = vpop.eup %10142  ;;  %v2280_v62 = vpop.xlane.xlu1 %2279  ;;  %v2314_v14 = vsel %vm526_vm7, %v11062_v58, 0.0 }
 0xf49   :  { %v2288_v1 = vsub.f32 %v2252_v17, %v2280_v62  ;;  %2315 = vadd.xlane.f32.xlu1 %v2314_v14  ;;  %v2311_v57 = vsel %vm526_vm7, %v11064_v61, 0.0  ;;  %v2277_v15 = vpop.xlane.xlu0 %2276 }
 0xf4a   :  { %2312 = vadd.xlane.f32.xlu0 %v2311_v57  ;;  %v2287_v25 = vsub.f32 %v11048_v13, %v2277_v15 }
 0xf4b   :  { %v2303_v26 = vmul.f32 1.442695, %v2288_v1 }
 0xf4c   :  { %v2301_v28 = vmul.f32 1.442695, %v2287_v25  ;;  %v2450_v29 = vpop.permute.xlu1 %2449 }
 0xf4d   :  { %10146 = vpow2.f32 %v2303_v26  ;;  %v2498_v30 = vpop.permute.xlu0 %2497  ;;  %v2455_v38 = vsel %vm1017_vm9, %v2450_v29, 0 }
 0xf4e   :  { %10148 = vpow2.f32 %v2297_v20  ;;  %v2503_v36 = vsel %vm1017_vm9, %v2498_v30, 0 }
 0xf4f   :  { %v11070_v2 = vpop.eup %10144  ;;  %10150 = vpow2.f32 %v2301_v28 }
 0xf50   :  { %v2320_v3 = vsel %vm526_vm7, %v11070_v2, 0.0 }
 0xf51   :  { %2321 = vadd.xlane.f32.xlu1 %v2320_v3 }
 0xf57   :  { %v11074_v8 = vpop.eup %10146 }
 0xf58   :  { %v2326_v4 = vsel %vm526_vm7, %v11074_v8, 0.0  ;;  %v11084_v31 = vpop.eup %10148 }
 0xf59   :  { %2327 = vadd.xlane.f32.xlu1 %v2326_v4  ;;  %v11088_v5 = vpop.eup %10150 }
 0xf60   :  { %2593 = vrot.lane.b32.xlu0 %v10966_v12, %s10403_s17  ;;  %v2317_v12 = vsel %vm526_vm7, %v11084_v31, 0.0 }
 0xf6a   :  { %2641 = vrot.lane.b32.xlu1 %v10973_v22, %s10403_s17  ;;  %v2323_v22 = vsel %vm526_vm7, %v11088_v5, 0.0 }
 0xf7d   :  { %v2310_v32 = vpop.xlane.xlu1 %2309  ;;  %v2307_v10 = vpop.xlane.xlu0 %2306 }
 0xf7e   :  { %10152 = vrcp.f32 %v2310_v32 }
 0xf7f   :  { %10154 = vrcp.f32 %v2307_v10  ;;  %2318 = vadd.xlane.f32.xlu0 %v2317_v12 }
 0xf81   :  { %v2546_v39 = vpop.permute.xlu1 %2545 }
 0xf83   :  { %2324 = vadd.xlane.f32.xlu0 %v2323_v22 }
 0xf88   :  { %v10153_v13 = vpop.eup %10152 }
 0xf89   :  { %v10155_v17 = vpop.eup %10154  ;;  %v2338_v33 = vmul.f32 %v10153_v13, %v10139_v24 }
 0xf8a   :  { %v2337_v37 = vmul.f32 %v10155_v17, %v10137_v18 }
 0xf8b   :  { %v2346_v34 = vpack.c.bf16 %v2338_v33, %v2338_v33 }
 0xf8c   :  { %v2345_v35 = vpack.c.bf16 %v2337_v37, %v2337_v37 }
 0xf8d   :  { %9139 = vmatmul.mubr.msk.bf16.vlgmr.msra.gmra.mrb[56].mxu1 %vm526_vm7, %v2346_v34 }
 0xf8e   :  { %9133 = vmatmul.mubr.msk.bf16.vlgmr.msra.gmra.mrb[64].mxu0 %vm526_vm7, %v2345_v35  ;;  %9149 = vmatpush3.bf16.msra.mxu1 %v2503_v36  ;;  %v10042_v36 = vld [vmem:[%s10453_s3 + $0x10] sm:$0xff]  }
 0xf8f   :  { %9143 = vmatpush3.bf16.msra.mxu0 %v2455_v38  ;;  %9144 = vmatprep.mubr.msk.bf16.mxu0 %vm10398_vm4, %v10397_v7 }
 0xf90   :  { %9150 = vmatprep.mubr.msk.bf16.mxu1 %vm10398_vm4, %v10397_v7  ;;  %9154 = vmatprep.subr.bf16.mxu0 %v10397_v7 }
 0xf91   :  { %9160 = vmatprep.subr.bf16.mxu1 %v10397_v7 }
 0xf99   :  { %2689 = vrot.lane.b32.xlu0 %v10975_v23, %s10403_s17  ;;  %v2551_v23 = vsel %vm1017_vm9, %v2546_v39, 0 }
 0xfd6   :  { %v2316_v40 = vpop.xlane.xlu1 %2315 }
 0xfd7   :  { %10156 = vrcp.f32 %v2316_v40  ;;  %v2313_v41 = vpop.xlane.xlu0 %2312 }
 0xfd8   :  { %10158 = vrcp.f32 %v2313_v41  ;;  %v10043_v41 = vld [vmem:[%s10453_s3 + $0x18] sm:$0xff]   ;;  %s12251_s3 = sld [smem:[#allocation5_spill]] }
 0xfdb   :  { %v2594_v51 = vpop.permute.xlu0 %2593 }
 0xfdc   :  { %v2599_v54 = vsel %vm1017_vm9, %v2594_v51, 0 }
 0xfde   :  { %v2322_v42 = vpop.xlane.xlu1 %2321 }
 0xfdf   :  { %10160 = vrcp.f32 %v2322_v42 }
 0xfe1   :  { %v10157_v44 = vpop.eup %10156 }
 0xfe2   :  { %v10159_v47 = vpop.eup %10158  ;;  %v2340_v50 = vmul.f32 %v10157_v44, %v11062_v58 }
 0xfe3   :  { %v2339_v18 = vmul.f32 %v10159_v47, %v11064_v61 }
 0xfe4   :  { %v2348_v24 = vpack.c.bf16 %v2340_v50, %v2340_v50 }
 0xfe5   :  { %v2347_v52 = vpack.c.bf16 %v2339_v18, %v2339_v18 }
 0xfe6   :  { %9151 = vmatmul.mubr.msk.bf16.vlgmr.msra.gmra.mrb[60].mxu1 %vm526_vm7, %v2348_v24  ;;  %v2328_v43 = vpop.xlane.xlu1 %2327 }
 0xfe7   :  { %9145 = vmatmul.mubr.msk.bf16.vlgmr.msra.gmra.mrb[68].mxu0 %vm526_vm7, %v2347_v52  ;;  %9161 = vmatpush3.bf16.msra.mxu1 %v2599_v54  ;;  %10162 = vrcp.f32 %v2328_v43 }
 0xfe8   :  { %9155 = vmatpush3.bf16.msra.mxu0 %v2551_v23  ;;  %9162 = vmatprep.mubr.msk.bf16.mxu1 %vm10398_vm4, %v10397_v7 }
 0xfe9   :  { %v10161_v59 = vpop.eup %10160  ;;  %9172 = vmatprep.subr.bf16.mxu1 %v10397_v7  ;;  %9156 = vmatprep.mubr.msk.bf16.mxu0 %vm10398_vm4, %v10397_v7 }
 0xfea   :  { %v2342_v60 = vmul.f32 %v10161_v59, %v11070_v2  ;;  %9166 = vmatprep.subr.bf16.mxu0 %v10397_v7  ;;  %v2642_v1 = vpop.permute.xlu1 %2641 }
 0xfeb   :  { %v2647_v2 = vsel %vm1017_vm9, %v2642_v1, 0 }
 0xfec   :  { %v2350_v55 = vpack.c.bf16 %v2342_v60, %v2342_v60 }
 0xfee   :  { %9163 = vmatmul.mubr.msk.bf16.vlgmr.msra.gmra.mrb[64].mxu1 %vm526_vm7, %v2350_v55 }
 0xfef   :  { %9174 = vmatprep.mubr.msk.bf16.mxu1 %vm10398_vm4, %v10397_v7 }
 0xff1   :  { %v10163_v63 = vpop.eup %10162 }
 0xff2   :  { %v2344_v53 = vmul.f32 %v10163_v63, %v11074_v8 }
 0xff4   :  { %v2352_v62 = vpack.c.bf16 %v2344_v53, %v2344_v53 }
0x100c   :  { %v2319_v21 = vpop.xlane.xlu0 %2318 }
0x100d   :  { %10164 = vrcp.f32 %v2319_v21 }
0x1010   :  { %v2325_v0 = vpop.xlane.xlu0 %2324 }
0x1011   :  { %10166 = vrcp.f32 %v2325_v0 }
0x1014   :  { %v2690_v16 = vpop.permute.xlu0 %2689 }
0x1015   :  { %v2695_v58 = vsel %vm1017_vm9, %v2690_v16, 0 }
0x1016   :  { %9173 = vmatpush3.bf16.msra.mxu1 %v2695_v58 }
0x1017   :  { %v10165_v61 = vpop.eup %10164  ;;  %9186 = vmatprep.subr.bf16.mxu1 %v10397_v7 }
0x1018   :  { %v2341_v14 = vmul.f32 %v10165_v61, %v11084_v31 }
0x1019   :  { %9175 = vmatmul.mubr.msk.bf16.vlgmr.msra.gmra.mrb[68].mxu1 %vm526_vm7, %v2352_v62 }
0x101a   :  { %v2349_v57 = vpack.c.bf16 %v2341_v14, %v2341_v14  ;;  %9190 = vmatprep.mubr.msk.bf16.mxu1 %vm10398_vm4, %v10397_v7 }
0x101b   :  { %v10167_v26 = vpop.eup %10166 }
0x101c   :  { %9157 = vmatmul.mubr.msk.bf16.vlgmr.msra.gmra.mrb[72].mxu0 %vm526_vm7, %v2349_v57  ;;  %v2343_v3 = vmul.f32 %v10167_v26, %v11088_v5 }
0x101d   :  { %9167 = vmatpush3.bf16.msra.mxu0 %v2647_v2  ;;  %9168 = vmatprep.mubr.msk.bf16.mxu0 %vm10398_vm4, %v10397_v7 }
0x101e   :  { %9178 = vmatprep.subr.bf16.mxu0 %v10397_v7  ;;  %v2351_v8 = vpack.c.bf16 %v2343_v3, %v2343_v3  ;;  %v8360_v3 = vld [vmem:[%s10458_s8 + $0x1] ss:$0 sm:$0xff]  ;;  %s12252_s8 = sld [smem:[#allocation9_spill]] }
0x1024   :  { %9169 = vmatmul.mubr.msk.bf16.vlgmr.msra.gmra.mrb[76].mxu0 %vm526_vm7, %v2351_v8 }
0x1025   :  { %9182 = vmatprep.mubr.msk.bf16.mxu0 %vm10398_vm4, %v10397_v7  ;;  %9179 = vmatpush3.bf16.msra.mxu0 %v10042_v36  ;;  %v10050_v36 = vld [vmem:[%s10493_s20 + $0x50] sm:$0xff]  }
0x1026   :  { %9180 = vmatprep.subr.bf16.mxu0 %v10397_v7 }
0x1029   :  { %9181 = vmatpush3.bf16.msra.mxu0 %v10043_v41 }
0x102a   :  { %9194 = vmatprep.subr.bf16.mxu0 %v10397_v7 }
0x1060   :  { %v2443_v4 = vpop.f32.mrb[56].mxu1 }
0x1061   :  { %v2395_v6 = vpop.f32.mrb[64].mxu0  ;;  %v9140_v11 = vpop.f32.mrb[57].mxu1 }
0x1062   :  { %v9134_v15 = vpop.f32.mrb[65].mxu0  ;;  %v2446_v20 = vpop.f32.mrb[58].mxu1 }
0x1063   :  { %v2398_v25 = vpop.f32.mrb[66].mxu0  ;;  %v9141_v28 = vpop.f32.mrb[59].mxu1 }
0x1064   :  { %v9135_v29 = vpop.f32.mrb[67].mxu0 }
0x10b9   :  { %v2539_v30 = vpop.f32.mrb[60].mxu1 }
0x10ba   :  { %v2491_v31 = vpop.f32.mrb[68].mxu0  ;;  %v9152_v32 = vpop.f32.mrb[61].mxu1 }
0x10bb   :  { %v9861_v10 = vpack.i.bf16 %v2539_v30, %v2491_v31  ;;  %v9146_v12 = vpop.f32.mrb[69].mxu0  ;;  %v2542_v5 = vpop.f32.mrb[62].mxu1 }
0x10bc   :  { %v2494_v22 = vpop.f32.mrb[70].mxu0  ;;  %v9153_v13 = vpop.f32.mrb[63].mxu1 }
0x10bd   :  { %9862 = vrot.lane.b32.xlu1 %v9861_v10, %s10404_s21  ;;  %v9147_v17 = vpop.f32.mrb[71].mxu0 }
0x10c1   :  { %v2635_v33 = vpop.f32.mrb[64].mxu1 }
0x10c2   :  { %v9164_v37 = vpop.f32.mrb[65].mxu1 }
0x10c3   :  { %v2638_v34 = vpop.f32.mrb[66].mxu1  ;;  %v10045_v37 = vld [vmem:[%s10483_s6 + $0x18] sm:$0xff]  }
0x10c4   :  { %v9165_v35 = vpop.f32.mrb[67].mxu1  ;;  %v10048_v34 = vld [vmem:[%s10493_s20 + $0x40] sm:$0xff]  }
0x10c5   :  { %v10049_v35 = vld [vmem:[%s10493_s20 + $0x48] sm:$0xff]  }
0x10ec   :  { %v2731_v38 = vpop.f32.mrb[68].mxu1 }
0x10ed   :  { %v9176_v39 = vpop.f32.mrb[69].mxu1 }
0x10ee   :  { %v2734_v40 = vpop.f32.mrb[70].mxu1  ;;  %v10052_v39 = vld [vmem:[%s10493_s20 + $0x60] sm:$0xff]  }
0x10ef   :  { %v2587_v42 = vpop.f32.mrb[72].mxu0  ;;  %v9177_v44 = vpop.f32.mrb[71].mxu1  ;;  %v10053_v40 = vld [vmem:[%s10493_s20 + $0x68] sm:$0xff]  }
0x10f0   :  { %v9866_v47 = vpack.i.bf16 %v2635_v33, %v2587_v42  ;;  %v9158_v50 = vpop.f32.mrb[73].mxu0  ;;  %v10044_v33 = vld [vmem:[%s10483_s6 + $0x10] sm:$0xff]   ;;  %s12255_s6 = sld [smem:[#allocation13_spill]] }
0x10f1   :  { %v2590_v51 = vpop.f32.mrb[74].mxu0  ;;  %9187 = vmatpush3.bf16.msra.mxu1 %v10044_v33 }
0x10f2   :  { %9867 = vrot.lane.b32.xlu0 %v9866_v47, %s10405_s28  ;;  %v9159_v18 = vpop.f32.mrb[75].mxu0  ;;  %9188 = vmatprep.subr.bf16.mxu1 %v10397_v7 }
0x10f5   :  { %9189 = vmatpush3.bf16.msra.mxu1 %v10045_v37 }
0x10f6   :  { %9214 = vmatprep.subr.bf16.mxu1 %v10397_v7 }
0x10f7   :  { %v2683_v24 = vpop.f32.mrb[76].mxu0 }
0x10f8   :  { %v9871_v52 = vpack.i.bf16 %v2731_v38, %v2683_v24  ;;  %v9170_v54 = vpop.f32.mrb[77].mxu0  ;;  %v10051_v38 = vld [vmem:[%s10493_s20 + $0x58] sm:$0xff]  }
0x10f9   :  { %v2686_v23 = vpop.f32.mrb[78].mxu0 }
0x10fa   :  { %9872 = vrot.lane.b32.xlu1 %v9871_v52, %s10406_s1  ;;  %v9171_v59 = vpop.f32.mrb[79].mxu0  ;;  %v8366_v52 = vld [vmem:[%s10463_s14 + $0x1] ss:$0 sm:$0xff]  ;;  %s12253_s14 = sld [smem:[#allocation10_spill]] }
0x112f   :  { %v9863_v60 = vpop.permute.xlu1 %9862 }
0x1130   :  { %v9865_v43 = vunpack.i.h.bf16 %v9863_v60  ;;  %v9864_v21 = vunpack.i.l.bf16 %v9863_v60  ;;  %v8367_v60 = vld [vmem:[%s10468_s19 + $0x1] ss:$0 sm:$0xff]  ;;  %s12254_s19 = sld [smem:[#allocation14_spill]] }
0x1132   :  { %v2762_v16 = vsel %vm526_vm7, %v2443_v4, %v9865_v43  ;;  %v2761_v58 = vsel %vm526_vm7, %v2395_v6, %v9864_v21 }
0x1164   :  { %v9868_v55 = vpop.permute.xlu0 %9867 }
0x1165   :  { %v9870_v63 = vunpack.i.h.bf16 %v9868_v55  ;;  %v9869_v0 = vunpack.i.l.bf16 %v9868_v55 }
0x1167   :  { %v2764_v14 = vsel %vm1423_vm12, %v2762_v16, %v9870_v63  ;;  %v2763_v1 = vsel %vm1423_vm12, %v2761_v58, %v9869_v0  ;;  %v10046_v63 = vld [vmem:[%s12250_s29] sm:$0xff]   ;;  %v10047_v16 = vld [vmem:[%s12250_s29 + $0x8] sm:$0xff]  }
0x116c   :  { %v9873_v53 = vpop.permute.xlu1 %9872 }
0x116d   :  { %v9875_v61 = vunpack.i.h.bf16 %v9873_v53  ;;  %v9874_v62 = vunpack.i.l.bf16 %v9873_v53  ;;  %v383_v53 = vld [vmem:[%s12251_s3] sm:$0xff] }
0x116e   :  { %v11190_v58 = vadd.f32 %v10765_v45, %v383_v53  ;;  %v10055_v45 = vld [vmem:[%s10493_s20 + $0x78] sm:$0xff]  }
0x116f   :  { %v2766_v57 = vsel %vm1426_vm13, %v2764_v14, %v9875_v61  ;;  %v2765_v26 = vsel %vm1426_vm13, %v2763_v1, %v9874_v62  ;;  %v11193_v61 = vadd.f32 %v383_v53, %v10767_v46  ;;  %v10054_v14 = vld [vmem:[%s10493_s20 + $0x70] sm:$0xff]   ;;  %v8390_v46 = vld [vmem:[%s10488_s12 + $0x1] ss:$0 sm:$0xff]  ;;  %s12256_s12 = sld [smem:[#allocation11_spill]]  ;;  %s12257_s20 = sld [smem:[#allocation12_spill]] }
0x1170   :  { %v2767_v2 = vpack.c.bf16 %v2766_v57, %v2765_v26 }
0x1171   :  { %v3113_v62 = vpack.c.bf16 %v11190_v58, %v11193_v61 }
0x1172   :  { %9183 = vmatmul.mubr.msk.bf16.vlgmr.msra.gmra.mrb[80].mxu0 %vm445_vm5, %v2767_v2 }
0x1173   :  { %9210 = vmatprep.mubr.msk.bf16.mxu0 %vm10398_vm4, %v10397_v7  ;;  %9195 = vmatpush3.bf16.msra.mxu0 %v10048_v34 }
0x1174   :  { %9196 = vmatprep.subr.bf16.mxu0 %v10397_v7 }
0x1177   :  { %9197 = vmatpush3.bf16.msra.mxu0 %v10049_v35 }
0x1178   :  { %9198 = vmatprep.subr.bf16.mxu0 %v10397_v7 }
0x117b   :  { %9199 = vmatpush3.bf16.msra.mxu0 %v10050_v36 }
0x117c   :  { %9200 = vmatprep.subr.bf16.mxu0 %v10397_v7 }
0x117f   :  { %9201 = vmatpush3.bf16.msra.mxu0 %v10051_v38 }
0x1180   :  { %9202 = vmatprep.subr.bf16.mxu0 %v10397_v7 }
0x1183   :  { %9203 = vmatpush3.bf16.msra.mxu0 %v10052_v39 }
0x1184   :  { %9204 = vmatprep.subr.bf16.mxu0 %v10397_v7 }
0x1187   :  { %9205 = vmatpush3.bf16.msra.mxu0 %v10053_v40 }
0x1188   :  { %9206 = vmatprep.subr.bf16.mxu0 %v10397_v7 }
0x118b   :  { %9207 = vmatpush3.bf16.msra.mxu0 %v10054_v14 }
0x118c   :  { %9208 = vmatprep.subr.bf16.mxu0 %v10397_v7 }
0x118f   :  { %9209 = vmatpush3.bf16.msra.mxu0 %v10055_v45 }
0x1190   :  { %9240 = vmatprep.subr.bf16.mxu0 %v10397_v7 }
0x1245   :  { %v2823_v8 = vpop.f32.mrb[80].mxu0 }
0x1246   :  { %v2824_v4 = vadd.f32 %v8360_v3, %v2823_v8  ;;  %v9184_v6 = vpop.f32.mrb[81].mxu0 }
0x1247   :  { %v2826_v11 = vpop.f32.mrb[82].mxu0 }
0x1248   :  { %v2827_v15 = vadd.f32 %v8360_v3, %v2826_v11  ;;  %v9185_v20 = vpop.f32.mrb[83].mxu0  ;;  %v2830_v25 = vadd.f32 %v2824_v4, %v10942_v56 }
0x124a   :  { %v2836_v28 = vsel %vm445_vm5, %v2830_v25, 0.0  ;;  %v2831_v29 = vadd.f32 %v2827_v15, %v10944_v19 }
0x124b   :  { %2837 = vadd.xlane.f32.xlu0 %v2836_v28 }
0x124c   :  { %v2839_v30 = vsel %vm445_vm5, %v2831_v29, 0.0 }
0x124d   :  { %2840 = vadd.xlane.f32.xlu1 %v2839_v30 }
0x12d8   :  { %v2838_v31 = vpop.xlane.xlu0 %2837 }
0x12d9   :  { %v2842_v32 = vmul.f32 0.03125, %v2838_v31 }
0x12da   :  { %v2841_v10 = vpop.xlane.xlu1 %2840 }
0x12db   :  { %v2844_v12 = vsub.f32 %v2830_v25, %v2842_v32  ;;  %v2843_v5 = vmul.f32 0.03125, %v2841_v10 }
0x12dd   :  { %v2845_v22 = vsub.f32 %v2831_v29, %v2843_v5  ;;  %v2846_v13 = vmul.f32 %v2844_v12, %v2844_v12 }
0x12df   :  { %v2848_v56 = vsel %vm445_vm5, %v2846_v13, 0.0  ;;  %v2847_v17 = vmul.f32 %v2845_v22, %v2845_v22 }
0x12e0   :  { %2849 = vadd.xlane.f32.xlu0 %v2848_v56 }
0x12e1   :  { %v2851_v19 = vsel %vm445_vm5, %v2847_v17, 0.0 }
0x12e4   :  { %2852 = vadd.xlane.f32.xlu0 %v2851_v19 }
0x136d   :  { %v2850_v41 = vpop.xlane.xlu0 %2849 }
0x136e   :  { %v2854_v42 = vmul.f32 0.03125, %v2850_v41 }
0x1370   :  { %v2856_v44 = vadd.f32 1e-05, %v2854_v42 }
0x1371   :  { %v2853_v47 = vpop.xlane.xlu0 %2852 }
0x1372   :  { %10168 = vrsqrt.f32 %v2856_v44  ;;  %v2855_v50 = vmul.f32 0.03125, %v2853_v47 }
0x1374   :  { %v2857_v51 = vadd.f32 1e-05, %v2855_v50 }
0x1376   :  { %10170 = vrsqrt.f32 %v2857_v51 }
0x137c   :  { %v10169_v18 = vpop.eup %10168 }
0x137d   :  { %v2860_v24 = vmul.f32 %v10169_v18, %v2844_v12 }
0x137f   :  { %v2868_v23 = vmul.f32 %v8366_v52, %v2860_v24 }
0x1380   :  { %v10171_v54 = vpop.eup %10170 }
0x1381   :  { %v2861_v59 = vmul.f32 %v10171_v54, %v2845_v22  ;;  %v11177_v43 = vadd.f32 %v8367_v60, %v2868_v23 }
0x1383   :  { %v2869_v55 = vmul.f32 %v8366_v52, %v2861_v59 }
0x1385   :  { %v11179_v21 = vadd.f32 %v8367_v60, %v2869_v55 }
0x1387   :  { %v2904_v0 = vpack.c.bf16 %v11179_v21, %v11177_v43 }
0x1389   :  { %9191 = vmatmul.mubr.msk.bf16.vlgmr.msra.gmra.mrb[72].mxu1 %vm445_vm5, %v2904_v0 }
0x138a   :  { %9215 = vmatpush3.bf16.msra.mxu1 %v10046_v63  ;;  %9218 = vmatprep.mubr.msk.bf16.mxu1 %vm10398_vm4, %v10397_v7 }
0x138b   :  { %9216 = vmatprep.subr.bf16.mxu1 %v10397_v7 }
0x138e   :  { %9217 = vmatpush3.bf16.msra.mxu1 %v10047_v16 }
0x138f   :  { %9222 = vmatprep.subr.bf16.mxu1 %v10397_v7 }
0x1391   :  { %9219 = vmatmul.mubr.msk.bf16.vlgmr.msra.gmra.mrb[76].mxu1 %vm445_vm5, %v3113_v62 }
0x1392   :  { %9224 = vmatprep.mubr.msk.bf16.mxu1 %vm10398_vm4, %v10397_v7 }
0x145c   :  { %v2960_v1 = vpop.f32.mrb[72].mxu1 }
0x145d   :  { %v2961_v57 = vadd.f32 %v8390_v46, %v2960_v1  ;;  %v9192_v26 = vpop.f32.mrb[73].mxu1  ;;  %v10407_v1 = vmov -1e+30  }
0x145e   :  { %v2963_v2 = vpop.f32.mrb[74].mxu1 }
0x145f   :  { %v2964_v3 = vadd.f32 %v8390_v46, %v2963_v2  ;;  %v9193_v8 = vpop.f32.mrb[75].mxu1  ;;  %v2967_v4 = vmax.f32 %v2961_v57, 0.0  ;;  %v11296_v57 = vsel %vm426_vm14, 0.0, %v10407_v1 }
0x1461   :  { %v2968_v6 = vmax.f32 %v2964_v3, 0.0 }
0x1463   :  { %v2969_v11 = vpack.c.bf16 %v2968_v6, %v2967_v4 }
0x1464   :  { %v3167_v15 = vpop.f32.mrb[76].mxu1 }
0x1465   :  { %9211 = vmatmul.mubr.bf16.vlgmr.msra.gmra.mrb[84].mxu0 %v2969_v11  ;;  %v9220_v20 = vpop.f32.mrb[77].mxu1  ;;  %v3199_v31 = vpack.c.bf16 %v3167_v15, %v3167_v15 }
0x1466   :  { %v3170_v25 = vpop.f32.mrb[78].mxu1  ;;  %9242 = vmatprep.mubr.msk.bf16.mxu0 %vm10398_vm4, %v10397_v7 }
0x1467   :  { %v9221_v28 = vpop.f32.mrb[79].mxu1  ;;  %v9881_v29 = vpack.i.bf16 %v3170_v25, %v3167_v15  ;;  %v3200_v30 = vpack.c.bf16 %v3170_v25, %v3170_v25 }
0x1469   :  { %9882 = vrot.lane.b32.xlu0 %v9881_v29, %s10401_s13  ;;  %9877 = vrot.lane.b32.xlu1 %v9881_v29, %s10400_s5 }
0x146d   :  { %9887 = vrot.lane.b32.xlu1 %v9881_v29, %s10399_s0  ;;  %3257 = vrot.lane.b32.xlu0 %v3200_v30, %s10402_s9 }
0x1471   :  { %3208 = vrot.lane.b32.xlu1 %v3199_v31, %s10402_s9 }
0x14db   :  { %v9883_v32 = vpop.permute.xlu0 %9882  ;;  %v9878_v10 = vpop.permute.xlu1 %9877 }
0x14dc   :  { %v9880_v12 = vunpack.i.h.bf16 %v9878_v10  ;;  %v9879_v5 = vunpack.i.l.bf16 %v9878_v10  ;;  %v9885_v22 = vunpack.i.h.bf16 %v9883_v32  ;;  %v9884_v13 = vunpack.i.l.bf16 %v9883_v32 }
0x14de   :  { %v11214_v56 = vpack.c.bf16 %v9880_v12, %v9880_v12  ;;  %v11216_v17 = vpack.c.bf16 %v9879_v5, %v9879_v5  ;;  %v11222_v33 = vpack.c.bf16 %v9885_v22, %v9885_v22  ;;  %v11224_v37 = vpack.c.bf16 %v9884_v13, %v9884_v13 }
0x14df   :  { %v9888_v19 = vpop.permute.xlu1 %9887  ;;  %v3258_v41 = vpop.permute.xlu0 %3257 }
0x14e0   :  { %3306 = vrot.lane.b32.xlu1 %v11216_v17, %s10402_s9  ;;  %3355 = vrot.lane.b32.xlu0 %v11214_v56, %s10402_s9  ;;  %v9890_v34 = vunpack.i.h.bf16 %v9888_v19  ;;  %v9889_v35 = vunpack.i.l.bf16 %v9888_v19  ;;  %v3263_v42 = vsel %vm526_vm7, %v3258_v41, 0 }
0x14e2   :  { %v11231_v39 = vpack.c.bf16 %v9890_v34, %v9890_v34  ;;  %v11233_v40 = vpack.c.bf16 %v9889_v35, %v9889_v35 }
0x14e3   :  { %v3209_v36 = vpop.permute.xlu1 %3208 }
0x14e4   :  { %v3214_v38 = vsel %vm526_vm7, %v3209_v36, 0  ;;  %3404 = vrot.lane.b32.xlu1 %v11224_v37, %s10402_s9  ;;  %3453 = vrot.lane.b32.xlu0 %v11222_v33, %s10402_s9 }
0x14e5   :  { %9223 = vmatpush3.bf16.xpose.msra.mxu1 %v3214_v38 }
0x14e6   :  { %9228 = vmatprep.subr.bf16.mxu1 %v10397_v7 }
0x14e8   :  { %3502 = vrot.lane.b32.xlu1 %v11233_v40, %s10402_s9  ;;  %3551 = vrot.lane.b32.xlu0 %v11231_v39, %s10402_s9 }
0x14ec   :  { %9225 = vmatmul.mubr.msk.bf16.vlgmr.msra.gmra.mrb[80].mxu1 %vm526_vm7, %v3199_v31  ;;  %3743 = vrot.lane.b32.xlu1 %v3200_v30, %s10403_s17 }
0x14ed   :  { %3695 = vrot.lane.b32.xlu0 %v3199_v31, %s10403_s17  ;;  %9229 = vmatpush3.bf16.xpose.msra.mxu1 %v3263_v42 }
0x14ee   :  { %9230 = vmatprep.mubr.msk.bf16.mxu1 %vm10398_vm4, %v10397_v7  ;;  %9234 = vmatprep.subr.bf16.mxu1 %v10397_v7 }
0x14f4   :  { %9231 = vmatmul.mubr.msk.bf16.vlgmr.msra.gmra.mrb[84].mxu1 %vm526_vm7, %v3200_v30 }
0x14f5   :  { %9236 = vmatprep.mubr.msk.bf16.mxu1 %vm10398_vm4, %v10397_v7 }
0x1538   :  { %v11250_v44 = vpop.f32.mrb[84].mxu0 }
0x1539   :  { %v9212_v47 = vpop.f32.mrb[85].mxu0 }
0x153a   :  { %v11252_v50 = vpop.f32.mrb[86].mxu0 }
0x153b   :  { %v9213_v51 = vpop.f32.mrb[87].mxu0 }
0x1552   :  { %v3307_v18 = vpop.permute.xlu1 %3306  ;;  %v3356_v24 = vpop.permute.xlu0 %3355 }
0x1553   :  { %v3312_v52 = vsel %vm526_vm7, %v3307_v18, 0  ;;  %v3361_v54 = vsel %vm526_vm7, %v3356_v24, 0 }
0x1554   :  { %9235 = vmatpush3.bf16.xpose.msra.mxu1 %v3312_v52  ;;  %9241 = vmatpush3.bf16.xpose.msra.mxu0 %v3361_v54 }
0x1555   :  { %9246 = vmatprep.subr.bf16.mxu1 %v10397_v7  ;;  %9252 = vmatprep.subr.bf16.mxu0 %v10397_v7 }
0x1556   :  { %v3405_v23 = vpop.permute.xlu1 %3404  ;;  %v3454_v59 = vpop.permute.xlu0 %3453 }
0x1557   :  { %v3410_v60 = vsel %vm526_vm7, %v3405_v23, 0  ;;  %v3459_v55 = vsel %vm526_vm7, %v3454_v59, 0 }
0x155a   :  { %v3503_v63 = vpop.permute.xlu1 %3502  ;;  %v3552_v0 = vpop.permute.xlu0 %3551 }
0x155b   :  { %9237 = vmatmul.mubr.msk.bf16.vlgmr.msra.gmra.mrb[88].mxu1 %vm526_vm7, %v11216_v17  ;;  %9243 = vmatmul.mubr.msk.bf16.vlgmr.msra.gmra.mrb[88].mxu0 %vm526_vm7, %v11214_v56  ;;  %v3508_v53 = vsel %vm526_vm7, %v3503_v63, 0  ;;  %v3557_v16 = vsel %vm526_vm7, %v3552_v0, 0 }
0x155c   :  { %9247 = vmatpush3.bf16.xpose.msra.mxu1 %v3410_v60  ;;  %9253 = vmatpush3.bf16.xpose.msra.mxu0 %v3459_v55 }
0x155d   :  { %9248 = vmatprep.mubr.msk.bf16.mxu1 %vm10398_vm4, %v10397_v7  ;;  %9254 = vmatprep.mubr.msk.bf16.mxu0 %vm10398_vm4, %v10397_v7 }
0x155e   :  { %9258 = vmatprep.subr.bf16.mxu1 %v10397_v7  ;;  %9264 = vmatprep.subr.bf16.mxu0 %v10397_v7  ;;  %v3744_v62 = vpop.permute.xlu1 %3743 }
0x155f   :  { %v3696_v14 = vpop.permute.xlu0 %3695  ;;  %v3749_v45 = vsel %vm1017_vm9, %v3744_v62, 0 }
0x1560   :  { %v3701_v46 = vsel %vm1017_vm9, %v3696_v14, 0 }
0x1563   :  { %9249 = vmatmul.mubr.msk.bf16.vlgmr.msra.gmra.mrb[92].mxu1 %vm526_vm7, %v11224_v37  ;;  %9255 = vmatmul.mubr.msk.bf16.vlgmr.msra.gmra.mrb[92].mxu0 %vm526_vm7, %v11222_v33 }
0x1564   :  { %9259 = vmatpush3.bf16.xpose.msra.mxu1 %v3508_v53  ;;  %9265 = vmatpush3.bf16.xpose.msra.mxu0 %v3557_v16 }
0x1565   :  { %9260 = vmatprep.mubr.msk.bf16.mxu1 %vm10398_vm4, %v10397_v7  ;;  %9266 = vmatprep.mubr.msk.bf16.mxu0 %vm10398_vm4, %v10397_v7 }
0x1566   :  { %9270 = vmatprep.subr.bf16.mxu1 %v10397_v7  ;;  %9276 = vmatprep.subr.bf16.mxu0 %v10397_v7 }
0x156b   :  { %9261 = vmatmul.mubr.msk.bf16.vlgmr.msra.gmra.mrb[96].mxu1 %vm526_vm7, %v11233_v40  ;;  %9267 = vmatmul.mubr.msk.bf16.vlgmr.msra.gmra.mrb[96].mxu0 %vm526_vm7, %v11231_v39 }
0x156c   :  { %9271 = vmatpush3.bf16.msra.mxu1 %v3701_v46  ;;  %9277 = vmatpush3.bf16.msra.mxu0 %v3749_v45 }
0x156d   :  { %9272 = vmatprep.mubr.msk.bf16.mxu1 %vm10398_vm4, %v10397_v7  ;;  %9278 = vmatprep.mubr.msk.bf16.mxu0 %vm10398_vm4, %v10397_v7 }
0x156e   :  { %9282 = vmatprep.subr.bf16.mxu1 %v10397_v7  ;;  %9288 = vmatprep.subr.bf16.mxu0 %v10397_v7 }
0x15bf   :  { %v3250_v26 = vpop.f32.mrb[80].mxu1 }
0x15c0   :  { %v3251_v2 = vadd.f32 %v3250_v26, %v11296_v57  ;;  %v9226_v3 = vpop.f32.mrb[81].mxu1 }
0x15c1   :  { %v3253_v8 = vpop.f32.mrb[82].mxu1 }
0x15c2   :  { %v9227_v4 = vpop.f32.mrb[83].mxu1  ;;  %v3599_v6 = vsel %vm526_vm7, %v3251_v2, -inf }
0x15c3   :  { %3600 = vmax.xlane.f32.xlu1 %v3599_v6 }
0x15c7   :  { %v3299_v11 = vpop.f32.mrb[84].mxu1 }
0x15c8   :  { %v3300_v15 = vadd.f32 %v3299_v11, %v11296_v57  ;;  %v9232_v20 = vpop.f32.mrb[85].mxu1 }
0x15c9   :  { %v3302_v25 = vpop.f32.mrb[86].mxu1 }
0x15ca   :  { %v9233_v28 = vpop.f32.mrb[87].mxu1  ;;  %v3602_v9 = vsel %vm526_vm7, %v3300_v15, -inf }
0x15cb   :  { %3603 = vmax.xlane.f32.xlu0 %v3602_v9 }
0x162e   :  { %v3348_v27 = vpop.f32.mrb[88].mxu1  ;;  %v3397_v29 = vpop.f32.mrb[88].mxu0 }
0x162f   :  { %v3349_v30 = vadd.f32 %v3348_v27, %v11296_v57  ;;  %v3398_v31 = vadd.f32 %v3397_v29, %v11296_v57  ;;  %v9238_v32 = vpop.f32.mrb[89].mxu1  ;;  %v9244_v10 = vpop.f32.mrb[89].mxu0 }
0x1630   :  { %v3351_v12 = vpop.f32.mrb[90].mxu1  ;;  %v3400_v5 = vpop.f32.mrb[90].mxu0 }
0x1631   :  { %v9239_v22 = vpop.f32.mrb[91].mxu1  ;;  %v9245_v13 = vpop.f32.mrb[91].mxu0  ;;  %v3605_v19 = vsel %vm526_vm7, %v3349_v30, -inf  ;;  %v3608_v34 = vsel %vm526_vm7, %v3398_v31, -inf }
0x1632   :  { %3606 = vmax.xlane.f32.xlu0 %v3605_v19  ;;  %3609 = vmax.xlane.f32.xlu1 %v3608_v34 }
0x1636   :  { %v3446_v35 = vpop.f32.mrb[92].mxu1  ;;  %v3495_v36 = vpop.f32.mrb[92].mxu0 }
0x1637   :  { %v11307_v38 = vadd.f32 %v3446_v35, %v11296_v57  ;;  %v3496_v41 = vadd.f32 %v3495_v36, %v11296_v57  ;;  %v9250_v42 = vpop.f32.mrb[93].mxu1  ;;  %v9256_v47 = vpop.f32.mrb[93].mxu0 }
0x1638   :  { %v3449_v51 = vpop.f32.mrb[94].mxu1  ;;  %v3498_v18 = vpop.f32.mrb[94].mxu0 }
0x1639   :  { %v9251_v24 = vpop.f32.mrb[95].mxu1  ;;  %v9257_v52 = vpop.f32.mrb[95].mxu0  ;;  %v3611_v54 = vsel %vm526_vm7, %v11307_v38, -inf  ;;  %v3614_v23 = vsel %vm526_vm7, %v3496_v41, -inf }
0x163a   :  { %3612 = vmax.xlane.f32.xlu0 %v3611_v54  ;;  %3615 = vmax.xlane.f32.xlu1 %v3614_v23 }
0x163e   :  { %v3544_v59 = vpop.f32.mrb[96].mxu1  ;;  %v3593_v60 = vpop.f32.mrb[96].mxu0 }
0x163f   :  { %v11314_v55 = vadd.f32 %v3544_v59, %v11296_v57  ;;  %v3594_v63 = vadd.f32 %v3593_v60, %v11296_v57  ;;  %v9262_v0 = vpop.f32.mrb[97].mxu1  ;;  %v9268_v53 = vpop.f32.mrb[97].mxu0 }
0x1640   :  { %v3547_v16 = vpop.f32.mrb[98].mxu1  ;;  %v3596_v62 = vpop.f32.mrb[98].mxu0 }
0x1641   :  { %v9263_v14 = vpop.f32.mrb[99].mxu1  ;;  %v9269_v45 = vpop.f32.mrb[99].mxu0  ;;  %v3617_v46 = vsel %vm526_vm7, %v11314_v55, -inf  ;;  %v3620_v1 = vsel %vm526_vm7, %v3594_v63, -inf }
0x1642   :  { %3618 = vmax.xlane.f32.xlu0 %v3617_v46  ;;  %3621 = vmax.xlane.f32.xlu1 %v3620_v1 }
0x1650   :  { %v3601_v26 = vpop.xlane.xlu1 %3600 }
0x1651   :  { %v3623_v8 = vsub.f32 %v3251_v2, %v3601_v26 }
0x1653   :  { %3791 = vrot.lane.b32.xlu1 %v11216_v17, %s10403_s17  ;;  %v3631_v6 = vmul.f32 1.442695, %v3623_v8 }
0x1655   :  { %10172 = vpow2.f32 %v3631_v6 }
0x1658   :  { %3839 = vrot.lane.b32.xlu0 %v11214_v56, %s10403_s17  ;;  %v3604_v3 = vpop.xlane.xlu0 %3603 }
0x1659   :  { %v3624_v4 = vsub.f32 %v3300_v15, %v3604_v3 }
0x165b   :  { %v3633_v11 = vmul.f32 1.442695, %v3624_v4 }
0x165d   :  { %10174 = vpow2.f32 %v3633_v11 }
0x165f   :  { %v10173_v20 = vpop.eup %10172 }
0x1660   :  { %v3647_v28 = vsel %vm526_vm7, %v10173_v20, 0.0 }
0x1667   :  { %v10175_v25 = vpop.eup %10174 }
0x1668   :  { %v3650_v9 = vsel %vm526_vm7, %v10175_v25, 0.0 }
0x1677   :  { %3648 = vadd.xlane.f32.xlu0 %v3647_v28  ;;  %3651 = vadd.xlane.f32.xlu1 %v3650_v9 }
0x1688   :  { %3887 = vrot.lane.b32.xlu1 %v11224_v37, %s10403_s17 }
0x16bf   :  { %v3607_v56 = vpop.xlane.xlu0 %3606  ;;  %v3610_v17 = vpop.xlane.xlu1 %3609 }
0x16c0   :  { %v3625_v27 = vsub.f32 %v3349_v30, %v3607_v56  ;;  %v3626_v2 = vsub.f32 %v3398_v31, %v3610_v17 }
0x16c2   :  { %v3635_v15 = vmul.f32 1.442695, %v3625_v27  ;;  %v3637_v29 = vmul.f32 1.442695, %v3626_v2 }
0x16c4   :  { %10176 = vpow2.f32 %v3635_v15 }
0x16c5   :  { %10178 = vpow2.f32 %v3637_v29 }
0x16c7   :  { %v3616_v32 = vpop.xlane.xlu1 %3615  ;;  %v3613_v42 = vpop.xlane.xlu0 %3612 }
0x16c8   :  { %v3628_v10 = vsub.f32 %v3496_v41, %v3616_v32  ;;  %v3627_v47 = vsub.f32 %v11307_v38, %v3613_v42 }
0x16ca   :  { %v3641_v12 = vmul.f32 1.442695, %v3628_v10  ;;  %v3639_v18 = vmul.f32 1.442695, %v3627_v47 }
0x16cc   :  { %10180 = vpow2.f32 %v3641_v12 }
0x16ce   :  { %v11328_v5 = vpop.eup %10176 }
0x16cf   :  { %v11330_v22 = vpop.eup %10178  ;;  %v3622_v13 = vpop.xlane.xlu1 %3621  ;;  %v3653_v37 = vsel %vm526_vm7, %v11328_v5, 0.0 }
0x16d0   :  { %v3630_v19 = vsub.f32 %v3594_v63, %v3622_v13  ;;  %3654 = vadd.xlane.f32.xlu0 %v3653_v37  ;;  %v3656_v30 = vsel %vm526_vm7, %v11330_v22, 0.0  ;;  %v3619_v51 = vpop.xlane.xlu0 %3618 }
0x16d1   :  { %3657 = vadd.xlane.f32.xlu1 %v3656_v30  ;;  %v3629_v24 = vsub.f32 %v11314_v55, %v3619_v51 }
0x16d2   :  { %v3645_v31 = vmul.f32 1.442695, %v3630_v19 }
0x16d3   :  { %v3643_v52 = vmul.f32 1.442695, %v3629_v24  ;;  %v3792_v23 = vpop.permute.xlu1 %3791 }
0x16d4   :  { %10182 = vpow2.f32 %v3645_v31  ;;  %v3840_v54 = vpop.permute.xlu0 %3839  ;;  %v3797_v45 = vsel %vm1017_vm9, %v3792_v23, 0 }
0x16d5   :  { %10184 = vpow2.f32 %v3639_v18  ;;  %v3845_v46 = vsel %vm1017_vm9, %v3840_v54, 0 }
0x16d6   :  { %v11336_v34 = vpop.eup %10180  ;;  %10186 = vpow2.f32 %v3643_v52 }
0x16d7   :  { %v3662_v35 = vsel %vm526_vm7, %v11336_v34, 0.0 }
0x16d8   :  { %3663 = vadd.xlane.f32.xlu1 %v3662_v35 }
0x16de   :  { %v11340_v36 = vpop.eup %10182 }
0x16df   :  { %v3668_v41 = vsel %vm526_vm7, %v11340_v36, 0.0  ;;  %v11350_v59 = vpop.eup %10184 }
0x16e0   :  { %3669 = vadd.xlane.f32.xlu1 %v3668_v41  ;;  %v11354_v38 = vpop.eup %10186 }
0x16e6   :  { %3935 = vrot.lane.b32.xlu0 %v11222_v33, %s10403_s17  ;;  %v3659_v33 = vsel %vm526_vm7, %v11350_v59, 0.0 }
0x16f1   :  { %3983 = vrot.lane.b32.xlu1 %v11233_v40, %s10403_s17  ;;  %v3665_v40 = vsel %vm526_vm7, %v11354_v38, 0.0 }
0x1704   :  { %v3649_v60 = vpop.xlane.xlu0 %3648  ;;  %v3652_v63 = vpop.xlane.xlu1 %3651 }
0x1705   :  { %10188 = vrcp.f32 %v3649_v60  ;;  %3660 = vadd.xlane.f32.xlu0 %v3659_v33 }
0x1706   :  { %10190 = vrcp.f32 %v3652_v63 }
0x1708   :  { %v3888_v1 = vpop.permute.xlu1 %3887 }
0x1709   :  { %3666 = vadd.xlane.f32.xlu0 %v3665_v40  ;;  %v3893_v56 = vsel %vm1017_vm9, %v3888_v1, 0 }
0x170f   :  { %v10189_v55 = vpop.eup %10188 }
0x1710   :  { %v10191_v0 = vpop.eup %10190  ;;  %v3679_v53 = vmul.f32 %v10189_v55, %v10173_v20 }
0x1711   :  { %v3680_v16 = vmul.f32 %v10191_v0, %v10175_v25 }
0x1712   :  { %v3687_v62 = vpack.c.bf16 %v3679_v53, %v3679_v53 }
0x1713   :  { %v3688_v14 = vpack.c.bf16 %v3680_v16, %v3680_v16 }
0x1714   :  { %9273 = vmatmul.mubr.msk.bf16.vlgmr.msra.gmra.mrb[100].mxu1 %vm526_vm7, %v3687_v62 }
0x1715   :  { %9279 = vmatmul.mubr.msk.bf16.vlgmr.msra.gmra.mrb[100].mxu0 %vm526_vm7, %v3688_v14  ;;  %9283 = vmatpush3.bf16.msra.mxu1 %v3797_v45 }
0x1716   :  { %9289 = vmatpush3.bf16.msra.mxu0 %v3845_v46  ;;  %9284 = vmatprep.mubr.msk.bf16.mxu1 %vm10398_vm4, %v10397_v7  ;;  %v10056_v46 = vld [vmem:[%s12252_s8] sm:$0xff]  }
0x1717   :  { %9290 = vmatprep.mubr.msk.bf16.mxu0 %vm10398_vm4, %v10397_v7  ;;  %9294 = vmatprep.subr.bf16.mxu1 %v10397_v7 }
0x1718   :  { %9300 = vmatprep.subr.bf16.mxu0 %v10397_v7 }
0x171f   :  { %4031 = vrot.lane.b32.xlu0 %v11231_v39, %s10403_s17 }
0x175d   :  { %v3655_v26 = vpop.xlane.xlu0 %3654 }
0x175e   :  { %10192 = vrcp.f32 %v3655_v26  ;;  %v3658_v3 = vpop.xlane.xlu1 %3657 }
0x175f   :  { %10194 = vrcp.f32 %v3658_v3 }
0x1761   :  { %v3936_v25 = vpop.permute.xlu0 %3935 }
0x1762   :  { %v3941_v39 = vsel %vm1017_vm9, %v3936_v25, 0 }
0x1765   :  { %v3664_v8 = vpop.xlane.xlu1 %3663 }
0x1766   :  { %10196 = vrcp.f32 %v3664_v8 }
0x1768   :  { %v10193_v4 = vpop.eup %10192 }
0x1769   :  { %v10195_v6 = vpop.eup %10194  ;;  %v3681_v11 = vmul.f32 %v10193_v4, %v11328_v5 }
0x176a   :  { %v3682_v20 = vmul.f32 %v10195_v6, %v11330_v22  ;;  %v10057_v6 = vld [vmem:[%s12252_s8 + $0x8] sm:$0xff]  }
0x176b   :  { %v3689_v28 = vpack.c.bf16 %v3681_v11, %v3681_v11 }
0x176c   :  { %v3690_v9 = vpack.c.bf16 %v3682_v20, %v3682_v20 }
0x176d   :  { %9285 = vmatmul.mubr.msk.bf16.vlgmr.msra.gmra.mrb[104].mxu1 %vm526_vm7, %v3689_v28  ;;  %v3670_v15 = vpop.xlane.xlu1 %3669 }
0x176e   :  { %9291 = vmatmul.mubr.msk.bf16.vlgmr.msra.gmra.mrb[104].mxu0 %vm526_vm7, %v3690_v9  ;;  %9295 = vmatpush3.bf16.msra.mxu1 %v3893_v56  ;;  %10198 = vrcp.f32 %v3670_v15 }
0x176f   :  { %9301 = vmatpush3.bf16.msra.mxu0 %v3941_v39  ;;  %9302 = vmatprep.mubr.msk.bf16.mxu0 %vm10398_vm4, %v10397_v7 }
0x1770   :  { %9312 = vmatprep.subr.bf16.mxu0 %v10397_v7  ;;  %9296 = vmatprep.mubr.msk.bf16.mxu1 %vm10398_vm4, %v10397_v7  ;;  %v10197_v17 = vpop.eup %10196 }
0x1771   :  { %9306 = vmatprep.subr.bf16.mxu1 %v10397_v7  ;;  %v3684_v27 = vmul.f32 %v10197_v17, %v11336_v34  ;;  %v3984_v30 = vpop.permute.xlu1 %3983 }
0x1772   :  { %v3989_v35 = vsel %vm1017_vm9, %v3984_v30, 0 }
0x1773   :  { %v3692_v2 = vpack.c.bf16 %v3684_v27, %v3684_v27 }
0x1776   :  { %9303 = vmatmul.mubr.msk.bf16.vlgmr.msra.gmra.mrb[108].mxu0 %vm526_vm7, %v3692_v2  ;;  %v8394_v2 = vld [vmem:[%s10498_s27 + $0x1] ss:$0 sm:$0xff]  ;;  %s12258_s27 = sld [smem:[#allocation15_spill]] }
0x1777   :  { %9314 = vmatprep.mubr.msk.bf16.mxu0 %vm10398_vm4, %v10397_v7  ;;  %v3059_v15 = vadd.f32 %v8394_v2, %v11250_v44 }
0x1778   :  { %v10199_v32 = vpop.eup %10198 }
0x1779   :  { %v3686_v12 = vmul.f32 %v10199_v32, %v11340_v36 }
0x177b   :  { %v3694_v37 = vpack.c.bf16 %v3686_v12, %v3686_v12 }
0x1792   :  { %v3661_v29 = vpop.xlane.xlu0 %3660 }
0x1793   :  { %10200 = vrcp.f32 %v3661_v29  ;;  %v3065_v29 = vadd.f32 %v3059_v15, %v11177_v43 }
0x1795   :  { %v3071_v32 = vsel %vm445_vm5, %v3065_v29, 0.0 }
0x1796   :  { %v3667_v10 = vpop.xlane.xlu0 %3666 }
0x1797   :  { %10202 = vrcp.f32 %v3667_v10  ;;  %v3062_v10 = vadd.f32 %v8394_v2, %v11252_v50 }
0x1799   :  { %v3066_v12 = vadd.f32 %v3062_v10, %v11179_v21  ;;  %v8405_v10 = vld [vmem:[%s12248_s2 + $0x1] ss:$0 sm:$0xff] }
0x179a   :  { %v4032_v5 = vpop.permute.xlu0 %4031 }
0x179b   :  { %v4037_v22 = vsel %vm1017_vm9, %v4032_v5, 0  ;;  %v3074_v5 = vsel %vm445_vm5, %v3066_v12, 0.0 }
0x179c   :  { %9313 = vmatpush3.bf16.msra.mxu0 %v4037_v22 }
0x179d   :  { %v10201_v13 = vpop.eup %10200  ;;  %9326 = vmatprep.subr.bf16.mxu0 %v10397_v7 }
0x179e   :  { %v3683_v19 = vmul.f32 %v10201_v13, %v11350_v59 }
0x179f   :  { %9315 = vmatmul.mubr.msk.bf16.vlgmr.msra.gmra.mrb[112].mxu0 %vm526_vm7, %v3694_v37 }
0x17a0   :  { %v3691_v31 = vpack.c.bf16 %v3683_v19, %v3683_v19  ;;  %9330 = vmatprep.mubr.msk.bf16.mxu0 %vm10398_vm4, %v10397_v7 }
0x17a1   :  { %v10203_v34 = vpop.eup %10202 }
0x17a2   :  { %9297 = vmatmul.mubr.msk.bf16.vlgmr.msra.gmra.mrb[108].mxu1 %vm526_vm7, %v3691_v31  ;;  %v3685_v36 = vmul.f32 %v10203_v34, %v11354_v38 }
0x17a3   :  { %9307 = vmatpush3.bf16.msra.mxu1 %v3989_v35  ;;  %9308 = vmatprep.mubr.msk.bf16.mxu1 %vm10398_vm4, %v10397_v7 }
0x17a4   :  { %9318 = vmatprep.subr.bf16.mxu1 %v10397_v7  ;;  %v3693_v41 = vpack.c.bf16 %v3685_v36, %v3685_v36 }
0x17aa   :  { %9309 = vmatmul.mubr.msk.bf16.vlgmr.msra.gmra.mrb[112].mxu1 %vm526_vm7, %v3693_v41 }
0x17ab   :  { %9322 = vmatprep.mubr.msk.bf16.mxu1 %vm10398_vm4, %v10397_v7  ;;  %9319 = vmatpush3.bf16.msra.mxu1 %v10056_v46 }
0x17ac   :  { %9320 = vmatprep.subr.bf16.mxu1 %v10397_v7 }
0x17af   :  { %9321 = vmatpush3.bf16.msra.mxu1 %v10057_v6 }
0x17b0   :  { %9334 = vmatprep.subr.bf16.mxu1 %v10397_v7 }
0x17e7   :  { %v3737_v42 = vpop.f32.mrb[100].mxu1 }
0x17e8   :  { %v3785_v47 = vpop.f32.mrb[100].mxu0  ;;  %v9274_v51 = vpop.f32.mrb[101].mxu1 }
0x17e9   :  { %v9280_v18 = vpop.f32.mrb[101].mxu0  ;;  %v3740_v24 = vpop.f32.mrb[102].mxu1 }
0x17ea   :  { %v3788_v52 = vpop.f32.mrb[102].mxu0  ;;  %v9275_v54 = vpop.f32.mrb[103].mxu1 }
0x17eb   :  { %v9281_v23 = vpop.f32.mrb[103].mxu0 }
0x1840   :  { %v3833_v59 = vpop.f32.mrb[104].mxu1 }
0x1841   :  { %v3881_v60 = vpop.f32.mrb[104].mxu0  ;;  %v9286_v63 = vpop.f32.mrb[105].mxu1 }
0x1842   :  { %v9891_v33 = vpack.i.bf16 %v3881_v60, %v3833_v59  ;;  %v9292_v38 = vpop.f32.mrb[105].mxu0  ;;  %v3836_v40 = vpop.f32.mrb[106].mxu1  ;;  %v8426_v59 = vld [vmem:[%s12253_s14] ss:$0 sm:$0xff] }
0x1843   :  { %v3884_v55 = vpop.f32.mrb[106].mxu0  ;;  %v9287_v0 = vpop.f32.mrb[107].mxu1 }
0x1844   :  { %9892 = vrot.lane.b32.xlu1 %v9891_v33, %s10404_s21  ;;  %v9293_v53 = vpop.f32.mrb[107].mxu0 }
0x1849   :  { %v3977_v16 = vpop.f32.mrb[108].mxu0 }
0x184a   :  { %v9304_v62 = vpop.f32.mrb[109].mxu0 }
0x184b   :  { %v3980_v14 = vpop.f32.mrb[110].mxu0 }
0x184c   :  { %v9305_v45 = vpop.f32.mrb[111].mxu0 }
0x1872   :  { %v4073_v1 = vpop.f32.mrb[112].mxu0 }
0x1873   :  { %v9316_v26 = vpop.f32.mrb[113].mxu0 }
0x1874   :  { %v4076_v3 = vpop.f32.mrb[114].mxu0  ;;  %v10058_v26 = vld [vmem:[%s12254_s19] sm:$0xff]  }
0x1875   :  { %v3929_v8 = vpop.f32.mrb[108].mxu1  ;;  %v9317_v4 = vpop.f32.mrb[115].mxu0  ;;  %v10059_v3 = vld [vmem:[%s12254_s19 + $0x8] sm:$0xff]  }
0x1876   :  { %v9896_v11 = vpack.i.bf16 %v3977_v16, %v3929_v8  ;;  %v9298_v20 = vpop.f32.mrb[109].mxu1 }
0x1877   :  { %v3932_v25 = vpop.f32.mrb[110].mxu1 }
0x1878   :  { %v9299_v28 = vpop.f32.mrb[111].mxu1  ;;  %9897 = vrot.lane.b32.xlu0 %v9896_v11, %s10405_s28 }
0x187d   :  { %v4025_v9 = vpop.f32.mrb[112].mxu1 }
0x187e   :  { %v9901_v56 = vpack.i.bf16 %v4073_v1, %v4025_v9  ;;  %v9310_v39 = vpop.f32.mrb[113].mxu1 }
0x187f   :  { %v4028_v17 = vpop.f32.mrb[114].mxu1 }
0x1880   :  { %v9311_v27 = vpop.f32.mrb[115].mxu1  ;;  %9902 = vrot.lane.b32.xlu1 %v9901_v56, %s10406_s1 }
0x1897   :  { %3072 = vadd.xlane.f32.xlu0 %v3071_v32 }
0x18a4   :  { %3075 = vadd.xlane.f32.xlu1 %v3074_v5 }
0x18b6   :  { %v9893_v22 = vpop.permute.xlu1 %9892 }
0x18b7   :  { %v9895_v37 = vunpack.i.h.bf16 %v9893_v22  ;;  %v9894_v19 = vunpack.i.l.bf16 %v9893_v22 }
0x18b9   :  { %v4104_v44 = vsel %vm526_vm7, %v3785_v47, %v9895_v37  ;;  %v4103_v43 = vsel %vm526_vm7, %v3737_v42, %v9894_v19 }
0x18ea   :  { %v9898_v13 = vpop.permute.xlu0 %9897 }
0x18eb   :  { %v9900_v30 = vunpack.i.h.bf16 %v9898_v13  ;;  %v9899_v31 = vunpack.i.l.bf16 %v9898_v13  ;;  %v8406_v13 = vld [vmem:[%s12249_s7 + $0x1] ss:$0 sm:$0xff] }
0x18ed   :  { %v4106_v50 = vsel %vm1423_vm12, %v4104_v44, %v9900_v30  ;;  %v4105_v21 = vsel %vm1423_vm12, %v4103_v43, %v9899_v31  ;;  %v10061_v44 = vld [vmem:[%s12255_s6 + $0x8] sm:$0xff]  }
0x18f2   :  { %v9903_v34 = vpop.permute.xlu1 %9902 }
0x18f3   :  { %v9905_v35 = vunpack.i.h.bf16 %v9903_v34  ;;  %v9904_v36 = vunpack.i.l.bf16 %v9903_v34  ;;  %v10060_v34 = vld [vmem:[%s12255_s6] sm:$0xff]  }
0x18f4   :  { %9327 = vmatpush3.bf16.msra.mxu0 %v10060_v34 }
0x18f5   :  { %v4108_v41 = vsel %vm1426_vm13, %v4106_v50, %v9905_v35  ;;  %v4107_v51 = vsel %vm1426_vm13, %v4105_v21, %v9904_v36  ;;  %9328 = vmatprep.subr.bf16.mxu0 %v10397_v7 }
0x18f6   :  { %v4109_v18 = vpack.c.bf16 %v4108_v41, %v4107_v51 }
0x18f8   :  { %9323 = vmatmul.mubr.msk.bf16.vlgmr.msra.gmra.mrb[116].mxu1 %vm445_vm5, %v4109_v18  ;;  %9329 = vmatpush3.bf16.msra.mxu0 %v10061_v44 }
0x18f9   :  { %9338 = vmatprep.mubr.msk.bf16.mxu1 %vm10398_vm4, %v10397_v7  ;;  %9335 = vmatpush3.bf16.msra.mxu1 %v10058_v26 }
0x18fa   :  { %9336 = vmatprep.subr.bf16.mxu1 %v10397_v7  ;;  %9342 = vmatprep.subr.bf16.mxu0 %v10397_v7 }
0x18fd   :  { %9337 = vmatpush3.bf16.msra.mxu1 %v10059_v3 }
0x18fe   :  { %9348 = vmatprep.subr.bf16.mxu1 %v10397_v7 }
0x1924   :  { %v3073_v47 = vpop.xlane.xlu0 %3072 }
0x1925   :  { %v3077_v24 = vmul.f32 0.03125, %v3073_v47  ;;  %v8430_v47 = vld [vmem:[%s12256_s12] ss:$0 sm:$0xff] }
0x1927   :  { %v3079_v42 = vsub.f32 %v3065_v29, %v3077_v24 }
0x1929   :  { %v3081_v52 = vmul.f32 %v3079_v42, %v3079_v42 }
0x192b   :  { %v3083_v54 = vsel %vm445_vm5, %v3081_v52, 0.0 }
0x192c   :  { %3084 = vadd.xlane.f32.xlu1 %v3083_v54  ;;  %v8431_v54 = vld [vmem:[%s12257_s20] ss:$0 sm:$0xff] }
0x1931   :  { %v3076_v23 = vpop.xlane.xlu1 %3075 }
0x1932   :  { %v3078_v63 = vmul.f32 0.03125, %v3076_v23 }
0x1934   :  { %v3080_v16 = vsub.f32 %v3066_v12, %v3078_v63 }
0x1936   :  { %v3082_v46 = vmul.f32 %v3080_v16, %v3080_v16 }
0x1938   :  { %v3086_v1 = vsel %vm445_vm5, %v3082_v46, 0.0 }
0x19cb   :  { %v4165_v60 = vpop.f32.mrb[116].mxu1 }
0x19cc   :  { %v4166_v33 = vadd.f32 %v8426_v59, %v4165_v60  ;;  %v9324_v38 = vpop.f32.mrb[117].mxu1 }
0x19cd   :  { %v4168_v40 = vpop.f32.mrb[118].mxu1 }
0x19ce   :  { %v4172_v55 = vadd.f32 %v4166_v33, %v11193_v61  ;;  %v4169_v0 = vadd.f32 %v8426_v59, %v4168_v40  ;;  %v9325_v53 = vpop.f32.mrb[119].mxu1  ;;  %v3085_v61 = vpop.xlane.xlu1 %3084 }
0x19d0   :  { %v4173_v62 = vadd.f32 %v4169_v0, %v11190_v58  ;;  %v4176_v14 = vsel %vm445_vm5, %v4172_v55, 0.0  ;;  %v3089_v58 = vmul.f32 0.03125, %v3085_v61 }
0x19d1   :  { %4177 = vadd.xlane.f32.xlu0 %v4176_v14 }
0x19d2   :  { %v4179_v45 = vsel %vm445_vm5, %v4173_v62, 0.0  ;;  %v3091_v6 = vadd.f32 1e-05, %v3089_v58 }
0x19d4   :  { %10204 = vrsqrt.f32 %v3091_v6 }
0x19d5   :  { %4180 = vadd.xlane.f32.xlu0 %v4179_v45 }
0x19d9   :  { %3087 = vadd.xlane.f32.xlu0 %v3086_v1 }
0x19de   :  { %v10205_v29 = vpop.eup %10204 }
0x19df   :  { %v3095_v32 = vmul.f32 %v10205_v29, %v3079_v42 }
0x19e1   :  { %v3103_v5 = vmul.f32 %v8405_v10, %v3095_v32 }
0x19e3   :  { %v3111_v19 = vadd.f32 %v8406_v13, %v3103_v5 }
0x1a5e   :  { %v4178_v8 = vpop.xlane.xlu0 %4177 }
0x1a5f   :  { %v4182_v4 = vmul.f32 0.03125, %v4178_v8 }
0x1a61   :  { %v4184_v11 = vsub.f32 %v4172_v55, %v4182_v4 }
0x1a62   :  { %v4181_v20 = vpop.xlane.xlu0 %4180 }
0x1a63   :  { %v4183_v25 = vmul.f32 0.03125, %v4181_v20  ;;  %v4186_v28 = vmul.f32 %v4184_v11, %v4184_v11 }
0x1a65   :  { %v4185_v9 = vsub.f32 %v4173_v62, %v4183_v25  ;;  %v4188_v56 = vsel %vm445_vm5, %v4186_v28, 0.0 }
0x1a66   :  { %4189 = vadd.xlane.f32.xlu1 %v4188_v56  ;;  %v3088_v39 = vpop.xlane.xlu0 %3087 }
0x1a67   :  { %v3090_v17 = vmul.f32 0.03125, %v3088_v39  ;;  %v4187_v27 = vmul.f32 %v4185_v9, %v4185_v9 }
0x1a69   :  { %v3092_v2 = vadd.f32 1e-05, %v3090_v17  ;;  %v4191_v15 = vsel %vm445_vm5, %v4187_v27, 0.0 }
0x1a6a   :  { %4192 = vadd.xlane.f32.xlu0 %v4191_v15 }
0x1a6b   :  { %10206 = vrsqrt.f32 %v3092_v2 }
0x1a75   :  { %v10207_v12 = vpop.eup %10206 }
0x1a76   :  { %v3096_v22 = vmul.f32 %v10207_v12, %v3080_v16 }
0x1a78   :  { %v3104_v37 = vmul.f32 %v8405_v10, %v3096_v22 }
0x1a7a   :  { %v3112_v30 = vadd.f32 %v8406_v13, %v3104_v37 }
0x1a7c   :  { %v11440_v31 = vpack.c.bf16 %v3112_v30, %v3111_v19 }
0x1a7e   :  { %9339 = vmatmul.mubr.msk.bf16.vlgmr.msra.gmra.mrb[120].mxu1 %vm445_vm5, %v11440_v31 }
0x1a7f   :  { %9350 = vmatprep.mubr.msk.bf16.mxu1 %vm10398_vm4, %v10397_v7 }
0x1af3   :  { %v4190_v43 = vpop.xlane.xlu1 %4189 }
0x1af4   :  { %v4194_v35 = vmul.f32 0.03125, %v4190_v43 }
0x1af6   :  { %v4196_v36 = vadd.f32 1e-05, %v4194_v35 }
0x1af7   :  { %v4193_v50 = vpop.xlane.xlu0 %4192 }
0x1af8   :  { %10208 = vrsqrt.f32 %v4196_v36  ;;  %v4195_v21 = vmul.f32 0.03125, %v4193_v50 }
0x1afa   :  { %v4197_v41 = vadd.f32 1e-05, %v4195_v21 }
0x1afc   :  { %10210 = vrsqrt.f32 %v4197_v41 }
0x1b02   :  { %v10209_v51 = vpop.eup %10208 }
0x1b03   :  { %v4200_v18 = vmul.f32 %v10209_v51, %v4184_v11 }
0x1b05   :  { %v4208_v42 = vmul.f32 %v8430_v47, %v4200_v18 }
0x1b06   :  { %v10211_v24 = vpop.eup %10210 }
0x1b07   :  { %v4201_v52 = vmul.f32 %v10211_v24, %v4185_v9  ;;  %v11452_v59 = vadd.f32 %v8431_v54, %v4208_v42 }
0x1b09   :  { %v4209_v23 = vmul.f32 %v8430_v47, %v4201_v52 }
0x1b0b   :  { %v11454_v60 = vadd.f32 %v8431_v54, %v4209_v23 }
0x1b0d   :  { %v4218_v63 = vpack.c.bf16 %v11454_v60, %v11452_v59 }
0x1b0f   :  { %9331 = vmatmul.mubr.msk.bf16.vlgmr.msra.gmra.mrb[116].mxu0 %vm445_vm5, %v4218_v63 }
0x1b10   :  { %9344 = vmatprep.mubr.msk.bf16.mxu0 %vm10398_vm4, %v10397_v7 }
0x1b51   :  { %v4333_v33 = vpop.f32.mrb[120].mxu1 }
0x1b52   :  { %v9340_v38 = vpop.f32.mrb[121].mxu1  ;;  %v4393_v40 = vpack.c.bf16 %v4333_v33, %v4333_v33 }
0x1b53   :  { %v4336_v55 = vpop.f32.mrb[122].mxu1 }
0x1b54   :  { %v9926_v0 = vpack.i.bf16 %v4336_v55, %v4333_v33  ;;  %v9341_v53 = vpop.f32.mrb[123].mxu1  ;;  %v4405_v16 = vsel %vm526_vm7, %v4393_v40, 0  ;;  %v11462_v62 = vpack.c.bf16 %v4336_v55, %v4336_v55 }
0x1b55   :  { %9343 = vmatpush3.bf16.xpose.msra.mxu0 %v4405_v16 }
0x1b56   :  { %9907 = vrot.lane.b32.xlu1 %v9926_v0, %s10400_s5  ;;  %9354 = vmatprep.subr.bf16.mxu0 %v10397_v7  ;;  %v4451_v14 = vsel %vm526_vm7, %v11462_v62, 0 }
0x1b57   :  { %9349 = vmatpush3.bf16.xpose.msra.mxu1 %v4451_v14 }
0x1b58   :  { %9360 = vmatprep.subr.bf16.mxu1 %v10397_v7 }
0x1b5a   :  { %9917 = vrot.lane.b32.xlu1 %v9926_v0, %s10401_s13 }
0x1bc8   :  { %v9908_v45 = vpop.permute.xlu1 %9907 }
0x1bc9   :  { %v9909_v46 = vunpack.i.l.bf16 %v9908_v45  ;;  %v9910_v1 = vunpack.i.h.bf16 %v9908_v45 }
0x1bcb   :  { %v11470_v26 = vpack.c.bf16 %v9909_v46, %v9909_v46  ;;  %v11472_v8 = vpack.c.bf16 %v9910_v1, %v9910_v1 }
0x1bcc   :  { %v9918_v9 = vpop.permute.xlu1 %9917 }
0x1bcd   :  { %v4497_v6 = vsel %vm526_vm7, %v11470_v26, 0  ;;  %v4543_v28 = vsel %vm526_vm7, %v11472_v8, 0  ;;  %v9920_v56 = vunpack.i.h.bf16 %v9918_v9  ;;  %v9919_v39 = vunpack.i.l.bf16 %v9918_v9 }
0x1bcf   :  { %v11491_v27 = vpack.c.bf16 %v9920_v56, %v9920_v56  ;;  %v11493_v2 = vpack.c.bf16 %v9919_v39, %v9919_v39 }
0x1bd1   :  { %v4589_v37 = vsel %vm526_vm7, %v11493_v2, 0  ;;  %v4635_v19 = vsel %vm526_vm7, %v11491_v27, 0 }
0x1be2   :  { %v4272_v3 = vpop.f32.mrb[116].mxu0 }
0x1be3   :  { %v4365_v61 = vpack.c.bf16 %v4272_v3, %v4272_v3  ;;  %v9332_v58 = vpop.f32.mrb[117].mxu0 }
0x1be4   :  { %v4275_v4 = vpop.f32.mrb[118].mxu0 }
0x1be5   :  { %v9931_v11 = vpack.i.bf16 %v4275_v4, %v4272_v3  ;;  %v4366_v20 = vpack.c.bf16 %v4275_v4, %v4275_v4  ;;  %v9333_v25 = vpop.f32.mrb[119].mxu0  ;;  %9345 = vmatmul.mubr.msk.bf16.vlgmr.msra.gmra.mrb[120].mxu0 %vm526_vm7, %v4365_v61 }
0x1be6   :  { %9355 = vmatpush3.bf16.xpose.msra.mxu0 %v4497_v6  ;;  %9356 = vmatprep.mubr.msk.bf16.mxu0 %vm10398_vm4, %v10397_v7 }
0x1be7   :  { %9922 = vrot.lane.b32.xlu1 %v9931_v11, %s10401_s13  ;;  %9912 = vrot.lane.b32.xlu0 %v9931_v11, %s10400_s5 }
0x1be8   :  { %9351 = vmatmul.mubr.msk.bf16.vlgmr.msra.gmra.mrb[124].mxu1 %vm526_vm7, %v4366_v20  ;;  %9366 = vmatprep.subr.bf16.mxu0 %v10397_v7 }
0x1be9   :  { %9361 = vmatpush3.bf16.xpose.msra.mxu1 %v4543_v28  ;;  %9362 = vmatprep.mubr.msk.bf16.mxu1 %vm10398_vm4, %v10397_v7 }
0x1bea   :  { %9372 = vmatprep.subr.bf16.mxu1 %v10397_v7 }
0x1beb   :  { %9932 = vrot.lane.b32.xlu1 %v9931_v11, %s10399_s0  ;;  %9927 = vrot.lane.b32.xlu0 %v9926_v0, %s10399_s0 }
0x1bef   :  { %4866 = vrot.lane.b32.xlu1 %v4393_v40, %s10402_s9 }
0x1c59   :  { %v9913_v17 = vpop.permute.xlu0 %9912  ;;  %v9923_v12 = vpop.permute.xlu1 %9922 }
0x1c5a   :  { %v9915_v15 = vunpack.i.h.bf16 %v9913_v17  ;;  %v9914_v29 = vunpack.i.l.bf16 %v9913_v17  ;;  %v9925_v30 = vunpack.i.h.bf16 %v9923_v12  ;;  %v9924_v34 = vunpack.i.l.bf16 %v9923_v12 }
0x1c5c   :  { %v4368_v32 = vpack.c.bf16 %v9915_v15, %v9915_v15  ;;  %v4367_v10 = vpack.c.bf16 %v9914_v29, %v9914_v29  ;;  %v4370_v35 = vpack.c.bf16 %v9925_v30, %v9925_v30  ;;  %v4369_v36 = vpack.c.bf16 %v9924_v34, %v9924_v34 }
0x1c5d   :  { %v9928_v5 = vpop.permute.xlu0 %9927  ;;  %v9933_v50 = vpop.permute.xlu1 %9932 }
0x1c5e   :  { %v9930_v22 = vunpack.i.h.bf16 %v9928_v5  ;;  %v9929_v13 = vunpack.i.l.bf16 %v9928_v5  ;;  %9357 = vmatmul.mubr.msk.bf16.vlgmr.msra.gmra.mrb[124].mxu0 %vm526_vm7, %v4367_v10  ;;  %9363 = vmatmul.mubr.msk.bf16.vlgmr.msra.gmra.mrb[128].mxu1 %vm526_vm7, %v4368_v32  ;;  %v9935_v51 = vunpack.i.h.bf16 %v9933_v50  ;;  %v9934_v18 = vunpack.i.l.bf16 %v9933_v50 }
0x1c5f   :  { %9367 = vmatpush3.bf16.xpose.msra.mxu0 %v4589_v37  ;;  %9373 = vmatpush3.bf16.xpose.msra.mxu1 %v4635_v19 }
0x1c60   :  { %9368 = vmatprep.mubr.msk.bf16.mxu0 %vm10398_vm4, %v10397_v7  ;;  %9374 = vmatprep.mubr.msk.bf16.mxu1 %vm10398_vm4, %v10397_v7  ;;  %v11506_v44 = vpack.c.bf16 %v9930_v22, %v9930_v22  ;;  %v11508_v43 = vpack.c.bf16 %v9929_v13, %v9929_v13  ;;  %v4372_v24 = vpack.c.bf16 %v9935_v51, %v9935_v51 }
0x1c61   :  { %9378 = vmatprep.subr.bf16.mxu0 %v10397_v7  ;;  %9384 = vmatprep.subr.bf16.mxu1 %v10397_v7  ;;  %v4867_v47 = vpop.permute.xlu1 %4866  ;;  %v4371_v42 = vpack.c.bf16 %v9934_v18, %v9934_v18 }
0x1c62   :  { %v4681_v21 = vsel %vm526_vm7, %v11508_v43, 0  ;;  %v4727_v41 = vsel %vm526_vm7, %v11506_v44, 0  ;;  %v4872_v52 = vsel %vm1017_vm9, %v4867_v47, 0 }
0x1c66   :  { %9369 = vmatmul.mubr.msk.bf16.vlgmr.msra.gmra.mrb[128].mxu0 %vm526_vm7, %v4369_v36  ;;  %9375 = vmatmul.mubr.msk.bf16.vlgmr.msra.gmra.mrb[132].mxu1 %vm526_vm7, %v4370_v35 }
0x1c67   :  { %9379 = vmatpush3.bf16.xpose.msra.mxu0 %v4681_v21  ;;  %9385 = vmatpush3.bf16.xpose.msra.mxu1 %v4727_v41 }
0x1c68   :  { %9380 = vmatprep.mubr.msk.bf16.mxu0 %vm10398_vm4, %v10397_v7  ;;  %9386 = vmatprep.mubr.msk.bf16.mxu1 %vm10398_vm4, %v10397_v7 }
0x1c69   :  { %9390 = vmatprep.subr.bf16.mxu0 %v10397_v7  ;;  %9396 = vmatprep.subr.bf16.mxu1 %v10397_v7 }
0x1c6e   :  { %9381 = vmatmul.mubr.msk.bf16.vlgmr.msra.gmra.mrb[132].mxu0 %vm526_vm7, %v4371_v42  ;;  %9387 = vmatmul.mubr.msk.bf16.vlgmr.msra.gmra.mrb[136].mxu1 %vm526_vm7, %v4372_v24 }
0x1c6f   :  { %9391 = vmatpush3.bf16.msra.mxu0 %v4872_v52  ;;  %9398 = vmatprep.mubr.msk.bf16.mxu1 %vm10398_vm4, %v10397_v7 }
0x1c70   :  { %9392 = vmatprep.mubr.msk.bf16.mxu0 %vm10398_vm4, %v10397_v7  ;;  %9402 = vmatprep.subr.bf16.mxu0 %v10397_v7 }
0x1cb8   :  { %v4441_v54 = vpop.f32.mrb[120].mxu0 }
0x1cb9   :  { %v11532_v23 = vadd.f32 %v4441_v54, %v10774_v49  ;;  %v9346_v63 = vpop.f32.mrb[121].mxu0 }
0x1cba   :  { %v4444_v33 = vpop.f32.mrb[122].mxu0 }
0x1cbb   :  { %v4487_v38 = vpop.f32.mrb[124].mxu1  ;;  %v9347_v40 = vpop.f32.mrb[123].mxu0  ;;  %v4769_v55 = vsel %vm526_vm7, %v11532_v23, -inf }
0x1cbc   :  { %v4488_v0 = vadd.f32 %v4487_v38, %v10771_v48  ;;  %v9352_v53 = vpop.f32.mrb[125].mxu1  ;;  %4770 = vmax.xlane.f32.xlu0 %v4769_v55 }
0x1cbd   :  { %v4490_v16 = vpop.f32.mrb[126].mxu1 }
0x1cbe   :  { %v9353_v14 = vpop.f32.mrb[127].mxu1  ;;  %v4772_v45 = vsel %vm526_vm7, %v4488_v0, -inf }
0x1cbf   :  { %4773 = vmax.xlane.f32.xlu1 %v4772_v45 }
0x1d31   :  { %v4533_v46 = vpop.f32.mrb[124].mxu0  ;;  %v4579_v1 = vpop.f32.mrb[128].mxu1 }
0x1d32   :  { %v4534_v3 = vadd.f32 %v4533_v46, %v10774_v49  ;;  %v9358_v61 = vpop.f32.mrb[125].mxu0  ;;  %v9364_v58 = vpop.f32.mrb[129].mxu1  ;;  %v4580_v11 = vadd.f32 %v4579_v1, %v10771_v48 }
0x1d33   :  { %v4536_v4 = vpop.f32.mrb[126].mxu0  ;;  %v4582_v6 = vpop.f32.mrb[130].mxu1 }
0x1d34   :  { %v9359_v20 = vpop.f32.mrb[127].mxu0  ;;  %v9365_v25 = vpop.f32.mrb[131].mxu1  ;;  %v4775_v28 = vsel %vm526_vm7, %v4534_v3, -inf  ;;  %v4778_v9 = vsel %vm526_vm7, %v4580_v11, -inf }
0x1d35   :  { %4776 = vmax.xlane.f32.xlu0 %v4775_v28 }
0x1d39   :  { %v4671_v56 = vpop.f32.mrb[132].mxu1  ;;  %4779 = vmax.xlane.f32.xlu0 %v4778_v9  ;;  %v4625_v39 = vpop.f32.mrb[128].mxu0 }
0x1d3a   :  { %v11543_v17 = vadd.f32 %v4671_v56, %v10771_v48  ;;  %v11546_v15 = vadd.f32 %v4625_v39, %v10774_v49  ;;  %v9370_v29 = vpop.f32.mrb[129].mxu0  ;;  %v9376_v32 = vpop.f32.mrb[133].mxu1 }
0x1d3b   :  { %v4628_v10 = vpop.f32.mrb[130].mxu0  ;;  %v4674_v12 = vpop.f32.mrb[134].mxu1 }
0x1d3c   :  { %v9371_v5 = vpop.f32.mrb[131].mxu0  ;;  %v9377_v22 = vpop.f32.mrb[135].mxu1  ;;  %v4784_v13 = vsel %vm526_vm7, %v11543_v17, -inf  ;;  %v4781_v37 = vsel %vm526_vm7, %v11546_v15, -inf }
0x1d3d   :  { %4785 = vmax.xlane.f32.xlu0 %v4784_v13  ;;  %4782 = vmax.xlane.f32.xlu1 %v4781_v37 }
0x1d41   :  { %v4717_v19 = vpop.f32.mrb[132].mxu0  ;;  %v4763_v30 = vpop.f32.mrb[136].mxu1 }
0x1d42   :  { %v4718_v34 = vadd.f32 %v4717_v19, %v10774_v49  ;;  %v4764_v35 = vadd.f32 %v4763_v30, %v10771_v48  ;;  %v9382_v36 = vpop.f32.mrb[133].mxu0  ;;  %v9388_v50 = vpop.f32.mrb[137].mxu1 }
0x1d43   :  { %v4720_v21 = vpop.f32.mrb[134].mxu0  ;;  %v4766_v41 = vpop.f32.mrb[138].mxu1 }
0x1d44   :  { %v9383_v51 = vpop.f32.mrb[135].mxu0  ;;  %v9389_v18 = vpop.f32.mrb[139].mxu1  ;;  %v4790_v47 = vsel %vm526_vm7, %v4764_v35, -inf  ;;  %v4787_v24 = vsel %vm526_vm7, %v4718_v34, -inf }
0x1d45   :  { %4791 = vmax.xlane.f32.xlu0 %v4790_v47  ;;  %4788 = vmax.xlane.f32.xlu1 %v4787_v24 }
0x1d49   :  { %v4771_v54 = vpop.xlane.xlu0 %4770 }
0x1d4a   :  { %v4793_v63 = vsub.f32 %v11532_v23, %v4771_v54 }
0x1d4c   :  { %v4774_v42 = vpop.xlane.xlu1 %4773  ;;  %v4801_v38 = vmul.f32 1.442695, %v4793_v63 }
0x1d4d   :  { %v4794_v52 = vsub.f32 %v4488_v0, %v4774_v42 }
0x1d4f   :  { %v4803_v33 = vmul.f32 1.442695, %v4794_v52 }
0x1d51   :  { %10212 = vpow2.f32 %v4803_v33 }
0x1d52   :  { %10214 = vpow2.f32 %v4801_v38 }
0x1d56   :  { %4964 = vrot.lane.b32.xlu1 %v11470_v26, %s10402_s9 }
0x1d5a   :  { %5013 = vrot.lane.b32.xlu1 %v11472_v8, %s10402_s9 }
0x1d5b   :  { %4915 = vrot.lane.b32.xlu0 %v11462_v62, %s10402_s9  ;;  %v10213_v40 = vpop.eup %10212 }
0x1d5c   :  { %v4820_v55 = vsel %vm526_vm7, %v10213_v40, 0.0  ;;  %v11564_v53 = vpop.eup %10214 }
0x1d5d   :  { %v4817_v26 = vsel %vm526_vm7, %v11564_v53, 0.0 }
0x1d7a   :  { %4821 = vadd.xlane.f32.xlu0 %v4820_v55 }
0x1d7e   :  { %4818 = vadd.xlane.f32.xlu1 %v4817_v26 }
0x1dc2   :  { %v4777_v62 = vpop.xlane.xlu0 %4776 }
0x1dc3   :  { %v4795_v8 = vsub.f32 %v4534_v3, %v4777_v62 }
0x1dc5   :  { %v4805_v0 = vmul.f32 1.442695, %v4795_v8 }
0x1dc6   :  { %v4780_v16 = vpop.xlane.xlu0 %4779 }
0x1dc7   :  { %10216 = vpow2.f32 %v4805_v0  ;;  %v4796_v23 = vsub.f32 %v4580_v11, %v4780_v16 }
0x1dc9   :  { %v4807_v14 = vmul.f32 1.442695, %v4796_v23 }
0x1dca   :  { %v4786_v45 = vpop.xlane.xlu0 %4785  ;;  %v4783_v11 = vpop.xlane.xlu1 %4782 }
0x1dcb   :  { %10218 = vpow2.f32 %v4807_v14  ;;  %v4797_v20 = vsub.f32 %v11546_v15, %v4783_v11  ;;  %v4798_v28 = vsub.f32 %v11543_v17, %v4786_v45 }
0x1dcd   :  { %v4809_v9 = vmul.f32 1.442695, %v4797_v20  ;;  %v4811_v39 = vmul.f32 1.442695, %v4798_v28 }
0x1dcf   :  { %10220 = vpow2.f32 %v4809_v9 }
0x1dd0   :  { %10222 = vpow2.f32 %v4811_v39 }
0x1dd1   :  { %v11568_v46 = vpop.eup %10216 }
0x1dd2   :  { %v4792_v1 = vpop.xlane.xlu0 %4791  ;;  %v4823_v61 = vsel %vm526_vm7, %v11568_v46, 0.0  ;;  %v4789_v25 = vpop.xlane.xlu1 %4788 }
0x1dd3   :  { %4824 = vadd.xlane.f32.xlu1 %v4823_v61  ;;  %v4799_v56 = vsub.f32 %v4718_v34, %v4789_v25  ;;  %v4800_v29 = vsub.f32 %v4764_v35, %v4792_v1 }
0x1dd5   :  { %v11572_v58 = vpop.eup %10218  ;;  %v4813_v32 = vmul.f32 1.442695, %v4799_v56  ;;  %v4815_v10 = vmul.f32 1.442695, %v4800_v29 }
0x1dd6   :  { %v4916_v4 = vpop.permute.xlu0 %4915  ;;  %v4826_v3 = vsel %vm526_vm7, %v11572_v58, 0.0  ;;  %v4965_v12 = vpop.permute.xlu1 %4964 }
0x1dd7   :  { %v4921_v6 = vsel %vm1017_vm9, %v4916_v4, 0  ;;  %4827 = vadd.xlane.f32.xlu0 %v4826_v3  ;;  %10224 = vpow2.f32 %v4813_v32  ;;  %v4970_v47 = vsel %vm1017_vm9, %v4965_v12, 0 }
0x1dd8   :  { %9397 = vmatpush3.bf16.msra.mxu1 %v4921_v6  ;;  %10226 = vpow2.f32 %v4815_v10 }
0x1dd9   :  { %9408 = vmatprep.subr.bf16.mxu1 %v10397_v7 }
0x1dda   :  { %v5014_v5 = vpop.permute.xlu1 %5013 }
0x1ddb   :  { %v5019_v41 = vsel %vm1017_vm9, %v5014_v5, 0 }
0x1de4   :  { %5111 = vrot.lane.b32.xlu1 %v11491_v27, %s10402_s9  ;;  %v11584_v27 = vpop.eup %10220 }
0x1de5   :  { %v4829_v17 = vsel %vm526_vm7, %v11584_v27, 0.0 }
0x1ded   :  { %5062 = vrot.lane.b32.xlu0 %v11493_v2, %s10402_s9  ;;  %v11586_v2 = vpop.eup %10222 }
0x1dee   :  { %v11590_v22 = vpop.eup %10224  ;;  %v4832_v37 = vsel %vm526_vm7, %v11586_v2, 0.0 }
0x1def   :  { %v4835_v19 = vsel %vm526_vm7, %v11590_v22, 0.0  ;;  %v11596_v30 = vpop.eup %10226 }
0x1df0   :  { %v4838_v34 = vsel %vm526_vm7, %v11596_v30, 0.0 }
0x1e07   :  { %v4822_v15 = vpop.xlane.xlu0 %4821 }
0x1e08   :  { %10228 = vrcp.f32 %v4822_v15  ;;  %4830 = vadd.xlane.f32.xlu1 %v4829_v17 }
0x1e0b   :  { %v4819_v13 = vpop.xlane.xlu1 %4818 }
0x1e0c   :  { %10230 = vrcp.f32 %v4819_v13  ;;  %4833 = vadd.xlane.f32.xlu0 %v4832_v37  ;;  %4836 = vadd.xlane.f32.xlu1 %v4835_v19 }
0x1e10   :  { %4839 = vadd.xlane.f32.xlu0 %v4838_v34 }
0x1e12   :  { %v10229_v35 = vpop.eup %10228 }
0x1e13   :  { %v4850_v36 = vmul.f32 %v10229_v35, %v10213_v40  ;;  %v10062_v35 = vld [vmem:[%s12258_s27] sm:$0xff]  }
0x1e15   :  { %v4858_v50 = vpack.c.bf16 %v4850_v36, %v4850_v36 }
0x1e16   :  { %v10231_v21 = vpop.eup %10230 }
0x1e17   :  { %9399 = vmatmul.mubr.msk.bf16.vlgmr.msra.gmra.mrb[140].mxu1 %vm526_vm7, %v4858_v50  ;;  %v4849_v51 = vmul.f32 %v10231_v21, %v11564_v53 }
0x1e18   :  { %9409 = vmatpush3.bf16.msra.mxu1 %v5019_v41  ;;  %9410 = vmatprep.mubr.msk.bf16.mxu1 %vm10398_vm4, %v10397_v7 }
0x1e19   :  { %v4857_v18 = vpack.c.bf16 %v4849_v51, %v4849_v51  ;;  %9420 = vmatprep.subr.bf16.mxu1 %v10397_v7 }
0x1e1b   :  { %9393 = vmatmul.mubr.msk.bf16.vlgmr.msra.gmra.mrb[136].mxu0 %vm526_vm7, %v4857_v18  ;;  %v10063_v18 = vld [vmem:[%s12258_s27 + $0x8] sm:$0xff]  }
0x1e1c   :  { %9403 = vmatpush3.bf16.msra.mxu0 %v4970_v47  ;;  %9404 = vmatprep.mubr.msk.bf16.mxu0 %vm10398_vm4, %v10397_v7 }
0x1e1d   :  { %5209 = vrot.lane.b32.xlu1 %v11506_v44, %s10402_s9  ;;  %9414 = vmatprep.subr.bf16.mxu0 %v10397_v7 }
0x1e26   :  { %5160 = vrot.lane.b32.xlu0 %v11508_v43, %s10402_s9 }
0x1e60   :  { %v4825_v24 = vpop.xlane.xlu1 %4824 }
0x1e61   :  { %10232 = vrcp.f32 %v4825_v24 }
0x1e64   :  { %v4828_v42 = vpop.xlane.xlu0 %4827  ;;  %v5112_v55 = vpop.permute.xlu1 %5111 }
0x1e65   :  { %10234 = vrcp.f32 %v4828_v42  ;;  %v5117_v53 = vsel %vm1017_vm9, %v5112_v55, 0 }
0x1e68   :  { %v5063_v63 = vpop.permute.xlu0 %5062 }
0x1e69   :  { %v5068_v40 = vsel %vm1017_vm9, %v5063_v63, 0 }
0x1e6b   :  { %v10233_v52 = vpop.eup %10232 }
0x1e6c   :  { %v4851_v54 = vmul.f32 %v10233_v52, %v11568_v46 }
0x1e6e   :  { %v4859_v33 = vpack.c.bf16 %v4851_v54, %v4851_v54 }
0x1e6f   :  { %v10235_v38 = vpop.eup %10234 }
0x1e70   :  { %9405 = vmatmul.mubr.msk.bf16.vlgmr.msra.gmra.mrb[140].mxu0 %vm526_vm7, %v4859_v33  ;;  %v4852_v44 = vmul.f32 %v10235_v38, %v11572_v58 }
0x1e71   :  { %9415 = vmatpush3.bf16.msra.mxu0 %v5068_v40  ;;  %9416 = vmatprep.mubr.msk.bf16.mxu0 %vm10398_vm4, %v10397_v7 }
0x1e72   :  { %v4860_v43 = vpack.c.bf16 %v4852_v44, %v4852_v44  ;;  %9426 = vmatprep.subr.bf16.mxu0 %v10397_v7 }
0x1e74   :  { %9411 = vmatmul.mubr.msk.bf16.vlgmr.msra.gmra.mrb[144].mxu1 %vm526_vm7, %v4860_v43 }
0x1e75   :  { %9421 = vmatpush3.bf16.msra.mxu1 %v5117_v53  ;;  %9422 = vmatprep.mubr.msk.bf16.mxu1 %vm10398_vm4, %v10397_v7 }
0x1e76   :  { %9432 = vmatprep.subr.bf16.mxu1 %v10397_v7 }
0x1e95   :  { %v4831_v26 = vpop.xlane.xlu1 %4830 }
0x1e96   :  { %10236 = vrcp.f32 %v4831_v26 }
0x1e99   :  { %v4834_v62 = vpop.xlane.xlu0 %4833  ;;  %v4837_v8 = vpop.xlane.xlu1 %4836 }
0x1e9a   :  { %10238 = vrcp.f32 %v4834_v62 }
0x1e9b   :  { %10240 = vrcp.f32 %v4837_v8 }
0x1e9d   :  { %v4840_v0 = vpop.xlane.xlu0 %4839  ;;  %v5210_v4 = vpop.permute.xlu1 %5209 }
0x1e9e   :  { %10242 = vrcp.f32 %v4840_v0  ;;  %v5215_v20 = vsel %vm1017_vm9, %v5210_v4, 0 }
0x1ea0   :  { %v10237_v16 = vpop.eup %10236 }
0x1ea1   :  { %v4853_v23 = vmul.f32 %v10237_v16, %v11584_v27  ;;  %v5161_v14 = vpop.permute.xlu0 %5160 }
0x1ea2   :  { %v5166_v61 = vsel %vm1017_vm9, %v5161_v14, 0 }
0x1ea3   :  { %v4861_v45 = vpack.c.bf16 %v4853_v23, %v4853_v23 }
0x1ea4   :  { %v10239_v46 = vpop.eup %10238 }
0x1ea5   :  { %v10241_v1 = vpop.eup %10240  ;;  %9417 = vmatmul.mubr.msk.bf16.vlgmr.msra.gmra.mrb[144].mxu0 %vm526_vm7, %v4861_v45  ;;  %v4854_v58 = vmul.f32 %v10239_v46, %v11586_v2 }
0x1ea6   :  { %9427 = vmatpush3.bf16.msra.mxu0 %v5166_v61  ;;  %9428 = vmatprep.mubr.msk.bf16.mxu0 %vm10398_vm4, %v10397_v7  ;;  %v4855_v3 = vmul.f32 %v10241_v1, %v11590_v22 }
0x1ea7   :  { %v4862_v6 = vpack.c.bf16 %v4854_v58, %v4854_v58  ;;  %9438 = vmatprep.subr.bf16.mxu0 %v10397_v7 }
0x1ea8   :  { %v10243_v11 = vpop.eup %10242  ;;  %v4863_v25 = vpack.c.bf16 %v4855_v3, %v4855_v3 }
0x1ea9   :  { %9423 = vmatmul.mubr.msk.bf16.vlgmr.msra.gmra.mrb[148].mxu1 %vm526_vm7, %v4862_v6  ;;  %v4856_v28 = vmul.f32 %v10243_v11, %v11596_v30 }
0x1eaa   :  { %9433 = vmatpush3.bf16.msra.mxu1 %v5215_v20  ;;  %9434 = vmatprep.mubr.msk.bf16.mxu1 %vm10398_vm4, %v10397_v7  ;;  %v8454_v20 = vld [vmem:[%s12259_s10] ss:$0 sm:$0xff] }
0x1eab   :  { %9446 = vmatprep.subr.bf16.mxu1 %v10397_v7  ;;  %v4864_v9 = vpack.c.bf16 %v4856_v28, %v4856_v28 }
0x1ead   :  { %9429 = vmatmul.mubr.msk.bf16.vlgmr.msra.gmra.mrb[148].mxu0 %vm526_vm7, %v4863_v25 }
0x1eae   :  { %9442 = vmatprep.mubr.msk.bf16.mxu0 %vm10398_vm4, %v10397_v7  ;;  %9439 = vmatpush3.bf16.msra.mxu0 %v10062_v35  ;;  %v10066_v35 = vld [vmem:[%s12261_s15] sm:$0xff]  }
0x1eaf   :  { %9440 = vmatprep.subr.bf16.mxu0 %v10397_v7 }
0x1eb1   :  { %9435 = vmatmul.mubr.msk.bf16.vlgmr.msra.gmra.mrb[152].mxu1 %vm526_vm7, %v4864_v9 }
0x1eb2   :  { %9450 = vmatprep.mubr.msk.bf16.mxu1 %vm10398_vm4, %v10397_v7  ;;  %9441 = vmatpush3.bf16.msra.mxu0 %v10063_v18 }
0x1eb3   :  { %9454 = vmatprep.subr.bf16.mxu0 %v10397_v7 }
0x1eea   :  { %v4957_v56 = vpop.f32.mrb[140].mxu1 }
0x1eeb   :  { %v9400_v39 = vpop.f32.mrb[141].mxu1 }
0x1eec   :  { %v4960_v29 = vpop.f32.mrb[142].mxu1 }
0x1eed   :  { %v9401_v32 = vpop.f32.mrb[143].mxu1 }
0x1eee   :  { %v4908_v10 = vpop.f32.mrb[136].mxu0 }
0x1eef   :  { %v9394_v12 = vpop.f32.mrb[137].mxu0 }
0x1ef0   :  { %v4911_v27 = vpop.f32.mrb[138].mxu0 }
0x1ef1   :  { %v9395_v2 = vpop.f32.mrb[139].mxu0 }
0x1f43   :  { %v5006_v5 = vpop.f32.mrb[140].mxu0 }
0x1f44   :  { %v9406_v15 = vpop.f32.mrb[141].mxu0 }
0x1f45   :  { %v5009_v17 = vpop.f32.mrb[142].mxu0 }
0x1f46   :  { %v9407_v22 = vpop.f32.mrb[143].mxu0 }
0x1f47   :  { %v5055_v13 = vpop.f32.mrb[144].mxu1 }
0x1f48   :  { %v9936_v37 = vpack.i.bf16 %v5055_v13, %v5006_v5  ;;  %v9412_v19 = vpop.f32.mrb[145].mxu1 }
0x1f49   :  { %v5058_v30 = vpop.f32.mrb[146].mxu1 }
0x1f4a   :  { %v9413_v34 = vpop.f32.mrb[147].mxu1  ;;  %9937 = vrot.lane.b32.xlu0 %v9936_v37, %s10404_s21  ;;  %v10064_v30 = vld [vmem:[%s12260_s11] sm:$0xff]  }
0x1f4b   :  { %9447 = vmatpush3.bf16.msra.mxu1 %v10064_v30  ;;  %v10065_v34 = vld [vmem:[%s12260_s11 + $0x8] sm:$0xff]   ;;  %v10075_v30 = vld [vmem:[%s12250_s29 + $0x18] sm:$0xff]  }
0x1f4c   :  { %9448 = vmatprep.subr.bf16.mxu1 %v10397_v7 }
0x1f4f   :  { %9449 = vmatpush3.bf16.msra.mxu1 %v10065_v34 }
0x1f50   :  { %9474 = vmatprep.subr.bf16.mxu1 %v10397_v7 }
0x1f78   :  { %v5104_v36 = vpop.f32.mrb[144].mxu0 }
0x1f79   :  { %v9418_v50 = vpop.f32.mrb[145].mxu0 }
0x1f7a   :  { %v5107_v21 = vpop.f32.mrb[146].mxu0  ;;  %v10068_v50 = vld [vmem:[%s12261_s15 + $0x10] sm:$0xff]  }
0x1f7b   :  { %v9419_v41 = vpop.f32.mrb[147].mxu0  ;;  %v10069_v21 = vld [vmem:[%s12261_s15 + $0x18] sm:$0xff]  }
0x1f7c   :  { %v5153_v51 = vpop.f32.mrb[148].mxu1  ;;  %v10070_v41 = vld [vmem:[%s12261_s15 + $0x20] sm:$0xff]  }
0x1f7d   :  { %v9941_v47 = vpack.i.bf16 %v5153_v51, %v5104_v36  ;;  %v9424_v24 = vpop.f32.mrb[149].mxu1  ;;  %v10067_v36 = vld [vmem:[%s12261_s15 + $0x8] sm:$0xff]  }
0x1f7e   :  { %v5156_v42 = vpop.f32.mrb[150].mxu1  ;;  %v10071_v51 = vld [vmem:[%s12261_s15 + $0x28] sm:$0xff]  }
0x1f7f   :  { %v9425_v52 = vpop.f32.mrb[151].mxu1  ;;  %9942 = vrot.lane.b32.xlu1 %v9941_v47, %s10405_s28 }
0x1f80   :  { %v5202_v54 = vpop.f32.mrb[148].mxu0 }
0x1f81   :  { %v9430_v63 = vpop.f32.mrb[149].mxu0 }
0x1f82   :  { %v5205_v33 = vpop.f32.mrb[150].mxu0 }
0x1f83   :  { %v9431_v38 = vpop.f32.mrb[151].mxu0  ;;  %v8458_v33 = vld [vmem:[%s12262_s16] ss:$0 sm:$0xff] }
0x1f84   :  { %v5251_v40 = vpop.f32.mrb[152].mxu1 }
0x1f85   :  { %v9946_v44 = vpack.i.bf16 %v5251_v40, %v5202_v54  ;;  %v9436_v55 = vpop.f32.mrb[153].mxu1 }
0x1f86   :  { %v5254_v43 = vpop.f32.mrb[154].mxu1 }
0x1f87   :  { %v9437_v53 = vpop.f32.mrb[155].mxu1  ;;  %9947 = vrot.lane.b32.xlu0 %v9946_v44, %s10406_s1  ;;  %v8459_v43 = vld [vmem:[%s12263_s18] ss:$0 sm:$0xff] }
0x1fbc   :  { %v9938_v26 = vpop.permute.xlu0 %9937 }
0x1fbd   :  { %v9940_v8 = vunpack.i.h.bf16 %v9938_v26  ;;  %v9939_v0 = vunpack.i.l.bf16 %v9938_v26 }
0x1fbf   :  { %v5282_v45 = vsel %vm526_vm7, %v4957_v56, %v9940_v8  ;;  %v5281_v46 = vsel %vm526_vm7, %v4908_v10, %v9939_v0  ;;  %v10072_v0 = vld [vmem:[%s12261_s15 + $0x30] sm:$0xff]  }
0x1ff1   :  { %v9943_v62 = vpop.permute.xlu1 %9942 }
0x1ff2   :  { %v9945_v16 = vunpack.i.h.bf16 %v9943_v62  ;;  %v9944_v23 = vunpack.i.l.bf16 %v9943_v62 }
0x1ff4   :  { %v5284_v58 = vsel %vm1423_vm12, %v5282_v45, %v9945_v16  ;;  %v5283_v4 = vsel %vm1423_vm12, %v5281_v46, %v9944_v23  ;;  %v10073_v16 = vld [vmem:[%s12261_s15 + $0x38] sm:$0xff]   ;;  %v8460_v23 = vld [vmem:[%s12264_s22] ss:$0 sm:$0xff] }
0x1ff9   :  { %v9948_v14 = vpop.permute.xlu0 %9947 }
0x1ffa   :  { %v9950_v1 = vunpack.i.h.bf16 %v9948_v14  ;;  %v9949_v61 = vunpack.i.l.bf16 %v9948_v14 }
0x1ffc   :  { %v5286_v3 = vsel %vm1426_vm13, %v5284_v58, %v9950_v1  ;;  %v5285_v6 = vsel %vm1426_vm13, %v5283_v4, %v9949_v61 }
0x1ffd   :  { %v5287_v11 = vpack.c.bf16 %v5286_v3, %v5285_v6 }
0x1fff   :  { %9443 = vmatmul.mubr.msk.bf16.vlgmr.msra.gmra.mrb[152].mxu0 %vm445_vm5, %v5287_v11  ;;  %v8464_v11 = vld [vmem:[%s10583_s4] ss:$0 sm:$0xff] }
0x2000   :  { %9470 = vmatprep.mubr.msk.bf16.mxu0 %vm10398_vm4, %v10397_v7  ;;  %9455 = vmatpush3.bf16.msra.mxu0 %v10066_v35 }
0x2001   :  { %9456 = vmatprep.subr.bf16.mxu0 %v10397_v7 }
0x2004   :  { %9457 = vmatpush3.bf16.msra.mxu0 %v10067_v36 }
0x2005   :  { %9458 = vmatprep.subr.bf16.mxu0 %v10397_v7 }
0x2008   :  { %9459 = vmatpush3.bf16.msra.mxu0 %v10068_v50 }
0x2009   :  { %9460 = vmatprep.subr.bf16.mxu0 %v10397_v7 }
0x200c   :  { %9461 = vmatpush3.bf16.msra.mxu0 %v10069_v21 }
0x200d   :  { %9462 = vmatprep.subr.bf16.mxu0 %v10397_v7 }
0x2010   :  { %9463 = vmatpush3.bf16.msra.mxu0 %v10070_v41 }
0x2011   :  { %9464 = vmatprep.subr.bf16.mxu0 %v10397_v7 }
0x2014   :  { %9465 = vmatpush3.bf16.msra.mxu0 %v10071_v51 }
0x2015   :  { %9466 = vmatprep.subr.bf16.mxu0 %v10397_v7 }
0x2018   :  { %9467 = vmatpush3.bf16.msra.mxu0 %v10072_v0 }
0x2019   :  { %9468 = vmatprep.subr.bf16.mxu0 %v10397_v7 }
0x201c   :  { %9469 = vmatpush3.bf16.msra.mxu0 %v10073_v16 }
0x201d   :  { %9500 = vmatprep.subr.bf16.mxu0 %v10397_v7 }
0x20d2   :  { %v5343_v25 = vpop.f32.mrb[152].mxu0 }
0x20d3   :  { %v5344_v28 = vadd.f32 %v8454_v20, %v5343_v25  ;;  %v9444_v9 = vpop.f32.mrb[153].mxu0 }
0x20d4   :  { %v5346_v56 = vpop.f32.mrb[154].mxu0 }
0x20d5   :  { %v5350_v39 = vadd.f32 %v5344_v28, %v11452_v59  ;;  %v5347_v29 = vadd.f32 %v8454_v20, %v5346_v56  ;;  %v9445_v32 = vpop.f32.mrb[155].mxu0 }
0x20d7   :  { %v5351_v10 = vadd.f32 %v5347_v29, %v11454_v60  ;;  %v5354_v12 = vsel %vm445_vm5, %v5350_v39, 0.0 }
0x20d8   :  { %5355 = vadd.xlane.f32.xlu1 %v5354_v12 }
0x20d9   :  { %v5357_v27 = vsel %vm445_vm5, %v5351_v10, 0.0 }
0x20da   :  { %5358 = vadd.xlane.f32.xlu0 %v5357_v27 }
0x2165   :  { %v5356_v2 = vpop.xlane.xlu1 %5355 }
0x2166   :  { %v5360_v5 = vmul.f32 0.03125, %v5356_v2 }
0x2167   :  { %v5359_v15 = vpop.xlane.xlu0 %5358 }
0x2168   :  { %v5362_v17 = vsub.f32 %v5350_v39, %v5360_v5  ;;  %v5361_v22 = vmul.f32 0.03125, %v5359_v15 }
0x216a   :  { %v5363_v59 = vsub.f32 %v5351_v10, %v5361_v22  ;;  %v5364_v13 = vmul.f32 %v5362_v17, %v5362_v17 }
0x216c   :  { %v5366_v37 = vsel %vm445_vm5, %v5364_v13, 0.0  ;;  %v5365_v60 = vmul.f32 %v5363_v59, %v5363_v59 }
0x216d   :  { %5367 = vadd.xlane.f32.xlu0 %v5366_v37 }
0x216e   :  { %v5369_v19 = vsel %vm445_vm5, %v5365_v60, 0.0 }
0x216f   :  { %5370 = vadd.xlane.f32.xlu1 %v5369_v19  ;;  %v10074_v19 = vld [vmem:[%s12250_s29 + $0x10] sm:$0xff]  }
0x21fa   :  { %v5368_v18 = vpop.xlane.xlu0 %5367 }
0x21fb   :  { %v5372_v47 = vmul.f32 0.03125, %v5368_v18  ;;  %v8473_v18 = vld [vmem:[%s12265_s23] ss:$0 sm:$0xff] }
0x21fc   :  { %v5371_v24 = vpop.xlane.xlu1 %5370 }
0x21fd   :  { %v5374_v42 = vadd.f32 1e-05, %v5372_v47  ;;  %v5373_v52 = vmul.f32 0.03125, %v5371_v24 }
0x21ff   :  { %10244 = vrsqrt.f32 %v5374_v42  ;;  %v5375_v54 = vadd.f32 1e-05, %v5373_v52 }
0x2201   :  { %10246 = vrsqrt.f32 %v5375_v54  ;;  %v8474_v54 = vld [vmem:[%s12266_s26] ss:$0 sm:$0xff] }
0x2209   :  { %v10245_v63 = vpop.eup %10244 }
0x220a   :  { %v5378_v38 = vmul.f32 %v10245_v63, %v5362_v17 }
0x220b   :  { %v10247_v40 = vpop.eup %10246 }
0x220c   :  { %v5386_v44 = vmul.f32 %v8458_v33, %v5378_v38  ;;  %v5379_v55 = vmul.f32 %v10247_v40, %v5363_v59 }
0x220e   :  { %v5387_v53 = vmul.f32 %v8458_v33, %v5379_v55  ;;  %v5394_v26 = vadd.f32 %v8459_v43, %v5386_v44 }
0x2210   :  { %v5395_v62 = vadd.f32 %v8459_v43, %v5387_v53 }
0x2212   :  { %v5418_v8 = vpack.c.bf16 %v5395_v62, %v5394_v26 }
0x2214   :  { %9451 = vmatmul.mubr.msk.bf16.vlgmr.msra.gmra.mrb[156].mxu1 %vm445_vm5, %v5418_v8 }
0x2215   :  { %9478 = vmatprep.mubr.msk.bf16.mxu1 %vm10398_vm4, %v10397_v7  ;;  %9475 = vmatpush3.bf16.msra.mxu1 %v10074_v19 }
0x2216   :  { %9476 = vmatprep.subr.bf16.mxu1 %v10397_v7 }
0x2219   :  { %9477 = vmatpush3.bf16.msra.mxu1 %v10075_v30 }
0x221a   :  { %9482 = vmatprep.subr.bf16.mxu1 %v10397_v7 }
0x22e7   :  { %v5474_v14 = vpop.f32.mrb[156].mxu1 }
0x22e8   :  { %v5475_v45 = vadd.f32 %v8460_v23, %v5474_v14  ;;  %v9452_v46 = vpop.f32.mrb[157].mxu1 }
0x22e9   :  { %v5477_v1 = vpop.f32.mrb[158].mxu1 }
0x22ea   :  { %v5478_v61 = vadd.f32 %v8460_v23, %v5477_v1  ;;  %v9453_v58 = vpop.f32.mrb[159].mxu1  ;;  %v5481_v4 = vmax.f32 %v5475_v45, 0.0 }
0x22ec   :  { %v5482_v3 = vmax.f32 %v5478_v61, 0.0 }
0x22ee   :  { %v5483_v6 = vpack.c.bf16 %v5482_v3, %v5481_v4 }
0x22f0   :  { %9471 = vmatmul.mubr.bf16.vlgmr.msra.gmra.mrb[156].mxu0 %v5483_v6 }
0x22f1   :  { %9502 = vmatprep.mubr.msk.bf16.mxu0 %vm10398_vm4, %v10397_v7 }
0x23c3   :  { %v5572_v20 = vpop.f32.mrb[156].mxu0 }
0x23c4   :  { %v5573_v25 = vadd.f32 %v8464_v11, %v5572_v20  ;;  %v9472_v28 = vpop.f32.mrb[157].mxu0 }
0x23c5   :  { %v5575_v9 = vpop.f32.mrb[158].mxu0 }
0x23c6   :  { %v5579_v56 = vadd.f32 %v5573_v25, %v5394_v26  ;;  %v5576_v39 = vadd.f32 %v8464_v11, %v5575_v9  ;;  %v9473_v29 = vpop.f32.mrb[159].mxu0 }
0x23c8   :  { %v5580_v32 = vadd.f32 %v5576_v39, %v5395_v62  ;;  %v5583_v10 = vsel %vm445_vm5, %v5579_v56, 0.0 }
0x23c9   :  { %5584 = vadd.xlane.f32.xlu0 %v5583_v10 }
0x23ca   :  { %v5586_v12 = vsel %vm445_vm5, %v5580_v32, 0.0 }
0x23cb   :  { %5587 = vadd.xlane.f32.xlu1 %v5586_v12 }
0x2456   :  { %v5585_v27 = vpop.xlane.xlu0 %5584 }
0x2457   :  { %v5589_v2 = vmul.f32 0.03125, %v5585_v27 }
0x2458   :  { %v5588_v5 = vpop.xlane.xlu1 %5587 }
0x2459   :  { %v5591_v15 = vsub.f32 %v5579_v56, %v5589_v2  ;;  %v5590_v17 = vmul.f32 0.03125, %v5588_v5 }
0x245b   :  { %v5592_v22 = vsub.f32 %v5580_v32, %v5590_v17  ;;  %v5593_v59 = vmul.f32 %v5591_v15, %v5591_v15 }
0x245d   :  { %v5595_v13 = vsel %vm445_vm5, %v5593_v59, 0.0  ;;  %v5594_v37 = vmul.f32 %v5592_v22, %v5592_v22 }
0x245e   :  { %5596 = vadd.xlane.f32.xlu0 %v5595_v13 }
0x245f   :  { %v5598_v60 = vsel %vm445_vm5, %v5594_v37, 0.0 }
0x2460   :  { %5599 = vadd.xlane.f32.xlu1 %v5598_v60 }
0x24eb   :  { %v5597_v34 = vpop.xlane.xlu0 %5596 }
0x24ec   :  { %v5601_v35 = vmul.f32 0.03125, %v5597_v34 }
0x24ed   :  { %v5600_v36 = vpop.xlane.xlu1 %5599 }
0x24ee   :  { %v5603_v50 = vadd.f32 1e-05, %v5601_v35  ;;  %v5602_v21 = vmul.f32 0.03125, %v5600_v36 }
0x24f0   :  { %10248 = vrsqrt.f32 %v5603_v50  ;;  %v5604_v41 = vadd.f32 1e-05, %v5602_v21 }
0x24f2   :  { %10250 = vrsqrt.f32 %v5604_v41 }
0x24fa   :  { %v10249_v51 = vpop.eup %10248 }
0x24fb   :  { %v5607_v47 = vmul.f32 %v10249_v51, %v5591_v15 }
0x24fc   :  { %v10251_v24 = vpop.eup %10250 }
0x24fd   :  { %v5615_v42 = vmul.f32 %v8473_v18, %v5607_v47  ;;  %v5608_v52 = vmul.f32 %v10251_v24, %v5592_v22 }
0x24ff   :  { %v5616_v63 = vmul.f32 %v8473_v18, %v5608_v52  ;;  %v11709_v33 = vadd.f32 %v8474_v54, %v5615_v42 }
0x2501   :  { %v11711_v38 = vadd.f32 %v8474_v54, %v5616_v63 }
0x2503   :  { %v5625_v40 = vpack.c.bf16 %v11711_v38, %v11709_v33 }
0x2505   :  { %9479 = vmatmul.mubr.msk.bf16.vlgmr.msra.gmra.mrb[160].mxu1 %vm445_vm5, %v5625_v40 }
0x2506   :  { %9484 = vmatprep.mubr.msk.bf16.mxu1 %vm10398_vm4, %v10397_v7 }
0x25d8   :  { %v5680_v44 = vpop.f32.mrb[160].mxu1 }
0x25d9   :  { %v9480_v55 = vpop.f32.mrb[161].mxu1  ;;  %v5714_v62 = vpack.c.bf16 %v5680_v44, %v5680_v44 }
0x25da   :  { %v5683_v43 = vpop.f32.mrb[162].mxu1 }
0x25db   :  { %v9961_v53 = vpack.i.bf16 %v5683_v43, %v5680_v44  ;;  %v9481_v26 = vpop.f32.mrb[163].mxu1  ;;  %v11722_v8 = vpack.c.bf16 %v5683_v43, %v5683_v43 }
0x25dd   :  { %9957 = vrot.lane.b32.xlu1 %v9961_v53, %s10401_s13  ;;  %9952 = vrot.lane.b32.xlu0 %v9961_v53, %s10400_s5 }
0x25e1   :  { %9962 = vrot.lane.b32.xlu1 %v9961_v53, %s10399_s0  ;;  %5723 = vrot.lane.b32.xlu0 %v5714_v62, %s10402_s9 }
0x25e5   :  { %5772 = vrot.lane.b32.xlu1 %v11722_v8, %s10402_s9 }
0x264f   :  { %v9958_v0 = vpop.permute.xlu1 %9957  ;;  %v9953_v16 = vpop.permute.xlu0 %9952 }
0x2650   :  { %v9955_v23 = vunpack.i.h.bf16 %v9953_v16  ;;  %v9954_v14 = vunpack.i.l.bf16 %v9953_v16  ;;  %v9960_v45 = vunpack.i.h.bf16 %v9958_v0  ;;  %v9959_v46 = vunpack.i.l.bf16 %v9958_v0 }
0x2652   :  { %v11726_v1 = vpack.c.bf16 %v9955_v23, %v9955_v23  ;;  %v11728_v61 = vpack.c.bf16 %v9954_v14, %v9954_v14  ;;  %v11735_v6 = vpack.c.bf16 %v9960_v45, %v9960_v45  ;;  %v11737_v11 = vpack.c.bf16 %v9959_v46, %v9959_v46 }
0x2653   :  { %v9963_v58 = vpop.permute.xlu1 %9962  ;;  %v5724_v4 = vpop.permute.xlu0 %5723 }
0x2654   :  { %v5729_v3 = vsel %vm526_vm7, %v5724_v4, 0  ;;  %5821 = vrot.lane.b32.xlu0 %v11728_v61, %s10402_s9  ;;  %5870 = vrot.lane.b32.xlu1 %v11726_v1, %s10402_s9  ;;  %v9964_v20 = vunpack.i.l.bf16 %v9963_v58  ;;  %v9965_v25 = vunpack.i.h.bf16 %v9963_v58 }
0x2655   :  { %9483 = vmatpush3.bf16.xpose.msra.mxu1 %v5729_v3 }
0x2656   :  { %9488 = vmatprep.subr.bf16.mxu1 %v10397_v7  ;;  %v11744_v9 = vpack.c.bf16 %v9964_v20, %v9964_v20  ;;  %v11746_v56 = vpack.c.bf16 %v9965_v25, %v9965_v25 }
0x2657   :  { %v5773_v28 = vpop.permute.xlu1 %5772 }
0x2658   :  { %5919 = vrot.lane.b32.xlu0 %v11737_v11, %s10402_s9  ;;  %5968 = vrot.lane.b32.xlu1 %v11735_v6, %s10402_s9  ;;  %v5778_v39 = vsel %vm526_vm7, %v5773_v28, 0 }
0x265c   :  { %9485 = vmatmul.mubr.msk.bf16.vlgmr.msra.gmra.mrb[164].mxu1 %vm526_vm7, %v5714_v62  ;;  %6017 = vrot.lane.b32.xlu0 %v11744_v9, %s10402_s9 }
0x265d   :  { %6066 = vrot.lane.b32.xlu1 %v11746_v56, %s10402_s9  ;;  %9489 = vmatpush3.bf16.xpose.msra.mxu1 %v5778_v39 }
0x265e   :  { %9490 = vmatprep.mubr.msk.bf16.mxu1 %vm10398_vm4, %v10397_v7  ;;  %9494 = vmatprep.subr.bf16.mxu1 %v10397_v7 }
0x2661   :  { %6210 = vrot.lane.b32.xlu1 %v5714_v62, %s10403_s17 }
0x2664   :  { %9491 = vmatmul.mubr.msk.bf16.vlgmr.msra.gmra.mrb[168].mxu1 %vm526_vm7, %v11722_v8 }
0x2665   :  { %9496 = vmatprep.mubr.msk.bf16.mxu1 %vm10398_vm4, %v10397_v7 }
0x26c6   :  { %v5822_v29 = vpop.permute.xlu0 %5821  ;;  %v5871_v32 = vpop.permute.xlu1 %5870 }
0x26c7   :  { %v5827_v10 = vsel %vm526_vm7, %v5822_v29, 0  ;;  %v5876_v12 = vsel %vm526_vm7, %v5871_v32, 0 }
0x26c8   :  { %9495 = vmatpush3.bf16.xpose.msra.mxu1 %v5827_v10  ;;  %9501 = vmatpush3.bf16.xpose.msra.mxu0 %v5876_v12 }
0x26c9   :  { %9506 = vmatprep.subr.bf16.mxu1 %v10397_v7  ;;  %9512 = vmatprep.subr.bf16.mxu0 %v10397_v7 }
0x26ca   :  { %v5920_v27 = vpop.permute.xlu0 %5919  ;;  %v5969_v2 = vpop.permute.xlu1 %5968 }
0x26cb   :  { %v5925_v5 = vsel %vm526_vm7, %v5920_v27, 0  ;;  %v5974_v15 = vsel %vm526_vm7, %v5969_v2, 0 }
0x26ce   :  { %v6018_v17 = vpop.permute.xlu0 %6017 }
0x26cf   :  { %9497 = vmatmul.mubr.msk.bf16.vlgmr.msra.gmra.mrb[172].mxu1 %vm526_vm7, %v11728_v61  ;;  %9503 = vmatmul.mubr.msk.bf16.vlgmr.msra.gmra.mrb[160].mxu0 %vm526_vm7, %v11726_v1  ;;  %v6067_v22 = vpop.permute.xlu1 %6066  ;;  %v6023_v59 = vsel %vm526_vm7, %v6018_v17, 0 }
0x26d0   :  { %9507 = vmatpush3.bf16.xpose.msra.mxu1 %v5925_v5  ;;  %9513 = vmatpush3.bf16.xpose.msra.mxu0 %v5974_v15  ;;  %v6072_v13 = vsel %vm526_vm7, %v6067_v22, 0 }
0x26d1   :  { %9508 = vmatprep.mubr.msk.bf16.mxu1 %vm10398_vm4, %v10397_v7  ;;  %9514 = vmatprep.mubr.msk.bf16.mxu0 %vm10398_vm4, %v10397_v7 }
0x26d2   :  { %9518 = vmatprep.subr.bf16.mxu1 %v10397_v7  ;;  %9524 = vmatprep.subr.bf16.mxu0 %v10397_v7 }
0x26d3   :  { %v6211_v37 = vpop.permute.xlu1 %6210 }
0x26d4   :  { %v6216_v60 = vsel %vm1017_vm9, %v6211_v37, 0 }
0x26d7   :  { %9509 = vmatmul.mubr.msk.bf16.vlgmr.msra.gmra.mrb[176].mxu1 %vm526_vm7, %v11737_v11  ;;  %9515 = vmatmul.mubr.msk.bf16.vlgmr.msra.gmra.mrb[164].mxu0 %vm526_vm7, %v11735_v6 }
0x26d8   :  { %9519 = vmatpush3.bf16.xpose.msra.mxu1 %v6023_v59  ;;  %9525 = vmatpush3.bf16.xpose.msra.mxu0 %v6072_v13 }
0x26d9   :  { %9520 = vmatprep.mubr.msk.bf16.mxu1 %vm10398_vm4, %v10397_v7  ;;  %9526 = vmatprep.mubr.msk.bf16.mxu0 %vm10398_vm4, %v10397_v7 }
0x26da   :  { %9530 = vmatprep.subr.bf16.mxu1 %v10397_v7  ;;  %9536 = vmatprep.subr.bf16.mxu0 %v10397_v7 }
0x26df   :  { %9521 = vmatmul.mubr.msk.bf16.vlgmr.msra.gmra.mrb[180].mxu1 %vm526_vm7, %v11744_v9  ;;  %9527 = vmatmul.mubr.msk.bf16.vlgmr.msra.gmra.mrb[168].mxu0 %vm526_vm7, %v11746_v56 }
0x26e0   :  { %9531 = vmatpush3.bf16.msra.mxu1 %v6216_v60  ;;  %9538 = vmatprep.mubr.msk.bf16.mxu0 %vm10398_vm4, %v10397_v7 }
0x26e1   :  { %9532 = vmatprep.mubr.msk.bf16.mxu1 %vm10398_vm4, %v10397_v7  ;;  %9542 = vmatprep.subr.bf16.mxu1 %v10397_v7 }
0x272f   :  { %v5765_v19 = vpop.f32.mrb[164].mxu1 }
0x2730   :  { %v11801_v30 = vadd.f32 %v5765_v19, %v11296_v57  ;;  %v9486_v34 = vpop.f32.mrb[165].mxu1 }
0x2731   :  { %v5768_v35 = vpop.f32.mrb[166].mxu1 }
0x2732   :  { %v9487_v36 = vpop.f32.mrb[167].mxu1  ;;  %v6114_v50 = vsel %vm526_vm7, %v11801_v30, -inf }
0x2733   :  { %6115 = vmax.xlane.f32.xlu0 %v6114_v50 }
0x2737   :  { %v5814_v21 = vpop.f32.mrb[168].mxu1 }
0x2738   :  { %v5815_v41 = vadd.f32 %v5814_v21, %v11296_v57  ;;  %v9492_v51 = vpop.f32.mrb[169].mxu1 }
0x2739   :  { %v5817_v18 = vpop.f32.mrb[170].mxu1 }
0x273a   :  { %v9493_v47 = vpop.f32.mrb[171].mxu1  ;;  %v6117_v24 = vsel %vm526_vm7, %v5815_v41, -inf }
0x273b   :  { %6118 = vmax.xlane.f32.xlu1 %v6117_v24 }
0x27a2   :  { %v5863_v42 = vpop.f32.mrb[172].mxu1  ;;  %v5912_v52 = vpop.f32.mrb[160].mxu0 }
0x27a3   :  { %v5864_v54 = vadd.f32 %v5863_v42, %v11296_v57  ;;  %v9498_v63 = vpop.f32.mrb[173].mxu1  ;;  %v9504_v40 = vpop.f32.mrb[161].mxu0  ;;  %v5913_v43 = vadd.f32 %v5912_v52, %v11296_v57 }
0x27a4   :  { %v5866_v44 = vpop.f32.mrb[174].mxu1  ;;  %v5915_v55 = vpop.f32.mrb[162].mxu0 }
0x27a5   :  { %v9499_v53 = vpop.f32.mrb[175].mxu1  ;;  %v9505_v26 = vpop.f32.mrb[163].mxu0  ;;  %v6120_v62 = vsel %vm526_vm7, %v5864_v54, -inf  ;;  %v6123_v0 = vsel %vm526_vm7, %v5913_v43, -inf }
0x27a6   :  { %6121 = vmax.xlane.f32.xlu0 %v6120_v62 }
0x27aa   :  { %v5961_v16 = vpop.f32.mrb[176].mxu1  ;;  %6124 = vmax.xlane.f32.xlu0 %v6123_v0  ;;  %v6010_v23 = vpop.f32.mrb[164].mxu0 }
0x27ab   :  { %v11812_v14 = vadd.f32 %v5961_v16, %v11296_v57  ;;  %v11815_v45 = vadd.f32 %v6010_v23, %v11296_v57  ;;  %v9510_v46 = vpop.f32.mrb[177].mxu1  ;;  %v9516_v58 = vpop.f32.mrb[165].mxu0 }
0x27ac   :  { %v5964_v4 = vpop.f32.mrb[178].mxu1  ;;  %v6013_v3 = vpop.f32.mrb[166].mxu0 }
0x27ad   :  { %v9511_v20 = vpop.f32.mrb[179].mxu1  ;;  %v9517_v25 = vpop.f32.mrb[167].mxu0  ;;  %v6126_v28 = vsel %vm526_vm7, %v11812_v14, -inf  ;;  %v6129_v39 = vsel %vm526_vm7, %v11815_v45, -inf }
0x27ae   :  { %6127 = vmax.xlane.f32.xlu1 %v6126_v28  ;;  %6130 = vmax.xlane.f32.xlu0 %v6129_v39 }
0x27b2   :  { %v6059_v29 = vpop.f32.mrb[180].mxu1  ;;  %v6108_v32 = vpop.f32.mrb[168].mxu0 }
0x27b3   :  { %v6060_v10 = vadd.f32 %v6059_v29, %v11296_v57  ;;  %v6109_v12 = vadd.f32 %v6108_v32, %v11296_v57  ;;  %v9522_v27 = vpop.f32.mrb[181].mxu1  ;;  %v9528_v2 = vpop.f32.mrb[169].mxu0 }
0x27b4   :  { %v6062_v5 = vpop.f32.mrb[182].mxu1  ;;  %v6111_v15 = vpop.f32.mrb[170].mxu0 }
0x27b5   :  { %v9523_v17 = vpop.f32.mrb[183].mxu1  ;;  %v9529_v22 = vpop.f32.mrb[171].mxu0  ;;  %v6132_v59 = vsel %vm526_vm7, %v6060_v10, -inf  ;;  %v6135_v13 = vsel %vm526_vm7, %v6109_v12, -inf }
0x27b6   :  { %6133 = vmax.xlane.f32.xlu1 %v6132_v59  ;;  %6136 = vmax.xlane.f32.xlu0 %v6135_v13 }
0x27c0   :  { %v6116_v60 = vpop.xlane.xlu0 %6115 }
0x27c1   :  { %v6138_v19 = vsub.f32 %v11801_v30, %v6116_v60 }
0x27c3   :  { %v6146_v35 = vmul.f32 1.442695, %v6138_v19 }
0x27c7   :  { %6306 = vrot.lane.b32.xlu1 %v11728_v61, %s10403_s17 }
0x27c8   :  { %v6119_v57 = vpop.xlane.xlu1 %6118 }
0x27c9   :  { %v6139_v37 = vsub.f32 %v5815_v41, %v6119_v57 }
0x27cb   :  { %6354 = vrot.lane.b32.xlu1 %v11726_v1, %s10403_s17  ;;  %v6148_v34 = vmul.f32 1.442695, %v6139_v37 }
0x27cc   :  { %6258 = vrot.lane.b32.xlu0 %v11722_v8, %s10403_s17 }
0x27cd   :  { %10252 = vpow2.f32 %v6148_v34 }
0x27ce   :  { %10254 = vpow2.f32 %v6146_v35 }
0x27d7   :  { %v10253_v36 = vpop.eup %10252 }
0x27d8   :  { %v6165_v50 = vsel %vm526_vm7, %v10253_v36, 0.0  ;;  %v11833_v21 = vpop.eup %10254 }
0x27d9   :  { %v6162_v1 = vsel %vm526_vm7, %v11833_v21, 0.0 }
0x27eb   :  { %6166 = vadd.xlane.f32.xlu0 %v6165_v50 }
0x27ef   :  { %6163 = vadd.xlane.f32.xlu1 %v6162_v1 }
0x2833   :  { %v6122_v8 = vpop.xlane.xlu0 %6121 }
0x2834   :  { %v6140_v61 = vsub.f32 %v5864_v54, %v6122_v8 }
0x2836   :  { %v6150_v41 = vmul.f32 1.442695, %v6140_v61 }
0x2837   :  { %v6125_v51 = vpop.xlane.xlu0 %6124 }
0x2838   :  { %10256 = vpow2.f32 %v6150_v41  ;;  %v6141_v30 = vsub.f32 %v5913_v43, %v6125_v51 }
0x283a   :  { %v6152_v18 = vmul.f32 1.442695, %v6141_v30 }
0x283b   :  { %v6131_v47 = vpop.xlane.xlu0 %6130  ;;  %v6128_v55 = vpop.xlane.xlu1 %6127 }
0x283c   :  { %10258 = vpow2.f32 %v6152_v18  ;;  %v6142_v43 = vsub.f32 %v11812_v14, %v6128_v55  ;;  %v6143_v26 = vsub.f32 %v11815_v45, %v6131_v47 }
0x283e   :  { %v6154_v62 = vmul.f32 1.442695, %v6142_v43  ;;  %v6156_v16 = vmul.f32 1.442695, %v6143_v26 }
0x2840   :  { %10260 = vpow2.f32 %v6154_v62 }
0x2841   :  { %10262 = vpow2.f32 %v6156_v16 }
0x2842   :  { %v11837_v24 = vpop.eup %10256 }
0x2843   :  { %v6137_v42 = vpop.xlane.xlu0 %6136  ;;  %v6168_v52 = vsel %vm526_vm7, %v11837_v24, 0.0  ;;  %v6134_v53 = vpop.xlane.xlu1 %6133 }
0x2844   :  { %6169 = vadd.xlane.f32.xlu1 %v6168_v52  ;;  %v6144_v0 = vsub.f32 %v6060_v10, %v6134_v53  ;;  %v6145_v46 = vsub.f32 %v6109_v12, %v6137_v42 }
0x2846   :  { %v11841_v63 = vpop.eup %10258  ;;  %v6158_v23 = vmul.f32 1.442695, %v6144_v0  ;;  %v6160_v58 = vmul.f32 1.442695, %v6145_v46 }
0x2847   :  { %v6259_v40 = vpop.permute.xlu0 %6258  ;;  %v6171_v54 = vsel %vm526_vm7, %v11841_v63, 0.0  ;;  %v6307_v4 = vpop.permute.xlu1 %6306 }
0x2848   :  { %v6264_v44 = vsel %vm1017_vm9, %v6259_v40, 0  ;;  %6172 = vadd.xlane.f32.xlu0 %v6171_v54  ;;  %10264 = vpow2.f32 %v6158_v23  ;;  %v6312_v22 = vsel %vm1017_vm9, %v6307_v4, 0 }
0x2849   :  { %9537 = vmatpush3.bf16.msra.mxu0 %v6264_v44  ;;  %10266 = vpow2.f32 %v6160_v58 }
0x284a   :  { %9548 = vmatprep.subr.bf16.mxu0 %v10397_v7 }
0x284b   :  { %v6355_v3 = vpop.permute.xlu1 %6354 }
0x284c   :  { %v6360_v5 = vsel %vm1017_vm9, %v6355_v3, 0 }
0x2855   :  { %6450 = vrot.lane.b32.xlu1 %v11735_v6, %s10403_s17  ;;  %v11853_v6 = vpop.eup %10260 }
0x2856   :  { %v6174_v45 = vsel %vm526_vm7, %v11853_v6, 0.0 }
0x285e   :  { %6402 = vrot.lane.b32.xlu0 %v11737_v11, %s10403_s17  ;;  %v11855_v11 = vpop.eup %10262 }
0x285f   :  { %v11859_v20 = vpop.eup %10264  ;;  %v6177_v39 = vsel %vm526_vm7, %v11855_v11, 0.0 }
0x2860   :  { %v6180_v28 = vsel %vm526_vm7, %v11859_v20, 0.0  ;;  %v11865_v29 = vpop.eup %10266 }
0x2861   :  { %v6183_v32 = vsel %vm526_vm7, %v11865_v29, 0.0 }
0x2878   :  { %v6167_v14 = vpop.xlane.xlu0 %6166 }
0x2879   :  { %10268 = vrcp.f32 %v6167_v14  ;;  %6175 = vadd.xlane.f32.xlu1 %v6174_v45 }
0x287c   :  { %v6164_v25 = vpop.xlane.xlu1 %6163 }
0x287d   :  { %10270 = vrcp.f32 %v6164_v25  ;;  %6181 = vadd.xlane.f32.xlu1 %v6180_v28  ;;  %6178 = vadd.xlane.f32.xlu0 %v6177_v39 }
0x2881   :  { %6184 = vadd.xlane.f32.xlu0 %v6183_v32  ;;  %v10076_v32 = vld [vmem:[%s12252_s8 + $0x10] sm:$0xff]  }
0x2883   :  { %v10269_v10 = vpop.eup %10268 }
0x2884   :  { %v6195_v12 = vmul.f32 %v10269_v10, %v10253_v36 }
0x2886   :  { %v6203_v27 = vpack.c.bf16 %v6195_v12, %v6195_v12 }
0x2887   :  { %v10271_v2 = vpop.eup %10270 }
0x2888   :  { %v6194_v15 = vmul.f32 %v10271_v2, %v11833_v21  ;;  %9539 = vmatmul.mubr.msk.bf16.vlgmr.msra.gmra.mrb[172].mxu0 %vm526_vm7, %v6203_v27 }
0x2889   :  { %9549 = vmatpush3.bf16.msra.mxu0 %v6360_v5  ;;  %9550 = vmatprep.mubr.msk.bf16.mxu0 %vm10398_vm4, %v10397_v7  ;;  %v10077_v5 = vld [vmem:[%s12252_s8 + $0x18] sm:$0xff]  }
0x288a   :  { %v6202_v17 = vpack.c.bf16 %v6194_v15, %v6194_v15  ;;  %9560 = vmatprep.subr.bf16.mxu0 %v10397_v7 }
0x288c   :  { %9533 = vmatmul.mubr.msk.bf16.vlgmr.msra.gmra.mrb[184].mxu1 %vm526_vm7, %v6202_v17 }
0x288d   :  { %9543 = vmatpush3.bf16.msra.mxu1 %v6312_v22  ;;  %9544 = vmatprep.mubr.msk.bf16.mxu1 %vm10398_vm4, %v10397_v7 }
0x288e   :  { %6546 = vrot.lane.b32.xlu1 %v11746_v56, %s10403_s17  ;;  %9554 = vmatprep.subr.bf16.mxu1 %v10397_v7 }
0x2897   :  { %6498 = vrot.lane.b32.xlu0 %v11744_v9, %s10403_s17 }
0x28d1   :  { %v6170_v59 = vpop.xlane.xlu1 %6169 }
0x28d2   :  { %10272 = vrcp.f32 %v6170_v59 }
0x28d5   :  { %v6173_v13 = vpop.xlane.xlu0 %6172  ;;  %v6451_v56 = vpop.permute.xlu1 %6450 }
0x28d6   :  { %10274 = vrcp.f32 %v6173_v13  ;;  %v6456_v50 = vsel %vm1017_vm9, %v6451_v56, 0 }
0x28d9   :  { %v6403_v60 = vpop.permute.xlu0 %6402 }
0x28da   :  { %v6408_v36 = vsel %vm1017_vm9, %v6403_v60, 0 }
0x28dc   :  { %v10273_v57 = vpop.eup %10272 }
0x28dd   :  { %v6196_v37 = vmul.f32 %v10273_v57, %v11837_v24 }
0x28df   :  { %v6204_v19 = vpack.c.bf16 %v6196_v37, %v6196_v37 }
0x28e0   :  { %v10275_v34 = vpop.eup %10274 }
0x28e1   :  { %v6197_v35 = vmul.f32 %v10275_v34, %v11841_v63  ;;  %9545 = vmatmul.mubr.msk.bf16.vlgmr.msra.gmra.mrb[188].mxu1 %vm526_vm7, %v6204_v19 }
0x28e2   :  { %9555 = vmatpush3.bf16.msra.mxu1 %v6408_v36  ;;  %9556 = vmatprep.mubr.msk.bf16.mxu1 %vm10398_vm4, %v10397_v7 }
0x28e3   :  { %v6205_v9 = vpack.c.bf16 %v6197_v35, %v6197_v35  ;;  %9566 = vmatprep.subr.bf16.mxu1 %v10397_v7 }
0x28e5   :  { %9551 = vmatmul.mubr.msk.bf16.vlgmr.msra.gmra.mrb[176].mxu0 %vm526_vm7, %v6205_v9 }
0x28e6   :  { %9561 = vmatpush3.bf16.msra.mxu0 %v6456_v50  ;;  %9562 = vmatprep.mubr.msk.bf16.mxu0 %vm10398_vm4, %v10397_v7 }
0x28e7   :  { %9572 = vmatprep.subr.bf16.mxu0 %v10397_v7 }
0x2906   :  { %v6176_v21 = vpop.xlane.xlu1 %6175 }
0x2907   :  { %10276 = vrcp.f32 %v6176_v21 }
0x290a   :  { %v6182_v1 = vpop.xlane.xlu1 %6181  ;;  %v6179_v8 = vpop.xlane.xlu0 %6178 }
0x290b   :  { %10278 = vrcp.f32 %v6182_v1 }
0x290c   :  { %10280 = vrcp.f32 %v6179_v8 }
0x290e   :  { %v6185_v61 = vpop.xlane.xlu0 %6184  ;;  %v6547_v40 = vpop.permute.xlu1 %6546 }
0x290f   :  { %10282 = vrcp.f32 %v6185_v61  ;;  %v6552_v55 = vsel %vm1017_vm9, %v6547_v40, 0 }
0x2911   :  { %v10277_v41 = vpop.eup %10276 }
0x2912   :  { %v6198_v51 = vmul.f32 %v10277_v41, %v11853_v6  ;;  %v6499_v30 = vpop.permute.xlu0 %6498 }
0x2913   :  { %v6504_v42 = vsel %vm1017_vm9, %v6499_v30, 0 }
0x2914   :  { %v6206_v18 = vpack.c.bf16 %v6198_v51, %v6198_v51 }
0x2915   :  { %v10279_v47 = vpop.eup %10278 }
0x2916   :  { %v10281_v24 = vpop.eup %10280  ;;  %9557 = vmatmul.mubr.msk.bf16.vlgmr.msra.gmra.mrb[192].mxu1 %vm526_vm7, %v6206_v18  ;;  %v6200_v63 = vmul.f32 %v10279_v47, %v11859_v20 }
0x2917   :  { %v6199_v52 = vmul.f32 %v10281_v24, %v11855_v11  ;;  %9567 = vmatpush3.bf16.msra.mxu1 %v6504_v42  ;;  %9568 = vmatprep.mubr.msk.bf16.mxu1 %vm10398_vm4, %v10397_v7 }
0x2918   :  { %9578 = vmatprep.subr.bf16.mxu1 %v10397_v7  ;;  %v6208_v43 = vpack.c.bf16 %v6200_v63, %v6200_v63 }
0x2919   :  { %v6207_v54 = vpack.c.bf16 %v6199_v52, %v6199_v52  ;;  %v10283_v44 = vpop.eup %10282 }
0x291a   :  { %v6201_v53 = vmul.f32 %v10283_v44, %v11865_v29 }
0x291b   :  { %9563 = vmatmul.mubr.msk.bf16.vlgmr.msra.gmra.mrb[180].mxu0 %vm526_vm7, %v6207_v54  ;;  %v10078_v54 = vld [vmem:[%s12254_s19 + $0x10] sm:$0xff]  }
0x291c   :  { %9573 = vmatpush3.bf16.msra.mxu0 %v6552_v55  ;;  %9574 = vmatprep.mubr.msk.bf16.mxu0 %vm10398_vm4, %v10397_v7  ;;  %v6209_v26 = vpack.c.bf16 %v6201_v53, %v6201_v53  ;;  %v10079_v55 = vld [vmem:[%s12254_s19 + $0x18] sm:$0xff]  }
0x291d   :  { %9586 = vmatprep.subr.bf16.mxu0 %v10397_v7 }
0x291e   :  { %9569 = vmatmul.mubr.msk.bf16.vlgmr.msra.gmra.mrb[196].mxu1 %vm526_vm7, %v6208_v43  ;;  %v8503_v43 = vld [vmem:[%s12253_s14 + $0x1] ss:$0 sm:$0xff] }
0x291f   :  { %9582 = vmatprep.mubr.msk.bf16.mxu1 %vm10398_vm4, %v10397_v7  ;;  %9579 = vmatpush3.bf16.msra.mxu1 %v10076_v32 }
0x2920   :  { %9580 = vmatprep.subr.bf16.mxu1 %v10397_v7 }
0x2923   :  { %9575 = vmatmul.mubr.msk.bf16.vlgmr.msra.gmra.mrb[184].mxu0 %vm526_vm7, %v6209_v26  ;;  %9581 = vmatpush3.bf16.msra.mxu1 %v10077_v5  ;;  %v10080_v5 = vld [vmem:[%s12255_s6 + $0x10] sm:$0xff]  }
0x2924   :  { %9590 = vmatprep.mubr.msk.bf16.mxu0 %vm10398_vm4, %v10397_v7  ;;  %9594 = vmatprep.subr.bf16.mxu1 %v10397_v7 }
0x2925   :  { %9587 = vmatpush3.bf16.msra.mxu0 %v10080_v5 }
0x2926   :  { %9588 = vmatprep.subr.bf16.mxu0 %v10397_v7 }
0x295b   :  { %v6300_v62 = vpop.f32.mrb[172].mxu0 }
0x295c   :  { %v9540_v0 = vpop.f32.mrb[173].mxu0 }
0x295d   :  { %v6303_v16 = vpop.f32.mrb[174].mxu0 }
0x295e   :  { %v9541_v23 = vpop.f32.mrb[175].mxu0 }
0x295f   :  { %v6252_v46 = vpop.f32.mrb[184].mxu1 }
0x2960   :  { %v9534_v58 = vpop.f32.mrb[185].mxu1 }
0x2961   :  { %v6255_v4 = vpop.f32.mrb[186].mxu1 }
0x2962   :  { %v9535_v6 = vpop.f32.mrb[187].mxu1 }
0x29b4   :  { %v6348_v11 = vpop.f32.mrb[188].mxu1 }
0x29b5   :  { %v9546_v3 = vpop.f32.mrb[189].mxu1 }
0x29b6   :  { %v6351_v14 = vpop.f32.mrb[190].mxu1 }
0x29b7   :  { %v9547_v45 = vpop.f32.mrb[191].mxu1 }
0x29b8   :  { %v6396_v20 = vpop.f32.mrb[176].mxu0 }
0x29b9   :  { %v9966_v25 = vpack.i.bf16 %v6396_v20, %v6348_v11  ;;  %v9552_v28 = vpop.f32.mrb[177].mxu0 }
0x29ba   :  { %v6399_v39 = vpop.f32.mrb[178].mxu0 }
0x29bb   :  { %9967 = vrot.lane.b32.xlu0 %v9966_v25, %s10404_s21  ;;  %v9553_v29 = vpop.f32.mrb[179].mxu0 }
0x29e9   :  { %v6444_v10 = vpop.f32.mrb[192].mxu1 }
0x29ea   :  { %v9558_v12 = vpop.f32.mrb[193].mxu1 }
0x29eb   :  { %v6447_v27 = vpop.f32.mrb[194].mxu1 }
0x29ec   :  { %v9559_v2 = vpop.f32.mrb[195].mxu1 }
0x29ee   :  { %v6492_v15 = vpop.f32.mrb[180].mxu0 }
0x29ef   :  { %v9971_v17 = vpack.i.bf16 %v6492_v15, %v6444_v10  ;;  %v9564_v22 = vpop.f32.mrb[181].mxu0  ;;  %v10081_v15 = vld [vmem:[%s12255_s6 + $0x18] sm:$0xff]  }
0x29f0   :  { %v6495_v59 = vpop.f32.mrb[182].mxu0  ;;  %9589 = vmatpush3.bf16.msra.mxu0 %v10081_v15 }
0x29f1   :  { %9972 = vrot.lane.b32.xlu1 %v9971_v17, %s10405_s28  ;;  %v9565_v13 = vpop.f32.mrb[183].mxu0  ;;  %v6540_v57 = vpop.f32.mrb[196].mxu1  ;;  %9602 = vmatprep.subr.bf16.mxu0 %v10397_v7 }
0x29f2   :  { %v9570_v37 = vpop.f32.mrb[197].mxu1 }
0x29f3   :  { %v6543_v60 = vpop.f32.mrb[198].mxu1 }
0x29f4   :  { %v9571_v19 = vpop.f32.mrb[199].mxu1 }
0x29f5   :  { %v8509_v19 = vld [vmem:[%s12256_s12 + $0x1] ss:$0 sm:$0xff] }
0x29f6   :  { %v6588_v34 = vpop.f32.mrb[184].mxu0 }
0x29f7   :  { %v9976_v35 = vpack.i.bf16 %v6588_v34, %v6540_v57  ;;  %v9576_v36 = vpop.f32.mrb[185].mxu0 }
0x29f8   :  { %v6591_v56 = vpop.f32.mrb[186].mxu0 }
0x29f9   :  { %9977 = vrot.lane.b32.xlu0 %v9976_v35, %s10406_s1  ;;  %v9577_v9 = vpop.f32.mrb[187].mxu0 }
0x29fa   :  { %v8510_v9 = vld [vmem:[%s12257_s20 + $0x1] ss:$0 sm:$0xff] }
0x2a2d   :  { %v9968_v50 = vpop.permute.xlu0 %9967 }
0x2a2e   :  { %v9970_v1 = vunpack.i.h.bf16 %v9968_v50  ;;  %v9969_v8 = vunpack.i.l.bf16 %v9968_v50 }
0x2a30   :  { %v6619_v30 = vsel %vm526_vm7, %v6300_v62, %v9970_v1  ;;  %v6618_v18 = vsel %vm526_vm7, %v6252_v46, %v9969_v8 }
0x2a63   :  { %v9973_v21 = vpop.permute.xlu1 %9972 }
0x2a64   :  { %v9975_v61 = vunpack.i.h.bf16 %v9973_v21  ;;  %v9974_v41 = vunpack.i.l.bf16 %v9973_v21 }
0x2a66   :  { %v6621_v42 = vsel %vm1423_vm12, %v6619_v30, %v9975_v61  ;;  %v6620_v52 = vsel %vm1423_vm12, %v6618_v18, %v9974_v41 }
0x2a6b   :  { %v9978_v51 = vpop.permute.xlu0 %9977 }
0x2a6c   :  { %v9980_v47 = vunpack.i.h.bf16 %v9978_v51  ;;  %v9979_v24 = vunpack.i.l.bf16 %v9978_v51 }
0x2a6e   :  { %v6623_v63 = vsel %vm1426_vm13, %v6621_v42, %v9980_v47  ;;  %v6622_v40 = vsel %vm1426_vm13, %v6620_v52, %v9979_v24 }
0x2a6f   :  { %v6624_v44 = vpack.c.bf16 %v6623_v63, %v6622_v40 }
0x2a71   :  { %9583 = vmatmul.mubr.msk.bf16.vlgmr.msra.gmra.mrb[200].mxu1 %vm445_vm5, %v6624_v44 }
0x2a72   :  { %9595 = vmatpush3.bf16.msra.mxu1 %v10078_v54  ;;  %9598 = vmatprep.mubr.msk.bf16.mxu1 %vm10398_vm4, %v10397_v7 }
0x2a73   :  { %9596 = vmatprep.subr.bf16.mxu1 %v10397_v7 }
0x2a76   :  { %9597 = vmatpush3.bf16.msra.mxu1 %v10079_v55 }
0x2a77   :  { %9608 = vmatprep.subr.bf16.mxu1 %v10397_v7 }
0x2a79   :  { %9599 = vmatmul.mubr.msk.bf16.vlgmr.msra.gmra.mrb[204].mxu1 %vm445_vm5, %v11440_v31 }
0x2a7a   :  { %9610 = vmatprep.mubr.msk.bf16.mxu1 %vm10398_vm4, %v10397_v7 }
0x2b44   :  { %v6680_v53 = vpop.f32.mrb[200].mxu1 }
0x2b45   :  { %v6681_v26 = vadd.f32 %v8503_v43, %v6680_v53  ;;  %v9584_v62 = vpop.f32.mrb[201].mxu1 }
0x2b46   :  { %v6683_v0 = vpop.f32.mrb[202].mxu1 }
0x2b47   :  { %v6687_v16 = vadd.f32 %v6681_v26, %v11709_v33  ;;  %v6684_v23 = vadd.f32 %v8503_v43, %v6683_v0  ;;  %v9585_v46 = vpop.f32.mrb[203].mxu1 }
0x2b49   :  { %v6688_v58 = vadd.f32 %v6684_v23, %v11711_v38  ;;  %v6693_v4 = vsel %vm445_vm5, %v6687_v16, 0.0 }
0x2b4a   :  { %6694 = vadd.xlane.f32.xlu1 %v6693_v4 }
0x2b4b   :  { %v6696_v6 = vsel %vm445_vm5, %v6688_v58, 0.0 }
0x2b4c   :  { %6697 = vadd.xlane.f32.xlu0 %v6696_v6  ;;  %v6848_v31 = vpop.f32.mrb[204].mxu1 }
0x2b4d   :  { %v9600_v11 = vpop.f32.mrb[205].mxu1  ;;  %v6910_v8 = vpack.c.bf16 %v6848_v31, %v6848_v31 }
0x2b4e   :  { %v6851_v3 = vpop.f32.mrb[206].mxu1 }
0x2b4f   :  { %v11945_v14 = vpack.i.bf16 %v6851_v3, %v6848_v31  ;;  %v9601_v45 = vpop.f32.mrb[207].mxu1  ;;  %v11947_v20 = vpack.c.bf16 %v6851_v3, %v6851_v3  ;;  %v6922_v41 = vsel %vm526_vm7, %v6910_v8, 0 }
0x2b51   :  { %v6968_v33 = vsel %vm526_vm7, %v11947_v20, 0 }
0x2b52   :  { %9609 = vmatpush3.bf16.xpose.msra.mxu1 %v6968_v33 }
0x2b53   :  { %9620 = vmatprep.subr.bf16.mxu1 %v10397_v7 }
0x2bd7   :  { %v6695_v38 = vpop.xlane.xlu1 %6694 }
0x2bd8   :  { %v6699_v25 = vmul.f32 0.03125, %v6695_v38 }
0x2bd9   :  { %v6698_v28 = vpop.xlane.xlu0 %6697 }
0x2bda   :  { %v6701_v39 = vsub.f32 %v6687_v16, %v6699_v25  ;;  %v6700_v29 = vmul.f32 0.03125, %v6698_v28 }
0x2bdc   :  { %v6702_v32 = vsub.f32 %v6688_v58, %v6700_v29  ;;  %v6703_v10 = vmul.f32 %v6701_v39, %v6701_v39 }
0x2bde   :  { %v6705_v12 = vsel %vm445_vm5, %v6703_v10, 0.0  ;;  %v6704_v27 = vmul.f32 %v6702_v32, %v6702_v32 }
0x2bdf   :  { %6706 = vadd.xlane.f32.xlu0 %v6705_v12 }
0x2be0   :  { %v6708_v2 = vsel %vm445_vm5, %v6704_v27, 0.0 }
0x2be1   :  { %6709 = vadd.xlane.f32.xlu1 %v6708_v2 }
0x2bf5   :  { %9982 = vrot.lane.b32.xlu0 %v11945_v14, %s10400_s5 }
0x2c6c   :  { %v6707_v17 = vpop.xlane.xlu0 %6706 }
0x2c6d   :  { %v6711_v22 = vmul.f32 0.03125, %v6707_v17 }
0x2c6e   :  { %v6710_v59 = vpop.xlane.xlu1 %6709 }
0x2c6f   :  { %v6713_v13 = vadd.f32 1e-05, %v6711_v22  ;;  %v6712_v57 = vmul.f32 0.03125, %v6710_v59 }
0x2c70   :  { %v9983_v51 = vpop.permute.xlu0 %9982 }
0x2c71   :  { %10284 = vrsqrt.f32 %v6713_v13  ;;  %v6714_v37 = vadd.f32 1e-05, %v6712_v57  ;;  %v9984_v30 = vunpack.i.l.bf16 %v9983_v51  ;;  %v9985_v18 = vunpack.i.h.bf16 %v9983_v51 }
0x2c73   :  { %10286 = vrsqrt.f32 %v6714_v37  ;;  %v11973_v47 = vpack.c.bf16 %v9984_v30, %v9984_v30  ;;  %v11975_v63 = vpack.c.bf16 %v9985_v18, %v9985_v18 }
0x2c75   :  { %v7014_v54 = vsel %vm526_vm7, %v11973_v47, 0  ;;  %v7060_v53 = vsel %vm526_vm7, %v11975_v63, 0 }
0x2c7b   :  { %v10285_v60 = vpop.eup %10284 }
0x2c7c   :  { %v6717_v34 = vmul.f32 %v10285_v60, %v6701_v39 }
0x2c7d   :  { %v10287_v35 = vpop.eup %10286 }
0x2c7e   :  { %v6725_v36 = vmul.f32 %v8509_v19, %v6717_v34  ;;  %v6718_v56 = vmul.f32 %v10287_v35, %v6702_v32 }
0x2c80   :  { %v6726_v50 = vmul.f32 %v8509_v19, %v6718_v56  ;;  %v11962_v21 = vadd.f32 %v8510_v9, %v6725_v36 }
0x2c82   :  { %v11964_v1 = vadd.f32 %v8510_v9, %v6726_v50 }
0x2c84   :  { %v6735_v61 = vpack.c.bf16 %v11964_v1, %v11962_v21 }
0x2c86   :  { %9591 = vmatmul.mubr.msk.bf16.vlgmr.msra.gmra.mrb[188].mxu0 %vm445_vm5, %v6735_v61 }
0x2c87   :  { %9603 = vmatpush3.bf16.xpose.msra.mxu0 %v6922_v41  ;;  %9604 = vmatprep.mubr.msk.bf16.mxu0 %vm10398_vm4, %v10397_v7 }
0x2c88   :  { %9614 = vmatprep.subr.bf16.mxu0 %v10397_v7 }
0x2d59   :  { %v6790_v24 = vpop.f32.mrb[188].mxu0 }
0x2d5a   :  { %v6882_v42 = vpack.c.bf16 %v6790_v24, %v6790_v24  ;;  %v9592_v52 = vpop.f32.mrb[189].mxu0 }
0x2d5b   :  { %v6793_v40 = vpop.f32.mrb[190].mxu0 }
0x2d5c   :  { %v10006_v44 = vpack.i.bf16 %v6793_v40, %v6790_v24  ;;  %v6883_v55 = vpack.c.bf16 %v6793_v40, %v6793_v40  ;;  %v9593_v43 = vpop.f32.mrb[191].mxu0  ;;  %9605 = vmatmul.mubr.msk.bf16.vlgmr.msra.gmra.mrb[192].mxu0 %vm526_vm7, %v6882_v42 }
0x2d5d   :  { %9615 = vmatpush3.bf16.xpose.msra.mxu0 %v7014_v54  ;;  %9616 = vmatprep.mubr.msk.bf16.mxu0 %vm10398_vm4, %v10397_v7 }
0x2d5e   :  { %9997 = vrot.lane.b32.xlu0 %v10006_v44, %s10401_s13  ;;  %9987 = vrot.lane.b32.xlu1 %v10006_v44, %s10400_s5 }
0x2d5f   :  { %9611 = vmatmul.mubr.msk.bf16.vlgmr.msra.gmra.mrb[208].mxu1 %vm526_vm7, %v6883_v55  ;;  %9626 = vmatprep.subr.bf16.mxu0 %v10397_v7 }
0x2d60   :  { %9621 = vmatpush3.bf16.xpose.msra.mxu1 %v7060_v53  ;;  %9622 = vmatprep.mubr.msk.bf16.mxu1 %vm10398_vm4, %v10397_v7 }
0x2d61   :  { %9632 = vmatprep.subr.bf16.mxu1 %v10397_v7 }
0x2d62   :  { %10007 = vrot.lane.b32.xlu0 %v10006_v44, %s10399_s0  ;;  %9992 = vrot.lane.b32.xlu1 %v11945_v14, %s10401_s13 }
0x2d66   :  { %7383 = vrot.lane.b32.xlu0 %v6910_v8, %s10402_s9  ;;  %10002 = vrot.lane.b32.xlu1 %v11945_v14, %s10399_s0 }
0x2d6a   :  { %7432 = vrot.lane.b32.xlu1 %v11947_v20, %s10402_s9 }
0x2dd0   :  { %v9988_v26 = vpop.permute.xlu1 %9987  ;;  %v9998_v11 = vpop.permute.xlu0 %9997 }
0x2dd1   :  { %v9990_v62 = vunpack.i.h.bf16 %v9988_v26  ;;  %v9989_v0 = vunpack.i.l.bf16 %v9988_v26  ;;  %v9999_v38 = vunpack.i.l.bf16 %v9998_v11  ;;  %v10000_v25 = vunpack.i.h.bf16 %v9998_v11 }
0x2dd3   :  { %v6885_v16 = vpack.c.bf16 %v9990_v62, %v9990_v62  ;;  %v6884_v23 = vpack.c.bf16 %v9989_v0, %v9989_v0  ;;  %v6886_v29 = vpack.c.bf16 %v9999_v38, %v9999_v38  ;;  %v6887_v32 = vpack.c.bf16 %v10000_v25, %v10000_v25 }
0x2dd4   :  { %v9993_v46 = vpop.permute.xlu1 %9992  ;;  %v10008_v10 = vpop.permute.xlu0 %10007 }
0x2dd5   :  { %v9995_v58 = vunpack.i.h.bf16 %v9993_v46  ;;  %v9994_v4 = vunpack.i.l.bf16 %v9993_v46  ;;  %9617 = vmatmul.mubr.msk.bf16.vlgmr.msra.gmra.mrb[196].mxu0 %vm526_vm7, %v6884_v23  ;;  %9623 = vmatmul.mubr.msk.bf16.vlgmr.msra.gmra.mrb[212].mxu1 %vm526_vm7, %v6885_v16  ;;  %v10009_v2 = vunpack.i.l.bf16 %v10008_v10  ;;  %v10010_v5 = vunpack.i.h.bf16 %v10008_v10 }
0x2dd6   :  { %9628 = vmatprep.mubr.msk.bf16.mxu0 %vm10398_vm4, %v10397_v7  ;;  %9634 = vmatprep.mubr.msk.bf16.mxu1 %vm10398_vm4, %v10397_v7 }
0x2dd7   :  { %v12005_v6 = vpack.c.bf16 %v9995_v58, %v9995_v58  ;;  %v12007_v31 = vpack.c.bf16 %v9994_v4, %v9994_v4  ;;  %v6888_v17 = vpack.c.bf16 %v10009_v2, %v10009_v2  ;;  %v6889_v59 = vpack.c.bf16 %v10010_v5, %v10010_v5 }
0x2dd8   :  { %v10003_v3 = vpop.permute.xlu1 %10002  ;;  %v7384_v15 = vpop.permute.xlu0 %7383 }
0x2dd9   :  { %v10004_v14 = vunpack.i.l.bf16 %v10003_v3  ;;  %v7106_v45 = vsel %vm526_vm7, %v12007_v31, 0  ;;  %v10005_v20 = vunpack.i.h.bf16 %v10003_v3  ;;  %v7152_v33 = vsel %vm526_vm7, %v12005_v6, 0 }
0x2dda   :  { %9627 = vmatpush3.bf16.xpose.msra.mxu0 %v7106_v45  ;;  %9633 = vmatpush3.bf16.xpose.msra.mxu1 %v7152_v33  ;;  %v7389_v13 = vsel %vm1017_vm9, %v7384_v15, 0 }
0x2ddb   :  { %9638 = vmatprep.subr.bf16.mxu0 %v10397_v7  ;;  %9644 = vmatprep.subr.bf16.mxu1 %v10397_v7  ;;  %v12015_v28 = vpack.c.bf16 %v10004_v14, %v10004_v14  ;;  %v12017_v39 = vpack.c.bf16 %v10005_v20, %v10005_v20 }
0x2ddc   :  { %v7433_v22 = vpop.permute.xlu1 %7432 }
0x2ddd   :  { %v7198_v12 = vsel %vm526_vm7, %v12015_v28, 0  ;;  %v7244_v27 = vsel %vm526_vm7, %v12017_v39, 0  ;;  %v7438_v57 = vsel %vm1017_vm9, %v7433_v22, 0 }
0x2de1   :  { %9629 = vmatmul.mubr.msk.bf16.vlgmr.msra.gmra.mrb[200].mxu0 %vm526_vm7, %v6886_v29  ;;  %9635 = vmatmul.mubr.msk.bf16.vlgmr.msra.gmra.mrb[216].mxu1 %vm526_vm7, %v6887_v32 }
0x2de2   :  { %9639 = vmatpush3.bf16.xpose.msra.mxu0 %v7198_v12  ;;  %9645 = vmatpush3.bf16.xpose.msra.mxu1 %v7244_v27 }
0x2de3   :  { %9640 = vmatprep.mubr.msk.bf16.mxu0 %vm10398_vm4, %v10397_v7  ;;  %9646 = vmatprep.mubr.msk.bf16.mxu1 %vm10398_vm4, %v10397_v7 }
0x2de4   :  { %9650 = vmatprep.subr.bf16.mxu0 %v10397_v7  ;;  %9656 = vmatprep.subr.bf16.mxu1 %v10397_v7 }
0x2de9   :  { %9641 = vmatmul.mubr.msk.bf16.vlgmr.msra.gmra.mrb[204].mxu0 %vm526_vm7, %v6888_v17  ;;  %9647 = vmatmul.mubr.msk.bf16.vlgmr.msra.gmra.mrb[220].mxu1 %vm526_vm7, %v6889_v59 }
0x2dea   :  { %9651 = vmatpush3.bf16.msra.mxu0 %v7389_v13  ;;  %9657 = vmatpush3.bf16.msra.mxu1 %v7438_v57 }
0x2deb   :  { %9652 = vmatprep.mubr.msk.bf16.mxu0 %vm10398_vm4, %v10397_v7  ;;  %9658 = vmatprep.mubr.msk.bf16.mxu1 %vm10398_vm4, %v10397_v7 }
0x2dec   :  { %9662 = vmatprep.subr.bf16.mxu0 %v10397_v7  ;;  %9668 = vmatprep.subr.bf16.mxu1 %v10397_v7 }
0x2e2f   :  { %v6958_v37 = vpop.f32.mrb[192].mxu0 }
0x2e30   :  { %v6959_v60 = vadd.f32 %v6958_v37, %v10774_v49  ;;  %v9606_v19 = vpop.f32.mrb[193].mxu0 }
0x2e31   :  { %v6961_v34 = vpop.f32.mrb[194].mxu0 }
0x2e32   :  { %v7004_v35 = vpop.f32.mrb[208].mxu1  ;;  %v9607_v36 = vpop.f32.mrb[195].mxu0  ;;  %v7286_v56 = vsel %vm526_vm7, %v6959_v60, -inf }
0x2e33   :  { %v7005_v9 = vadd.f32 %v7004_v35, %v10771_v48  ;;  %v9612_v50 = vpop.f32.mrb[209].mxu1  ;;  %7287 = vmax.xlane.f32.xlu1 %v7286_v56 }
0x2e34   :  { %v7007_v8 = vpop.f32.mrb[210].mxu1 }
0x2e35   :  { %v9613_v61 = vpop.f32.mrb[211].mxu1  ;;  %v7289_v41 = vsel %vm526_vm7, %v7005_v9, -inf }
0x2e36   :  { %7290 = vmax.xlane.f32.xlu0 %v7289_v41 }
0x2ea8   :  { %v7050_v51 = vpop.f32.mrb[196].mxu0  ;;  %v7096_v30 = vpop.f32.mrb[212].mxu1 }
0x2ea9   :  { %v7051_v18 = vadd.f32 %v7050_v51, %v10774_v49  ;;  %v7097_v24 = vadd.f32 %v7096_v30, %v10771_v48  ;;  %v9618_v42 = vpop.f32.mrb[197].mxu0  ;;  %v9624_v52 = vpop.f32.mrb[213].mxu1 }
0x2eaa   :  { %v7053_v40 = vpop.f32.mrb[198].mxu0  ;;  %v7099_v54 = vpop.f32.mrb[214].mxu1 }
0x2eab   :  { %v9619_v44 = vpop.f32.mrb[199].mxu0  ;;  %v9625_v55 = vpop.f32.mrb[215].mxu1  ;;  %v7295_v43 = vsel %vm526_vm7, %v7097_v24, -inf  ;;  %v7292_v53 = vsel %vm526_vm7, %v7051_v18, -inf }
0x2eac   :  { %7296 = vmax.xlane.f32.xlu1 %v7295_v43  ;;  %7293 = vmax.xlane.f32.xlu0 %v7292_v53 }
0x2eb4   :  { %v7142_v26 = vpop.f32.mrb[200].mxu0  ;;  %v7188_v0 = vpop.f32.mrb[216].mxu1 }
0x2eb5   :  { %v12050_v62 = vadd.f32 %v7142_v26, %v10774_v49  ;;  %v9630_v16 = vpop.f32.mrb[201].mxu0  ;;  %v7189_v23 = vadd.f32 %v7188_v0, %v10771_v48  ;;  %v9636_v46 = vpop.f32.mrb[217].mxu1 }
0x2eb6   :  { %v7145_v58 = vpop.f32.mrb[202].mxu0  ;;  %v7191_v4 = vpop.f32.mrb[218].mxu1 }
0x2eb7   :  { %v9631_v11 = vpop.f32.mrb[203].mxu0  ;;  %v7298_v3 = vsel %vm526_vm7, %v12050_v62, -inf  ;;  %v9637_v14 = vpop.f32.mrb[219].mxu1  ;;  %v7301_v45 = vsel %vm526_vm7, %v7189_v23, -inf }
0x2eb8   :  { %7299 = vmax.xlane.f32.xlu0 %v7298_v3  ;;  %7302 = vmax.xlane.f32.xlu1 %v7301_v45 }
0x2ebc   :  { %v7234_v20 = vpop.f32.mrb[204].mxu0  ;;  %v7280_v38 = vpop.f32.mrb[220].mxu1 }
0x2ebd   :  { %v12057_v33 = vadd.f32 %v7234_v20, %v10774_v49  ;;  %v9642_v25 = vpop.f32.mrb[205].mxu0  ;;  %v7281_v29 = vadd.f32 %v7280_v38, %v10771_v48  ;;  %v9648_v32 = vpop.f32.mrb[221].mxu1 }
0x2ebe   :  { %v7237_v10 = vpop.f32.mrb[206].mxu0  ;;  %v7283_v12 = vpop.f32.mrb[222].mxu1 }
0x2ebf   :  { %v9643_v27 = vpop.f32.mrb[207].mxu0  ;;  %v7304_v2 = vsel %vm526_vm7, %v12057_v33, -inf  ;;  %v9649_v5 = vpop.f32.mrb[223].mxu1  ;;  %v7307_v15 = vsel %vm526_vm7, %v7281_v29, -inf }
0x2ec0   :  { %7305 = vmax.xlane.f32.xlu0 %v7304_v2  ;;  %7308 = vmax.xlane.f32.xlu1 %v7307_v15  ;;  %v7288_v49 = vpop.xlane.xlu1 %7287 }
0x2ec1   :  { %v7310_v17 = vsub.f32 %v6959_v60, %v7288_v49 }
0x2ec3   :  { %v7291_v48 = vpop.xlane.xlu0 %7290  ;;  %v7318_v59 = vmul.f32 1.442695, %v7310_v17 }
0x2ec4   :  { %v7311_v22 = vsub.f32 %v7005_v9, %v7291_v48 }
0x2ec5   :  { %10288 = vpow2.f32 %v7318_v59 }
0x2ec6   :  { %v7320_v13 = vmul.f32 1.442695, %v7311_v22 }
0x2ec8   :  { %10290 = vpow2.f32 %v7320_v13 }
0x2ecf   :  { %v10289_v57 = vpop.eup %10288 }
0x2ed0   :  { %v7334_v19 = vsel %vm526_vm7, %v10289_v57, 0.0 }
0x2ed1   :  { %7481 = vrot.lane.b32.xlu1 %v11973_v47, %s10402_s9 }
0x2ed2   :  { %v10291_v37 = vpop.eup %10290 }
0x2ed3   :  { %v7337_v34 = vsel %vm526_vm7, %v10291_v37, 0.0 }
0x2ed6   :  { %7530 = vrot.lane.b32.xlu0 %v11975_v63, %s10402_s9 }
0x2ef5   :  { %7335 = vadd.xlane.f32.xlu0 %v7334_v19  ;;  %7338 = vadd.xlane.f32.xlu1 %v7337_v34 }
0x2f06   :  { %7579 = vrot.lane.b32.xlu1 %v12007_v31, %s10402_s9 }
0x2f39   :  { %v7297_v47 = vpop.xlane.xlu1 %7296  ;;  %v7294_v63 = vpop.xlane.xlu0 %7293 }
0x2f3a   :  { %v7313_v35 = vsub.f32 %v7097_v24, %v7297_v47  ;;  %v7312_v60 = vsub.f32 %v7051_v18, %v7294_v63 }
0x2f3c   :  { %v7324_v36 = vmul.f32 1.442695, %v7313_v35  ;;  %v7322_v56 = vmul.f32 1.442695, %v7312_v60 }
0x2f3e   :  { %10292 = vpow2.f32 %v7324_v36 }
0x2f3f   :  { %10294 = vpow2.f32 %v7322_v56 }
0x2f45   :  { %v7303_v9 = vpop.xlane.xlu1 %7302  ;;  %v7300_v44 = vpop.xlane.xlu0 %7299 }
0x2f46   :  { %v7315_v50 = vsub.f32 %v7189_v23, %v7303_v9  ;;  %v7314_v55 = vsub.f32 %v12050_v62, %v7300_v44 }
0x2f48   :  { %v12071_v8 = vpop.eup %10292  ;;  %v7328_v41 = vmul.f32 1.442695, %v7315_v50  ;;  %v7326_v53 = vmul.f32 1.442695, %v7314_v55 }
0x2f49   :  { %v12073_v61 = vpop.eup %10294  ;;  %v7343_v51 = vsel %vm526_vm7, %v12071_v8, 0.0 }
0x2f4a   :  { %7344 = vadd.xlane.f32.xlu1 %v7343_v51  ;;  %v7340_v31 = vsel %vm526_vm7, %v12073_v61, 0.0  ;;  %10296 = vpow2.f32 %v7328_v41 }
0x2f4b   :  { %7341 = vadd.xlane.f32.xlu0 %v7340_v31 }
0x2f4d   :  { %v7309_v30 = vpop.xlane.xlu1 %7308  ;;  %v7306_v43 = vpop.xlane.xlu0 %7305 }
0x2f4e   :  { %v7317_v18 = vsub.f32 %v7281_v29, %v7309_v30  ;;  %v7316_v26 = vsub.f32 %v12057_v33, %v7306_v43 }
0x2f50   :  { %v7332_v24 = vmul.f32 1.442695, %v7317_v18  ;;  %v7330_v0 = vmul.f32 1.442695, %v7316_v26 }
0x2f51   :  { %v7531_v23 = vpop.permute.xlu0 %7530  ;;  %v7482_v46 = vpop.permute.xlu1 %7481 }
0x2f52   :  { %10298 = vpow2.f32 %v7332_v24  ;;  %v7487_v38 = vsel %vm1017_vm9, %v7482_v46, 0  ;;  %v7536_v25 = vsel %vm1017_vm9, %v7531_v23, 0 }
0x2f53   :  { %10300 = vpow2.f32 %v7326_v53 }
0x2f54   :  { %v12079_v42 = vpop.eup %10296  ;;  %10302 = vpow2.f32 %v7330_v0 }
0x2f55   :  { %v7349_v52 = vsel %vm526_vm7, %v12079_v42, 0.0 }
0x2f56   :  { %7350 = vadd.xlane.f32.xlu1 %v7349_v52 }
0x2f5c   :  { %v12083_v40 = vpop.eup %10298 }
0x2f5d   :  { %v7355_v54 = vsel %vm526_vm7, %v12083_v40, 0.0  ;;  %v12093_v16 = vpop.eup %10300 }
0x2f5e   :  { %7356 = vadd.xlane.f32.xlu1 %v7355_v54  ;;  %v12097_v58 = vpop.eup %10302 }
0x2f5f   :  { %v7352_v11 = vsel %vm526_vm7, %v12097_v58, 0.0 }
0x2f61   :  { %7628 = vrot.lane.b32.xlu0 %v12005_v6, %s10402_s9  ;;  %v7346_v6 = vsel %vm526_vm7, %v12093_v16, 0.0 }
0x2f6f   :  { %7677 = vrot.lane.b32.xlu1 %v12015_v28, %s10402_s9 }
0x2f80   :  { %7347 = vadd.xlane.f32.xlu0 %v7346_v6 }
0x2f82   :  { %v7336_v62 = vpop.xlane.xlu0 %7335  ;;  %v7339_v4 = vpop.xlane.xlu1 %7338 }
0x2f83   :  { %10304 = vrcp.f32 %v7336_v62 }
0x2f84   :  { %10306 = vrcp.f32 %v7339_v4  ;;  %7353 = vadd.xlane.f32.xlu0 %v7352_v11 }
0x2f86   :  { %v7580_v29 = vpop.permute.xlu1 %7579 }
0x2f8d   :  { %v10305_v28 = vpop.eup %10304 }
0x2f8e   :  { %v10307_v3 = vpop.eup %10306  ;;  %v7366_v14 = vmul.f32 %v10305_v28, %v10289_v57  ;;  %v10082_v28 = vld [vmem:[%s12258_s27 + $0x10] sm:$0xff]  }
0x2f8f   :  { %v7367_v45 = vmul.f32 %v10307_v3, %v10291_v37 }
0x2f90   :  { %v7374_v20 = vpack.c.bf16 %v7366_v14, %v7366_v14 }
0x2f91   :  { %v7375_v33 = vpack.c.bf16 %v7367_v45, %v7367_v45 }
0x2f92   :  { %9653 = vmatmul.mubr.msk.bf16.vlgmr.msra.gmra.mrb[208].mxu0 %vm526_vm7, %v7374_v20  ;;  %v10083_v20 = vld [vmem:[%s12258_s27 + $0x18] sm:$0xff]  }
0x2f93   :  { %9659 = vmatmul.mubr.msk.bf16.vlgmr.msra.gmra.mrb[224].mxu1 %vm526_vm7, %v7375_v33  ;;  %9663 = vmatpush3.bf16.msra.mxu0 %v7487_v38 }
0x2f94   :  { %9669 = vmatpush3.bf16.msra.mxu1 %v7536_v25  ;;  %9664 = vmatprep.mubr.msk.bf16.mxu0 %vm10398_vm4, %v10397_v7 }
0x2f95   :  { %9670 = vmatprep.mubr.msk.bf16.mxu1 %vm10398_vm4, %v10397_v7  ;;  %9674 = vmatprep.subr.bf16.mxu0 %v10397_v7 }
0x2f96   :  { %9680 = vmatprep.subr.bf16.mxu1 %v10397_v7 }
0x2f9a   :  { %7726 = vrot.lane.b32.xlu0 %v12017_v39, %s10402_s9  ;;  %v7585_v39 = vsel %vm1017_vm9, %v7580_v29, 0 }
0x2fd7   :  { %v7345_v32 = vpop.xlane.xlu1 %7344 }
0x2fd8   :  { %10308 = vrcp.f32 %v7345_v32  ;;  %v7342_v10 = vpop.xlane.xlu0 %7341 }
0x2fd9   :  { %10310 = vrcp.f32 %v7342_v10 }
0x2fdc   :  { %v7629_v15 = vpop.permute.xlu0 %7628 }
0x2fdd   :  { %v7634_v22 = vsel %vm1017_vm9, %v7629_v15, 0 }
0x2fe2   :  { %v10309_v12 = vpop.eup %10308 }
0x2fe3   :  { %v10311_v27 = vpop.eup %10310  ;;  %v7369_v2 = vmul.f32 %v10309_v12, %v12071_v8  ;;  %v7351_v49 = vpop.xlane.xlu1 %7350 }
0x2fe4   :  { %v7368_v5 = vmul.f32 %v10311_v27, %v12073_v61  ;;  %10312 = vrcp.f32 %v7351_v49 }
0x2fe5   :  { %v7377_v48 = vpack.c.bf16 %v7369_v2, %v7369_v2 }
0x2fe6   :  { %v7376_v17 = vpack.c.bf16 %v7368_v5, %v7368_v5 }
0x2fe7   :  { %9671 = vmatmul.mubr.msk.bf16.vlgmr.msra.gmra.mrb[228].mxu1 %vm526_vm7, %v7377_v48 }
0x2fe8   :  { %9665 = vmatmul.mubr.msk.bf16.vlgmr.msra.gmra.mrb[212].mxu0 %vm526_vm7, %v7376_v17  ;;  %9681 = vmatpush3.bf16.msra.mxu1 %v7634_v22 }
0x2fe9   :  { %9675 = vmatpush3.bf16.msra.mxu0 %v7585_v39  ;;  %9682 = vmatprep.mubr.msk.bf16.mxu1 %vm10398_vm4, %v10397_v7 }
0x2fea   :  { %9692 = vmatprep.subr.bf16.mxu1 %v10397_v7  ;;  %9676 = vmatprep.mubr.msk.bf16.mxu0 %vm10398_vm4, %v10397_v7 }
0x2feb   :  { %9686 = vmatprep.subr.bf16.mxu0 %v10397_v7  ;;  %v7357_v37 = vpop.xlane.xlu1 %7356 }
0x2fec   :  { %10314 = vrcp.f32 %v7357_v37 }
0x2fee   :  { %v10313_v59 = vpop.eup %10312 }
0x2fef   :  { %v7371_v13 = vmul.f32 %v10313_v59, %v12079_v42  ;;  %v7678_v50 = vpop.permute.xlu1 %7677 }
0x2ff0   :  { %v7683_v41 = vsel %vm1017_vm9, %v7678_v50, 0 }
0x2ff1   :  { %v7379_v57 = vpack.c.bf16 %v7371_v13, %v7371_v13 }
0x2ff3   :  { %9683 = vmatmul.mubr.msk.bf16.vlgmr.msra.gmra.mrb[232].mxu1 %vm526_vm7, %v7379_v57 }
0x2ff4   :  { %9694 = vmatprep.mubr.msk.bf16.mxu1 %vm10398_vm4, %v10397_v7 }
0x2ff6   :  { %v10315_v34 = vpop.eup %10314 }
0x2ff7   :  { %v7373_v63 = vmul.f32 %v10315_v34, %v12083_v40 }
0x2ff9   :  { %v7381_v56 = vpack.c.bf16 %v7373_v63, %v7373_v63 }
0x300d   :  { %v7348_v19 = vpop.xlane.xlu0 %7347 }
0x300e   :  { %10316 = vrcp.f32 %v7348_v19 }
0x3011   :  { %v7354_v47 = vpop.xlane.xlu0 %7353 }
0x3012   :  { %10318 = vrcp.f32 %v7354_v47 }
0x3015   :  { %v7727_v35 = vpop.permute.xlu0 %7726 }
0x3016   :  { %v7732_v60 = vsel %vm1017_vm9, %v7727_v35, 0 }
0x3017   :  { %9693 = vmatpush3.bf16.msra.mxu1 %v7732_v60 }
0x3018   :  { %v10317_v36 = vpop.eup %10316  ;;  %9706 = vmatprep.subr.bf16.mxu1 %v10397_v7 }
0x3019   :  { %v7370_v9 = vmul.f32 %v10317_v36, %v12093_v16 }
0x301a   :  { %9695 = vmatmul.mubr.msk.bf16.vlgmr.msra.gmra.mrb[236].mxu1 %vm526_vm7, %v7381_v56  ;;  %v8546_v56 = vld [vmem:[%s12259_s10 + $0x1] ss:$0 sm:$0xff] }
0x301b   :  { %v7378_v8 = vpack.c.bf16 %v7370_v9, %v7370_v9  ;;  %9710 = vmatprep.mubr.msk.bf16.mxu1 %vm10398_vm4, %v10397_v7 }
0x301c   :  { %v10319_v61 = vpop.eup %10318 }
0x301d   :  { %9677 = vmatmul.mubr.msk.bf16.vlgmr.msra.gmra.mrb[216].mxu0 %vm526_vm7, %v7378_v8  ;;  %v7372_v51 = vmul.f32 %v10319_v61, %v12097_v58 }
0x301e   :  { %9687 = vmatpush3.bf16.msra.mxu0 %v7683_v41  ;;  %9688 = vmatprep.mubr.msk.bf16.mxu0 %vm10398_vm4, %v10397_v7 }
0x301f   :  { %9698 = vmatprep.subr.bf16.mxu0 %v10397_v7  ;;  %v7380_v31 = vpack.c.bf16 %v7372_v51, %v7372_v51 }
0x3025   :  { %9689 = vmatmul.mubr.msk.bf16.vlgmr.msra.gmra.mrb[220].mxu0 %vm526_vm7, %v7380_v31 }
0x3026   :  { %9702 = vmatprep.mubr.msk.bf16.mxu0 %vm10398_vm4, %v10397_v7  ;;  %9699 = vmatpush3.bf16.msra.mxu0 %v10082_v28 }
0x3027   :  { %9700 = vmatprep.subr.bf16.mxu0 %v10397_v7 }
0x302a   :  { %9701 = vmatpush3.bf16.msra.mxu0 %v10083_v20 }
0x302b   :  { %9714 = vmatprep.subr.bf16.mxu0 %v10397_v7 }
0x3065   :  { %v7425_v30 = vpop.f32.mrb[208].mxu0 }
0x3066   :  { %v7474_v18 = vpop.f32.mrb[224].mxu1  ;;  %v9654_v24 = vpop.f32.mrb[209].mxu0 }
0x3067   :  { %v9660_v42 = vpop.f32.mrb[225].mxu1  ;;  %v7428_v52 = vpop.f32.mrb[210].mxu0 }
0x3068   :  { %v7477_v40 = vpop.f32.mrb[226].mxu1  ;;  %v9655_v54 = vpop.f32.mrb[211].mxu0 }
0x3069   :  { %v9661_v44 = vpop.f32.mrb[227].mxu1 }
0x30ba   :  { %v7572_v55 = vpop.f32.mrb[228].mxu1 }
0x30bb   :  { %v7523_v43 = vpop.f32.mrb[212].mxu0  ;;  %v9672_v53 = vpop.f32.mrb[229].mxu1 }
0x30bc   :  { %v10011_v26 = vpack.i.bf16 %v7572_v55, %v7523_v43  ;;  %v9666_v0 = vpop.f32.mrb[213].mxu0  ;;  %v7575_v16 = vpop.f32.mrb[230].mxu1 }
0x30bd   :  { %v7526_v23 = vpop.f32.mrb[214].mxu0  ;;  %v9673_v46 = vpop.f32.mrb[231].mxu1  ;;  %v10085_v0 = vld [vmem:[%s12260_s11 + $0x18] sm:$0xff]   ;;  %v10086_v16 = vld [vmem:[%s12261_s15 + $0x40] sm:$0xff]  }
0x30be   :  { %10012 = vrot.lane.b32.xlu1 %v10011_v26, %s10404_s21  ;;  %v9667_v6 = vpop.f32.mrb[215].mxu0  ;;  %v10084_v26 = vld [vmem:[%s12260_s11 + $0x10] sm:$0xff]   ;;  %v10087_v23 = vld [vmem:[%s12261_s15 + $0x48] sm:$0xff]  }
0x30bf   :  { %9707 = vmatpush3.bf16.msra.mxu1 %v10084_v26  ;;  %v10088_v46 = vld [vmem:[%s12261_s15 + $0x50] sm:$0xff]   ;;  %v10089_v6 = vld [vmem:[%s12261_s15 + $0x58] sm:$0xff]  }
0x30c0   :  { %9708 = vmatprep.subr.bf16.mxu1 %v10397_v7 }
0x30c3   :  { %9709 = vmatpush3.bf16.msra.mxu1 %v10085_v0 }
0x30c4   :  { %9734 = vmatprep.subr.bf16.mxu1 %v10397_v7 }
0x30c6   :  { %v7670_v58 = vpop.f32.mrb[232].mxu1 }
0x30c7   :  { %v9684_v62 = vpop.f32.mrb[233].mxu1 }
0x30c8   :  { %v7673_v4 = vpop.f32.mrb[234].mxu1  ;;  %v10091_v62 = vld [vmem:[%s12261_s15 + $0x68] sm:$0xff]  }
0x30c9   :  { %v9685_v11 = vpop.f32.mrb[235].mxu1 }
0x30ed   :  { %v7768_v3 = vpop.f32.mrb[236].mxu1 }
0x30ee   :  { %v9696_v14 = vpop.f32.mrb[237].mxu1 }
0x30ef   :  { %v7771_v45 = vpop.f32.mrb[238].mxu1 }
0x30f0   :  { %v7621_v33 = vpop.f32.mrb[216].mxu0  ;;  %v9697_v38 = vpop.f32.mrb[239].mxu1 }
0x30f1   :  { %v10016_v25 = vpack.i.bf16 %v7670_v58, %v7621_v33  ;;  %v9678_v29 = vpop.f32.mrb[217].mxu0  ;;  %v10090_v58 = vld [vmem:[%s12261_s15 + $0x60] sm:$0xff]  }
0x30f2   :  { %v7624_v32 = vpop.f32.mrb[218].mxu0  ;;  %v8552_v38 = vld [vmem:[%s12262_s16 + $0x1] ss:$0 sm:$0xff] }
0x30f3   :  { %10017 = vrot.lane.b32.xlu0 %v10016_v25, %s10405_s28  ;;  %v9679_v10 = vpop.f32.mrb[219].mxu0 }
0x30f4   :  { %v8553_v10 = vld [vmem:[%s12263_s18 + $0x1] ss:$0 sm:$0xff] }
0x30f8   :  { %v7719_v12 = vpop.f32.mrb[220].mxu0 }
0x30f9   :  { %v10021_v27 = vpack.i.bf16 %v7768_v3, %v7719_v12  ;;  %v9690_v2 = vpop.f32.mrb[221].mxu0 }
0x30fa   :  { %v7722_v5 = vpop.f32.mrb[222].mxu0 }
0x30fb   :  { %10022 = vrot.lane.b32.xlu1 %v10021_v27, %s10406_s1  ;;  %v9691_v15 = vpop.f32.mrb[223].mxu0 }
0x30fc   :  { %v10092_v15 = vld [vmem:[%s12261_s15 + $0x70] sm:$0xff]  }
0x3130   :  { %v10013_v49 = vpop.permute.xlu1 %10012 }
0x3131   :  { %v10015_v17 = vunpack.i.h.bf16 %v10013_v49  ;;  %v10014_v22 = vunpack.i.l.bf16 %v10013_v49  ;;  %v10093_v49 = vld [vmem:[%s12261_s15 + $0x78] sm:$0xff]  }
0x3133   :  { %v7799_v57 = vsel %vm526_vm7, %v7474_v18, %v10015_v17  ;;  %v7798_v37 = vsel %vm526_vm7, %v7425_v30, %v10014_v22 }
0x3165   :  { %v10018_v48 = vpop.permute.xlu0 %10017 }
0x3166   :  { %v10020_v39 = vunpack.i.h.bf16 %v10018_v48  ;;  %v10019_v59 = vunpack.i.l.bf16 %v10018_v48  ;;  %v8576_v48 = vld [vmem:[%s12264_s22 + $0x1] ss:$0 sm:$0xff] }
0x3168   :  { %v7801_v47 = vsel %vm1423_vm12, %v7799_v57, %v10020_v39  ;;  %v7800_v63 = vsel %vm1423_vm12, %v7798_v37, %v10019_v59 }
0x316d   :  { %v10023_v13 = vpop.permute.xlu1 %10022 }
0x316e   :  { %v10025_v19 = vunpack.i.h.bf16 %v10023_v13  ;;  %v10024_v34 = vunpack.i.l.bf16 %v10023_v13 }
0x3170   :  { %v7803_v35 = vsel %vm1426_vm13, %v7801_v47, %v10025_v19  ;;  %v7802_v60 = vsel %vm1426_vm13, %v7800_v63, %v10024_v34  ;;  %v8580_v47 = vld [vmem:[%s10583_s4 + $0x1] ss:$0 sm:$0xff] }
0x3171   :  { %v7804_v36 = vpack.c.bf16 %v7803_v35, %v7802_v60 }
0x3173   :  { %9703 = vmatmul.mubr.msk.bf16.vlgmr.msra.gmra.mrb[224].mxu0 %vm445_vm5, %v7804_v36 }
0x3174   :  { %9730 = vmatprep.mubr.msk.bf16.mxu0 %vm10398_vm4, %v10397_v7  ;;  %9715 = vmatpush3.bf16.msra.mxu0 %v10086_v16 }
0x3175   :  { %9716 = vmatprep.subr.bf16.mxu0 %v10397_v7 }
0x3178   :  { %9717 = vmatpush3.bf16.msra.mxu0 %v10087_v23 }
0x3179   :  { %9718 = vmatprep.subr.bf16.mxu0 %v10397_v7 }
0x317c   :  { %9719 = vmatpush3.bf16.msra.mxu0 %v10088_v46  ;;  %v8591_v46 = vld [vmem:[%s12265_s23 + $0x1] ss:$0 sm:$0xff] }
0x317d   :  { %9720 = vmatprep.subr.bf16.mxu0 %v10397_v7 }
0x3180   :  { %9721 = vmatpush3.bf16.msra.mxu0 %v10089_v6 }
0x3181   :  { %9722 = vmatprep.subr.bf16.mxu0 %v10397_v7 }
0x3184   :  { %9723 = vmatpush3.bf16.msra.mxu0 %v10090_v58 }
0x3185   :  { %9724 = vmatprep.subr.bf16.mxu0 %v10397_v7 }
0x3188   :  { %9725 = vmatpush3.bf16.msra.mxu0 %v10091_v62 }
0x3189   :  { %9726 = vmatprep.subr.bf16.mxu0 %v10397_v7 }
0x318c   :  { %9727 = vmatpush3.bf16.msra.mxu0 %v10092_v15 }
0x318d   :  { %9728 = vmatprep.subr.bf16.mxu0 %v10397_v7 }
0x3190   :  { %9729 = vmatpush3.bf16.msra.mxu0 %v10093_v49 }
0x3246   :  { %v7860_v9 = vpop.f32.mrb[224].mxu0 }
0x3247   :  { %v7861_v50 = vadd.f32 %v8546_v56, %v7860_v9  ;;  %v9704_v8 = vpop.f32.mrb[225].mxu0 }
0x3248   :  { %v7863_v61 = vpop.f32.mrb[226].mxu0 }
0x3249   :  { %v7867_v41 = vadd.f32 %v7861_v50, %v11962_v21  ;;  %v7864_v51 = vadd.f32 %v8546_v56, %v7863_v61  ;;  %v9705_v31 = vpop.f32.mrb[227].mxu0 }
0x324b   :  { %v7868_v30 = vadd.f32 %v7864_v51, %v11964_v1  ;;  %v7873_v18 = vsel %vm445_vm5, %v7867_v41, 0.0 }
0x324c   :  { %7874 = vadd.xlane.f32.xlu0 %v7873_v18 }
0x324d   :  { %v7876_v24 = vsel %vm445_vm5, %v7868_v30, 0.0 }
0x324e   :  { %7877 = vadd.xlane.f32.xlu1 %v7876_v24 }
0x32d9   :  { %v7875_v42 = vpop.xlane.xlu0 %7874 }
0x32da   :  { %v7879_v52 = vmul.f32 0.03125, %v7875_v42 }
0x32db   :  { %v7878_v40 = vpop.xlane.xlu1 %7877 }
0x32dc   :  { %v7881_v54 = vsub.f32 %v7867_v41, %v7879_v52  ;;  %v7880_v44 = vmul.f32 0.03125, %v7878_v40 }
0x32de   :  { %v7882_v21 = vsub.f32 %v7868_v30, %v7880_v44  ;;  %v7883_v55 = vmul.f32 %v7881_v54, %v7881_v54 }
0x32e0   :  { %v7885_v43 = vsel %vm445_vm5, %v7883_v55, 0.0  ;;  %v7884_v1 = vmul.f32 %v7882_v21, %v7882_v21  ;;  %v10095_v55 = vld [vmem:[%s10588_s25 + $0x8] sm:$0xff]  }
0x32e1   :  { %7886 = vadd.xlane.f32.xlu0 %v7885_v43 }
0x32e2   :  { %v7888_v53 = vsel %vm445_vm5, %v7884_v1, 0.0 }
0x32e5   :  { %7889 = vadd.xlane.f32.xlu0 %v7888_v53 }
0x336e   :  { %v7887_v4 = vpop.xlane.xlu0 %7886 }
0x336f   :  { %v7891_v11 = vmul.f32 0.03125, %v7887_v4 }
0x3371   :  { %v7893_v28 = vadd.f32 1e-05, %v7891_v11  ;;  %v8592_v11 = vld [vmem:[%s12266_s26 + $0x1] ss:$0 sm:$0xff] }
0x3372   :  { %v7890_v3 = vpop.xlane.xlu0 %7889 }
0x3373   :  { %10320 = vrsqrt.f32 %v7893_v28  ;;  %v7892_v14 = vmul.f32 0.03125, %v7890_v3 }
0x3375   :  { %v7894_v45 = vadd.f32 1e-05, %v7892_v14 }
0x3377   :  { %10322 = vrsqrt.f32 %v7894_v45  ;;  %v8593_v45 = vld [vmem:[%s10593_s30] ss:$0 sm:$0xff] }
0x337d   :  { %v10321_v20 = vpop.eup %10320 }
0x337e   :  { %v7897_v33 = vmul.f32 %v10321_v20, %v7881_v54 }
0x3380   :  { %v7905_v29 = vmul.f32 %v8552_v38, %v7897_v33 }
0x3381   :  { %v10323_v25 = vpop.eup %10322 }
0x3382   :  { %v7898_v32 = vmul.f32 %v10323_v25, %v7882_v21  ;;  %v7913_v27 = vadd.f32 %v8553_v10, %v7905_v29  ;;  %v10094_v21 = vld [vmem:[%s10588_s25] sm:$0xff]   ;;  %s10408_s25 = smov [#allocation2]  }
0x3383   :  { %s8235_s30 = sshll.u32 %s10408_s25, 4  ;;  %s8236_s30 = int_to_ptr.vmem [resolvable:$true] %s8235_s30 }
0x3384   :  { %v7906_v12 = vmul.f32 %v8552_v38, %v7898_v32  ;;  %s10336_s4 = scalar_lea.vmem %s8236_s30, 256  ;;  %p10341_p1 = scmp.lt.s32.totalorder %s8236_s30, %s8236_s30 }
0x3385   :  { %p10337_p0 = scmp.ne.s32.totalorder %s8236_s30, %s10336_s4  ;;  %p10342_p2 = scmp.lt.s32.totalorder %s10336_s4, %s10336_s4 }
0x3386   :  { %v7914_v2 = vadd.f32 %v8553_v10, %v7906_v12 }
0x3387   :  { %p10343_p3 = por %p10342_p2, %p10341_p1 }
0x3388   :  { %v7941_v5 = vpack.c.bf16 %v7914_v2, %v7913_v27 }
0x3389   :  { %p10344_p4 = pnand %p10343_p3, %p10337_p0 }
0x338a   :  { %9711 = vmatmul.mubr.msk.bf16.vlgmr.msra.gmra.mrb[240].mxu1 %vm445_vm5, %v7941_v5 }
0x338b   :  { %9738 = vmatprep.mubr.msk.bf16.mxu1 %vm10398_vm4, %v10397_v7  ;;  %9735 = vmatpush3.bf16.msra.mxu1 %v10094_v21 }
0x338c   :  { %9736 = vmatprep.subr.bf16.mxu1 %v10397_v7 }
0x338f   :  { %9737 = vmatpush3.bf16.msra.mxu1 %v10095_v55 }
0x345d   :  { %v7997_v17 = vpop.f32.mrb[240].mxu1 }
0x345e   :  { %v7998_v22 = vadd.f32 %v8576_v48, %v7997_v17  ;;  %v9712_v39 = vpop.f32.mrb[241].mxu1 }
0x345f   :  { %v8000_v59 = vpop.f32.mrb[242].mxu1 }
0x3460   :  { %v8001_v13 = vadd.f32 %v8576_v48, %v8000_v59  ;;  %v9713_v57 = vpop.f32.mrb[243].mxu1  ;;  %v8004_v37 = vmax.f32 %v7998_v22, 0.0 }
0x3462   :  { %v8005_v19 = vmax.f32 %v8001_v13, 0.0 }
0x3464   :  { %v8006_v34 = vpack.c.bf16 %v8005_v19, %v8004_v37 }
0x3466   :  { %9731 = vmatmul.mubr.bf16.vlgmr.msra.gmra.mrb[228].mxu0 %v8006_v34 }
0x3539   :  { %v8095_v63 = vpop.f32.mrb[228].mxu0 }
0x353a   :  { %v8096_v35 = vadd.f32 %v8580_v47, %v8095_v63  ;;  %v9732_v60 = vpop.f32.mrb[229].mxu0 }
0x353b   :  { %v8098_v36 = vpop.f32.mrb[230].mxu0 }
0x353c   :  { %v8102_v56 = vadd.f32 %v8096_v35, %v7913_v27  ;;  %v8099_v9 = vadd.f32 %v8580_v47, %v8098_v36  ;;  %v9733_v50 = vpop.f32.mrb[231].mxu0 }
0x353e   :  { %v8103_v8 = vadd.f32 %v8099_v9, %v7914_v2  ;;  %v8108_v61 = vsel %vm445_vm5, %v8102_v56, 0.0 }
0x353f   :  { %8109 = vadd.xlane.f32.xlu1 %v8108_v61 }
0x3540   :  { %v8111_v41 = vsel %vm445_vm5, %v8103_v8, 0.0 }
0x3541   :  { %8112 = vadd.xlane.f32.xlu0 %v8111_v41 }
0x35cc   :  { %v8110_v51 = vpop.xlane.xlu1 %8109 }
0x35cd   :  { %v8114_v31 = vmul.f32 0.03125, %v8110_v51 }
0x35ce   :  { %v8113_v30 = vpop.xlane.xlu0 %8112 }
0x35cf   :  { %v8116_v18 = vsub.f32 %v8102_v56, %v8114_v31  ;;  %v8115_v24 = vmul.f32 0.03125, %v8113_v30 }
0x35d1   :  { %v8117_v42 = vsub.f32 %v8103_v8, %v8115_v24  ;;  %v8118_v52 = vmul.f32 %v8116_v18, %v8116_v18 }
0x35d3   :  { %v8120_v40 = vsel %vm445_vm5, %v8118_v52, 0.0  ;;  %v8119_v54 = vmul.f32 %v8117_v42, %v8117_v42 }
0x35d4   :  { %8121 = vadd.xlane.f32.xlu1 %v8120_v40 }
0x35d5   :  { %v8123_v44 = vsel %vm445_vm5, %v8119_v54, 0.0 }
0x35d6   :  { %8124 = vadd.xlane.f32.xlu0 %v8123_v44 }
0x3661   :  { %v8122_v43 = vpop.xlane.xlu1 %8121 }
0x3662   :  { %v8126_v1 = vmul.f32 0.03125, %v8122_v43 }
0x3663   :  { %v8125_v53 = vpop.xlane.xlu0 %8124 }
0x3664   :  { %v8128_v26 = vadd.f32 1e-05, %v8126_v1  ;;  %v8127_v0 = vmul.f32 0.03125, %v8125_v53 }
0x3666   :  { %10324 = vrsqrt.f32 %v8128_v26  ;;  %v8129_v16 = vadd.f32 1e-05, %v8127_v0 }
0x3668   :  { %10326 = vrsqrt.f32 %v8129_v16 }
0x3670   :  { %v10325_v23 = vpop.eup %10324 }
0x3671   :  { %v8132_v6 = vmul.f32 %v10325_v23, %v8116_v18 }
0x3672   :  { %v10327_v58 = vpop.eup %10326 }
0x3673   :  { %v8140_v62 = vmul.f32 %v8591_v46, %v8132_v6  ;;  %v8133_v4 = vmul.f32 %v10327_v58, %v8117_v42 }
0x3675   :  { %v8141_v28 = vmul.f32 %v8591_v46, %v8133_v4  ;;  %v8148_v7 = vadd.f32 %v8592_v11, %v8140_v62 }
0x3677   :  { %v8149_v3 = vadd.f32 %v8592_v11, %v8141_v28 }
0x3679   :  { %v8150_v14 = vpack.c.bf16 %v8149_v3, %v8148_v7 }
0x367b   :  { %9739 = vmatmul.mubr.msk.bf16.vlgmr.msra.gmra.mrb[244].mxu1 %vm445_vm5, %v8150_v14 }
0x374e   :  { %v8211_v20 = vpop.f32.mrb[244].mxu1 }
0x374f   :  { %v8212_v33 = vadd.f32 %v8593_v45, %v8211_v20  ;;  %v9740_v38 = vpop.f32.mrb[245].mxu1 }
0x3750   :  { %v8214_v25 = vpop.f32.mrb[246].mxu1 }
0x3751   :  { %v8218_v29 = vsub.f32 0.0, %v8212_v33  ;;  %v8215_v32 = vadd.f32 %v8593_v45, %v8214_v25  ;;  %v9741_v10 = vpop.f32.mrb[247].mxu1 }
0x3753   :  { %v8220_v12 = vmul.f32 1.442695, %v8218_v29  ;;  %v8219_v27 = vsub.f32 0.0, %v8215_v32 }
0x3755   :  { %10328 = vpow2.f32 %v8220_v12  ;;  %v8222_v2 = vmul.f32 1.442695, %v8219_v27 }
0x3757   :  { %10330 = vpow2.f32 %v8222_v2 }
0x375f   :  { %v10329_v5 = vpop.eup %10328 }
0x3760   :  { %v8224_v15 = vadd.f32 1.0, %v10329_v5 }
0x3761   :  { %v10331_v49 = vpop.eup %10330 }
0x3762   :  { %10332 = vrcp.f32 %v8224_v15  ;;  %v8225_v48 = vadd.f32 1.0, %v10331_v49 }
0x3764   :  { %10334 = vrcp.f32 %v8225_v48 }
0x376c   :  { %v10333_v17 = vpop.eup %10332 }
0x376d   :  { %8228 = vst [vmem:[#allocation2] sm:$0xff] %v10333_v17 }
0x376e   :  { %v10335_v22 = vpop.eup %10334 }
0x376f   :  { %8229 = vst [vmem:[#allocation2 + $0x8] sm:$0xff] %v10335_v22 }
0x3770   :  { %10347 = shalt.err (!%p10344_p4)
}
0x3771   :  { %s10348_s0 = scalar_lea.hbm %s10598_s24, 256 }
0x3772   :  { %p10349_p5 = scmp.ne.s32.totalorder %s10598_s24, %s10348_s0  ;;  %p10352_p6 = scmp.lt.u32.totalorder %s10348_s0, %s10598_s24 }
0x3774   :  { %p10354_p7 = pnand %p10352_p6, %p10349_p5 }
0x3776   :  { %10357 = shalt.err (!%p10354_p7)
}
0x3777   :  { %s10409_s5 = smov 128  }
0x3778   :  { %8241 = dma.vmem_to_hbm [thread:$0]  %s8236_s30, 256, %s10598_s24, [#allocation3], %s10409_s5, %s10409_s5, %s10404_s21  }
0x3779   :  { %10358 = dma.done.wait [#allocation3], 256  }
0x377a   :  { %10359 = vsyncadd [#allocation3], 4294967040 }
0x377b   :  { %8245 = vsyncpa [#allocation3], 1 }

</bundles_post_ra>
